<compile_context>
chip_gen: v6e
topology: v6e:2x2x1
jax: 0.10.0
libtpu: 0.0.40
codegen_flags: <defaults>
</compile_context>

<pallas_src>
import functools

import jax
import jax.numpy as jnp
from jax import lax
from jax.experimental import pallas as pl
from jax.experimental.pallas import tpu as pltpu

SEQ = 8
DIM = 1024
N_HEADS = 8
N_KV_HEADS = 2
HEAD_DIM = DIM // N_HEADS          # 128
HALF = HEAD_DIM // 2               # 64
NORM_EPS = 1e-5
SCALE = 1.0 / (128.0 ** 0.5)       # the module hard-codes / 128**0.5


def _attention_kernel(x_ref, nw_ref, cosq_ref, sinq_ref, cosk_ref, sink_ref,
                      wqkv_ref, wo_ref, out_ref, concat_ref,
                      *, n_heads, n_kv_heads, head_dim, norm_eps):
    seq = x_ref.shape[0]
    dim = x_ref.shape[1]
    kv_width = n_kv_heads * head_dim
    half = head_dim // 2
    ratio = n_heads // n_kv_heads   # module hard-codes `head // 4` (== this ratio here)

    # ---- RMS norm (f32 stats, bf16 result, matching the bf16 torch pipeline) ----
    xf = x_ref[...].astype(jnp.float32)
    ms = jnp.mean(xf * xf, axis=-1, keepdims=True)
    inv = lax.rsqrt(ms + norm_eps)
    nx = (xf * inv * nw_ref[...].astype(jnp.float32)).astype(jnp.bfloat16)   # (seq, dim)

    # ---- fused Q/K/V projection: one full-width MXU matmul (seq,dim)@(dim,dim+2*kv) ----
    qkv = jnp.dot(nx, wqkv_ref[...], preferred_element_type=jnp.float32)
    # torch q/k matmuls emit bf16, then RoPE upcasts to f32 — keep the round-trip.
    q = qkv[:, :dim].astype(jnp.bfloat16).astype(jnp.float32)
    k = qkv[:, dim:dim + kv_width].astype(jnp.bfloat16).astype(jnp.float32)
    v = qkv[:, dim + kv_width:].astype(jnp.bfloat16)          # torch matmul emits bf16

    # ---- RoPE in de-interleaved layout (A = even pair elements, B = odd) ----
    # Layout (built by the wrapper via a weight-row permutation):
    #   q[:, :dim//2]  = A slots, q[:, dim//2:] = B slots   (per-head contiguous halves)
    # Rotation: A' = A*cos - B*sin ; B' = B*cos + A*sin   -> pure VPU, no lane movement.
    q_half = dim // 2
    k_half = kv_width // 2
    qa, qb = q[:, :q_half], q[:, q_half:]
    ka, kb = k[:, :k_half], k[:, k_half:]
    cq, sq = cosq_ref[...], sinq_ref[...]                      # (seq, q_half) f32
    ck, sk = cosk_ref[...], sink_ref[...]                      # (seq, k_half) f32
    qa2 = qa * cq - qb * sq
    qb2 = qb * cq + qa * sq
    ka2 = ka * ck - kb * sk
    kb2 = kb * ck + ka * sk

    # ---- causal mask addend (torch: scores + triu(full(finfo.min), diagonal=1)) ----
    row = lax.broadcasted_iota(jnp.int32, (seq, seq), 0)
    col = lax.broadcasted_iota(jnp.int32, (seq, seq), 1)
    mask_add = jnp.where(col > row,
                         jnp.float32(jnp.finfo(jnp.float32).min),
                         jnp.float32(0.0))

    # ---- per-head attention (unrolled; tiny (seq,seq) blocks) ----
    dn = (((1,), (1,)), ((), ()))   # contract last dims (q @ k.T)
    for h in range(n_heads):
        g = h // ratio
        qha = qa2[:, h * half:(h + 1) * half]                 # (seq, half) f32
        qhb = qb2[:, h * half:(h + 1) * half]
        kha = ka2[:, g * half:(g + 1) * half]
        khb = kb2[:, g * half:(g + 1) * half]
        vh = v[:, g * head_dim:(g + 1) * head_dim]            # (seq, head_dim) bf16

        # q_rot·k_rot over the full head_dim == A-part dot + B-part dot
        sc = (lax.dot_general(qha, kha, dn, preferred_element_type=jnp.float32)
              + lax.dot_general(qhb, khb, dn, preferred_element_type=jnp.float32)) * SCALE
        masked = sc + mask_add
        m = jnp.max(masked, axis=-1, keepdims=True)
        e = jnp.exp(masked - m)
        p = (e / jnp.sum(e, axis=-1, keepdims=True)).astype(jnp.bfloat16)
        attn_h = jnp.dot(p, vh, preferred_element_type=jnp.float32).astype(jnp.bfloat16)
        concat_ref[:, h * head_dim:(h + 1) * head_dim] = attn_h

    # ---- single full-width output projection (seq,dim)@(dim,dim) ----
    out_ref[...] = jnp.dot(concat_ref[...], wo_ref[...],
                           preferred_element_type=jnp.float32).astype(out_ref.dtype)


def attention_forward(x, norm_w, wq, wk, wv, wo, rope_freqs,
                      *, n_heads=N_HEADS, n_kv_heads=N_KV_HEADS, norm_eps=NORM_EPS):
    seq, dim = x.shape
    head_dim = wq.shape[0] // n_heads
    half = head_dim // 2
    kv_width = n_kv_heads * head_dim
    qkv_cols = dim + 2 * kv_width

    # ---- plain-JAX glue: permute + fuse projection weights, build RoPE tables ----
    # De-interleave RoPE pairs at the weight level (same permutation on q and k,
    # so per-head q·k scores are unchanged): output feature order per projection is
    # [head0 even elems, head1 even elems, ..., head0 odd elems, head1 odd elems, ...].
    def deinterleave_perm(nh):
        hh = jnp.arange(nh)[:, None]
        ii = jnp.arange(half)[None, :]
        a = (hh * head_dim + 2 * ii).reshape(-1)
        b = (hh * head_dim + 2 * ii + 1).reshape(-1)
        return jnp.concatenate([a, b], axis=0)

    wq_p = wq[deinterleave_perm(n_heads)]                     # (dim, dim) row-permuted
    wk_p = wk[deinterleave_perm(n_kv_heads)]                  # (kv_width, dim)
    w_qkv = jnp.concatenate([wq_p.T, wk_p.T, wv.T], axis=1)   # (dim, dim + 2*kv_width) bf16
    wo_t = wo.T                                               # (n_heads*head_dim, dim) bf16

    t = jnp.arange(seq, dtype=jnp.float32)
    angles = jnp.outer(t, rope_freqs.astype(jnp.float32))     # (seq, half)
    cos = jnp.cos(angles)
    sin = jnp.sin(angles)
    cosq = jnp.tile(cos, (1, n_heads))                        # (seq, n_heads*half) f32
    sinq = jnp.tile(sin, (1, n_heads))
    cosk = jnp.tile(cos, (1, n_kv_heads))                     # (seq, n_kv_heads*half) f32
    sink = jnp.tile(sin, (1, n_kv_heads))

    norm_w2 = norm_w.reshape(1, dim)

    kernel = functools.partial(_attention_kernel, n_heads=n_heads,
                               n_kv_heads=n_kv_heads, head_dim=head_dim,
                               norm_eps=norm_eps)

    grid_spec = pltpu.PrefetchScalarGridSpec(
        num_scalar_prefetch=0,
        grid=(1,),                                            # single step: no per-head grid overhead
        in_specs=[
            pl.BlockSpec((seq, dim), lambda i: (0, 0)),                 # x
            pl.BlockSpec((1, dim), lambda i: (0, 0)),                   # attention_norm.weight
            pl.BlockSpec((seq, n_heads * half), lambda i: (0, 0)),      # cos (q layout)
            pl.BlockSpec((seq, n_heads * half), lambda i: (0, 0)),      # sin (q layout)
            pl.BlockSpec((seq, n_kv_heads * half), lambda i: (0, 0)),   # cos (k layout)
            pl.BlockSpec((seq, n_kv_heads * half), lambda i: (0, 0)),   # sin (k layout)
            pl.BlockSpec((dim, qkv_cols), lambda i: (0, 0)),            # fused [Wq | Wk | Wv]
            pl.BlockSpec((n_heads * head_dim, dim), lambda i: (0, 0)),  # Wo.T
        ],
        out_specs=pl.BlockSpec((seq, dim), lambda i: (0, 0)),
        scratch_shapes=[
            pltpu.VMEM((seq, n_heads * head_dim), jnp.bfloat16),        # head-concat buffer
        ],
    )

    flops = int(2 * seq * dim * qkv_cols                      # fused QKV projection
                + 2 * seq * (n_heads * head_dim) * dim        # output projection
                + n_heads * 4 * seq * seq * head_dim)         # scores + attn @ v
    bytes_accessed = int(2 * (w_qkv.size + wo_t.size + x.size + seq * dim + norm_w2.size)
                         + 4 * (cosq.size + sinq.size + cosk.size + sink.size))
    cost = pl.CostEstimate(flops=flops,
                           transcendentals=int(n_heads * seq * seq),
                           bytes_accessed=bytes_accessed)

    return pl.pallas_call(
        kernel,
        out_shape=jax.ShapeDtypeStruct((seq, dim), jnp.bfloat16),
        grid_spec=grid_spec,
        compiler_params=pltpu.CompilerParams(
            dimension_semantics=("arbitrary",),
            vmem_limit_bytes=32 * 1024 * 1024),
        cost_estimate=cost,
    )(x, norm_w2, cosq, sinq, cosk, sink, w_qkv, wo_t)


def reference_forward(x, norm_w, wq, wk, wv, wo, rope_freqs,
                      n_heads=N_HEADS, n_kv_heads=N_KV_HEADS, norm_eps=NORM_EPS):
    """Pure-JAX mirror of the PyTorch forward (for validation)."""
    seq, dim = x.shape
    head_dim = wq.shape[0] // n_heads
    xf = x.astype(jnp.float32)
    ms = jnp.mean(xf * xf, axis=-1, keepdims=True)
    nx = (xf * lax.rsqrt(ms + norm_eps) * norm_w.astype(jnp.float32)).astype(jnp.bfloat16)

    t = jnp.arange(seq, dtype=jnp.float32)
    angles = jnp.outer(t, rope_freqs.astype(jnp.float32))
    cos = jnp.cos(angles)
    sin = jnp.sin(angles)

    def rope(v):
        vp = v.reshape(seq, -1, 2)
        a, b = vp[..., 0], vp[..., 1]
        ra = a * cos - b * sin
        rb = a * sin + b * cos
        return jnp.stack([ra, rb], axis=-1).reshape(seq, -1)

    wq3 = wq.reshape(n_heads, head_dim, dim)
    wk3 = wk.reshape(n_kv_heads, head_dim, dim)
    wv3 = wv.reshape(n_kv_heads, head_dim, dim)

    outs = []
    for h in range(n_heads):
        q = jnp.dot(nx, wq3[h].T, preferred_element_type=jnp.float32).astype(jnp.bfloat16).astype(jnp.float32)
        k = jnp.dot(nx, wk3[h // 4].T, preferred_element_type=jnp.float32).astype(jnp.bfloat16).astype(jnp.float32)
        v = jnp.dot(nx, wv3[h // 4].T, preferred_element_type=jnp.float32).astype(jnp.bfloat16)
        qr = rope(q)
        kr = rope(k)
        sc = jnp.dot(qr, kr.T) * SCALE
        mask = jnp.where(jnp.arange(seq)[None, :] > jnp.arange(seq)[:, None],
                         jnp.finfo(jnp.float32).min, 0.0).astype(jnp.float32)
        p = jax.nn.softmax(sc + mask, axis=-1).astype(jnp.bfloat16)
        outs.append(jnp.dot(p, v, preferred_element_type=jnp.float32).astype(jnp.bfloat16))
    cat = jnp.concatenate(outs, axis=-1)
    return jnp.dot(cat, wo.T, preferred_element_type=jnp.float32).astype(jnp.bfloat16)


if __name__ == "__main__":
    key = jax.random.PRNGKey(0)
    kx, knw, kq, kk, kv, ko = jax.random.split(key, 6)

    # Deterministic synthetic parameters (shapes implied by the module's __init__/forward).
    x = jax.random.normal(kx, (SEQ, DIM), jnp.float32).astype(jnp.bfloat16)
    norm_w = (1.0 + 0.1 * jax.random.normal(knw, (DIM,), jnp.float32)).astype(jnp.bfloat16)
    wq = (0.02 * jax.random.normal(kq, (N_HEADS * HEAD_DIM, DIM), jnp.float32)).astype(jnp.bfloat16)
    wk = (0.02 * jax.random.normal(kk, (N_KV_HEADS * HEAD_DIM, DIM), jnp.float32)).astype(jnp.bfloat16)
    wv = (0.02 * jax.random.normal(kv, (N_KV_HEADS * HEAD_DIM, DIM), jnp.float32)).astype(jnp.bfloat16)
    wo = (0.02 * jax.random.normal(ko, (DIM, N_HEADS * HEAD_DIM), jnp.float32)).astype(jnp.bfloat16)
    rope_freqs = 1.0 / (10000.0 ** (jnp.arange(0, HEAD_DIM, 2, dtype=jnp.float32) / HEAD_DIM))

    out = attention_forward(x, norm_w, wq, wk, wv, wo, rope_freqs)
    out = jax.block_until_ready(out)

    ref = reference_forward(x, norm_w, wq, wk, wv, wo, rope_freqs)
    max_diff = float(jnp.max(jnp.abs(out.astype(jnp.float32) - ref.astype(jnp.float32))))
    assert out.shape == (SEQ, DIM) and out.dtype == jnp.bfloat16
    assert max_diff < 0.08, f"mismatch vs reference: {max_diff}"
    print("KERNEL_OK")
</pallas_src>

<mosaic_0001>
module attributes {stable_mosaic.version = 11 : i64} {
  func.func @_attention_kernel(%arg0: i32, %arg1: memref<8x1024xbf16, #tpu.memory_space<vmem>>, %arg2: memref<1x1024xbf16, #tpu.memory_space<vmem>>, %arg3: memref<8x512xf32, #tpu.memory_space<vmem>>, %arg4: memref<8x512xf32, #tpu.memory_space<vmem>>, %arg5: memref<8x128xf32, #tpu.memory_space<vmem>>, %arg6: memref<8x128xf32, #tpu.memory_space<vmem>>, %arg7: memref<1024x1536xbf16, #tpu.memory_space<vmem>>, %arg8: memref<1024x1024xbf16, #tpu.memory_space<vmem>>, %arg9: memref<8x1024xbf16, #tpu.memory_space<vmem>>, %arg10: memref<8x1024xbf16, #tpu.memory_space<vmem>>) attributes {dimension_semantics = [#tpu.dimension_semantics<arbitrary>], iteration_bounds = array<i64: 1>, scalar_prefetch = 0 : i64, scratch_operands = 1 : i64, tpu.core_type = #tpu.core_type<tc>, window_params = [{pipeline_mode = #tpu.pipeline_mode<synchronous>, transform_indices = @transform_0, window_bounds = array<i64: 8, 1024>}, {pipeline_mode = #tpu.pipeline_mode<synchronous>, transform_indices = @transform_1, window_bounds = array<i64: 1, 1024>}, {pipeline_mode = #tpu.pipeline_mode<synchronous>, transform_indices = @transform_2, window_bounds = array<i64: 8, 512>}, {pipeline_mode = #tpu.pipeline_mode<synchronous>, transform_indices = @transform_3, window_bounds = array<i64: 8, 512>}, {pipeline_mode = #tpu.pipeline_mode<synchronous>, transform_indices = @transform_4, window_bounds = array<i64: 8, 128>}, {pipeline_mode = #tpu.pipeline_mode<synchronous>, transform_indices = @transform_5, window_bounds = array<i64: 8, 128>}, {pipeline_mode = #tpu.pipeline_mode<synchronous>, transform_indices = @transform_6, window_bounds = array<i64: 1024, 1536>}, {pipeline_mode = #tpu.pipeline_mode<synchronous>, transform_indices = @transform_7, window_bounds = array<i64: 1024, 1024>}, {pipeline_mode = #tpu.pipeline_mode<synchronous>, transform_indices = @transform_8, window_bounds = array<i64: 8, 1024>}]} {
    %c0 = arith.constant 0 : index
    %c0_0 = arith.constant 0 : index
    %0 = vector.load %arg1[%c0, %c0_0] : memref<8x1024xbf16, #tpu.memory_space<vmem>>, vector<8x1024xbf16>
    %1 = arith.extf %0 : vector<8x1024xbf16> to vector<8x1024xf32>
    %2 = arith.mulf %1, %1 : vector<8x1024xf32>
    %cst = arith.constant dense<0.000000e+00> : vector<8xf32>
    %3 = vector.multi_reduction <add>, %2, %cst [1] : vector<8x1024xf32> to vector<8xf32>
    %4 = vector.shape_cast %3 : vector<8xf32> to vector<8x1xf32>
    %cst_1 = arith.constant 1.024000e+03 : f32
    %5 = vector.broadcast %cst_1 : f32 to vector<8x1xf32>
    %6 = arith.divf %4, %5 : vector<8x1xf32>
    %cst_2 = arith.constant 9.99999974E-6 : f32
    %7 = vector.broadcast %cst_2 : f32 to vector<8x1xf32>
    %8 = arith.addf %6, %7 : vector<8x1xf32>
    %9 = math.rsqrt %8 : vector<8x1xf32>
    %10 = vector.broadcast %9 : vector<8x1xf32> to vector<8x1024xf32>
    %11 = arith.mulf %1, %10 : vector<8x1024xf32>
    %c0_3 = arith.constant 0 : index
    %c0_4 = arith.constant 0 : index
    %12 = vector.load %arg2[%c0_3, %c0_4] : memref<1x1024xbf16, #tpu.memory_space<vmem>>, vector<1x1024xbf16>
    %13 = arith.extf %12 : vector<1x1024xbf16> to vector<1x1024xf32>
    %14 = vector.broadcast %13 : vector<1x1024xf32> to vector<8x1024xf32>
    %15 = arith.mulf %11, %14 : vector<8x1024xf32>
    %16 = arith.truncf %15 : vector<8x1024xf32> to vector<8x1024xbf16>
    %c0_5 = arith.constant 0 : index
    %c0_6 = arith.constant 0 : index
    %17 = vector.load %arg7[%c0_5, %c0_6] : memref<1024x1536xbf16, #tpu.memory_space<vmem>>, vector<1024x1536xbf16>
    %cst_7 = arith.constant dense<0.000000e+00> : vector<8x1536xf32>
    %18 = tpu.matmul %16, %17, %cst_7 {dimension_numbers = #tpu.dot_dimension_numbers<[1], [0], [0], [1], [0, 0, 1, 1], [], []>} : vector<8x1024xbf16>, vector<1024x1536xbf16>, vector<8x1536xf32> -> vector<8x1536xf32>
    %19 = vector.extract_strided_slice %18 {offsets = [0, 0], sizes = [8, 1024], strides = [1, 1]} : vector<8x1536xf32> to vector<8x1024xf32>
    %20 = arith.truncf %19 : vector<8x1024xf32> to vector<8x1024xbf16>
    %21 = arith.extf %20 : vector<8x1024xbf16> to vector<8x1024xf32>
    %22 = vector.extract_strided_slice %18 {offsets = [0, 1024], sizes = [8, 256], strides = [1, 1]} : vector<8x1536xf32> to vector<8x256xf32>
    %23 = arith.truncf %22 : vector<8x256xf32> to vector<8x256xbf16>
    %24 = arith.extf %23 : vector<8x256xbf16> to vector<8x256xf32>
    %25 = vector.extract_strided_slice %18 {offsets = [0, 1280], sizes = [8, 256], strides = [1, 1]} : vector<8x1536xf32> to vector<8x256xf32>
    %26 = arith.truncf %25 : vector<8x256xf32> to vector<8x256xbf16>
    %27 = vector.extract_strided_slice %21 {offsets = [0, 0], sizes = [8, 512], strides = [1, 1]} : vector<8x1024xf32> to vector<8x512xf32>
    %28 = vector.extract_strided_slice %21 {offsets = [0, 512], sizes = [8, 512], strides = [1, 1]} : vector<8x1024xf32> to vector<8x512xf32>
    %29 = vector.extract_strided_slice %24 {offsets = [0, 0], sizes = [8, 128], strides = [1, 1]} : vector<8x256xf32> to vector<8x128xf32>
    %30 = vector.extract_strided_slice %24 {offsets = [0, 128], sizes = [8, 128], strides = [1, 1]} : vector<8x256xf32> to vector<8x128xf32>
    %c0_8 = arith.constant 0 : index
    %c0_9 = arith.constant 0 : index
    %31 = vector.load %arg3[%c0_8, %c0_9] : memref<8x512xf32, #tpu.memory_space<vmem>>, vector<8x512xf32>
    %c0_10 = arith.constant 0 : index
    %c0_11 = arith.constant 0 : index
    %32 = vector.load %arg4[%c0_10, %c0_11] : memref<8x512xf32, #tpu.memory_space<vmem>>, vector<8x512xf32>
    %c0_12 = arith.constant 0 : index
    %c0_13 = arith.constant 0 : index
    %33 = vector.load %arg5[%c0_12, %c0_13] : memref<8x128xf32, #tpu.memory_space<vmem>>, vector<8x128xf32>
    %c0_14 = arith.constant 0 : index
    %c0_15 = arith.constant 0 : index
    %34 = vector.load %arg6[%c0_14, %c0_15] : memref<8x128xf32, #tpu.memory_space<vmem>>, vector<8x128xf32>
    %35 = arith.mulf %27, %31 : vector<8x512xf32>
    %36 = arith.mulf %28, %32 : vector<8x512xf32>
    %37 = arith.subf %35, %36 : vector<8x512xf32>
    %38 = arith.mulf %28, %31 : vector<8x512xf32>
    %39 = arith.mulf %27, %32 : vector<8x512xf32>
    %40 = arith.addf %38, %39 : vector<8x512xf32>
    %41 = arith.mulf %29, %33 : vector<8x128xf32>
    %42 = arith.mulf %30, %34 : vector<8x128xf32>
    %43 = arith.subf %41, %42 : vector<8x128xf32>
    %44 = arith.mulf %30, %33 : vector<8x128xf32>
    %45 = arith.mulf %29, %34 : vector<8x128xf32>
    %46 = arith.addf %44, %45 : vector<8x128xf32>
    %47 = tpu.iota {dimensions = array<i32: 0>} : vector<8x8xi32>
    %48 = tpu.iota {dimensions = array<i32: 1>} : vector<8x8xi32>
    %49 = arith.cmpi sgt, %48, %47 : vector<8x8xi32>
    %cst_16 = arith.constant -3.40282347E+38 : f32
    %cst_17 = arith.constant 0.000000e+00 : f32
    %50 = vector.broadcast %cst_16 : f32 to vector<8x8xf32>
    %51 = vector.broadcast %cst_17 : f32 to vector<8x8xf32>
    %52 = arith.select %49, %50, %51 : vector<8x8xi1>, vector<8x8xf32>
    %53 = vector.extract_strided_slice %37 {offsets = [0, 0], sizes = [8, 64], strides = [1, 1]} : vector<8x512xf32> to vector<8x64xf32>
    %54 = vector.extract_strided_slice %40 {offsets = [0, 0], sizes = [8, 64], strides = [1, 1]} : vector<8x512xf32> to vector<8x64xf32>
    %55 = vector.extract_strided_slice %43 {offsets = [0, 0], sizes = [8, 64], strides = [1, 1]} : vector<8x128xf32> to vector<8x64xf32>
    %56 = vector.extract_strided_slice %46 {offsets = [0, 0], sizes = [8, 64], strides = [1, 1]} : vector<8x128xf32> to vector<8x64xf32>
    %57 = vector.extract_strided_slice %26 {offsets = [0, 0], sizes = [8, 128], strides = [1, 1]} : vector<8x256xbf16> to vector<8x128xbf16>
    %cst_18 = arith.constant dense<0.000000e+00> : vector<8x8xf32>
    %58 = tpu.matmul %53, %55, %cst_18 {dimension_numbers = #tpu.dot_dimension_numbers<[1], [1], [0], [0], [0, 0, 1, 0], [], []>} : vector<8x64xf32>, vector<8x64xf32>, vector<8x8xf32> -> vector<8x8xf32>
    %cst_19 = arith.constant dense<0.000000e+00> : vector<8x8xf32>
    %59 = tpu.matmul %54, %56, %cst_19 {dimension_numbers = #tpu.dot_dimension_numbers<[1], [1], [0], [0], [0, 0, 1, 0], [], []>} : vector<8x64xf32>, vector<8x64xf32>, vector<8x8xf32> -> vector<8x8xf32>
    %60 = arith.addf %58, %59 : vector<8x8xf32>
    %cst_20 = arith.constant 0.0883883461 : f32
    %61 = vector.broadcast %cst_20 : f32 to vector<8x8xf32>
    %62 = arith.mulf %60, %61 : vector<8x8xf32>
    %63 = arith.addf %62, %52 : vector<8x8xf32>
    %cst_21 = arith.constant dense<0xFF800000> : vector<8xf32>
    %64 = vector.multi_reduction <maximumf>, %63, %cst_21 [1] : vector<8x8xf32> to vector<8xf32>
    %65 = vector.shape_cast %64 : vector<8xf32> to vector<8x1xf32>
    %66 = vector.broadcast %65 : vector<8x1xf32> to vector<8x8xf32>
    %67 = arith.subf %63, %66 : vector<8x8xf32>
    %68 = math.exp %67 : vector<8x8xf32>
    %cst_22 = arith.constant dense<0.000000e+00> : vector<8xf32>
    %69 = vector.multi_reduction <add>, %68, %cst_22 [1] : vector<8x8xf32> to vector<8xf32>
    %70 = vector.shape_cast %69 : vector<8xf32> to vector<8x1xf32>
    %71 = vector.broadcast %70 : vector<8x1xf32> to vector<8x8xf32>
    %72 = arith.divf %68, %71 : vector<8x8xf32>
    %73 = arith.truncf %72 : vector<8x8xf32> to vector<8x8xbf16>
    %cst_23 = arith.constant dense<0.000000e+00> : vector<8x128xf32>
    %74 = tpu.matmul %73, %57, %cst_23 {dimension_numbers = #tpu.dot_dimension_numbers<[1], [0], [0], [1], [0, 0, 1, 1], [], []>} : vector<8x8xbf16>, vector<8x128xbf16>, vector<8x128xf32> -> vector<8x128xf32>
    %75 = arith.truncf %74 : vector<8x128xf32> to vector<8x128xbf16>
    %c0_24 = arith.constant 0 : index
    %c0_25 = arith.constant 0 : index
    %76 = vector.load %arg10[%c0_24, %c0_25] : memref<8x1024xbf16, #tpu.memory_space<vmem>>, vector<8x128xbf16>
    tpu.vector_store %arg10[%c0_24, %c0_25], %75 {strides = array<i32>} : memref<8x1024xbf16, #tpu.memory_space<vmem>>, vector<8x128xbf16>,
    %77 = vector.extract_strided_slice %37 {offsets = [0, 64], sizes = [8, 64], strides = [1, 1]} : vector<8x512xf32> to vector<8x64xf32>
    %78 = vector.extract_strided_slice %40 {offsets = [0, 64], sizes = [8, 64], strides = [1, 1]} : vector<8x512xf32> to vector<8x64xf32>
    %79 = vector.extract_strided_slice %43 {offsets = [0, 0], sizes = [8, 64], strides = [1, 1]} : vector<8x128xf32> to vector<8x64xf32>
    %80 = vector.extract_strided_slice %46 {offsets = [0, 0], sizes = [8, 64], strides = [1, 1]} : vector<8x128xf32> to vector<8x64xf32>
    %81 = vector.extract_strided_slice %26 {offsets = [0, 0], sizes = [8, 128], strides = [1, 1]} : vector<8x256xbf16> to vector<8x128xbf16>
    %cst_26 = arith.constant dense<0.000000e+00> : vector<8x8xf32>
    %82 = tpu.matmul %77, %79, %cst_26 {dimension_numbers = #tpu.dot_dimension_numbers<[1], [1], [0], [0], [0, 0, 1, 0], [], []>} : vector<8x64xf32>, vector<8x64xf32>, vector<8x8xf32> -> vector<8x8xf32>
    %cst_27 = arith.constant dense<0.000000e+00> : vector<8x8xf32>
    %83 = tpu.matmul %78, %80, %cst_27 {dimension_numbers = #tpu.dot_dimension_numbers<[1], [1], [0], [0], [0, 0, 1, 0], [], []>} : vector<8x64xf32>, vector<8x64xf32>, vector<8x8xf32> -> vector<8x8xf32>
    %84 = arith.addf %82, %83 : vector<8x8xf32>
    %cst_28 = arith.constant 0.0883883461 : f32
    %85 = vector.broadcast %cst_28 : f32 to vector<8x8xf32>
    %86 = arith.mulf %84, %85 : vector<8x8xf32>
    %87 = arith.addf %86, %52 : vector<8x8xf32>
    %cst_29 = arith.constant dense<0xFF800000> : vector<8xf32>
    %88 = vector.multi_reduction <maximumf>, %87, %cst_29 [1] : vector<8x8xf32> to vector<8xf32>
    %89 = vector.shape_cast %88 : vector<8xf32> to vector<8x1xf32>
    %90 = vector.broadcast %89 : vector<8x1xf32> to vector<8x8xf32>
    %91 = arith.subf %87, %90 : vector<8x8xf32>
    %92 = math.exp %91 : vector<8x8xf32>
    %cst_30 = arith.constant dense<0.000000e+00> : vector<8xf32>
    %93 = vector.multi_reduction <add>, %92, %cst_30 [1] : vector<8x8xf32> to vector<8xf32>
    %94 = vector.shape_cast %93 : vector<8xf32> to vector<8x1xf32>
    %95 = vector.broadcast %94 : vector<8x1xf32> to vector<8x8xf32>
    %96 = arith.divf %92, %95 : vector<8x8xf32>
    %97 = arith.truncf %96 : vector<8x8xf32> to vector<8x8xbf16>
    %cst_31 = arith.constant dense<0.000000e+00> : vector<8x128xf32>
    %98 = tpu.matmul %97, %81, %cst_31 {dimension_numbers = #tpu.dot_dimension_numbers<[1], [0], [0], [1], [0, 0, 1, 1], [], []>} : vector<8x8xbf16>, vector<8x128xbf16>, vector<8x128xf32> -> vector<8x128xf32>
    %99 = arith.truncf %98 : vector<8x128xf32> to vector<8x128xbf16>
    %c0_32 = arith.constant 0 : index
    %c128 = arith.constant 128 : index
    %100 = vector.load %arg10[%c0_32, %c128] : memref<8x1024xbf16, #tpu.memory_space<vmem>>, vector<8x128xbf16>
    tpu.vector_store %arg10[%c0_32, %c128], %99 {strides = array<i32>} : memref<8x1024xbf16, #tpu.memory_space<vmem>>, vector<8x128xbf16>,
    %101 = vector.extract_strided_slice %37 {offsets = [0, 128], sizes = [8, 64], strides = [1, 1]} : vector<8x512xf32> to vector<8x64xf32>
    %102 = vector.extract_strided_slice %40 {offsets = [0, 128], sizes = [8, 64], strides = [1, 1]} : vector<8x512xf32> to vector<8x64xf32>
    %103 = vector.extract_strided_slice %43 {offsets = [0, 0], sizes = [8, 64], strides = [1, 1]} : vector<8x128xf32> to vector<8x64xf32>
    %104 = vector.extract_strided_slice %46 {offsets = [0, 0], sizes = [8, 64], strides = [1, 1]} : vector<8x128xf32> to vector<8x64xf32>
    %105 = vector.extract_strided_slice %26 {offsets = [0, 0], sizes = [8, 128], strides = [1, 1]} : vector<8x256xbf16> to vector<8x128xbf16>
    %cst_33 = arith.constant dense<0.000000e+00> : vector<8x8xf32>
    %106 = tpu.matmul %101, %103, %cst_33 {dimension_numbers = #tpu.dot_dimension_numbers<[1], [1], [0], [0], [0, 0, 1, 0], [], []>} : vector<8x64xf32>, vector<8x64xf32>, vector<8x8xf32> -> vector<8x8xf32>
    %cst_34 = arith.constant dense<0.000000e+00> : vector<8x8xf32>
    %107 = tpu.matmul %102, %104, %cst_34 {dimension_numbers = #tpu.dot_dimension_numbers<[1], [1], [0], [0], [0, 0, 1, 0], [], []>} : vector<8x64xf32>, vector<8x64xf32>, vector<8x8xf32> -> vector<8x8xf32>
    %108 = arith.addf %106, %107 : vector<8x8xf32>
    %cst_35 = arith.constant 0.0883883461 : f32
    %109 = vector.broadcast %cst_35 : f32 to vector<8x8xf32>
    %110 = arith.mulf %108, %109 : vector<8x8xf32>
    %111 = arith.addf %110, %52 : vector<8x8xf32>
    %cst_36 = arith.constant dense<0xFF800000> : vector<8xf32>
    %112 = vector.multi_reduction <maximumf>, %111, %cst_36 [1] : vector<8x8xf32> to vector<8xf32>
    %113 = vector.shape_cast %112 : vector<8xf32> to vector<8x1xf32>
    %114 = vector.broadcast %113 : vector<8x1xf32> to vector<8x8xf32>
    %115 = arith.subf %111, %114 : vector<8x8xf32>
    %116 = math.exp %115 : vector<8x8xf32>
    %cst_37 = arith.constant dense<0.000000e+00> : vector<8xf32>
    %117 = vector.multi_reduction <add>, %116, %cst_37 [1] : vector<8x8xf32> to vector<8xf32>
    %118 = vector.shape_cast %117 : vector<8xf32> to vector<8x1xf32>
    %119 = vector.broadcast %118 : vector<8x1xf32> to vector<8x8xf32>
    %120 = arith.divf %116, %119 : vector<8x8xf32>
    %121 = arith.truncf %120 : vector<8x8xf32> to vector<8x8xbf16>
    %cst_38 = arith.constant dense<0.000000e+00> : vector<8x128xf32>
    %122 = tpu.matmul %121, %105, %cst_38 {dimension_numbers = #tpu.dot_dimension_numbers<[1], [0], [0], [1], [0, 0, 1, 1], [], []>} : vector<8x8xbf16>, vector<8x128xbf16>, vector<8x128xf32> -> vector<8x128xf32>
    %123 = arith.truncf %122 : vector<8x128xf32> to vector<8x128xbf16>
    %c0_39 = arith.constant 0 : index
    %c256 = arith.constant 256 : index
    %124 = vector.load %arg10[%c0_39, %c256] : memref<8x1024xbf16, #tpu.memory_space<vmem>>, vector<8x128xbf16>
    tpu.vector_store %arg10[%c0_39, %c256], %123 {strides = array<i32>} : memref<8x1024xbf16, #tpu.memory_space<vmem>>, vector<8x128xbf16>,
    %125 = vector.extract_strided_slice %37 {offsets = [0, 192], sizes = [8, 64], strides = [1, 1]} : vector<8x512xf32> to vector<8x64xf32>
    %126 = vector.extract_strided_slice %40 {offsets = [0, 192], sizes = [8, 64], strides = [1, 1]} : vector<8x512xf32> to vector<8x64xf32>
    %127 = vector.extract_strided_slice %43 {offsets = [0, 0], sizes = [8, 64], strides = [1, 1]} : vector<8x128xf32> to vector<8x64xf32>
    %128 = vector.extract_strided_slice %46 {offsets = [0, 0], sizes = [8, 64], strides = [1, 1]} : vector<8x128xf32> to vector<8x64xf32>
    %129 = vector.extract_strided_slice %26 {offsets = [0, 0], sizes = [8, 128], strides = [1, 1]} : vector<8x256xbf16> to vector<8x128xbf16>
    %cst_40 = arith.constant dense<0.000000e+00> : vector<8x8xf32>
    %130 = tpu.matmul %125, %127, %cst_40 {dimension_numbers = #tpu.dot_dimension_numbers<[1], [1], [0], [0], [0, 0, 1, 0], [], []>} : vector<8x64xf32>, vector<8x64xf32>, vector<8x8xf32> -> vector<8x8xf32>
    %cst_41 = arith.constant dense<0.000000e+00> : vector<8x8xf32>
    %131 = tpu.matmul %126, %128, %cst_41 {dimension_numbers = #tpu.dot_dimension_numbers<[1], [1], [0], [0], [0, 0, 1, 0], [], []>} : vector<8x64xf32>, vector<8x64xf32>, vector<8x8xf32> -> vector<8x8xf32>
    %132 = arith.addf %130, %131 : vector<8x8xf32>
    %cst_42 = arith.constant 0.0883883461 : f32
    %133 = vector.broadcast %cst_42 : f32 to vector<8x8xf32>
    %134 = arith.mulf %132, %133 : vector<8x8xf32>
    %135 = arith.addf %134, %52 : vector<8x8xf32>
    %cst_43 = arith.constant dense<0xFF800000> : vector<8xf32>
    %136 = vector.multi_reduction <maximumf>, %135, %cst_43 [1] : vector<8x8xf32> to vector<8xf32>
    %137 = vector.shape_cast %136 : vector<8xf32> to vector<8x1xf32>
    %138 = vector.broadcast %137 : vector<8x1xf32> to vector<8x8xf32>
    %139 = arith.subf %135, %138 : vector<8x8xf32>
    %140 = math.exp %139 : vector<8x8xf32>
    %cst_44 = arith.constant dense<0.000000e+00> : vector<8xf32>
    %141 = vector.multi_reduction <add>, %140, %cst_44 [1] : vector<8x8xf32> to vector<8xf32>
    %142 = vector.shape_cast %141 : vector<8xf32> to vector<8x1xf32>
    %143 = vector.broadcast %142 : vector<8x1xf32> to vector<8x8xf32>
    %144 = arith.divf %140, %143 : vector<8x8xf32>
    %145 = arith.truncf %144 : vector<8x8xf32> to vector<8x8xbf16>
    %cst_45 = arith.constant dense<0.000000e+00> : vector<8x128xf32>
    %146 = tpu.matmul %145, %129, %cst_45 {dimension_numbers = #tpu.dot_dimension_numbers<[1], [0], [0], [1], [0, 0, 1, 1], [], []>} : vector<8x8xbf16>, vector<8x128xbf16>, vector<8x128xf32> -> vector<8x128xf32>
    %147 = arith.truncf %146 : vector<8x128xf32> to vector<8x128xbf16>
    %c0_46 = arith.constant 0 : index
    %c384 = arith.constant 384 : index
    %148 = vector.load %arg10[%c0_46, %c384] : memref<8x1024xbf16, #tpu.memory_space<vmem>>, vector<8x128xbf16>
    tpu.vector_store %arg10[%c0_46, %c384], %147 {strides = array<i32>} : memref<8x1024xbf16, #tpu.memory_space<vmem>>, vector<8x128xbf16>,
    %149 = vector.extract_strided_slice %37 {offsets = [0, 256], sizes = [8, 64], strides = [1, 1]} : vector<8x512xf32> to vector<8x64xf32>
    %150 = vector.extract_strided_slice %40 {offsets = [0, 256], sizes = [8, 64], strides = [1, 1]} : vector<8x512xf32> to vector<8x64xf32>
    %151 = vector.extract_strided_slice %43 {offsets = [0, 64], sizes = [8, 64], strides = [1, 1]} : vector<8x128xf32> to vector<8x64xf32>
    %152 = vector.extract_strided_slice %46 {offsets = [0, 64], sizes = [8, 64], strides = [1, 1]} : vector<8x128xf32> to vector<8x64xf32>
    %153 = vector.extract_strided_slice %26 {offsets = [0, 128], sizes = [8, 128], strides = [1, 1]} : vector<8x256xbf16> to vector<8x128xbf16>
    %cst_47 = arith.constant dense<0.000000e+00> : vector<8x8xf32>
    %154 = tpu.matmul %149, %151, %cst_47 {dimension_numbers = #tpu.dot_dimension_numbers<[1], [1], [0], [0], [0, 0, 1, 0], [], []>} : vector<8x64xf32>, vector<8x64xf32>, vector<8x8xf32> -> vector<8x8xf32>
    %cst_48 = arith.constant dense<0.000000e+00> : vector<8x8xf32>
    %155 = tpu.matmul %150, %152, %cst_48 {dimension_numbers = #tpu.dot_dimension_numbers<[1], [1], [0], [0], [0, 0, 1, 0], [], []>} : vector<8x64xf32>, vector<8x64xf32>, vector<8x8xf32> -> vector<8x8xf32>
    %156 = arith.addf %154, %155 : vector<8x8xf32>
    %cst_49 = arith.constant 0.0883883461 : f32
    %157 = vector.broadcast %cst_49 : f32 to vector<8x8xf32>
    %158 = arith.mulf %156, %157 : vector<8x8xf32>
    %159 = arith.addf %158, %52 : vector<8x8xf32>
    %cst_50 = arith.constant dense<0xFF800000> : vector<8xf32>
    %160 = vector.multi_reduction <maximumf>, %159, %cst_50 [1] : vector<8x8xf32> to vector<8xf32>
    %161 = vector.shape_cast %160 : vector<8xf32> to vector<8x1xf32>
    %162 = vector.broadcast %161 : vector<8x1xf32> to vector<8x8xf32>
    %163 = arith.subf %159, %162 : vector<8x8xf32>
    %164 = math.exp %163 : vector<8x8xf32>
    %cst_51 = arith.constant dense<0.000000e+00> : vector<8xf32>
    %165 = vector.multi_reduction <add>, %164, %cst_51 [1] : vector<8x8xf32> to vector<8xf32>
    %166 = vector.shape_cast %165 : vector<8xf32> to vector<8x1xf32>
    %167 = vector.broadcast %166 : vector<8x1xf32> to vector<8x8xf32>
    %168 = arith.divf %164, %167 : vector<8x8xf32>
    %169 = arith.truncf %168 : vector<8x8xf32> to vector<8x8xbf16>
    %cst_52 = arith.constant dense<0.000000e+00> : vector<8x128xf32>
    %170 = tpu.matmul %169, %153, %cst_52 {dimension_numbers = #tpu.dot_dimension_numbers<[1], [0], [0], [1], [0, 0, 1, 1], [], []>} : vector<8x8xbf16>, vector<8x128xbf16>, vector<8x128xf32> -> vector<8x128xf32>
    %171 = arith.truncf %170 : vector<8x128xf32> to vector<8x128xbf16>
    %c0_53 = arith.constant 0 : index
    %c512 = arith.constant 512 : index
    %172 = vector.load %arg10[%c0_53, %c512] : memref<8x1024xbf16, #tpu.memory_space<vmem>>, vector<8x128xbf16>
    tpu.vector_store %arg10[%c0_53, %c512], %171 {strides = array<i32>} : memref<8x1024xbf16, #tpu.memory_space<vmem>>, vector<8x128xbf16>,
    %173 = vector.extract_strided_slice %37 {offsets = [0, 320], sizes = [8, 64], strides = [1, 1]} : vector<8x512xf32> to vector<8x64xf32>
    %174 = vector.extract_strided_slice %40 {offsets = [0, 320], sizes = [8, 64], strides = [1, 1]} : vector<8x512xf32> to vector<8x64xf32>
    %175 = vector.extract_strided_slice %43 {offsets = [0, 64], sizes = [8, 64], strides = [1, 1]} : vector<8x128xf32> to vector<8x64xf32>
    %176 = vector.extract_strided_slice %46 {offsets = [0, 64], sizes = [8, 64], strides = [1, 1]} : vector<8x128xf32> to vector<8x64xf32>
    %177 = vector.extract_strided_slice %26 {offsets = [0, 128], sizes = [8, 128], strides = [1, 1]} : vector<8x256xbf16> to vector<8x128xbf16>
    %cst_54 = arith.constant dense<0.000000e+00> : vector<8x8xf32>
    %178 = tpu.matmul %173, %175, %cst_54 {dimension_numbers = #tpu.dot_dimension_numbers<[1], [1], [0], [0], [0, 0, 1, 0], [], []>} : vector<8x64xf32>, vector<8x64xf32>, vector<8x8xf32> -> vector<8x8xf32>
    %cst_55 = arith.constant dense<0.000000e+00> : vector<8x8xf32>
    %179 = tpu.matmul %174, %176, %cst_55 {dimension_numbers = #tpu.dot_dimension_numbers<[1], [1], [0], [0], [0, 0, 1, 0], [], []>} : vector<8x64xf32>, vector<8x64xf32>, vector<8x8xf32> -> vector<8x8xf32>
    %180 = arith.addf %178, %179 : vector<8x8xf32>
    %cst_56 = arith.constant 0.0883883461 : f32
    %181 = vector.broadcast %cst_56 : f32 to vector<8x8xf32>
    %182 = arith.mulf %180, %181 : vector<8x8xf32>
    %183 = arith.addf %182, %52 : vector<8x8xf32>
    %cst_57 = arith.constant dense<0xFF800000> : vector<8xf32>
    %184 = vector.multi_reduction <maximumf>, %183, %cst_57 [1] : vector<8x8xf32> to vector<8xf32>
    %185 = vector.shape_cast %184 : vector<8xf32> to vector<8x1xf32>
    %186 = vector.broadcast %185 : vector<8x1xf32> to vector<8x8xf32>
    %187 = arith.subf %183, %186 : vector<8x8xf32>
    %188 = math.exp %187 : vector<8x8xf32>
    %cst_58 = arith.constant dense<0.000000e+00> : vector<8xf32>
    %189 = vector.multi_reduction <add>, %188, %cst_58 [1] : vector<8x8xf32> to vector<8xf32>
    %190 = vector.shape_cast %189 : vector<8xf32> to vector<8x1xf32>
    %191 = vector.broadcast %190 : vector<8x1xf32> to vector<8x8xf32>
    %192 = arith.divf %188, %191 : vector<8x8xf32>
    %193 = arith.truncf %192 : vector<8x8xf32> to vector<8x8xbf16>
    %cst_59 = arith.constant dense<0.000000e+00> : vector<8x128xf32>
    %194 = tpu.matmul %193, %177, %cst_59 {dimension_numbers = #tpu.dot_dimension_numbers<[1], [0], [0], [1], [0, 0, 1, 1], [], []>} : vector<8x8xbf16>, vector<8x128xbf16>, vector<8x128xf32> -> vector<8x128xf32>
    %195 = arith.truncf %194 : vector<8x128xf32> to vector<8x128xbf16>
    %c0_60 = arith.constant 0 : index
    %c640 = arith.constant 640 : index
    %196 = vector.load %arg10[%c0_60, %c640] : memref<8x1024xbf16, #tpu.memory_space<vmem>>, vector<8x128xbf16>
    tpu.vector_store %arg10[%c0_60, %c640], %195 {strides = array<i32>} : memref<8x1024xbf16, #tpu.memory_space<vmem>>, vector<8x128xbf16>,
    %197 = vector.extract_strided_slice %37 {offsets = [0, 384], sizes = [8, 64], strides = [1, 1]} : vector<8x512xf32> to vector<8x64xf32>
    %198 = vector.extract_strided_slice %40 {offsets = [0, 384], sizes = [8, 64], strides = [1, 1]} : vector<8x512xf32> to vector<8x64xf32>
    %199 = vector.extract_strided_slice %43 {offsets = [0, 64], sizes = [8, 64], strides = [1, 1]} : vector<8x128xf32> to vector<8x64xf32>
    %200 = vector.extract_strided_slice %46 {offsets = [0, 64], sizes = [8, 64], strides = [1, 1]} : vector<8x128xf32> to vector<8x64xf32>
    %201 = vector.extract_strided_slice %26 {offsets = [0, 128], sizes = [8, 128], strides = [1, 1]} : vector<8x256xbf16> to vector<8x128xbf16>
    %cst_61 = arith.constant dense<0.000000e+00> : vector<8x8xf32>
    %202 = tpu.matmul %197, %199, %cst_61 {dimension_numbers = #tpu.dot_dimension_numbers<[1], [1], [0], [0], [0, 0, 1, 0], [], []>} : vector<8x64xf32>, vector<8x64xf32>, vector<8x8xf32> -> vector<8x8xf32>
    %cst_62 = arith.constant dense<0.000000e+00> : vector<8x8xf32>
    %203 = tpu.matmul %198, %200, %cst_62 {dimension_numbers = #tpu.dot_dimension_numbers<[1], [1], [0], [0], [0, 0, 1, 0], [], []>} : vector<8x64xf32>, vector<8x64xf32>, vector<8x8xf32> -> vector<8x8xf32>
    %204 = arith.addf %202, %203 : vector<8x8xf32>
    %cst_63 = arith.constant 0.0883883461 : f32
    %205 = vector.broadcast %cst_63 : f32 to vector<8x8xf32>
    %206 = arith.mulf %204, %205 : vector<8x8xf32>
    %207 = arith.addf %206, %52 : vector<8x8xf32>
    %cst_64 = arith.constant dense<0xFF800000> : vector<8xf32>
    %208 = vector.multi_reduction <maximumf>, %207, %cst_64 [1] : vector<8x8xf32> to vector<8xf32>
    %209 = vector.shape_cast %208 : vector<8xf32> to vector<8x1xf32>
    %210 = vector.broadcast %209 : vector<8x1xf32> to vector<8x8xf32>
    %211 = arith.subf %207, %210 : vector<8x8xf32>
    %212 = math.exp %211 : vector<8x8xf32>
    %cst_65 = arith.constant dense<0.000000e+00> : vector<8xf32>
    %213 = vector.multi_reduction <add>, %212, %cst_65 [1] : vector<8x8xf32> to vector<8xf32>
    %214 = vector.shape_cast %213 : vector<8xf32> to vector<8x1xf32>
    %215 = vector.broadcast %214 : vector<8x1xf32> to vector<8x8xf32>
    %216 = arith.divf %212, %215 : vector<8x8xf32>
    %217 = arith.truncf %216 : vector<8x8xf32> to vector<8x8xbf16>
    %cst_66 = arith.constant dense<0.000000e+00> : vector<8x128xf32>
    %218 = tpu.matmul %217, %201, %cst_66 {dimension_numbers = #tpu.dot_dimension_numbers<[1], [0], [0], [1], [0, 0, 1, 1], [], []>} : vector<8x8xbf16>, vector<8x128xbf16>, vector<8x128xf32> -> vector<8x128xf32>
    %219 = arith.truncf %218 : vector<8x128xf32> to vector<8x128xbf16>
    %c0_67 = arith.constant 0 : index
    %c768 = arith.constant 768 : index
    %220 = vector.load %arg10[%c0_67, %c768] : memref<8x1024xbf16, #tpu.memory_space<vmem>>, vector<8x128xbf16>
    tpu.vector_store %arg10[%c0_67, %c768], %219 {strides = array<i32>} : memref<8x1024xbf16, #tpu.memory_space<vmem>>, vector<8x128xbf16>,
    %221 = vector.extract_strided_slice %37 {offsets = [0, 448], sizes = [8, 64], strides = [1, 1]} : vector<8x512xf32> to vector<8x64xf32>
    %222 = vector.extract_strided_slice %40 {offsets = [0, 448], sizes = [8, 64], strides = [1, 1]} : vector<8x512xf32> to vector<8x64xf32>
    %223 = vector.extract_strided_slice %43 {offsets = [0, 64], sizes = [8, 64], strides = [1, 1]} : vector<8x128xf32> to vector<8x64xf32>
    %224 = vector.extract_strided_slice %46 {offsets = [0, 64], sizes = [8, 64], strides = [1, 1]} : vector<8x128xf32> to vector<8x64xf32>
    %225 = vector.extract_strided_slice %26 {offsets = [0, 128], sizes = [8, 128], strides = [1, 1]} : vector<8x256xbf16> to vector<8x128xbf16>
    %cst_68 = arith.constant dense<0.000000e+00> : vector<8x8xf32>
    %226 = tpu.matmul %221, %223, %cst_68 {dimension_numbers = #tpu.dot_dimension_numbers<[1], [1], [0], [0], [0, 0, 1, 0], [], []>} : vector<8x64xf32>, vector<8x64xf32>, vector<8x8xf32> -> vector<8x8xf32>
    %cst_69 = arith.constant dense<0.000000e+00> : vector<8x8xf32>
    %227 = tpu.matmul %222, %224, %cst_69 {dimension_numbers = #tpu.dot_dimension_numbers<[1], [1], [0], [0], [0, 0, 1, 0], [], []>} : vector<8x64xf32>, vector<8x64xf32>, vector<8x8xf32> -> vector<8x8xf32>
    %228 = arith.addf %226, %227 : vector<8x8xf32>
    %cst_70 = arith.constant 0.0883883461 : f32
    %229 = vector.broadcast %cst_70 : f32 to vector<8x8xf32>
    %230 = arith.mulf %228, %229 : vector<8x8xf32>
    %231 = arith.addf %230, %52 : vector<8x8xf32>
    %cst_71 = arith.constant dense<0xFF800000> : vector<8xf32>
    %232 = vector.multi_reduction <maximumf>, %231, %cst_71 [1] : vector<8x8xf32> to vector<8xf32>
    %233 = vector.shape_cast %232 : vector<8xf32> to vector<8x1xf32>
    %234 = vector.broadcast %233 : vector<8x1xf32> to vector<8x8xf32>
    %235 = arith.subf %231, %234 : vector<8x8xf32>
    %236 = math.exp %235 : vector<8x8xf32>
    %cst_72 = arith.constant dense<0.000000e+00> : vector<8xf32>
    %237 = vector.multi_reduction <add>, %236, %cst_72 [1] : vector<8x8xf32> to vector<8xf32>
    %238 = vector.shape_cast %237 : vector<8xf32> to vector<8x1xf32>
    %239 = vector.broadcast %238 : vector<8x1xf32> to vector<8x8xf32>
    %240 = arith.divf %236, %239 : vector<8x8xf32>
    %241 = arith.truncf %240 : vector<8x8xf32> to vector<8x8xbf16>
    %cst_73 = arith.constant dense<0.000000e+00> : vector<8x128xf32>
    %242 = tpu.matmul %241, %225, %cst_73 {dimension_numbers = #tpu.dot_dimension_numbers<[1], [0], [0], [1], [0, 0, 1, 1], [], []>} : vector<8x8xbf16>, vector<8x128xbf16>, vector<8x128xf32> -> vector<8x128xf32>
    %243 = arith.truncf %242 : vector<8x128xf32> to vector<8x128xbf16>
    %c0_74 = arith.constant 0 : index
    %c896 = arith.constant 896 : index
    %244 = vector.load %arg10[%c0_74, %c896] : memref<8x1024xbf16, #tpu.memory_space<vmem>>, vector<8x128xbf16>
    tpu.vector_store %arg10[%c0_74, %c896], %243 {strides = array<i32>} : memref<8x1024xbf16, #tpu.memory_space<vmem>>, vector<8x128xbf16>,
    %c0_75 = arith.constant 0 : index
    %c0_76 = arith.constant 0 : index
    %245 = vector.load %arg10[%c0_75, %c0_76] : memref<8x1024xbf16, #tpu.memory_space<vmem>>, vector<8x1024xbf16>
    %c0_77 = arith.constant 0 : index
    %c0_78 = arith.constant 0 : index
    %246 = vector.load %arg8[%c0_77, %c0_78] : memref<1024x1024xbf16, #tpu.memory_space<vmem>>, vector<1024x1024xbf16>
    %cst_79 = arith.constant dense<0.000000e+00> : vector<8x1024xf32>
    %247 = tpu.matmul %245, %246, %cst_79 {dimension_numbers = #tpu.dot_dimension_numbers<[1], [0], [0], [1], [0, 0, 1, 1], [], []>} : vector<8x1024xbf16>, vector<1024x1024xbf16>, vector<8x1024xf32> -> vector<8x1024xf32>
    %248 = arith.truncf %247 : vector<8x1024xf32> to vector<8x1024xbf16>
    %c0_80 = arith.constant 0 : index
    %c0_81 = arith.constant 0 : index
    %249 = vector.load %arg9[%c0_80, %c0_81] : memref<8x1024xbf16, #tpu.memory_space<vmem>>, vector<8x1024xbf16>
    tpu.vector_store %arg9[%c0_80, %c0_81], %248 {strides = array<i32>} : memref<8x1024xbf16, #tpu.memory_space<vmem>>, vector<8x1024xbf16>,
    return
  }
  func.func @transform_0(%arg0: i32) -> (i32, i32) {
    %c0_i32 = arith.constant 0 : i32
    %c0_i32_0 = arith.constant 0 : i32
    %c0_i32_1 = arith.constant 0 : i32
    return %c0_i32, %c0_i32_0 : i32, i32
  }
  func.func @transform_1(%arg0: i32) -> (i32, i32) {
    %c0_i32 = arith.constant 0 : i32
    %c0_i32_0 = arith.constant 0 : i32
    %c0_i32_1 = arith.constant 0 : i32
    return %c0_i32, %c0_i32_0 : i32, i32
  }
  func.func @transform_2(%arg0: i32) -> (i32, i32) {
    %c0_i32 = arith.constant 0 : i32
    %c0_i32_0 = arith.constant 0 : i32
    %c0_i32_1 = arith.constant 0 : i32
    return %c0_i32, %c0_i32_0 : i32, i32
  }
  func.func @transform_3(%arg0: i32) -> (i32, i32) {
    %c0_i32 = arith.constant 0 : i32
    %c0_i32_0 = arith.constant 0 : i32
    %c0_i32_1 = arith.constant 0 : i32
    return %c0_i32, %c0_i32_0 : i32, i32
  }
  func.func @transform_4(%arg0: i32) -> (i32, i32) {
    %c0_i32 = arith.constant 0 : i32
    %c0_i32_0 = arith.constant 0 : i32
    %c0_i32_1 = arith.constant 0 : i32
    return %c0_i32, %c0_i32_0 : i32, i32
  }
  func.func @transform_5(%arg0: i32) -> (i32, i32) {
    %c0_i32 = arith.constant 0 : i32
    %c0_i32_0 = arith.constant 0 : i32
    %c0_i32_1 = arith.constant 0 : i32
    return %c0_i32, %c0_i32_0 : i32, i32
  }
  func.func @transform_6(%arg0: i32) -> (i32, i32) {
    %c0_i32 = arith.constant 0 : i32
    %c0_i32_0 = arith.constant 0 : i32
    %c0_i32_1 = arith.constant 0 : i32
    return %c0_i32, %c0_i32_0 : i32, i32
  }
  func.func @transform_7(%arg0: i32) -> (i32, i32) {
    %c0_i32 = arith.constant 0 : i32
    %c0_i32_0 = arith.constant 0 : i32
    %c0_i32_1 = arith.constant 0 : i32
    return %c0_i32, %c0_i32_0 : i32, i32
  }
  func.func @transform_8(%arg0: i32) -> (i32, i32) {
    %c0_i32 = arith.constant 0 : i32
    %c0_i32_0 = arith.constant 0 : i32
    %c0_i32_1 = arith.constant 0 : i32
    return %c0_i32, %c0_i32_0 : i32, i32
  }
}

</mosaic_0001>

<bundles_post_ra>
// kernel: tpu_custom_call.1
= control target key start
LH: loop header
LB: loop body
LE: loop exit
PB: predicated region body
PF: predicated region fallthrough
CT: control target
= control target key end

     0   :  { %13 = vsyncpa [#allocation4], 0  ;;  %s14924_s0 = inlined_call_operand.hbm [shape: bf16[8,1024], index: 0, kind: input, shape index: {}]   ;;  %s14925_s1 = inlined_call_operand.hbm [shape: bf16[1,1024], index: 1, kind: input, shape index: {}]   ;;  %s14926_s2 = inlined_call_operand.hbm [shape: f32[8,512], index: 2, kind: input, shape index: {}]   ;;  %s14927_s3 = inlined_call_operand.hbm [shape: f32[8,512], index: 3, kind: input, shape index: {}]   ;;  %s14928_s4 = inlined_call_operand.hbm [shape: f32[8,128], index: 4, kind: input, shape index: {}]   ;;  %s14929_s5 = inlined_call_operand.hbm [shape: f32[8,128], index: 5, kind: input, shape index: {}]   ;;  %s14930_s6 = inlined_call_operand.hbm [shape: bf16[1024,1536], index: 6, kind: input, shape index: {}]   ;;  %s14931_s7 = inlined_call_operand.hbm [shape: bf16[1024,1024], index: 7, kind: input, shape index: {}]   ;;  %s14932_s8 = inlined_call_operand.hbm [shape: bf16[8,1024], index: 8, kind: output, shape index: {}]  }
   0x1   :  { %14 = vsyncpa [#allocation7], 0 }
   0x2   :  { %15 = vsyncpa [#allocation10], 0 }
   0x3   :  { %16 = vsyncpa [#allocation13], 0 }
   0x4   :  { %17 = vsyncpa [#allocation16], 0 }
   0x5   :  { %18 = vsyncpa [#allocation5], 0  ;;  %s14322_s27 = smov [#allocation6]   ;;  %s14323_s29 = smov [#allocation9]  }
   0x6   :  { %s35_s28 = sshll.u32 %s14322_s27, 4  ;;  %s55_s30 = sshll.u32 %s14323_s29, 4  ;;  %s36_s28 = int_to_ptr.vmem [resolvable:$true] %s35_s28  ;;  %s56_s30 = int_to_ptr.vmem [resolvable:$true] %s55_s30 }
   0x7   :  { %s14138_s9 = scalar_lea.vmem %s36_s28, 128  ;;  %p14143_p1 = scmp.lt.s32.totalorder %s36_s28, %s36_s28 }
   0x8   :  { %p14139_p0 = scmp.ne.s32.totalorder %s36_s28, %s14138_s9  ;;  %p14144_p2 = scmp.lt.s32.totalorder %s14138_s9, %s14138_s9 }
   0xa   :  { %p14145_p3 = por %p14144_p2, %p14143_p1 }
   0xc   :  { %p14146_p4 = pnand %p14145_p3, %p14139_p0 }
   0xe   :  { %14149 = shalt.err (!%p14146_p4)
}
   0xf   :  { %38 = dma.hbm_to_vmem [thread:$0]  %s14925_s1, 128, %s36_s28, [#allocation7]  }
  0x10   :  { %s14158_s12 = scalar_lea.vmem %s56_s30, 512  ;;  %p14163_p6 = scmp.lt.s32.totalorder %s56_s30, %s56_s30 }
  0x11   :  { %p14159_p5 = scmp.ne.s32.totalorder %s56_s30, %s14158_s12  ;;  %p14164_p7 = scmp.lt.s32.totalorder %s14158_s12, %s14158_s12 }
  0x13   :  { %p14165_p8 = por %p14164_p7, %p14163_p6 }
  0x15   :  { %p14166_p9 = pnand %p14165_p8, %p14159_p5 }
  0x17   :  { %14169 = shalt.err (!%p14166_p9)
}
  0x18   :  { %58 = dma.hbm_to_vmem [thread:$0]  %s14927_s3, 512, %s56_s30, [#allocation10]  }
  0x19   :  { %s14324_s15 = smov [#allocation12]   ;;  %s14325_s17 = smov [#allocation3]  }
  0x1a   :  { %s75_s16 = sshll.u32 %s14324_s15, 4  ;;  %s25_s18 = sshll.u32 %s14325_s17, 4  ;;  %s76_s16 = int_to_ptr.vmem [resolvable:$true] %s75_s16  ;;  %s26_s18 = int_to_ptr.vmem [resolvable:$true] %s25_s18 }
  0x1b   :  { %s14178_s19 = scalar_lea.vmem %s76_s16, 128  ;;  %p14183_p11 = scmp.lt.s32.totalorder %s76_s16, %s76_s16 }
  0x1c   :  { %p14179_p10 = scmp.ne.s32.totalorder %s76_s16, %s14178_s19  ;;  %p14184_p12 = scmp.lt.s32.totalorder %s14178_s19, %s14178_s19 }
  0x1e   :  { %p14185_p13 = por %p14184_p12, %p14183_p11 }
  0x20   :  { %p14186_p0 = pnand %p14185_p13, %p14179_p10 }
  0x22   :  { %14189 = shalt.err (!%p14186_p0)
}
  0x23   :  { %78 = dma.hbm_to_vmem [thread:$0]  %s14929_s5, 128, %s76_s16, [#allocation13]  }
  0x24   :  { %s14198_s21 = scalar_lea.vmem %s26_s18, 512  ;;  %p14203_p2 = scmp.lt.s32.totalorder %s26_s18, %s26_s18 }
  0x25   :  { %p14199_p1 = scmp.ne.s32.totalorder %s26_s18, %s14198_s21  ;;  %p14204_p3 = scmp.lt.s32.totalorder %s14198_s21, %s14198_s21 }
  0x27   :  { %p14205_p4 = por %p14204_p3, %p14203_p2 }
  0x29   :  { %p14206_p5 = pnand %p14205_p4, %p14199_p1 }
  0x2b   :  { %14209 = shalt.err (!%p14206_p5)
}
  0x2c   :  { %28 = dma.hbm_to_vmem [thread:$0]  %s14924_s0, 512, %s26_s18, [#allocation4]  }
  0x2d   :  { %s14326_s23 = smov [#allocation8]   ;;  %s14327_s25 = smov [#allocation11]  }
  0x2e   :  { %s45_s24 = sshll.u32 %s14326_s23, 4  ;;  %s65_s26 = sshll.u32 %s14327_s25, 4  ;;  %s46_s24 = int_to_ptr.vmem [resolvable:$true] %s45_s24  ;;  %s66_s26 = int_to_ptr.vmem [resolvable:$true] %s65_s26 }
  0x2f   :  { %s14218_s27 = scalar_lea.vmem %s46_s24, 512  ;;  %p14223_p7 = scmp.lt.s32.totalorder %s46_s24, %s46_s24 }
  0x30   :  { %p14219_p6 = scmp.ne.s32.totalorder %s46_s24, %s14218_s27  ;;  %p14224_p8 = scmp.lt.s32.totalorder %s14218_s27, %s14218_s27 }
  0x32   :  { %p14225_p9 = por %p14224_p8, %p14223_p7 }
  0x34   :  { %p14226_p10 = pnand %p14225_p9, %p14219_p6 }
  0x36   :  { %14229 = shalt.err (!%p14226_p10)
}
  0x37   :  { %48 = dma.hbm_to_vmem [thread:$0]  %s14926_s2, 512, %s46_s24, [#allocation7]  }
  0x38   :  { %s14238_s29 = scalar_lea.vmem %s66_s26, 128  ;;  %p14243_p12 = scmp.lt.s32.totalorder %s66_s26, %s66_s26 }
  0x39   :  { %p14239_p11 = scmp.ne.s32.totalorder %s66_s26, %s14238_s29  ;;  %p14244_p13 = scmp.lt.s32.totalorder %s14238_s29, %s14238_s29 }
  0x3b   :  { %p14245_p0 = por %p14244_p13, %p14243_p12 }
  0x3d   :  { %p14246_p1 = pnand %p14245_p0, %p14239_p11 }
  0x3f   :  { %14249 = shalt.err (!%p14246_p1)
}
  0x40   :  { %68 = dma.hbm_to_vmem [thread:$0]  %s14928_s4, 128, %s66_s26, [#allocation10]  }
  0x41   :  { %s14328_s9 = smov [#allocation14]  }
  0x42   :  { %s84_s10 = sshll.u32 %s14328_s9, 4  ;;  %s85_s10 = int_to_ptr.vmem [resolvable:$true] %s84_s10 }
  0x43   :  { %s14258_s11 = scalar_lea.vmem %s85_s10, 98304  ;;  %p14263_p3 = scmp.lt.s32.totalorder %s85_s10, %s85_s10 }
  0x44   :  { %p14259_p2 = scmp.ne.s32.totalorder %s85_s10, %s14258_s11  ;;  %p14264_p4 = scmp.lt.s32.totalorder %s14258_s11, %s14258_s11 }
  0x46   :  { %p14265_p5 = por %p14264_p4, %p14263_p3 }
  0x48   :  { %p14266_p6 = pnand %p14265_p5, %p14259_p2 }
  0x4a   :  { %14269 = shalt.err (!%p14266_p6)
}
  0x4b   :  { %s14329_s2 = smov 768   ;;  %s14330_s12 = smov 48  }
  0x4c   :  { %90 = dma.hbm_to_vmem [thread:$0]  %s14930_s6, 98304, %s85_s10, [#allocation13], %s14329_s2, %s14329_s2, %s14330_s12  }
  0x4d   :  { %s14331_s15 = smov [#allocation15]  }
  0x4e   :  { %s96_s16 = sshll.u32 %s14331_s15, 4  ;;  %s97_s16 = int_to_ptr.vmem [resolvable:$true] %s96_s16 }
  0x4f   :  { %s14278_s4 = scalar_lea.vmem %s97_s16, 65536  ;;  %p14283_p8 = scmp.lt.s32.totalorder %s97_s16, %s97_s16 }
  0x50   :  { %p14279_p7 = scmp.ne.s32.totalorder %s97_s16, %s14278_s4  ;;  %p14284_p9 = scmp.lt.s32.totalorder %s14278_s4, %s14278_s4 }
  0x52   :  { %p14285_p10 = por %p14284_p9, %p14283_p8 }
  0x54   :  { %p14286_p11 = pnand %p14285_p10, %p14279_p7 }
  0x56   :  { %14289 = shalt.err (!%p14286_p11)
}
  0x57   :  { %s14332_s17 = smov 512   ;;  %s14333_s18 = smov 32  }
  0x58   :  { %102 = dma.hbm_to_vmem [thread:$0]  %s14931_s7, 65536, %s97_s16, [#allocation16], %s14332_s17, %s14332_s17, %s14333_s18  }
  0x59   :  { %14310 = dma.done.wait [#allocation4], 512  }
  0x5a   :  { %14311 = vsyncadd [#allocation4], 4294966784 }
  0x5b   :  { %14312 = dma.done.wait [#allocation7], 640  }
  0x5c   :  { %14313 = vsyncadd [#allocation7], 4294966656 }
  0x5d   :  { %14314 = dma.done.wait [#allocation10], 640  }
  0x5e   :  { %14315 = vsyncadd [#allocation10], 4294966656 }
  0x5f   :  { %14316 = dma.done.wait [#allocation13], 98432  }
  0x60   :  { %14317 = vsyncadd [#allocation13], 4294868864 }
  0x61   :  { %14318 = dma.done.wait [#allocation16], 65536  }
  0x62   :  { %14319 = vsyncadd [#allocation16], 4294901760  ;;  %v128_v0 = vld [vmem:[#allocation3] sm:$0xff]  ;;  %v129_v1 = vld [vmem:[#allocation3 + $0x8] sm:$0xff]  ;;  %s14334_s6 = smov 64   ;;  %vm14336_vm0 = vmmov 0  }
  0x63   :  { %v130_v2 = vld [vmem:[#allocation3 + $0x10] sm:$0xff]  ;;  %v14407_v3 = vunpack.c.l.bf16 %v128_v0  ;;  %v14409_v4 = vunpack.c.h.bf16 %v128_v0  ;;  %v14411_v5 = vunpack.c.l.bf16 %v129_v1  ;;  %v14413_v6 = vunpack.c.h.bf16 %v129_v1  ;;  %v131_v7 = vld [vmem:[#allocation3 + $0x18] sm:$0xff]  ;;  %s14337_s7 = smov [#allocation17]  }
  0x64   :  { %v12936_v8 = vld [vmem:[#allocation14 + $0x2a4] ss:$48 sps:$4 sm:$0xff]   ;;  %v14415_v9 = vunpack.c.l.bf16 %v130_v2  ;;  %v12940_v14 = vld [vmem:[#allocation14 + $0x2a0] ss:$48 sps:$4 sm:$0xff]   ;;  %v14423_v17 = vunpack.c.h.bf16 %v130_v2  ;;  %v14427_v23 = vunpack.c.l.bf16 %v131_v7  ;;  %v14431_v29 = vunpack.c.h.bf16 %v131_v7  ;;  %s11395_s20 = sshll.u32 %s14337_s7, 4  ;;  %s11396_s20 = int_to_ptr.vmem [resolvable:$true] %s11395_s20 }
  0x65   :  { %v140_v10 = vmul.f32 %v14407_v3, %v14407_v3  ;;  %v141_v11 = vmul.f32 %v14409_v4, %v14409_v4  ;;  %v142_v12 = vmul.f32 %v14411_v5, %v14411_v5  ;;  %v12938_v13 = vld [vmem:[#allocation14 + $0x8a4] ss:$48 sps:$4 sm:$0xff]   ;;  %v12941_v15 = vld [vmem:[#allocation14 + $0x8a0] ss:$48 sps:$4 sm:$0xff]   ;;  %4870 = vmatprep.subr.bf16.mxu0 %v12936_v8  ;;  %v143_v18 = vmul.f32 %v14413_v6, %v14413_v6  ;;  %s14290_s21 = scalar_lea.vmem %s11396_s20, 512  ;;  %p14295_p13 = scmp.lt.s32.totalorder %s11396_s20, %s11396_s20 }
  0x66   :  { %v12942_v16 = vld [vmem:[#allocation14 + $0x244] ss:$48 sps:$4 sm:$0xff]   ;;  %4911 = vmatprep.subr.bf16.mxu1 %v12938_v13  ;;  %4871 = vmatpush1.bf16.msra.mxu0 %v12940_v14  ;;  %v12946_v21 = vld [vmem:[#allocation14 + $0x240] ss:$48 sps:$4 sm:$0xff]   ;;  %v144_v24 = vmul.f32 %v14415_v9, %v14415_v9  ;;  %v145_v30 = vmul.f32 %v14423_v17, %v14423_v17  ;;  %v146_v34 = vmul.f32 %v14427_v23, %v14427_v23  ;;  %vm5922_vm1 = vcmask 523264   ;;  %p14291_p12 = scmp.ne.s32.totalorder %s11396_s20, %s14290_s21  ;;  %p14296_p0 = scmp.lt.s32.totalorder %s14290_s21, %s14290_s21 }
  0x67   :  { %v148_v19 = vadd.f32 %v141_v11, %v140_v10  ;;  %v12944_v20 = vld [vmem:[#allocation14 + $0x844] ss:$48 sps:$4 sm:$0xff]   ;;  %4912 = vmatpush1.bf16.msra.mxu1 %v12941_v15  ;;  %4872 = vmatprep.subr.bf16.mxu0 %v12942_v16  ;;  %v12947_v22 = vld [vmem:[#allocation14 + $0x840] ss:$48 sps:$4 sm:$0xff]   ;;  %v147_v37 = vmul.f32 %v14431_v29, %v14431_v29  ;;  %v174_v10 = vlaneseq  ;;  %vm6093_vm2 = vcmask 1043456  }
  0x68   :  { %4913 = vmatprep.subr.bf16.mxu1 %v12944_v20  ;;  %v12948_v26 = vld [vmem:[#allocation14 + $0x1e4] ss:$48 sps:$4 sm:$0xff]   ;;  %v12952_v28 = vld [vmem:[#allocation14 + $0x1e0] ss:$48 sps:$4 sm:$0xff]   ;;  %v169_v20 = vld [vmem:[#allocation6] sm:$0xff]  ;;  %vm6077_vm4 = vcmask 64512   ;;  %p14297_p1 = por %p14296_p0, %p14295_p13 }
  0x69   :  { %v149_v25 = vadd.f32 %v148_v19, %v142_v12  ;;  %v12950_v27 = vld [vmem:[#allocation14 + $0x7e4] ss:$48 sps:$4 sm:$0xff]   ;;  %v12953_v32 = vld [vmem:[#allocation14 + $0x7e0] ss:$48 sps:$4 sm:$0xff]   ;;  %v14440_v13 = vshrl.u32 %v174_v10, 7 }
  0x6a   :  { %4873 = vmatpush1.bf16.msra.mxu0 %v12946_v21  ;;  %v12954_v33 = vld [vmem:[#allocation14 + $0x184] ss:$48 sps:$4 sm:$0xff]   ;;  %v12958_v39 = vld [vmem:[#allocation14 + $0x180] ss:$48 sps:$4 sm:$0xff]   ;;  %p14298_p2 = pnand %p14297_p1, %p14291_p12 }
  0x6b   :  { %v150_v31 = vadd.f32 %v149_v25, %v143_v18  ;;  %4914 = vmatpush1.bf16.msra.mxu1 %v12947_v22  ;;  %4874 = vmatprep.subr.bf16.mxu0 %v12948_v26  ;;  %v12956_v36 = vld [vmem:[#allocation14 + $0x784] ss:$48 sps:$4 sm:$0xff]   ;;  %v12959_v40 = vld [vmem:[#allocation14 + $0x780] ss:$48 sps:$4 sm:$0xff]   ;;  %v184_v22 = vsub.s32 4, %v14440_v13 }
  0x6c   :  { %4915 = vmatprep.subr.bf16.mxu1 %v12950_v27  ;;  %v12960_v41 = vld [vmem:[#allocation14 + $0x124] ss:$48 sps:$4 sm:$0xff]   ;;  %v12964_v44 = vld [vmem:[#allocation14 + $0x120] ss:$48 sps:$4 sm:$0xff]  }
  0x6d   :  { %v151_v35 = vadd.f32 %v150_v31, %v144_v24  ;;  %v12962_v43 = vld [vmem:[#allocation14 + $0x724] ss:$48 sps:$4 sm:$0xff]   ;;  %v12965_v46 = vld [vmem:[#allocation14 + $0x720] ss:$48 sps:$4 sm:$0xff]   ;;  %v14443_v24 = vunpack.c.h.bf16 %v169_v20 }
  0x6e   :  { %4875 = vmatpush1.bf16.msra.mxu0 %v12952_v28  ;;  %v12966_v47 = vld [vmem:[#allocation14 + $0xc4] ss:$48 sps:$4 sm:$0xff]   ;;  %v12970_v49 = vld [vmem:[#allocation14 + $0xc0] ss:$48 sps:$4 sm:$0xff]  }
  0x6f   :  { %v152_v38 = vadd.f32 %v151_v35, %v145_v30  ;;  %4916 = vmatpush1.bf16.msra.mxu1 %v12953_v32  ;;  %4876 = vmatprep.subr.bf16.mxu0 %v12954_v33  ;;  %v12968_v48 = vld [vmem:[#allocation14 + $0x6c4] ss:$48 sps:$4 sm:$0xff]   ;;  %v12971_v50 = vld [vmem:[#allocation14 + $0x6c0] ss:$48 sps:$4 sm:$0xff]   ;;  %v14446_v28 = vrot.slane %v14443_v24, %v184_v22  ;;  %v14449_v30 = vsub.s32 0, %v14440_v13 }
  0x70   :  { %4917 = vmatprep.subr.bf16.mxu1 %v12956_v36  ;;  %v12972_v51 = vld [vmem:[#allocation14 + $0x64] ss:$48 sps:$4 sm:$0xff]   ;;  %v12976_v53 = vld [vmem:[#allocation14 + $0x60] ss:$48 sps:$4 sm:$0xff]  }
  0x71   :  { %v153_v42 = vadd.f32 %v152_v38, %v146_v34  ;;  %v12974_v52 = vld [vmem:[#allocation14 + $0x664] ss:$48 sps:$4 sm:$0xff]   ;;  %v12977_v54 = vld [vmem:[#allocation14 + $0x660] ss:$48 sps:$4 sm:$0xff]   ;;  %v241_v33 = vrot.slane %v14446_v28, %v14449_v30 }
  0x72   :  { %4877 = vmatpush1.bf16.msra.mxu0 %v12958_v39  ;;  %v12978_v55 = vld [vmem:[#allocation14 + $0x4] ss:$48 sps:$4 sm:$0xff]   ;;  %v12982_v57 = vld [vmem:[#allocation14] ss:$48 sps:$4 sm:$0xff]  }
  0x73   :  { %v154_v45 = vadd.f32 %v153_v42, %v147_v37  ;;  %4918 = vmatpush1.bf16.msra.mxu1 %v12959_v40  ;;  %4878 = vmatprep.subr.bf16.mxu0 %v12960_v41  ;;  %v12980_v56 = vld [vmem:[#allocation14 + $0x604] ss:$48 sps:$4 sm:$0xff]   ;;  %v12983_v58 = vld [vmem:[#allocation14 + $0x600] ss:$48 sps:$4 sm:$0xff]  }
  0x74   :  { %4919 = vmatprep.subr.bf16.mxu1 %v12962_v43  ;;  %v12984_v59 = vld [vmem:[#allocation14 + $0x5a4] ss:$48 sps:$4 sm:$0xff]   ;;  %v12988_v61 = vld [vmem:[#allocation14 + $0x5a0] ss:$48 sps:$4 sm:$0xff]  }
  0x75   :  { %155 = vadd.xlane.f32.xlu0 %v154_v45  ;;  %v12986_v60 = vld [vmem:[#allocation14 + $0xba4] ss:$48 sps:$4 sm:$0xff]   ;;  %v12989_v62 = vld [vmem:[#allocation14 + $0xba0] ss:$48 sps:$4 sm:$0xff]  }
  0x76   :  { %4879 = vmatpush1.bf16.msra.mxu0 %v12964_v44  ;;  %v12990_v63 = vld [vmem:[#allocation14 + $0x544] ss:$48 sps:$4 sm:$0xff]   ;;  %v12994_v1 = vld [vmem:[#allocation14 + $0x540] ss:$48 sps:$4 sm:$0xff]  }
  0x77   :  { %4920 = vmatpush1.bf16.msra.mxu1 %v12965_v46  ;;  %4880 = vmatprep.subr.bf16.mxu0 %v12966_v47  ;;  %v12992_v0 = vld [vmem:[#allocation14 + $0xb44] ss:$48 sps:$4 sm:$0xff]   ;;  %v12995_v2 = vld [vmem:[#allocation14 + $0xb40] ss:$48 sps:$4 sm:$0xff]  }
  0x78   :  { %4921 = vmatprep.subr.bf16.mxu1 %v12968_v48  ;;  %v12996_v7 = vld [vmem:[#allocation14 + $0x4e4] ss:$48 sps:$4 sm:$0xff]   ;;  %v13000_v11 = vld [vmem:[#allocation14 + $0x4e0] ss:$48 sps:$4 sm:$0xff]   ;;  %v170_v48 = vunpack.c.l.bf16 %v169_v20 }
  0x79   :  { %v12998_v8 = vld [vmem:[#allocation14 + $0xae4] ss:$48 sps:$4 sm:$0xff]   ;;  %v13001_v12 = vld [vmem:[#allocation14 + $0xae0] ss:$48 sps:$4 sm:$0xff]  }
  0x7a   :  { %4881 = vmatpush1.bf16.msra.mxu0 %v12970_v49  ;;  %v13002_v14 = vld [vmem:[#allocation14 + $0x484] ss:$48 sps:$4 sm:$0xff]   ;;  %v13006_v16 = vld [vmem:[#allocation14 + $0x480] ss:$48 sps:$4 sm:$0xff]   ;;  %v180_v49 = vsub.s32 2, %v14440_v13 }
  0x7b   :  { %4922 = vmatpush1.bf16.msra.mxu1 %v12971_v50  ;;  %4882 = vmatprep.subr.bf16.mxu0 %v12972_v51  ;;  %v13004_v15 = vld [vmem:[#allocation14 + $0xa84] ss:$48 sps:$4 sm:$0xff]   ;;  %v13007_v18 = vld [vmem:[#allocation14 + $0xa80] ss:$48 sps:$4 sm:$0xff]   ;;  %v188_v50 = vsub.s32 6, %v14440_v13 }
  0x7c   :  { %4923 = vmatprep.subr.bf16.mxu1 %v12974_v52  ;;  %v13008_v19 = vld [vmem:[#allocation14 + $0x424] ss:$48 sps:$4 sm:$0xff]   ;;  %v13012_v25 = vld [vmem:[#allocation14 + $0x420] ss:$48 sps:$4 sm:$0xff]   ;;  %v181_v51 = vrot.slane %v170_v48, %v180_v49 }
  0x7d   :  { %v13010_v21 = vld [vmem:[#allocation14 + $0xa24] ss:$48 sps:$4 sm:$0xff]   ;;  %v13013_v26 = vld [vmem:[#allocation14 + $0xa20] ss:$48 sps:$4 sm:$0xff]   ;;  %v189_v52 = vrot.slane %v170_v48, %v188_v50 }
  0x7e   :  { %4883 = vmatpush1.bf16.msra.mxu0 %v12976_v53  ;;  %v13014_v27 = vld [vmem:[#allocation14 + $0x3c4] ss:$48 sps:$4 sm:$0xff]   ;;  %v13018_v32 = vld [vmem:[#allocation14 + $0x3c0] ss:$48 sps:$4 sm:$0xff]   ;;  %v177_v53 = vrot.slane %v170_v48, %v14449_v30 }
  0x7f   :  { %4924 = vmatpush1.bf16.msra.mxu1 %v12977_v54  ;;  %4884 = vmatprep.subr.bf16.mxu0 %v12978_v55  ;;  %v13016_v31 = vld [vmem:[#allocation14 + $0x9c4] ss:$48 sps:$4 sm:$0xff]   ;;  %v13019_v34 = vld [vmem:[#allocation14 + $0x9c0] ss:$48 sps:$4 sm:$0xff]   ;;  %v185_v54 = vrot.slane %v170_v48, %v184_v22  ;;  %v197_v55 = vrot.slane %v14443_v24, %v180_v49 }
  0x80   :  { %4925 = vmatprep.subr.bf16.mxu1 %v12980_v56  ;;  %v13020_v35 = vld [vmem:[#allocation14 + $0x364] ss:$48 sps:$4 sm:$0xff]   ;;  %v13024_v37 = vld [vmem:[#allocation14 + $0x360] ss:$48 sps:$4 sm:$0xff]   ;;  %v205_v56 = vrot.slane %v14443_v24, %v188_v50 }
  0x81   :  { %v13022_v36 = vld [vmem:[#allocation14 + $0x964] ss:$48 sps:$4 sm:$0xff]   ;;  %v13025_v38 = vld [vmem:[#allocation14 + $0x960] ss:$48 sps:$4 sm:$0xff]  }
  0x82   :  { %4885 = vmatpush1.bf16.msra.mxu0 %v12982_v57  ;;  %v13026_v39 = vld [vmem:[#allocation14 + $0x304] ss:$48 sps:$4 sm:$0xff]   ;;  %v13030_v41 = vld [vmem:[#allocation14 + $0x300] ss:$48 sps:$4 sm:$0xff]   ;;  %v193_v57 = vrot.slane %v14443_v24, %v14449_v30 }
  0x83   :  { %4926 = vmatpush1.bf16.msra.mxu1 %v12983_v58  ;;  %4886 = vmatprep.subr.bf16.mxu0 %v12984_v59  ;;  %v13028_v40 = vld [vmem:[#allocation14 + $0x904] ss:$48 sps:$4 sm:$0xff]   ;;  %v13031_v42 = vld [vmem:[#allocation14 + $0x900] ss:$48 sps:$4 sm:$0xff]   ;;  %v221_v58 = vrot.slane %v181_v51, %v14449_v30  ;;  %v229_v59 = vrot.slane %v189_v52, %v14449_v30 }
  0x84   :  { %4927 = vmatprep.subr.bf16.mxu1 %v12986_v60  ;;  %v13034_v43 = vld [vmem:[#allocation14 + $0xea4] ss:$48 sps:$4 sm:$0xff]   ;;  %v217_v60 = vrot.slane %v177_v53, %v14449_v30  ;;  %v13032_v20 = vld [vmem:[#allocation14 + $0xea0] ss:$48 sps:$4 sm:$0xff]  }
  0x85   :  { %v13037_v44 = vld [vmem:[#allocation14 + $0x14a4] ss:$48 sps:$4 sm:$0xff]   ;;  %v13068_v50 = vld [vmem:[#allocation14 + $0xc60] ss:$48 sps:$4 sm:$0xff]  }
  0x86   :  { %4887 = vmatpush2.bf16.msra.mxu0 %v12988_v61  ;;  %v225_v61 = vrot.slane %v185_v54, %v14449_v30  ;;  %v13070_v48 = vld [vmem:[#allocation14 + $0xc64] ss:$48 sps:$4 sm:$0xff]   ;;  %v13071_v51 = vld [vmem:[#allocation14 + $0x1260] ss:$48 sps:$4 sm:$0xff]  }
  0x87   :  { %4928 = vmatpush2.bf16.msra.mxu1 %v12989_v62  ;;  %4888 = vmatprep.subr.bf16.mxu0 %v12990_v63  ;;  %v237_v63 = vrot.slane %v197_v55, %v14449_v30  ;;  %v13073_v49 = vld [vmem:[#allocation14 + $0x1264] ss:$48 sps:$4 sm:$0xff]   ;;  %v13074_v54 = vld [vmem:[#allocation14 + $0xc00] ss:$48 sps:$4 sm:$0xff]  }
  0x88   :  { %4929 = vmatprep.subr.bf16.mxu1 %v12992_v0  ;;  %v245_v0 = vrot.slane %v205_v56, %v14449_v30  ;;  %v13076_v52 = vld [vmem:[#allocation14 + $0xc04] ss:$48 sps:$4 sm:$0xff]   ;;  %v13077_v55 = vld [vmem:[#allocation14 + $0x1200] ss:$48 sps:$4 sm:$0xff]  }
  0x89   :  { %v13079_v53 = vld [vmem:[#allocation14 + $0x1204] ss:$48 sps:$4 sm:$0xff]  }
  0x8a   :  { %4889 = vmatpush2.bf16.msra.mxu0 %v12994_v1  ;;  %v233_v1 = vrot.slane %v193_v57, %v14449_v30  ;;  %v13082_v56 = vld [vmem:[#allocation14 + $0x11a4] ss:$48 sps:$4 sm:$0xff]  }
  0x8b   :  { %4930 = vmatpush2.bf16.msra.mxu1 %v12995_v2  ;;  %4890 = vmatprep.subr.bf16.mxu0 %v12996_v7  ;;  %v13085_v57 = vld [vmem:[#allocation14 + $0x17a4] ss:$48 sps:$4 sm:$0xff]  }
  0x8c   :  { %4931 = vmatprep.subr.bf16.mxu1 %v12998_v8 }
  0x8e   :  { %4891 = vmatpush2.bf16.msra.mxu0 %v13000_v11 }
  0x8f   :  { %4932 = vmatpush2.bf16.msra.mxu1 %v13001_v12  ;;  %4892 = vmatprep.subr.bf16.mxu0 %v13002_v14 }
  0x90   :  { %4933 = vmatprep.subr.bf16.mxu1 %v13004_v15 }
  0x92   :  { %4893 = vmatpush2.bf16.msra.mxu0 %v13006_v16 }
  0x93   :  { %4934 = vmatpush2.bf16.msra.mxu1 %v13007_v18  ;;  %4894 = vmatprep.subr.bf16.mxu0 %v13008_v19 }
  0x94   :  { %4935 = vmatprep.subr.bf16.mxu1 %v13010_v21  ;;  %v13035_v21 = vld [vmem:[#allocation14 + $0x14a0] ss:$48 sps:$4 sm:$0xff]  }
  0x96   :  { %4895 = vmatpush2.bf16.msra.mxu0 %v13012_v25 }
  0x97   :  { %4936 = vmatpush2.bf16.msra.mxu1 %v13013_v26  ;;  %4896 = vmatprep.subr.bf16.mxu0 %v13014_v27  ;;  %v13038_v26 = vld [vmem:[#allocation14 + $0xe40] ss:$48 sps:$4 sm:$0xff]  }
  0x98   :  { %4937 = vmatprep.subr.bf16.mxu1 %v13016_v31  ;;  %v13041_v27 = vld [vmem:[#allocation14 + $0x1440] ss:$48 sps:$4 sm:$0xff]   ;;  %v13043_v31 = vld [vmem:[#allocation14 + $0x1444] ss:$48 sps:$4 sm:$0xff]  }
  0x9a   :  { %4897 = vmatpush2.bf16.msra.mxu0 %v13018_v32  ;;  %v13046_v32 = vld [vmem:[#allocation14 + $0xde4] ss:$48 sps:$4 sm:$0xff]  }
  0x9b   :  { %4938 = vmatpush2.bf16.msra.mxu1 %v13019_v34  ;;  %4898 = vmatprep.subr.bf16.mxu0 %v13020_v35  ;;  %v13044_v34 = vld [vmem:[#allocation14 + $0xde0] ss:$48 sps:$4 sm:$0xff]  }
  0x9c   :  { %4939 = vmatprep.subr.bf16.mxu1 %v13022_v36  ;;  %v13047_v35 = vld [vmem:[#allocation14 + $0x13e0] ss:$48 sps:$4 sm:$0xff]   ;;  %v13052_v36 = vld [vmem:[#allocation14 + $0xd84] ss:$48 sps:$4 sm:$0xff]  }
  0x9e   :  { %4899 = vmatpush2.bf16.msra.mxu0 %v13024_v37  ;;  %v13055_v37 = vld [vmem:[#allocation14 + $0x1384] ss:$48 sps:$4 sm:$0xff]  }
  0x9f   :  { %4940 = vmatpush2.bf16.msra.mxu1 %v13025_v38  ;;  %4900 = vmatprep.subr.bf16.mxu0 %v13026_v39  ;;  %v13050_v38 = vld [vmem:[#allocation14 + $0xd80] ss:$48 sps:$4 sm:$0xff]  }
  0xa0   :  { %4941 = vmatprep.subr.bf16.mxu1 %v13028_v40  ;;  %v13053_v39 = vld [vmem:[#allocation14 + $0x1380] ss:$48 sps:$4 sm:$0xff]   ;;  %v13058_v40 = vld [vmem:[#allocation14 + $0xd24] ss:$48 sps:$4 sm:$0xff]  }
  0xa2   :  { %4901 = vmatpush2.bf16.msra.mxu0 %v13030_v41  ;;  %v13061_v41 = vld [vmem:[#allocation14 + $0x1324] ss:$48 sps:$4 sm:$0xff]  }
  0xa3   :  { %4942 = vmatpush2.bf16.msra.mxu1 %v13031_v42  ;;  %4952 = vmatprep.subr.bf16.mxu0 %v13034_v43  ;;  %v13056_v42 = vld [vmem:[#allocation14 + $0xd20] ss:$48 sps:$4 sm:$0xff]  }
  0xa4   :  { %4993 = vmatprep.subr.bf16.mxu1 %v13037_v44  ;;  %v13059_v43 = vld [vmem:[#allocation14 + $0x1320] ss:$48 sps:$4 sm:$0xff]   ;;  %v13064_v44 = vld [vmem:[#allocation14 + $0xcc4] ss:$48 sps:$4 sm:$0xff]  }
  0xfe   :  { %v156_v45 = vpop.xlane.xlu0 %155 }
  0xff   :  { %v158_v46 = vmul.f32 0.0009765625, %v156_v45  ;;  %v13067_v45 = vld [vmem:[#allocation14 + $0x12c4] ss:$48 sps:$4 sm:$0xff]  }
 0x101   :  { %v159_v47 = vadd.f32 1e-05, %v158_v46  ;;  %v13062_v46 = vld [vmem:[#allocation14 + $0xcc0] ss:$48 sps:$4 sm:$0xff]  }
 0x103   :  { %14096 = vrsqrt.f32 %v159_v47  ;;  %v13065_v47 = vld [vmem:[#allocation14 + $0x12c0] ss:$48 sps:$4 sm:$0xff]  }
 0x110   :  { %v14097_v62 = vpop.eup %14096 }
 0x111   :  { %v162_v2 = vmul.f32 %v14097_v62, %v14409_v4  ;;  %v164_v7 = vmul.f32 %v14097_v62, %v14413_v6  ;;  %v161_v8 = vmul.f32 %v14097_v62, %v14407_v3  ;;  %v163_v11 = vmul.f32 %v14097_v62, %v14411_v5 }
 0x112   :  { %v166_v12 = vmul.f32 %v14097_v62, %v14423_v17  ;;  %v168_v14 = vmul.f32 %v14097_v62, %v14431_v29  ;;  %v165_v15 = vmul.f32 %v14097_v62, %v14415_v9  ;;  %v167_v16 = vmul.f32 %v14097_v62, %v14427_v23  ;;  %v13040_v29 = vld [vmem:[#allocation14 + $0xe44] ss:$48 sps:$4 sm:$0xff]   ;;  %v13086_v62 = vld [vmem:[#allocation14 + $0x1140] ss:$48 sps:$4 sm:$0xff]  }
 0x113   :  { %v247_v18 = vmul.f32 %v221_v58, %v162_v2  ;;  %v249_v19 = vmul.f32 %v229_v59, %v164_v7  ;;  %v246_v22 = vmul.f32 %v217_v60, %v161_v8  ;;  %v248_v4 = vmul.f32 %v225_v61, %v163_v11  ;;  %v13080_v58 = vld [vmem:[#allocation14 + $0x11a0] ss:$48 sps:$4 sm:$0xff]   ;;  %v13088_v60 = vld [vmem:[#allocation14 + $0x1144] ss:$48 sps:$4 sm:$0xff]  }
 0x114   :  { %v251_v24 = vmul.f32 %v237_v63, %v166_v12  ;;  %v253_v6 = vmul.f32 %v245_v0, %v168_v14  ;;  %v14475_v25 = vmul.f32 %v233_v1, %v165_v15  ;;  %v14480_v3 = vmul.f32 %v241_v33, %v167_v16  ;;  %v13049_v33 = vld [vmem:[#allocation14 + $0x13e4] ss:$48 sps:$4 sm:$0xff]   ;;  %v13083_v59 = vld [vmem:[#allocation14 + $0x17a0] ss:$48 sps:$4 sm:$0xff]  }
 0x115   :  { %v14482_v5 = vpack.c.bf16 %v247_v18, %v247_v18  ;;  %v14484_v9 = vpack.c.bf16 %v249_v19, %v249_v19  ;;  %v14486_v17 = vpack.c.bf16 %v246_v22, %v246_v22  ;;  %v14488_v23 = vpack.c.bf16 %v248_v4, %v248_v4  ;;  %v13091_v61 = vld [vmem:[#allocation14 + $0x1744] ss:$48 sps:$4 sm:$0xff]   ;;  %v13089_v63 = vld [vmem:[#allocation14 + $0x1740] ss:$48 sps:$4 sm:$0xff]  }
 0x116   :  { %v14494_v28 = vpack.c.bf16 %v251_v24, %v251_v24  ;;  %v14496_v30 = vpack.c.bf16 %v253_v6, %v253_v6  ;;  %v13094_v0 = vld [vmem:[#allocation14 + $0x10e4] ss:$48 sps:$4 sm:$0xff]   ;;  %v13092_v2 = vld [vmem:[#allocation14 + $0x10e0] ss:$48 sps:$4 sm:$0xff]  }
 0x117   :  { %4902 = vmatprep.mubr.bf16.mxu0 %v14482_v5  ;;  %4943 = vmatprep.mubr.bf16.mxu1 %v14484_v9  ;;  %v13097_v1 = vld [vmem:[#allocation14 + $0x16e4] ss:$48 sps:$4 sm:$0xff]   ;;  %v13095_v7 = vld [vmem:[#allocation14 + $0x16e0] ss:$48 sps:$4 sm:$0xff]  }
 0x118   :  { %4903 = vmatmul.mubr.bf16.vlgmr.msra.gmra.mxu0 %v14486_v17  ;;  %4944 = vmatmul.mubr.bf16.vlgmr.msra.gmra.mxu1 %v14488_v23  ;;  %v13100_v8 = vld [vmem:[#allocation14 + $0x1084] ss:$48 sps:$4 sm:$0xff]   ;;  %v13098_v12 = vld [vmem:[#allocation14 + $0x1080] ss:$48 sps:$4 sm:$0xff]  }
 0x119   :  { %4953 = vmatpush1.bf16.msra.mxu0 %v13032_v20  ;;  %4994 = vmatpush1.bf16.msra.mxu1 %v13035_v21  ;;  %v13103_v11 = vld [vmem:[#allocation14 + $0x1684] ss:$48 sps:$4 sm:$0xff]   ;;  %v13101_v14 = vld [vmem:[#allocation14 + $0x1680] ss:$48 sps:$4 sm:$0xff]  }
 0x11a   :  { %4984 = vmatprep.mubr.bf16.mxu0 %v14494_v28  ;;  %5025 = vmatprep.mubr.bf16.mxu1 %v14496_v30  ;;  %v13106_v15 = vld [vmem:[#allocation14 + $0x1024] ss:$48 sps:$4 sm:$0xff]   ;;  %v13104_v18 = vld [vmem:[#allocation14 + $0x1020] ss:$48 sps:$4 sm:$0xff]  }
 0x11b   :  { %4954 = vmatprep.subr.bf16.mxu0 %v13040_v29  ;;  %4995 = vmatprep.subr.bf16.mxu1 %v13043_v31  ;;  %v13109_v16 = vld [vmem:[#allocation14 + $0x1624] ss:$48 sps:$4 sm:$0xff]   ;;  %v13107_v19 = vld [vmem:[#allocation14 + $0x1620] ss:$48 sps:$4 sm:$0xff]  }
 0x11c   :  { %v13112_v20 = vld [vmem:[#allocation14 + $0xfc4] ss:$48 sps:$4 sm:$0xff]   ;;  %v13110_v22 = vld [vmem:[#allocation14 + $0xfc0] ss:$48 sps:$4 sm:$0xff]  }
 0x11d   :  { %4955 = vmatpush1.bf16.msra.mxu0 %v13038_v26  ;;  %4996 = vmatpush1.bf16.msra.mxu1 %v13041_v27  ;;  %v13115_v21 = vld [vmem:[#allocation14 + $0x15c4] ss:$48 sps:$4 sm:$0xff]   ;;  %v13113_v4 = vld [vmem:[#allocation14 + $0x15c0] ss:$48 sps:$4 sm:$0xff]  }
 0x11e   :  { %4956 = vmatprep.subr.bf16.mxu0 %v13046_v32  ;;  %4997 = vmatprep.subr.bf16.mxu1 %v13049_v33  ;;  %v13118_v24 = vld [vmem:[#allocation14 + $0xf64] ss:$48 sps:$4 sm:$0xff]   ;;  %v13116_v29 = vld [vmem:[#allocation14 + $0xf60] ss:$48 sps:$4 sm:$0xff]  }
 0x11f   :  { %v13121_v6 = vld [vmem:[#allocation14 + $0x1564] ss:$48 sps:$4 sm:$0xff]   ;;  %v13119_v26 = vld [vmem:[#allocation14 + $0x1560] ss:$48 sps:$4 sm:$0xff]  }
 0x120   :  { %v13124_v27 = vld [vmem:[#allocation14 + $0xf04] ss:$48 sps:$4 sm:$0xff]   ;;  %v13122_v32 = vld [vmem:[#allocation14 + $0xf00] ss:$48 sps:$4 sm:$0xff]  }
 0x121   :  { %4957 = vmatpush1.bf16.msra.mxu0 %v13044_v34  ;;  %4998 = vmatpush1.bf16.msra.mxu1 %v13047_v35  ;;  %v13127_v31 = vld [vmem:[#allocation14 + $0x1504] ss:$48 sps:$4 sm:$0xff]   ;;  %v13125_v33 = vld [vmem:[#allocation14 + $0x1500] ss:$48 sps:$4 sm:$0xff]   ;;  %v13130_v34 = vld [vmem:[#allocation14 + $0x2ac] ss:$48 sps:$4 sm:$0xff]  }
 0x122   :  { %4958 = vmatprep.subr.bf16.mxu0 %v13052_v36  ;;  %4999 = vmatprep.subr.bf16.mxu1 %v13055_v37  ;;  %v13133_v35 = vld [vmem:[#allocation14 + $0x8ac] ss:$48 sps:$4 sm:$0xff]   ;;  %v13128_v36 = vld [vmem:[#allocation14 + $0x2a8] ss:$48 sps:$4 sm:$0xff]  }
 0x123   :  { %v13131_v37 = vld [vmem:[#allocation14 + $0x8a8] ss:$48 sps:$4 sm:$0xff]  }
 0x125   :  { %4959 = vmatpush1.bf16.msra.mxu0 %v13050_v38  ;;  %5000 = vmatpush1.bf16.msra.mxu1 %v13053_v39  ;;  %v13136_v38 = vld [vmem:[#allocation14 + $0x24c] ss:$48 sps:$4 sm:$0xff]  }
 0x126   :  { %4960 = vmatprep.subr.bf16.mxu0 %v13058_v40  ;;  %5001 = vmatprep.subr.bf16.mxu1 %v13061_v41  ;;  %v13139_v39 = vld [vmem:[#allocation14 + $0x84c] ss:$48 sps:$4 sm:$0xff]   ;;  %v14502_v40 = vpack.c.bf16 %v14475_v25, %v14475_v25  ;;  %v14506_v41 = vpack.c.bf16 %v14480_v3, %v14480_v3  ;;  %v13140_v3 = vld [vmem:[#allocation14 + $0x1e8] ss:$48 sps:$4 sm:$0xff]  }
 0x127   :  { %v13145_v25 = vld [vmem:[#allocation14 + $0x7ec] ss:$48 sps:$4 sm:$0xff]  }
 0x129   :  { %4961 = vmatpush1.bf16.msra.mxu0 %v13056_v42  ;;  %5002 = vmatpush1.bf16.msra.mxu1 %v13059_v43  ;;  %v13134_v42 = vld [vmem:[#allocation14 + $0x248] ss:$48 sps:$4 sm:$0xff]  }
 0x12a   :  { %4962 = vmatprep.subr.bf16.mxu0 %v13064_v44  ;;  %5003 = vmatprep.subr.bf16.mxu1 %v13067_v45  ;;  %v13137_v43 = vld [vmem:[#allocation14 + $0x848] ss:$48 sps:$4 sm:$0xff]   ;;  %v13142_v44 = vld [vmem:[#allocation14 + $0x1ec] ss:$48 sps:$4 sm:$0xff]  }
 0x12b   :  { %v13143_v45 = vld [vmem:[#allocation14 + $0x7e8] ss:$48 sps:$4 sm:$0xff]  }
 0x12d   :  { %4963 = vmatpush1.bf16.msra.mxu0 %v13062_v46  ;;  %5004 = vmatpush1.bf16.msra.mxu1 %v13065_v47  ;;  %v13148_v46 = vld [vmem:[#allocation14 + $0x18c] ss:$48 sps:$4 sm:$0xff]   ;;  %v13146_v47 = vld [vmem:[#allocation14 + $0x188] ss:$48 sps:$4 sm:$0xff]  }
 0x12e   :  { %4964 = vmatprep.subr.bf16.mxu0 %v13070_v48  ;;  %5005 = vmatprep.subr.bf16.mxu1 %v13073_v49  ;;  %v13151_v48 = vld [vmem:[#allocation14 + $0x78c] ss:$48 sps:$4 sm:$0xff]   ;;  %v13149_v49 = vld [vmem:[#allocation14 + $0x788] ss:$48 sps:$4 sm:$0xff]  }
 0x131   :  { %4965 = vmatpush1.bf16.msra.mxu0 %v13068_v50  ;;  %5006 = vmatpush1.bf16.msra.mxu1 %v13071_v51  ;;  %v13154_v50 = vld [vmem:[#allocation14 + $0x12c] ss:$48 sps:$4 sm:$0xff]   ;;  %v13152_v51 = vld [vmem:[#allocation14 + $0x128] ss:$48 sps:$4 sm:$0xff]  }
 0x132   :  { %4966 = vmatprep.subr.bf16.mxu0 %v13076_v52  ;;  %5007 = vmatprep.subr.bf16.mxu1 %v13079_v53  ;;  %v13157_v52 = vld [vmem:[#allocation14 + $0x72c] ss:$48 sps:$4 sm:$0xff]   ;;  %v13155_v53 = vld [vmem:[#allocation14 + $0x728] ss:$48 sps:$4 sm:$0xff]  }
 0x135   :  { %4967 = vmatpush1.bf16.msra.mxu0 %v13074_v54  ;;  %5008 = vmatpush1.bf16.msra.mxu1 %v13077_v55  ;;  %v13160_v54 = vld [vmem:[#allocation14 + $0xcc] ss:$48 sps:$4 sm:$0xff]   ;;  %v13158_v55 = vld [vmem:[#allocation14 + $0xc8] ss:$48 sps:$4 sm:$0xff]  }
 0x136   :  { %4968 = vmatprep.subr.bf16.mxu0 %v13082_v56  ;;  %5009 = vmatprep.subr.bf16.mxu1 %v13085_v57  ;;  %v13163_v56 = vld [vmem:[#allocation14 + $0x6cc] ss:$48 sps:$4 sm:$0xff]   ;;  %v13161_v57 = vld [vmem:[#allocation14 + $0x6c8] ss:$48 sps:$4 sm:$0xff]  }
 0x139   :  { %4969 = vmatpush2.bf16.msra.mxu0 %v13080_v58  ;;  %5010 = vmatpush2.bf16.msra.mxu1 %v13083_v59  ;;  %v13166_v58 = vld [vmem:[#allocation14 + $0x6c] ss:$48 sps:$4 sm:$0xff]   ;;  %v13164_v59 = vld [vmem:[#allocation14 + $0x68] ss:$48 sps:$4 sm:$0xff]  }
 0x13a   :  { %4970 = vmatprep.subr.bf16.mxu0 %v13088_v60  ;;  %5011 = vmatprep.subr.bf16.mxu1 %v13091_v61  ;;  %v13169_v60 = vld [vmem:[#allocation14 + $0x66c] ss:$48 sps:$4 sm:$0xff]   ;;  %v13167_v61 = vld [vmem:[#allocation14 + $0x668] ss:$48 sps:$4 sm:$0xff]  }
 0x13d   :  { %4971 = vmatpush2.bf16.msra.mxu0 %v13086_v62  ;;  %5012 = vmatpush2.bf16.msra.mxu1 %v13089_v63  ;;  %v13172_v62 = vld [vmem:[#allocation14 + $0xc] ss:$48 sps:$4 sm:$0xff]   ;;  %v13170_v63 = vld [vmem:[#allocation14 + $0x8] ss:$48 sps:$4 sm:$0xff]  }
 0x13e   :  { %4972 = vmatprep.subr.bf16.mxu0 %v13094_v0  ;;  %5013 = vmatprep.subr.bf16.mxu1 %v13097_v1  ;;  %v13175_v0 = vld [vmem:[#allocation14 + $0x60c] ss:$48 sps:$4 sm:$0xff]   ;;  %v13173_v1 = vld [vmem:[#allocation14 + $0x608] ss:$48 sps:$4 sm:$0xff]  }
 0x141   :  { %4973 = vmatpush2.bf16.msra.mxu0 %v13092_v2  ;;  %5014 = vmatpush2.bf16.msra.mxu1 %v13095_v7  ;;  %v13178_v2 = vld [vmem:[#allocation14 + $0x5ac] ss:$48 sps:$4 sm:$0xff]   ;;  %v13176_v7 = vld [vmem:[#allocation14 + $0x5a8] ss:$48 sps:$4 sm:$0xff]  }
 0x142   :  { %4974 = vmatprep.subr.bf16.mxu0 %v13100_v8  ;;  %5015 = vmatprep.subr.bf16.mxu1 %v13103_v11  ;;  %v13181_v8 = vld [vmem:[#allocation14 + $0xbac] ss:$48 sps:$4 sm:$0xff]   ;;  %v13179_v11 = vld [vmem:[#allocation14 + $0xba8] ss:$48 sps:$4 sm:$0xff]  }
 0x145   :  { %4975 = vmatpush2.bf16.msra.mxu0 %v13098_v12  ;;  %5016 = vmatpush2.bf16.msra.mxu1 %v13101_v14  ;;  %v13184_v12 = vld [vmem:[#allocation14 + $0x54c] ss:$48 sps:$4 sm:$0xff]   ;;  %v13182_v14 = vld [vmem:[#allocation14 + $0x548] ss:$48 sps:$4 sm:$0xff]  }
 0x146   :  { %4976 = vmatprep.subr.bf16.mxu0 %v13106_v15  ;;  %5017 = vmatprep.subr.bf16.mxu1 %v13109_v16  ;;  %v13187_v15 = vld [vmem:[#allocation14 + $0xb4c] ss:$48 sps:$4 sm:$0xff]   ;;  %v13185_v16 = vld [vmem:[#allocation14 + $0xb48] ss:$48 sps:$4 sm:$0xff]  }
 0x149   :  { %4977 = vmatpush2.bf16.msra.mxu0 %v13104_v18  ;;  %5018 = vmatpush2.bf16.msra.mxu1 %v13107_v19  ;;  %v13190_v18 = vld [vmem:[#allocation14 + $0x4ec] ss:$48 sps:$4 sm:$0xff]   ;;  %v13188_v19 = vld [vmem:[#allocation14 + $0x4e8] ss:$48 sps:$4 sm:$0xff]  }
 0x14a   :  { %4978 = vmatprep.subr.bf16.mxu0 %v13112_v20  ;;  %5019 = vmatprep.subr.bf16.mxu1 %v13115_v21  ;;  %v13193_v20 = vld [vmem:[#allocation14 + $0xaec] ss:$48 sps:$4 sm:$0xff]   ;;  %v13191_v21 = vld [vmem:[#allocation14 + $0xae8] ss:$48 sps:$4 sm:$0xff]  }
 0x14d   :  { %4979 = vmatpush2.bf16.msra.mxu0 %v13110_v22  ;;  %5020 = vmatpush2.bf16.msra.mxu1 %v13113_v4  ;;  %v13196_v22 = vld [vmem:[#allocation14 + $0x48c] ss:$48 sps:$4 sm:$0xff]   ;;  %v13194_v4 = vld [vmem:[#allocation14 + $0x488] ss:$48 sps:$4 sm:$0xff]  }
 0x14e   :  { %4980 = vmatprep.subr.bf16.mxu0 %v13118_v24  ;;  %5021 = vmatprep.subr.bf16.mxu1 %v13121_v6  ;;  %v13199_v24 = vld [vmem:[#allocation14 + $0xa8c] ss:$48 sps:$4 sm:$0xff]   ;;  %v13197_v6 = vld [vmem:[#allocation14 + $0xa88] ss:$48 sps:$4 sm:$0xff]  }
 0x151   :  { %4981 = vmatpush2.bf16.msra.mxu0 %v13116_v29  ;;  %5022 = vmatpush2.bf16.msra.mxu1 %v13119_v26  ;;  %v13202_v29 = vld [vmem:[#allocation14 + $0x42c] ss:$48 sps:$4 sm:$0xff]   ;;  %v13200_v26 = vld [vmem:[#allocation14 + $0x428] ss:$48 sps:$4 sm:$0xff]  }
 0x152   :  { %4982 = vmatprep.subr.bf16.mxu0 %v13124_v27  ;;  %5023 = vmatprep.subr.bf16.mxu1 %v13127_v31  ;;  %v13205_v27 = vld [vmem:[#allocation14 + $0xa2c] ss:$48 sps:$4 sm:$0xff]   ;;  %v13203_v31 = vld [vmem:[#allocation14 + $0xa28] ss:$48 sps:$4 sm:$0xff]  }
 0x155   :  { %4983 = vmatpush2.bf16.msra.mxu0 %v13122_v32  ;;  %5024 = vmatpush2.bf16.msra.mxu1 %v13125_v33  ;;  %v13208_v32 = vld [vmem:[#allocation14 + $0x3cc] ss:$48 sps:$4 sm:$0xff]   ;;  %v13206_v33 = vld [vmem:[#allocation14 + $0x3c8] ss:$48 sps:$4 sm:$0xff]  }
 0x156   :  { %5034 = vmatprep.subr.bf16.mxu0 %v13130_v34  ;;  %5075 = vmatprep.subr.bf16.mxu1 %v13133_v35  ;;  %v13211_v34 = vld [vmem:[#allocation14 + $0x9cc] ss:$48 sps:$4 sm:$0xff]   ;;  %v13209_v35 = vld [vmem:[#allocation14 + $0x9c8] ss:$48 sps:$4 sm:$0xff]  }
 0x158   :  { %4985 = vmatmul.mubr.bf16.vlgmr.msra.gmra.mxu0 %v14502_v40  ;;  %5026 = vmatmul.mubr.bf16.vlgmr.msra.gmra.mxu1 %v14506_v41 }
 0x159   :  { %5035 = vmatpush1.bf16.msra.mxu0 %v13128_v36  ;;  %5066 = vmatprep.mubr.bf16.mxu0 %v14482_v5  ;;  %v13214_v36 = vld [vmem:[#allocation14 + $0x36c] ss:$48 sps:$4 sm:$0xff]  }
 0x15a   :  { %5076 = vmatpush1.bf16.msra.mxu1 %v13131_v37  ;;  %5107 = vmatprep.mubr.bf16.mxu1 %v14484_v9  ;;  %v13212_v37 = vld [vmem:[#allocation14 + $0x368] ss:$48 sps:$4 sm:$0xff]  }
 0x15b   :  { %5036 = vmatprep.subr.bf16.mxu0 %v13136_v38  ;;  %5077 = vmatprep.subr.bf16.mxu1 %v13139_v39  ;;  %v13217_v38 = vld [vmem:[#allocation14 + $0x96c] ss:$48 sps:$4 sm:$0xff]   ;;  %v13215_v39 = vld [vmem:[#allocation14 + $0x968] ss:$48 sps:$4 sm:$0xff]  }
 0x15d   :  { %5037 = vmatpush1.bf16.msra.mxu0 %v13134_v42  ;;  %v13220_v42 = vld [vmem:[#allocation14 + $0x30c] ss:$48 sps:$4 sm:$0xff]  }
 0x15e   :  { %5078 = vmatpush1.bf16.msra.mxu1 %v13137_v43  ;;  %5038 = vmatprep.subr.bf16.mxu0 %v13142_v44  ;;  %v13218_v43 = vld [vmem:[#allocation14 + $0x308] ss:$48 sps:$4 sm:$0xff]   ;;  %v13223_v44 = vld [vmem:[#allocation14 + $0x90c] ss:$48 sps:$4 sm:$0xff]  }
 0x15f   :  { %5079 = vmatprep.subr.bf16.mxu1 %v13145_v25  ;;  %v13221_v25 = vld [vmem:[#allocation14 + $0x908] ss:$48 sps:$4 sm:$0xff]  }
 0x161   :  { %5039 = vmatpush1.bf16.msra.mxu0 %v13140_v3  ;;  %v13226_v3 = vld [vmem:[#allocation14 + $0xeac] ss:$48 sps:$4 sm:$0xff]  }
 0x162   :  { %5080 = vmatpush1.bf16.msra.mxu1 %v13143_v45  ;;  %5040 = vmatprep.subr.bf16.mxu0 %v13148_v46  ;;  %v13229_v45 = vld [vmem:[#allocation14 + $0x14ac] ss:$48 sps:$4 sm:$0xff]   ;;  %v13224_v46 = vld [vmem:[#allocation14 + $0xea8] ss:$48 sps:$4 sm:$0xff]  }
 0x163   :  { %5081 = vmatprep.subr.bf16.mxu1 %v13151_v48  ;;  %v13232_v48 = vld [vmem:[#allocation14 + $0xe4c] ss:$48 sps:$4 sm:$0xff]  }
 0x165   :  { %5041 = vmatpush1.bf16.msra.mxu0 %v13146_v47  ;;  %v13227_v47 = vld [vmem:[#allocation14 + $0x14a8] ss:$48 sps:$4 sm:$0xff]  }
 0x166   :  { %5082 = vmatpush1.bf16.msra.mxu1 %v13149_v49  ;;  %5042 = vmatprep.subr.bf16.mxu0 %v13154_v50  ;;  %v13230_v49 = vld [vmem:[#allocation14 + $0xe48] ss:$48 sps:$4 sm:$0xff]  }
 0x167   :  { %5083 = vmatprep.subr.bf16.mxu1 %v13157_v52  ;;  %v13233_v50 = vld [vmem:[#allocation14 + $0x1448] ss:$48 sps:$4 sm:$0xff]   ;;  %v13238_v52 = vld [vmem:[#allocation14 + $0xdec] ss:$48 sps:$4 sm:$0xff]  }
 0x169   :  { %5043 = vmatpush1.bf16.msra.mxu0 %v13152_v51  ;;  %v13235_v51 = vld [vmem:[#allocation14 + $0x144c] ss:$48 sps:$4 sm:$0xff]  }
 0x16a   :  { %5084 = vmatpush1.bf16.msra.mxu1 %v13155_v53  ;;  %5044 = vmatprep.subr.bf16.mxu0 %v13160_v54  ;;  %v13241_v53 = vld [vmem:[#allocation14 + $0x13ec] ss:$48 sps:$4 sm:$0xff]   ;;  %v13236_v54 = vld [vmem:[#allocation14 + $0xde8] ss:$48 sps:$4 sm:$0xff]  }
 0x16b   :  { %5085 = vmatprep.subr.bf16.mxu1 %v13163_v56  ;;  %v13244_v56 = vld [vmem:[#allocation14 + $0xd8c] ss:$48 sps:$4 sm:$0xff]  }
 0x16d   :  { %5045 = vmatpush1.bf16.msra.mxu0 %v13158_v55  ;;  %v13239_v55 = vld [vmem:[#allocation14 + $0x13e8] ss:$48 sps:$4 sm:$0xff]  }
 0x16e   :  { %5086 = vmatpush1.bf16.msra.mxu1 %v13161_v57  ;;  %5046 = vmatprep.subr.bf16.mxu0 %v13166_v58  ;;  %v13247_v57 = vld [vmem:[#allocation14 + $0x138c] ss:$48 sps:$4 sm:$0xff]   ;;  %v13242_v58 = vld [vmem:[#allocation14 + $0xd88] ss:$48 sps:$4 sm:$0xff]  }
 0x16f   :  { %5087 = vmatprep.subr.bf16.mxu1 %v13169_v60  ;;  %v13250_v60 = vld [vmem:[#allocation14 + $0xd2c] ss:$48 sps:$4 sm:$0xff]  }
 0x171   :  { %5047 = vmatpush1.bf16.msra.mxu0 %v13164_v59  ;;  %v13245_v59 = vld [vmem:[#allocation14 + $0x1388] ss:$48 sps:$4 sm:$0xff]  }
 0x172   :  { %5088 = vmatpush1.bf16.msra.mxu1 %v13167_v61  ;;  %5048 = vmatprep.subr.bf16.mxu0 %v13172_v62  ;;  %v13253_v61 = vld [vmem:[#allocation14 + $0x132c] ss:$48 sps:$4 sm:$0xff]   ;;  %v13248_v62 = vld [vmem:[#allocation14 + $0xd28] ss:$48 sps:$4 sm:$0xff]  }
 0x173   :  { %5089 = vmatprep.subr.bf16.mxu1 %v13175_v0  ;;  %v13256_v0 = vld [vmem:[#allocation14 + $0xccc] ss:$48 sps:$4 sm:$0xff]  }
 0x175   :  { %5049 = vmatpush1.bf16.msra.mxu0 %v13170_v63  ;;  %v13251_v63 = vld [vmem:[#allocation14 + $0x1328] ss:$48 sps:$4 sm:$0xff]  }
 0x176   :  { %5090 = vmatpush1.bf16.msra.mxu1 %v13173_v1  ;;  %5050 = vmatprep.subr.bf16.mxu0 %v13178_v2  ;;  %v13254_v1 = vld [vmem:[#allocation14 + $0xcc8] ss:$48 sps:$4 sm:$0xff]   ;;  %v13259_v2 = vld [vmem:[#allocation14 + $0x12cc] ss:$48 sps:$4 sm:$0xff]  }
 0x177   :  { %5091 = vmatprep.subr.bf16.mxu1 %v13181_v8  ;;  %v13262_v8 = vld [vmem:[#allocation14 + $0xc6c] ss:$48 sps:$4 sm:$0xff]  }
 0x179   :  { %5051 = vmatpush2.bf16.msra.mxu0 %v13176_v7  ;;  %v13257_v7 = vld [vmem:[#allocation14 + $0x12c8] ss:$48 sps:$4 sm:$0xff]  }
 0x17a   :  { %5092 = vmatpush2.bf16.msra.mxu1 %v13179_v11  ;;  %5052 = vmatprep.subr.bf16.mxu0 %v13184_v12  ;;  %v13260_v11 = vld [vmem:[#allocation14 + $0xc68] ss:$48 sps:$4 sm:$0xff]   ;;  %v13265_v12 = vld [vmem:[#allocation14 + $0x126c] ss:$48 sps:$4 sm:$0xff]  }
 0x17b   :  { %5093 = vmatprep.subr.bf16.mxu1 %v13187_v15  ;;  %v13268_v15 = vld [vmem:[#allocation14 + $0xc0c] ss:$48 sps:$4 sm:$0xff]  }
 0x17d   :  { %5053 = vmatpush2.bf16.msra.mxu0 %v13182_v14  ;;  %v13263_v14 = vld [vmem:[#allocation14 + $0x1268] ss:$48 sps:$4 sm:$0xff]  }
 0x17e   :  { %5094 = vmatpush2.bf16.msra.mxu1 %v13185_v16  ;;  %5054 = vmatprep.subr.bf16.mxu0 %v13190_v18  ;;  %v13266_v16 = vld [vmem:[#allocation14 + $0xc08] ss:$48 sps:$4 sm:$0xff]   ;;  %v13271_v18 = vld [vmem:[#allocation14 + $0x120c] ss:$48 sps:$4 sm:$0xff]  }
 0x17f   :  { %5095 = vmatprep.subr.bf16.mxu1 %v13193_v20  ;;  %v13274_v20 = vld [vmem:[#allocation14 + $0x11ac] ss:$48 sps:$4 sm:$0xff]  }
 0x181   :  { %5055 = vmatpush2.bf16.msra.mxu0 %v13188_v19  ;;  %v13269_v19 = vld [vmem:[#allocation14 + $0x1208] ss:$48 sps:$4 sm:$0xff]  }
 0x182   :  { %5096 = vmatpush2.bf16.msra.mxu1 %v13191_v21  ;;  %5056 = vmatprep.subr.bf16.mxu0 %v13196_v22  ;;  %v13272_v21 = vld [vmem:[#allocation14 + $0x11a8] ss:$48 sps:$4 sm:$0xff]   ;;  %v13277_v22 = vld [vmem:[#allocation14 + $0x17ac] ss:$48 sps:$4 sm:$0xff]  }
 0x183   :  { %5097 = vmatprep.subr.bf16.mxu1 %v13199_v24  ;;  %v13280_v24 = vld [vmem:[#allocation14 + $0x114c] ss:$48 sps:$4 sm:$0xff]  }
 0x185   :  { %5057 = vmatpush2.bf16.msra.mxu0 %v13194_v4  ;;  %v13275_v4 = vld [vmem:[#allocation14 + $0x17a8] ss:$48 sps:$4 sm:$0xff]  }
 0x186   :  { %5098 = vmatpush2.bf16.msra.mxu1 %v13197_v6  ;;  %5058 = vmatprep.subr.bf16.mxu0 %v13202_v29  ;;  %v13278_v6 = vld [vmem:[#allocation14 + $0x1148] ss:$48 sps:$4 sm:$0xff]   ;;  %v13283_v29 = vld [vmem:[#allocation14 + $0x174c] ss:$48 sps:$4 sm:$0xff]  }
 0x187   :  { %5099 = vmatprep.subr.bf16.mxu1 %v13205_v27  ;;  %v13286_v27 = vld [vmem:[#allocation14 + $0x10ec] ss:$48 sps:$4 sm:$0xff]  }
 0x189   :  { %5059 = vmatpush2.bf16.msra.mxu0 %v13200_v26  ;;  %v13281_v26 = vld [vmem:[#allocation14 + $0x1748] ss:$48 sps:$4 sm:$0xff]  }
 0x18a   :  { %5100 = vmatpush2.bf16.msra.mxu1 %v13203_v31  ;;  %5060 = vmatprep.subr.bf16.mxu0 %v13208_v32  ;;  %v13284_v31 = vld [vmem:[#allocation14 + $0x10e8] ss:$48 sps:$4 sm:$0xff]   ;;  %v13289_v32 = vld [vmem:[#allocation14 + $0x16ec] ss:$48 sps:$4 sm:$0xff]  }
 0x18b   :  { %5101 = vmatprep.subr.bf16.mxu1 %v13211_v34  ;;  %v13292_v34 = vld [vmem:[#allocation14 + $0x108c] ss:$48 sps:$4 sm:$0xff]  }
 0x18d   :  { %5061 = vmatpush2.bf16.msra.mxu0 %v13206_v33  ;;  %v13287_v33 = vld [vmem:[#allocation14 + $0x16e8] ss:$48 sps:$4 sm:$0xff]  }
 0x18e   :  { %5102 = vmatpush2.bf16.msra.mxu1 %v13209_v35  ;;  %5062 = vmatprep.subr.bf16.mxu0 %v13214_v36  ;;  %v13290_v35 = vld [vmem:[#allocation14 + $0x1088] ss:$48 sps:$4 sm:$0xff]   ;;  %v13295_v36 = vld [vmem:[#allocation14 + $0x168c] ss:$48 sps:$4 sm:$0xff]  }
 0x18f   :  { %5103 = vmatprep.subr.bf16.mxu1 %v13217_v38  ;;  %v13298_v38 = vld [vmem:[#allocation14 + $0x102c] ss:$48 sps:$4 sm:$0xff]  }
 0x191   :  { %5063 = vmatpush2.bf16.msra.mxu0 %v13212_v37  ;;  %v13293_v37 = vld [vmem:[#allocation14 + $0x1688] ss:$48 sps:$4 sm:$0xff]  }
 0x192   :  { %5104 = vmatpush2.bf16.msra.mxu1 %v13215_v39  ;;  %5064 = vmatprep.subr.bf16.mxu0 %v13220_v42  ;;  %v13296_v39 = vld [vmem:[#allocation14 + $0x1028] ss:$48 sps:$4 sm:$0xff]   ;;  %v13301_v42 = vld [vmem:[#allocation14 + $0x162c] ss:$48 sps:$4 sm:$0xff]  }
 0x193   :  { %5105 = vmatprep.subr.bf16.mxu1 %v13223_v44  ;;  %v13304_v44 = vld [vmem:[#allocation14 + $0xfcc] ss:$48 sps:$4 sm:$0xff]  }
 0x195   :  { %5065 = vmatpush2.bf16.msra.mxu0 %v13218_v43  ;;  %v13299_v43 = vld [vmem:[#allocation14 + $0x1628] ss:$48 sps:$4 sm:$0xff]  }
 0x196   :  { %5106 = vmatpush2.bf16.msra.mxu1 %v13221_v25  ;;  %5116 = vmatprep.subr.bf16.mxu0 %v13226_v3  ;;  %v13302_v25 = vld [vmem:[#allocation14 + $0xfc8] ss:$48 sps:$4 sm:$0xff]   ;;  %v13307_v3 = vld [vmem:[#allocation14 + $0x15cc] ss:$48 sps:$4 sm:$0xff]  }
 0x197   :  { %5157 = vmatprep.subr.bf16.mxu1 %v13229_v45  ;;  %v13305_v45 = vld [vmem:[#allocation14 + $0x15c8] ss:$48 sps:$4 sm:$0xff]  }
 0x198   :  { %5067 = vmatmul.mubr.bf16.vlgmr.msra.gmra.mxu0 %v14486_v17 }
 0x199   :  { %5108 = vmatmul.mubr.bf16.vlgmr.msra.gmra.mxu1 %v14488_v23  ;;  %5117 = vmatpush1.bf16.msra.mxu0 %v13224_v46  ;;  %v13310_v46 = vld [vmem:[#allocation14 + $0xf6c] ss:$48 sps:$4 sm:$0xff]  }
 0x19a   :  { %5148 = vmatprep.mubr.bf16.mxu0 %v14494_v28  ;;  %5158 = vmatpush1.bf16.msra.mxu1 %v13227_v47  ;;  %v13308_v47 = vld [vmem:[#allocation14 + $0xf68] ss:$48 sps:$4 sm:$0xff]  }
 0x19b   :  { %5189 = vmatprep.mubr.bf16.mxu1 %v14496_v30  ;;  %5118 = vmatprep.subr.bf16.mxu0 %v13232_v48  ;;  %v13313_v48 = vld [vmem:[#allocation14 + $0x156c] ss:$48 sps:$4 sm:$0xff]  }
 0x19c   :  { %5159 = vmatprep.subr.bf16.mxu1 %v13235_v51  ;;  %v13314_v51 = vld [vmem:[#allocation14 + $0xf08] ss:$48 sps:$4 sm:$0xff]  }
 0x19d   :  { %5119 = vmatpush1.bf16.msra.mxu0 %v13230_v49  ;;  %v13311_v49 = vld [vmem:[#allocation14 + $0x1568] ss:$48 sps:$4 sm:$0xff]  }
 0x19e   :  { %5160 = vmatpush1.bf16.msra.mxu1 %v13233_v50  ;;  %5120 = vmatprep.subr.bf16.mxu0 %v13238_v52  ;;  %v13316_v50 = vld [vmem:[#allocation14 + $0xf0c] ss:$48 sps:$4 sm:$0xff]  }
 0x19f   :  { %5161 = vmatprep.subr.bf16.mxu1 %v13241_v53  ;;  %v13319_v52 = vld [vmem:[#allocation14 + $0x150c] ss:$48 sps:$4 sm:$0xff]   ;;  %v13317_v53 = vld [vmem:[#allocation14 + $0x1508] ss:$48 sps:$4 sm:$0xff]  }
 0x1a1   :  { %5121 = vmatpush1.bf16.msra.mxu0 %v13236_v54  ;;  %v13322_v54 = vld [vmem:[#allocation14 + $0x2b4] ss:$48 sps:$4 sm:$0xff]  }
 0x1a2   :  { %5162 = vmatpush1.bf16.msra.mxu1 %v13239_v55  ;;  %5122 = vmatprep.subr.bf16.mxu0 %v13244_v56  ;;  %v13325_v55 = vld [vmem:[#allocation14 + $0x8b4] ss:$48 sps:$4 sm:$0xff]   ;;  %v13320_v56 = vld [vmem:[#allocation14 + $0x2b0] ss:$48 sps:$4 sm:$0xff]  }
 0x1a3   :  { %5163 = vmatprep.subr.bf16.mxu1 %v13247_v57  ;;  %v13323_v57 = vld [vmem:[#allocation14 + $0x8b0] ss:$48 sps:$4 sm:$0xff]  }
 0x1a5   :  { %5123 = vmatpush1.bf16.msra.mxu0 %v13242_v58  ;;  %v13328_v58 = vld [vmem:[#allocation14 + $0x254] ss:$48 sps:$4 sm:$0xff]  }
 0x1a6   :  { %5164 = vmatpush1.bf16.msra.mxu1 %v13245_v59  ;;  %5124 = vmatprep.subr.bf16.mxu0 %v13250_v60  ;;  %v13326_v59 = vld [vmem:[#allocation14 + $0x250] ss:$48 sps:$4 sm:$0xff]  }
 0x1a7   :  { %5165 = vmatprep.subr.bf16.mxu1 %v13253_v61 }
 0x1a9   :  { %5125 = vmatpush1.bf16.msra.mxu0 %v13248_v62  ;;  %v13329_v62 = vld [vmem:[#allocation14 + $0x850] ss:$48 sps:$4 sm:$0xff]  }
 0x1aa   :  { %5166 = vmatpush1.bf16.msra.mxu1 %v13251_v63  ;;  %5126 = vmatprep.subr.bf16.mxu0 %v13256_v0  ;;  %v13331_v63 = vld [vmem:[#allocation14 + $0x854] ss:$48 sps:$4 sm:$0xff]  }
 0x1ab   :  { %5167 = vmatprep.subr.bf16.mxu1 %v13259_v2  ;;  %v13337_v2 = vld [vmem:[#allocation14 + $0x7f4] ss:$48 sps:$4 sm:$0xff]  }
 0x1ad   :  { %5127 = vmatpush1.bf16.msra.mxu0 %v13254_v1  ;;  %v13334_v1 = vld [vmem:[#allocation14 + $0x1f4] ss:$48 sps:$4 sm:$0xff]  }
 0x1ae   :  { %5168 = vmatpush1.bf16.msra.mxu1 %v13257_v7  ;;  %5128 = vmatprep.subr.bf16.mxu0 %v13262_v8 }
 0x1af   :  { %5169 = vmatprep.subr.bf16.mxu1 %v13265_v12 }
 0x1b1   :  { %5129 = vmatpush1.bf16.msra.mxu0 %v13260_v11 }
 0x1b2   :  { %5170 = vmatpush1.bf16.msra.mxu1 %v13263_v14  ;;  %5130 = vmatprep.subr.bf16.mxu0 %v13268_v15  ;;  %v13332_v14 = vld [vmem:[#allocation14 + $0x1f0] ss:$48 sps:$4 sm:$0xff]  }
 0x1b3   :  { %5171 = vmatprep.subr.bf16.mxu1 %v13271_v18  ;;  %v13335_v15 = vld [vmem:[#allocation14 + $0x7f0] ss:$48 sps:$4 sm:$0xff]  }
 0x1b5   :  { %5131 = vmatpush1.bf16.msra.mxu0 %v13266_v16  ;;  %v13340_v16 = vld [vmem:[#allocation14 + $0x194] ss:$48 sps:$4 sm:$0xff]  }
 0x1b6   :  { %5172 = vmatpush1.bf16.msra.mxu1 %v13269_v19  ;;  %5132 = vmatprep.subr.bf16.mxu0 %v13274_v20  ;;  %v13343_v20 = vld [vmem:[#allocation14 + $0x794] ss:$48 sps:$4 sm:$0xff]  }
 0x1b7   :  { %5173 = vmatprep.subr.bf16.mxu1 %v13277_v22  ;;  %v13341_v22 = vld [vmem:[#allocation14 + $0x790] ss:$48 sps:$4 sm:$0xff]  }
 0x1b9   :  { %5133 = vmatpush2.bf16.msra.mxu0 %v13272_v21  ;;  %v13338_v21 = vld [vmem:[#allocation14 + $0x190] ss:$48 sps:$4 sm:$0xff]  }
 0x1ba   :  { %5174 = vmatpush2.bf16.msra.mxu1 %v13275_v4  ;;  %5134 = vmatprep.subr.bf16.mxu0 %v13280_v24  ;;  %v13346_v4 = vld [vmem:[#allocation14 + $0x134] ss:$48 sps:$4 sm:$0xff]   ;;  %v13344_v24 = vld [vmem:[#allocation14 + $0x130] ss:$48 sps:$4 sm:$0xff]  }
 0x1bb   :  { %5175 = vmatprep.subr.bf16.mxu1 %v13283_v29  ;;  %v13347_v29 = vld [vmem:[#allocation14 + $0x730] ss:$48 sps:$4 sm:$0xff]  }
 0x1bd   :  { %5135 = vmatpush2.bf16.msra.mxu0 %v13278_v6  ;;  %v13349_v6 = vld [vmem:[#allocation14 + $0x734] ss:$48 sps:$4 sm:$0xff]  }
 0x1be   :  { %5176 = vmatpush2.bf16.msra.mxu1 %v13281_v26  ;;  %5136 = vmatprep.subr.bf16.mxu0 %v13286_v27  ;;  %v13352_v26 = vld [vmem:[#allocation14 + $0xd4] ss:$48 sps:$4 sm:$0xff]   ;;  %v13350_v27 = vld [vmem:[#allocation14 + $0xd0] ss:$48 sps:$4 sm:$0xff]  }
 0x1bf   :  { %5177 = vmatprep.subr.bf16.mxu1 %v13289_v32  ;;  %v13353_v32 = vld [vmem:[#allocation14 + $0x6d0] ss:$48 sps:$4 sm:$0xff]  }
 0x1c1   :  { %5137 = vmatpush2.bf16.msra.mxu0 %v13284_v31  ;;  %v13355_v31 = vld [vmem:[#allocation14 + $0x6d4] ss:$48 sps:$4 sm:$0xff]  }
 0x1c2   :  { %5178 = vmatpush2.bf16.msra.mxu1 %v13287_v33  ;;  %5138 = vmatprep.subr.bf16.mxu0 %v13292_v34  ;;  %v13358_v33 = vld [vmem:[#allocation14 + $0x74] ss:$48 sps:$4 sm:$0xff]  }
 0x1c3   :  { %5179 = vmatprep.subr.bf16.mxu1 %v13295_v36  ;;  %v13361_v34 = vld [vmem:[#allocation14 + $0x674] ss:$48 sps:$4 sm:$0xff]   ;;  %v13359_v36 = vld [vmem:[#allocation14 + $0x670] ss:$48 sps:$4 sm:$0xff]  }
 0x1c5   :  { %5139 = vmatpush2.bf16.msra.mxu0 %v13290_v35  ;;  %v13356_v35 = vld [vmem:[#allocation14 + $0x70] ss:$48 sps:$4 sm:$0xff]  }
 0x1c6   :  { %5180 = vmatpush2.bf16.msra.mxu1 %v13293_v37  ;;  %5140 = vmatprep.subr.bf16.mxu0 %v13298_v38  ;;  %v13364_v37 = vld [vmem:[#allocation14 + $0x14] ss:$48 sps:$4 sm:$0xff]  }
 0x1c7   :  { %5181 = vmatprep.subr.bf16.mxu1 %v13301_v42  ;;  %v13367_v38 = vld [vmem:[#allocation14 + $0x614] ss:$48 sps:$4 sm:$0xff]   ;;  %v13365_v42 = vld [vmem:[#allocation14 + $0x610] ss:$48 sps:$4 sm:$0xff]  }
 0x1c9   :  { %5141 = vmatpush2.bf16.msra.mxu0 %v13296_v39  ;;  %v13362_v39 = vld [vmem:[#allocation14 + $0x10] ss:$48 sps:$4 sm:$0xff]  }
 0x1ca   :  { %5182 = vmatpush2.bf16.msra.mxu1 %v13299_v43  ;;  %5142 = vmatprep.subr.bf16.mxu0 %v13304_v44  ;;  %v13370_v43 = vld [vmem:[#allocation14 + $0x5b4] ss:$48 sps:$4 sm:$0xff]  }
 0x1cb   :  { %5183 = vmatprep.subr.bf16.mxu1 %v13307_v3  ;;  %v13373_v44 = vld [vmem:[#allocation14 + $0xbb4] ss:$48 sps:$4 sm:$0xff]   ;;  %v13371_v3 = vld [vmem:[#allocation14 + $0xbb0] ss:$48 sps:$4 sm:$0xff]  }
 0x1cd   :  { %5143 = vmatpush2.bf16.msra.mxu0 %v13302_v25  ;;  %v13368_v25 = vld [vmem:[#allocation14 + $0x5b0] ss:$48 sps:$4 sm:$0xff]  }
 0x1ce   :  { %5184 = vmatpush2.bf16.msra.mxu1 %v13305_v45  ;;  %5144 = vmatprep.subr.bf16.mxu0 %v13310_v46  ;;  %v13376_v45 = vld [vmem:[#allocation14 + $0x554] ss:$48 sps:$4 sm:$0xff]  }
 0x1cf   :  { %5185 = vmatprep.subr.bf16.mxu1 %v13313_v48  ;;  %v13379_v46 = vld [vmem:[#allocation14 + $0xb54] ss:$48 sps:$4 sm:$0xff]   ;;  %v13377_v48 = vld [vmem:[#allocation14 + $0xb50] ss:$48 sps:$4 sm:$0xff]  }
 0x1d1   :  { %5145 = vmatpush2.bf16.msra.mxu0 %v13308_v47  ;;  %v13374_v47 = vld [vmem:[#allocation14 + $0x550] ss:$48 sps:$4 sm:$0xff]  }
 0x1d2   :  { %5186 = vmatpush2.bf16.msra.mxu1 %v13311_v49  ;;  %5146 = vmatprep.subr.bf16.mxu0 %v13316_v50  ;;  %v13382_v49 = vld [vmem:[#allocation14 + $0x4f4] ss:$48 sps:$4 sm:$0xff]  }
 0x1d3   :  { %5187 = vmatprep.subr.bf16.mxu1 %v13319_v52  ;;  %v13385_v50 = vld [vmem:[#allocation14 + $0xaf4] ss:$48 sps:$4 sm:$0xff]   ;;  %v13383_v52 = vld [vmem:[#allocation14 + $0xaf0] ss:$48 sps:$4 sm:$0xff]  }
 0x1d5   :  { %5147 = vmatpush2.bf16.msra.mxu0 %v13314_v51  ;;  %v13380_v51 = vld [vmem:[#allocation14 + $0x4f0] ss:$48 sps:$4 sm:$0xff]  }
 0x1d6   :  { %5188 = vmatpush2.bf16.msra.mxu1 %v13317_v53  ;;  %5198 = vmatprep.subr.bf16.mxu0 %v13322_v54  ;;  %v13388_v53 = vld [vmem:[#allocation14 + $0x494] ss:$48 sps:$4 sm:$0xff]  }
 0x1d7   :  { %5239 = vmatprep.subr.bf16.mxu1 %v13325_v55  ;;  %v13391_v54 = vld [vmem:[#allocation14 + $0xa94] ss:$48 sps:$4 sm:$0xff]   ;;  %v13386_v55 = vld [vmem:[#allocation14 + $0x490] ss:$48 sps:$4 sm:$0xff]  }
 0x1d8   :  { %5149 = vmatmul.mubr.bf16.vlgmr.msra.gmra.mxu0 %v14502_v40  ;;  %v4904_v60 = vpop.f32.mrf.mxu0  ;;  %v4945_v61 = vpop.f32.mrf.mxu1 }
 0x1d9   :  { %5190 = vmatmul.mubr.bf16.vlgmr.msra.gmra.mxu1 %v14506_v41  ;;  %v14518_v0 = vadd.f32 %v4945_v61, %v4904_v60  ;;  %5199 = vmatpush1.bf16.msra.mxu0 %v13320_v56  ;;  %v13389_v56 = vld [vmem:[#allocation14 + $0xa90] ss:$48 sps:$4 sm:$0xff]   ;;  %v13400_v61 = vld [vmem:[#allocation14 + $0x3d4] ss:$48 sps:$4 sm:$0xff]  }
 0x1da   :  { %5230 = vmatprep.mubr.bf16.mxu0 %v14482_v5  ;;  %5240 = vmatpush1.bf16.msra.mxu1 %v13323_v57  ;;  %v14521_v7 = vpop.f32.mrf.mxu0  ;;  %v14523_v8 = vpop.f32.mrf.mxu1  ;;  %v13394_v57 = vld [vmem:[#allocation14 + $0x434] ss:$48 sps:$4 sm:$0xff]   ;;  %v13395_v60 = vld [vmem:[#allocation14 + $0xa30] ss:$48 sps:$4 sm:$0xff]  }
 0x1db   :  { %5271 = vmatprep.mubr.bf16.mxu1 %v14484_v9  ;;  %5200 = vmatprep.subr.bf16.mxu0 %v13328_v58  ;;  %v13397_v58 = vld [vmem:[#allocation14 + $0xa34] ss:$48 sps:$4 sm:$0xff]  }
 0x1dc   :  { %5241 = vmatprep.subr.bf16.mxu1 %v13331_v63  ;;  %v4908_v11 = vpop.f32.mrf.mxu0  ;;  %v4949_v12 = vpop.f32.mrf.mxu1  ;;  %v13398_v63 = vld [vmem:[#allocation14 + $0x3d0] ss:$48 sps:$4 sm:$0xff]  }
 0x1dd   :  { %5201 = vmatpush1.bf16.msra.mxu0 %v13326_v59  ;;  %v13392_v59 = vld [vmem:[#allocation14 + $0x430] ss:$48 sps:$4 sm:$0xff]   ;;  %v13409_v11 = vld [vmem:[#allocation14 + $0x974] ss:$48 sps:$4 sm:$0xff]  }
 0x1de   :  { %5242 = vmatpush1.bf16.msra.mxu1 %v13329_v62  ;;  %v4909_v18 = vpop.f32.mrf.mxu0  ;;  %v4950_v19 = vpop.f32.mrf.mxu1  ;;  %5202 = vmatprep.subr.bf16.mxu0 %v13334_v1  ;;  %v13403_v62 = vld [vmem:[#allocation14 + $0x9d4] ss:$48 sps:$4 sm:$0xff]   ;;  %v13401_v1 = vld [vmem:[#allocation14 + $0x9d0] ss:$48 sps:$4 sm:$0xff]  }
 0x1df   :  { %5243 = vmatprep.subr.bf16.mxu1 %v13337_v2  ;;  %v13406_v2 = vld [vmem:[#allocation14 + $0x374] ss:$48 sps:$4 sm:$0xff]   ;;  %v13404_v12 = vld [vmem:[#allocation14 + $0x370] ss:$48 sps:$4 sm:$0xff]  }
 0x1e0   :  { %v13410_v18 = vld [vmem:[#allocation14 + $0x310] ss:$48 sps:$4 sm:$0xff]  }
 0x1e1   :  { %5203 = vmatpush1.bf16.msra.mxu0 %v13332_v14  ;;  %v13407_v14 = vld [vmem:[#allocation14 + $0x970] ss:$48 sps:$4 sm:$0xff]  }
 0x1e2   :  { %5244 = vmatpush1.bf16.msra.mxu1 %v13335_v15  ;;  %5204 = vmatprep.subr.bf16.mxu0 %v13340_v16  ;;  %v13412_v15 = vld [vmem:[#allocation14 + $0x314] ss:$48 sps:$4 sm:$0xff]   ;;  %v13413_v19 = vld [vmem:[#allocation14 + $0x910] ss:$48 sps:$4 sm:$0xff]  }
 0x1e3   :  { %5245 = vmatprep.subr.bf16.mxu1 %v13343_v20  ;;  %v13415_v16 = vld [vmem:[#allocation14 + $0x914] ss:$48 sps:$4 sm:$0xff]  }
 0x1e4   :  { %v13418_v20 = vld [vmem:[#allocation14 + $0xeb4] ss:$48 sps:$4 sm:$0xff]  }
 0x1e5   :  { %5205 = vmatpush1.bf16.msra.mxu0 %v13338_v21  ;;  %v13421_v21 = vld [vmem:[#allocation14 + $0x14b4] ss:$48 sps:$4 sm:$0xff]  }
 0x1e6   :  { %5246 = vmatpush1.bf16.msra.mxu1 %v13341_v22  ;;  %5206 = vmatprep.subr.bf16.mxu0 %v13346_v4  ;;  %v13416_v22 = vld [vmem:[#allocation14 + $0xeb0] ss:$48 sps:$4 sm:$0xff]  }
 0x1e7   :  { %5247 = vmatprep.subr.bf16.mxu1 %v13349_v6  ;;  %v13419_v4 = vld [vmem:[#allocation14 + $0x14b0] ss:$48 sps:$4 sm:$0xff]  }
 0x1e9   :  { %5207 = vmatpush1.bf16.msra.mxu0 %v13344_v24  ;;  %v13424_v24 = vld [vmem:[#allocation14 + $0xe54] ss:$48 sps:$4 sm:$0xff]  }
 0x1ea   :  { %5248 = vmatpush1.bf16.msra.mxu1 %v13347_v29  ;;  %5208 = vmatprep.subr.bf16.mxu0 %v13352_v26  ;;  %v13427_v26 = vld [vmem:[#allocation14 + $0x1454] ss:$48 sps:$4 sm:$0xff]  }
 0x1eb   :  { %5249 = vmatprep.subr.bf16.mxu1 %v13355_v31 }
 0x1ed   :  { %5209 = vmatpush1.bf16.msra.mxu0 %v13350_v27  ;;  %v4948_v27 = vadd.f32 %v14523_v8, %v14521_v7  ;;  %v13433_v7 = vld [vmem:[#allocation14 + $0x13f4] ss:$48 sps:$4 sm:$0xff]  }
 0x1ee   :  { %5250 = vmatpush1.bf16.msra.mxu1 %v13353_v32  ;;  %5210 = vmatprep.subr.bf16.mxu0 %v13358_v33  ;;  %v13422_v32 = vld [vmem:[#allocation14 + $0xe50] ss:$48 sps:$4 sm:$0xff]  }
 0x1ef   :  { %5251 = vmatprep.subr.bf16.mxu1 %v13361_v34 }
 0x1f1   :  { %5211 = vmatpush1.bf16.msra.mxu0 %v13356_v35  ;;  %v13425_v35 = vld [vmem:[#allocation14 + $0x1450] ss:$48 sps:$4 sm:$0xff]  }
 0x1f2   :  { %5252 = vmatpush1.bf16.msra.mxu1 %v13359_v36  ;;  %5212 = vmatprep.subr.bf16.mxu0 %v13364_v37  ;;  %v13430_v36 = vld [vmem:[#allocation14 + $0xdf4] ss:$48 sps:$4 sm:$0xff]  }
 0x1f3   :  { %5253 = vmatprep.subr.bf16.mxu1 %v13367_v38 }
 0x1f5   :  { %5213 = vmatpush1.bf16.msra.mxu0 %v13362_v39 }
 0x1f6   :  { %5254 = vmatpush1.bf16.msra.mxu1 %v13365_v42  ;;  %5214 = vmatprep.subr.bf16.mxu0 %v13370_v43  ;;  %v13428_v42 = vld [vmem:[#allocation14 + $0xdf0] ss:$48 sps:$4 sm:$0xff]  }
 0x1f7   :  { %5255 = vmatprep.subr.bf16.mxu1 %v13373_v44 }
 0x1f9   :  { %5215 = vmatpush2.bf16.msra.mxu0 %v13368_v25  ;;  %v13431_v25 = vld [vmem:[#allocation14 + $0x13f0] ss:$48 sps:$4 sm:$0xff]  }
 0x1fa   :  { %5256 = vmatpush2.bf16.msra.mxu1 %v13371_v3  ;;  %5216 = vmatprep.subr.bf16.mxu0 %v13376_v45  ;;  %v13436_v3 = vld [vmem:[#allocation14 + $0xd94] ss:$48 sps:$4 sm:$0xff]  }
 0x1fb   :  { %5257 = vmatprep.subr.bf16.mxu1 %v13379_v46  ;;  %v13439_v45 = vld [vmem:[#allocation14 + $0x1394] ss:$48 sps:$4 sm:$0xff]   ;;  %v13434_v46 = vld [vmem:[#allocation14 + $0xd90] ss:$48 sps:$4 sm:$0xff]  }
 0x1fd   :  { %5217 = vmatpush2.bf16.msra.mxu0 %v13374_v47  ;;  %v13437_v47 = vld [vmem:[#allocation14 + $0x1390] ss:$48 sps:$4 sm:$0xff]  }
 0x1fe   :  { %5258 = vmatpush2.bf16.msra.mxu1 %v13377_v48  ;;  %5218 = vmatprep.subr.bf16.mxu0 %v13382_v49  ;;  %v13442_v48 = vld [vmem:[#allocation14 + $0xd34] ss:$48 sps:$4 sm:$0xff]  }
 0x1ff   :  { %5259 = vmatprep.subr.bf16.mxu1 %v13385_v50  ;;  %v13445_v49 = vld [vmem:[#allocation14 + $0x1334] ss:$48 sps:$4 sm:$0xff]   ;;  %v13440_v50 = vld [vmem:[#allocation14 + $0xd30] ss:$48 sps:$4 sm:$0xff]  }
 0x201   :  { %5219 = vmatpush2.bf16.msra.mxu0 %v13380_v51  ;;  %v13443_v51 = vld [vmem:[#allocation14 + $0x1330] ss:$48 sps:$4 sm:$0xff]  }
 0x202   :  { %5260 = vmatpush2.bf16.msra.mxu1 %v13383_v52  ;;  %5220 = vmatprep.subr.bf16.mxu0 %v13388_v53  ;;  %v13448_v52 = vld [vmem:[#allocation14 + $0xcd4] ss:$48 sps:$4 sm:$0xff]  }
 0x203   :  { %5261 = vmatprep.subr.bf16.mxu1 %v13391_v54  ;;  %v13451_v53 = vld [vmem:[#allocation14 + $0x12d4] ss:$48 sps:$4 sm:$0xff]   ;;  %v13446_v54 = vld [vmem:[#allocation14 + $0xcd0] ss:$48 sps:$4 sm:$0xff]  }
 0x205   :  { %5221 = vmatpush2.bf16.msra.mxu0 %v13386_v55  ;;  %v13449_v55 = vld [vmem:[#allocation14 + $0x12d0] ss:$48 sps:$4 sm:$0xff]  }
 0x206   :  { %5262 = vmatpush2.bf16.msra.mxu1 %v13389_v56  ;;  %5222 = vmatprep.subr.bf16.mxu0 %v13394_v57  ;;  %v13454_v56 = vld [vmem:[#allocation14 + $0xc74] ss:$48 sps:$4 sm:$0xff]  }
 0x207   :  { %5263 = vmatprep.subr.bf16.mxu1 %v13397_v58  ;;  %v13457_v57 = vld [vmem:[#allocation14 + $0x1274] ss:$48 sps:$4 sm:$0xff]   ;;  %v13452_v58 = vld [vmem:[#allocation14 + $0xc70] ss:$48 sps:$4 sm:$0xff]  }
 0x209   :  { %5223 = vmatpush2.bf16.msra.mxu0 %v13392_v59  ;;  %v13455_v59 = vld [vmem:[#allocation14 + $0x1270] ss:$48 sps:$4 sm:$0xff]  }
 0x20a   :  { %5264 = vmatpush2.bf16.msra.mxu1 %v13395_v60  ;;  %5224 = vmatprep.subr.bf16.mxu0 %v13400_v61  ;;  %v13460_v60 = vld [vmem:[#allocation14 + $0xc14] ss:$48 sps:$4 sm:$0xff]  }
 0x20b   :  { %5265 = vmatprep.subr.bf16.mxu1 %v13403_v62  ;;  %v13463_v61 = vld [vmem:[#allocation14 + $0x1214] ss:$48 sps:$4 sm:$0xff]   ;;  %v13458_v62 = vld [vmem:[#allocation14 + $0xc10] ss:$48 sps:$4 sm:$0xff]  }
 0x20d   :  { %5225 = vmatpush2.bf16.msra.mxu0 %v13398_v63  ;;  %v13461_v63 = vld [vmem:[#allocation14 + $0x1210] ss:$48 sps:$4 sm:$0xff]  }
 0x20e   :  { %5266 = vmatpush2.bf16.msra.mxu1 %v13401_v1  ;;  %5226 = vmatprep.subr.bf16.mxu0 %v13406_v2  ;;  %v13466_v1 = vld [vmem:[#allocation14 + $0x11b4] ss:$48 sps:$4 sm:$0xff]  }
 0x20f   :  { %5267 = vmatprep.subr.bf16.mxu1 %v13409_v11  ;;  %v13469_v2 = vld [vmem:[#allocation14 + $0x17b4] ss:$48 sps:$4 sm:$0xff]   ;;  %v13464_v11 = vld [vmem:[#allocation14 + $0x11b0] ss:$48 sps:$4 sm:$0xff]  }
 0x211   :  { %5227 = vmatpush2.bf16.msra.mxu0 %v13404_v12  ;;  %v13467_v12 = vld [vmem:[#allocation14 + $0x17b0] ss:$48 sps:$4 sm:$0xff]  }
 0x212   :  { %5268 = vmatpush2.bf16.msra.mxu1 %v13407_v14  ;;  %5228 = vmatprep.subr.bf16.mxu0 %v13412_v15  ;;  %v13472_v14 = vld [vmem:[#allocation14 + $0x1154] ss:$48 sps:$4 sm:$0xff]  }
 0x213   :  { %5269 = vmatprep.subr.bf16.mxu1 %v13415_v16  ;;  %v13475_v15 = vld [vmem:[#allocation14 + $0x1754] ss:$48 sps:$4 sm:$0xff]   ;;  %v13470_v16 = vld [vmem:[#allocation14 + $0x1150] ss:$48 sps:$4 sm:$0xff]  }
 0x215   :  { %5229 = vmatpush2.bf16.msra.mxu0 %v13410_v18  ;;  %v13473_v18 = vld [vmem:[#allocation14 + $0x1750] ss:$48 sps:$4 sm:$0xff]  }
 0x216   :  { %5270 = vmatpush2.bf16.msra.mxu1 %v13413_v19  ;;  %5280 = vmatprep.subr.bf16.mxu0 %v13418_v20  ;;  %v13478_v19 = vld [vmem:[#allocation14 + $0x10f4] ss:$48 sps:$4 sm:$0xff]  }
 0x217   :  { %5321 = vmatprep.subr.bf16.mxu1 %v13421_v21  ;;  %v13481_v20 = vld [vmem:[#allocation14 + $0x16f4] ss:$48 sps:$4 sm:$0xff]   ;;  %v13476_v21 = vld [vmem:[#allocation14 + $0x10f0] ss:$48 sps:$4 sm:$0xff]  }
 0x218   :  { %v4986_v6 = vpop.f32.mrf.mxu0  ;;  %v5027_v29 = vpop.f32.mrf.mxu1  ;;  %5231 = vmatmul.mubr.bf16.vlgmr.msra.gmra.mxu0 %v14486_v17 }
 0x219   :  { %v4987_v31 = vadd.f32 %v4986_v6, %v14518_v0  ;;  %5272 = vmatmul.mubr.bf16.vlgmr.msra.gmra.mxu1 %v14488_v23  ;;  %5281 = vmatpush1.bf16.msra.mxu0 %v13416_v22  ;;  %v13479_v22 = vld [vmem:[#allocation14 + $0x16f0] ss:$48 sps:$4 sm:$0xff]  }
 0x21a   :  { %5312 = vmatprep.mubr.bf16.mxu0 %v14494_v28  ;;  %5322 = vmatpush1.bf16.msra.mxu1 %v13419_v4  ;;  %v4988_v33 = vpop.f32.mrf.mxu0  ;;  %v5029_v34 = vpop.f32.mrf.mxu1  ;;  %v13484_v4 = vld [vmem:[#allocation14 + $0x1094] ss:$48 sps:$4 sm:$0xff]   ;;  %v13482_v6 = vld [vmem:[#allocation14 + $0x1090] ss:$48 sps:$4 sm:$0xff]  }
 0x21b   :  { %v14532_v37 = vadd.f32 %v5027_v29, %v4987_v31  ;;  %5353 = vmatprep.mubr.bf16.mxu1 %v14496_v30  ;;  %v4989_v38 = vadd.f32 %v4988_v33, %v4948_v27  ;;  %5282 = vmatprep.subr.bf16.mxu0 %v13424_v24  ;;  %v13487_v24 = vld [vmem:[#allocation14 + $0x1694] ss:$48 sps:$4 sm:$0xff]   ;;  %v13485_v29 = vld [vmem:[#allocation14 + $0x1690] ss:$48 sps:$4 sm:$0xff]  }
 0x21c   :  { %v4990_v8 = vpop.f32.mrf.mxu0  ;;  %v5031_v0 = vpop.f32.mrf.mxu1  ;;  %5323 = vmatprep.subr.bf16.mxu1 %v13427_v26  ;;  %v13490_v26 = vld [vmem:[#allocation14 + $0x1034] ss:$48 sps:$4 sm:$0xff]   ;;  %v13488_v31 = vld [vmem:[#allocation14 + $0x1030] ss:$48 sps:$4 sm:$0xff]  }
 0x21d   :  { %v14535_v39 = vadd.f32 %v5029_v34, %v4989_v38  ;;  %5283 = vmatpush1.bf16.msra.mxu0 %v13422_v32  ;;  %v13493_v27 = vld [vmem:[#allocation14 + $0x1634] ss:$48 sps:$4 sm:$0xff]   ;;  %v13491_v32 = vld [vmem:[#allocation14 + $0x1630] ss:$48 sps:$4 sm:$0xff]  }
 0x21e   :  { %5324 = vmatpush1.bf16.msra.mxu1 %v13425_v35  ;;  %v4991_v43 = vpop.f32.mrf.mxu0  ;;  %v5032_v44 = vpop.f32.mrf.mxu1  ;;  %5284 = vmatprep.subr.bf16.mxu0 %v13430_v36  ;;  %v13496_v33 = vld [vmem:[#allocation14 + $0xfd4] ss:$48 sps:$4 sm:$0xff]   ;;  %v13494_v35 = vld [vmem:[#allocation14 + $0xfd0] ss:$48 sps:$4 sm:$0xff]  }
 0x21f   :  { %5325 = vmatprep.subr.bf16.mxu1 %v13433_v7  ;;  %v13499_v34 = vld [vmem:[#allocation14 + $0x15d4] ss:$48 sps:$4 sm:$0xff]   ;;  %v13497_v36 = vld [vmem:[#allocation14 + $0x15d0] ss:$48 sps:$4 sm:$0xff]  }
 0x220   :  { %v13502_v38 = vld [vmem:[#allocation14 + $0xf74] ss:$48 sps:$4 sm:$0xff]   ;;  %v13500_v8 = vld [vmem:[#allocation14 + $0xf70] ss:$48 sps:$4 sm:$0xff]  }
 0x221   :  { %5285 = vmatpush1.bf16.msra.mxu0 %v13428_v42  ;;  %v13505_v7 = vld [vmem:[#allocation14 + $0x1574] ss:$48 sps:$4 sm:$0xff]   ;;  %v13503_v0 = vld [vmem:[#allocation14 + $0x1570] ss:$48 sps:$4 sm:$0xff]  }
 0x222   :  { %5326 = vmatpush1.bf16.msra.mxu1 %v13431_v25  ;;  %5286 = vmatprep.subr.bf16.mxu0 %v13436_v3  ;;  %v13508_v42 = vld [vmem:[#allocation14 + $0xf14] ss:$48 sps:$4 sm:$0xff]   ;;  %v13506_v44 = vld [vmem:[#allocation14 + $0xf10] ss:$48 sps:$4 sm:$0xff]   ;;  %v13514_v3 = vld [vmem:[#allocation14 + $0x2bc] ss:$48 sps:$4 sm:$0xff]  }
 0x223   :  { %5327 = vmatprep.subr.bf16.mxu1 %v13439_v45  ;;  %v13511_v43 = vld [vmem:[#allocation14 + $0x1514] ss:$48 sps:$4 sm:$0xff]   ;;  %v13509_v25 = vld [vmem:[#allocation14 + $0x1510] ss:$48 sps:$4 sm:$0xff]   ;;  %v13517_v45 = vld [vmem:[#allocation14 + $0x8bc] ss:$48 sps:$4 sm:$0xff]  }
 0x225   :  { %5287 = vmatpush1.bf16.msra.mxu0 %v13434_v46  ;;  %v13512_v46 = vld [vmem:[#allocation14 + $0x2b8] ss:$48 sps:$4 sm:$0xff]  }
 0x226   :  { %5328 = vmatpush1.bf16.msra.mxu1 %v13437_v47  ;;  %5288 = vmatprep.subr.bf16.mxu0 %v13442_v48  ;;  %v13515_v47 = vld [vmem:[#allocation14 + $0x8b8] ss:$48 sps:$4 sm:$0xff]   ;;  %v13520_v48 = vld [vmem:[#allocation14 + $0x25c] ss:$48 sps:$4 sm:$0xff]  }
 0x227   :  { %5329 = vmatprep.subr.bf16.mxu1 %v13445_v49 }
 0x229   :  { %5289 = vmatpush1.bf16.msra.mxu0 %v13440_v50  ;;  %v13523_v50 = vld [vmem:[#allocation14 + $0x85c] ss:$48 sps:$4 sm:$0xff]  }
 0x22a   :  { %5330 = vmatpush1.bf16.msra.mxu1 %v13443_v51  ;;  %5290 = vmatprep.subr.bf16.mxu0 %v13448_v52  ;;  %v13518_v52 = vld [vmem:[#allocation14 + $0x258] ss:$48 sps:$4 sm:$0xff]  }
 0x22b   :  { %5331 = vmatprep.subr.bf16.mxu1 %v13451_v53 }
 0x22d   :  { %5291 = vmatpush1.bf16.msra.mxu0 %v13446_v54 }
 0x22e   :  { %5332 = vmatpush1.bf16.msra.mxu1 %v13449_v55  ;;  %5292 = vmatprep.subr.bf16.mxu0 %v13454_v56  ;;  %v13521_v55 = vld [vmem:[#allocation14 + $0x858] ss:$48 sps:$4 sm:$0xff]   ;;  %v13526_v56 = vld [vmem:[#allocation14 + $0x1fc] ss:$48 sps:$4 sm:$0xff]  }
 0x22f   :  { %5333 = vmatprep.subr.bf16.mxu1 %v13457_v57 }
 0x231   :  { %5293 = vmatpush1.bf16.msra.mxu0 %v13452_v58  ;;  %v13529_v58 = vld [vmem:[#allocation14 + $0x7fc] ss:$48 sps:$4 sm:$0xff]  }
 0x232   :  { %5334 = vmatpush1.bf16.msra.mxu1 %v13455_v59  ;;  %5294 = vmatprep.subr.bf16.mxu0 %v13460_v60 }
 0x233   :  { %5335 = vmatprep.subr.bf16.mxu1 %v13463_v61 }
 0x235   :  { %5295 = vmatpush1.bf16.msra.mxu0 %v13458_v62  ;;  %v13524_v62 = vld [vmem:[#allocation14 + $0x1f8] ss:$48 sps:$4 sm:$0xff]  }
 0x236   :  { %5336 = vmatpush1.bf16.msra.mxu1 %v13461_v63  ;;  %5296 = vmatprep.subr.bf16.mxu0 %v13466_v1  ;;  %v13527_v1 = vld [vmem:[#allocation14 + $0x7f8] ss:$48 sps:$4 sm:$0xff]  }
 0x237   :  { %5337 = vmatprep.subr.bf16.mxu1 %v13469_v2  ;;  %v13532_v2 = vld [vmem:[#allocation14 + $0x19c] ss:$48 sps:$4 sm:$0xff]  }
 0x239   :  { %5297 = vmatpush2.bf16.msra.mxu0 %v13464_v11 }
 0x23a   :  { %5338 = vmatpush2.bf16.msra.mxu1 %v13467_v12  ;;  %5298 = vmatprep.subr.bf16.mxu0 %v13472_v14  ;;  %v13535_v12 = vld [vmem:[#allocation14 + $0x79c] ss:$48 sps:$4 sm:$0xff]   ;;  %v13530_v14 = vld [vmem:[#allocation14 + $0x198] ss:$48 sps:$4 sm:$0xff]  }
 0x23b   :  { %5339 = vmatprep.subr.bf16.mxu1 %v13475_v15  ;;  %v13533_v15 = vld [vmem:[#allocation14 + $0x798] ss:$48 sps:$4 sm:$0xff]  }
 0x23d   :  { %5299 = vmatpush2.bf16.msra.mxu0 %v13470_v16  ;;  %v13538_v16 = vld [vmem:[#allocation14 + $0x13c] ss:$48 sps:$4 sm:$0xff]  }
 0x23e   :  { %5340 = vmatpush2.bf16.msra.mxu1 %v13473_v18  ;;  %5300 = vmatprep.subr.bf16.mxu0 %v13478_v19  ;;  %v13541_v18 = vld [vmem:[#allocation14 + $0x73c] ss:$48 sps:$4 sm:$0xff]   ;;  %v13536_v19 = vld [vmem:[#allocation14 + $0x138] ss:$48 sps:$4 sm:$0xff]  }
 0x23f   :  { %5341 = vmatprep.subr.bf16.mxu1 %v13481_v20  ;;  %v13539_v20 = vld [vmem:[#allocation14 + $0x738] ss:$48 sps:$4 sm:$0xff]  }
 0x241   :  { %5301 = vmatpush2.bf16.msra.mxu0 %v13476_v21  ;;  %v13544_v21 = vld [vmem:[#allocation14 + $0xdc] ss:$48 sps:$4 sm:$0xff]  }
 0x242   :  { %5342 = vmatpush2.bf16.msra.mxu1 %v13479_v22  ;;  %5302 = vmatprep.subr.bf16.mxu0 %v13484_v4  ;;  %v13547_v22 = vld [vmem:[#allocation14 + $0x6dc] ss:$48 sps:$4 sm:$0xff]   ;;  %v13542_v4 = vld [vmem:[#allocation14 + $0xd8] ss:$48 sps:$4 sm:$0xff]  }
 0x243   :  { %5343 = vmatprep.subr.bf16.mxu1 %v13487_v24  ;;  %v13545_v24 = vld [vmem:[#allocation14 + $0x6d8] ss:$48 sps:$4 sm:$0xff]  }
 0x245   :  { %5303 = vmatpush2.bf16.msra.mxu0 %v13482_v6  ;;  %v13550_v6 = vld [vmem:[#allocation14 + $0x7c] ss:$48 sps:$4 sm:$0xff]  }
 0x246   :  { %5344 = vmatpush2.bf16.msra.mxu1 %v13485_v29  ;;  %5304 = vmatprep.subr.bf16.mxu0 %v13490_v26  ;;  %v13553_v29 = vld [vmem:[#allocation14 + $0x67c] ss:$48 sps:$4 sm:$0xff]   ;;  %v13548_v26 = vld [vmem:[#allocation14 + $0x78] ss:$48 sps:$4 sm:$0xff]  }
 0x247   :  { %5345 = vmatprep.subr.bf16.mxu1 %v13493_v27  ;;  %v13551_v27 = vld [vmem:[#allocation14 + $0x678] ss:$48 sps:$4 sm:$0xff]  }
 0x249   :  { %5305 = vmatpush2.bf16.msra.mxu0 %v13488_v31  ;;  %v13556_v31 = vld [vmem:[#allocation14 + $0x1c] ss:$48 sps:$4 sm:$0xff]  }
 0x24a   :  { %5346 = vmatpush2.bf16.msra.mxu1 %v13491_v32  ;;  %5306 = vmatprep.subr.bf16.mxu0 %v13496_v33  ;;  %v13559_v32 = vld [vmem:[#allocation14 + $0x61c] ss:$48 sps:$4 sm:$0xff]   ;;  %v13554_v33 = vld [vmem:[#allocation14 + $0x18] ss:$48 sps:$4 sm:$0xff]  }
 0x24b   :  { %5347 = vmatprep.subr.bf16.mxu1 %v13499_v34  ;;  %v13557_v34 = vld [vmem:[#allocation14 + $0x618] ss:$48 sps:$4 sm:$0xff]  }
 0x24d   :  { %5307 = vmatpush2.bf16.msra.mxu0 %v13494_v35  ;;  %v13562_v35 = vld [vmem:[#allocation14 + $0x5bc] ss:$48 sps:$4 sm:$0xff]  }
 0x24e   :  { %5348 = vmatpush2.bf16.msra.mxu1 %v13497_v36  ;;  %5308 = vmatprep.subr.bf16.mxu0 %v13502_v38  ;;  %v13565_v36 = vld [vmem:[#allocation14 + $0xbbc] ss:$48 sps:$4 sm:$0xff]   ;;  %v13560_v38 = vld [vmem:[#allocation14 + $0x5b8] ss:$48 sps:$4 sm:$0xff]  }
 0x24f   :  { %5349 = vmatprep.subr.bf16.mxu1 %v13505_v7  ;;  %v13563_v7 = vld [vmem:[#allocation14 + $0xbb8] ss:$48 sps:$4 sm:$0xff]  }
 0x251   :  { %5309 = vmatpush2.bf16.msra.mxu0 %v13500_v8  ;;  %v13568_v8 = vld [vmem:[#allocation14 + $0x55c] ss:$48 sps:$4 sm:$0xff]  }
 0x252   :  { %5350 = vmatpush2.bf16.msra.mxu1 %v13503_v0  ;;  %5310 = vmatprep.subr.bf16.mxu0 %v13508_v42  ;;  %v13571_v0 = vld [vmem:[#allocation14 + $0xb5c] ss:$48 sps:$4 sm:$0xff]   ;;  %v13566_v42 = vld [vmem:[#allocation14 + $0x558] ss:$48 sps:$4 sm:$0xff]  }
 0x253   :  { %5351 = vmatprep.subr.bf16.mxu1 %v13511_v43  ;;  %v13569_v43 = vld [vmem:[#allocation14 + $0xb58] ss:$48 sps:$4 sm:$0xff]  }
 0x255   :  { %5311 = vmatpush2.bf16.msra.mxu0 %v13506_v44  ;;  %v13574_v44 = vld [vmem:[#allocation14 + $0x4fc] ss:$48 sps:$4 sm:$0xff]  }
 0x256   :  { %5352 = vmatpush2.bf16.msra.mxu1 %v13509_v25  ;;  %5362 = vmatprep.subr.bf16.mxu0 %v13514_v3  ;;  %v13577_v25 = vld [vmem:[#allocation14 + $0xafc] ss:$48 sps:$4 sm:$0xff]   ;;  %v13572_v3 = vld [vmem:[#allocation14 + $0x4f8] ss:$48 sps:$4 sm:$0xff]  }
 0x257   :  { %5403 = vmatprep.subr.bf16.mxu1 %v13517_v45  ;;  %v13575_v45 = vld [vmem:[#allocation14 + $0xaf8] ss:$48 sps:$4 sm:$0xff]  }
 0x258   :  { %v5068_v49 = vpop.f32.mrf.mxu0  ;;  %5313 = vmatmul.mubr.bf16.vlgmr.msra.gmra.mxu0 %v14502_v40 }
 0x259   :  { %v5109_v51 = vpop.f32.mrf.mxu1  ;;  %5354 = vmatmul.mubr.bf16.vlgmr.msra.gmra.mxu1 %v14506_v41  ;;  %5363 = vmatpush1.bf16.msra.mxu0 %v13512_v46  ;;  %v13580_v46 = vld [vmem:[#allocation14 + $0x49c] ss:$48 sps:$4 sm:$0xff]  }
 0x25a   :  { %v14539_v53 = vadd.f32 %v5109_v51, %v5068_v49  ;;  %5394 = vmatprep.mubr.bf16.mxu0 %v14482_v5  ;;  %5404 = vmatpush1.bf16.msra.mxu1 %v13515_v47  ;;  %v5070_v54 = vpop.f32.mrf.mxu0  ;;  %v13583_v47 = vld [vmem:[#allocation14 + $0xa9c] ss:$48 sps:$4 sm:$0xff]   ;;  %v13581_v49 = vld [vmem:[#allocation14 + $0xa98] ss:$48 sps:$4 sm:$0xff]  }
 0x25b   :  { %5435 = vmatprep.mubr.bf16.mxu1 %v14484_v9  ;;  %v5111_v57 = vpop.f32.mrf.mxu1  ;;  %5364 = vmatprep.subr.bf16.mxu0 %v13520_v48  ;;  %v13578_v48 = vld [vmem:[#allocation14 + $0x498] ss:$48 sps:$4 sm:$0xff]   ;;  %v13589_v51 = vld [vmem:[#allocation14 + $0xa3c] ss:$48 sps:$4 sm:$0xff]  }
 0x25c   :  { %v14543_v59 = vadd.f32 %v5111_v57, %v5070_v54  ;;  %v5072_v60 = vpop.f32.mrf.mxu0  ;;  %5405 = vmatprep.subr.bf16.mxu1 %v13523_v50  ;;  %v13586_v50 = vld [vmem:[#allocation14 + $0x43c] ss:$48 sps:$4 sm:$0xff]   ;;  %v13587_v54 = vld [vmem:[#allocation14 + $0xa38] ss:$48 sps:$4 sm:$0xff]  }
 0x25d   :  { %v5113_v61 = vpop.f32.mrf.mxu1  ;;  %5365 = vmatpush1.bf16.msra.mxu0 %v13518_v52  ;;  %v13584_v52 = vld [vmem:[#allocation14 + $0x438] ss:$48 sps:$4 sm:$0xff]   ;;  %v13598_v60 = vld [vmem:[#allocation14 + $0x37c] ss:$48 sps:$4 sm:$0xff]  }
 0x25e   :  { %5406 = vmatpush1.bf16.msra.mxu1 %v13521_v55  ;;  %v5073_v63 = vpop.f32.mrf.mxu0  ;;  %5366 = vmatprep.subr.bf16.mxu0 %v13526_v56  ;;  %v13592_v55 = vld [vmem:[#allocation14 + $0x3dc] ss:$48 sps:$4 sm:$0xff]   ;;  %v13590_v57 = vld [vmem:[#allocation14 + $0x3d8] ss:$48 sps:$4 sm:$0xff]  }
 0x25f   :  { %v5114_v11 = vpop.f32.mrf.mxu1  ;;  %5407 = vmatprep.subr.bf16.mxu1 %v13529_v58  ;;  %v13595_v56 = vld [vmem:[#allocation14 + $0x9dc] ss:$48 sps:$4 sm:$0xff]   ;;  %v13593_v58 = vld [vmem:[#allocation14 + $0x9d8] ss:$48 sps:$4 sm:$0xff]  }
 0x260   :  { %v13601_v61 = vld [vmem:[#allocation14 + $0x97c] ss:$48 sps:$4 sm:$0xff]   ;;  %v13599_v63 = vld [vmem:[#allocation14 + $0x978] ss:$48 sps:$4 sm:$0xff]  }
 0x261   :  { %5367 = vmatpush1.bf16.msra.mxu0 %v13524_v62  ;;  %v13596_v62 = vld [vmem:[#allocation14 + $0x378] ss:$48 sps:$4 sm:$0xff]  }
 0x262   :  { %5408 = vmatpush1.bf16.msra.mxu1 %v13527_v1  ;;  %5368 = vmatprep.subr.bf16.mxu0 %v13532_v2  ;;  %v13604_v1 = vld [vmem:[#allocation14 + $0x31c] ss:$48 sps:$4 sm:$0xff]   ;;  %v13602_v11 = vld [vmem:[#allocation14 + $0x318] ss:$48 sps:$4 sm:$0xff]  }
 0x263   :  { %5409 = vmatprep.subr.bf16.mxu1 %v13535_v12  ;;  %v13607_v2 = vld [vmem:[#allocation14 + $0x91c] ss:$48 sps:$4 sm:$0xff]   ;;  %v13605_v12 = vld [vmem:[#allocation14 + $0x918] ss:$48 sps:$4 sm:$0xff]  }
 0x265   :  { %5369 = vmatpush1.bf16.msra.mxu0 %v13530_v14  ;;  %v13610_v14 = vld [vmem:[#allocation14 + $0xebc] ss:$48 sps:$4 sm:$0xff]  }
 0x266   :  { %5410 = vmatpush1.bf16.msra.mxu1 %v13533_v15  ;;  %5370 = vmatprep.subr.bf16.mxu0 %v13538_v16  ;;  %v13613_v15 = vld [vmem:[#allocation14 + $0x14bc] ss:$48 sps:$4 sm:$0xff]   ;;  %v13608_v16 = vld [vmem:[#allocation14 + $0xeb8] ss:$48 sps:$4 sm:$0xff]  }
 0x267   :  { %5411 = vmatprep.subr.bf16.mxu1 %v13541_v18  ;;  %v13611_v18 = vld [vmem:[#allocation14 + $0x14b8] ss:$48 sps:$4 sm:$0xff]  }
 0x269   :  { %5371 = vmatpush1.bf16.msra.mxu0 %v13536_v19  ;;  %v13616_v19 = vld [vmem:[#allocation14 + $0xe5c] ss:$48 sps:$4 sm:$0xff]  }
 0x26a   :  { %5412 = vmatpush1.bf16.msra.mxu1 %v13539_v20  ;;  %5372 = vmatprep.subr.bf16.mxu0 %v13544_v21  ;;  %v13619_v21 = vld [vmem:[#allocation14 + $0x145c] ss:$48 sps:$4 sm:$0xff]  }
 0x26b   :  { %5413 = vmatprep.subr.bf16.mxu1 %v13547_v22 }
 0x26d   :  { %5373 = vmatpush1.bf16.msra.mxu0 %v13542_v4 }
 0x26e   :  { %5414 = vmatpush1.bf16.msra.mxu1 %v13545_v24  ;;  %5374 = vmatprep.subr.bf16.mxu0 %v13550_v6  ;;  %v13614_v24 = vld [vmem:[#allocation14 + $0xe58] ss:$48 sps:$4 sm:$0xff]  }
 0x26f   :  { %5415 = vmatprep.subr.bf16.mxu1 %v13553_v29  ;;  %v13617_v29 = vld [vmem:[#allocation14 + $0x1458] ss:$48 sps:$4 sm:$0xff]  }
 0x271   :  { %5375 = vmatpush1.bf16.msra.mxu0 %v13548_v26  ;;  %v13622_v26 = vld [vmem:[#allocation14 + $0xdfc] ss:$48 sps:$4 sm:$0xff]  }
 0x272   :  { %5416 = vmatpush1.bf16.msra.mxu1 %v13551_v27  ;;  %5376 = vmatprep.subr.bf16.mxu0 %v13556_v31 }
 0x273   :  { %5417 = vmatprep.subr.bf16.mxu1 %v13559_v32 }
 0x275   :  { %5377 = vmatpush1.bf16.msra.mxu0 %v13554_v33 }
 0x276   :  { %5418 = vmatpush1.bf16.msra.mxu1 %v13557_v34  ;;  %5378 = vmatprep.subr.bf16.mxu0 %v13562_v35 }
 0x277   :  { %5419 = vmatprep.subr.bf16.mxu1 %v13565_v36  ;;  %v13620_v36 = vld [vmem:[#allocation14 + $0xdf8] ss:$48 sps:$4 sm:$0xff]  }
 0x279   :  { %5379 = vmatpush2.bf16.msra.mxu0 %v13560_v38 }
 0x27a   :  { %5420 = vmatpush2.bf16.msra.mxu1 %v13563_v7  ;;  %5380 = vmatprep.subr.bf16.mxu0 %v13568_v8  ;;  %v13623_v7 = vld [vmem:[#allocation14 + $0x13f8] ss:$48 sps:$4 sm:$0xff]   ;;  %v13628_v8 = vld [vmem:[#allocation14 + $0xd9c] ss:$48 sps:$4 sm:$0xff]  }
 0x27b   :  { %5421 = vmatprep.subr.bf16.mxu1 %v13571_v0 }
 0x27d   :  { %5381 = vmatpush2.bf16.msra.mxu0 %v13566_v42  ;;  %v13631_v42 = vld [vmem:[#allocation14 + $0x139c] ss:$48 sps:$4 sm:$0xff]  }
 0x27e   :  { %5422 = vmatpush2.bf16.msra.mxu1 %v13569_v43  ;;  %5382 = vmatprep.subr.bf16.mxu0 %v13574_v44  ;;  %v13629_v43 = vld [vmem:[#allocation14 + $0x1398] ss:$48 sps:$4 sm:$0xff]   ;;  %v13634_v44 = vld [vmem:[#allocation14 + $0xd3c] ss:$48 sps:$4 sm:$0xff]  }
 0x27f   :  { %5423 = vmatprep.subr.bf16.mxu1 %v13577_v25  ;;  %v13637_v25 = vld [vmem:[#allocation14 + $0x133c] ss:$48 sps:$4 sm:$0xff]  }
 0x281   :  { %5383 = vmatpush2.bf16.msra.mxu0 %v13572_v3  ;;  %v13632_v3 = vld [vmem:[#allocation14 + $0xd38] ss:$48 sps:$4 sm:$0xff]  }
 0x282   :  { %5424 = vmatpush2.bf16.msra.mxu1 %v13575_v45  ;;  %5384 = vmatprep.subr.bf16.mxu0 %v13580_v46  ;;  %v13635_v45 = vld [vmem:[#allocation14 + $0x1338] ss:$48 sps:$4 sm:$0xff]   ;;  %v13640_v46 = vld [vmem:[#allocation14 + $0xcdc] ss:$48 sps:$4 sm:$0xff]  }
 0x283   :  { %5425 = vmatprep.subr.bf16.mxu1 %v13583_v47  ;;  %v13643_v47 = vld [vmem:[#allocation14 + $0x12dc] ss:$48 sps:$4 sm:$0xff]  }
 0x285   :  { %5385 = vmatpush2.bf16.msra.mxu0 %v13578_v48  ;;  %v13638_v48 = vld [vmem:[#allocation14 + $0xcd8] ss:$48 sps:$4 sm:$0xff]  }
 0x286   :  { %5426 = vmatpush2.bf16.msra.mxu1 %v13581_v49  ;;  %5386 = vmatprep.subr.bf16.mxu0 %v13586_v50  ;;  %v13641_v49 = vld [vmem:[#allocation14 + $0x12d8] ss:$48 sps:$4 sm:$0xff]   ;;  %v13646_v50 = vld [vmem:[#allocation14 + $0xc7c] ss:$48 sps:$4 sm:$0xff]  }
 0x287   :  { %5427 = vmatprep.subr.bf16.mxu1 %v13589_v51  ;;  %v13649_v51 = vld [vmem:[#allocation14 + $0x127c] ss:$48 sps:$4 sm:$0xff]  }
 0x289   :  { %5387 = vmatpush2.bf16.msra.mxu0 %v13584_v52  ;;  %v13644_v52 = vld [vmem:[#allocation14 + $0xc78] ss:$48 sps:$4 sm:$0xff]  }
 0x28a   :  { %5428 = vmatpush2.bf16.msra.mxu1 %v13587_v54  ;;  %5388 = vmatprep.subr.bf16.mxu0 %v13592_v55  ;;  %v13647_v54 = vld [vmem:[#allocation14 + $0x1278] ss:$48 sps:$4 sm:$0xff]   ;;  %v13652_v55 = vld [vmem:[#allocation14 + $0xc1c] ss:$48 sps:$4 sm:$0xff]  }
 0x28b   :  { %5429 = vmatprep.subr.bf16.mxu1 %v13595_v56  ;;  %v13655_v56 = vld [vmem:[#allocation14 + $0x121c] ss:$48 sps:$4 sm:$0xff]  }
 0x28d   :  { %5389 = vmatpush2.bf16.msra.mxu0 %v13590_v57  ;;  %v13650_v57 = vld [vmem:[#allocation14 + $0xc18] ss:$48 sps:$4 sm:$0xff]  }
 0x28e   :  { %5430 = vmatpush2.bf16.msra.mxu1 %v13593_v58  ;;  %5390 = vmatprep.subr.bf16.mxu0 %v13598_v60  ;;  %v13653_v58 = vld [vmem:[#allocation14 + $0x1218] ss:$48 sps:$4 sm:$0xff]   ;;  %v13658_v60 = vld [vmem:[#allocation14 + $0x11bc] ss:$48 sps:$4 sm:$0xff]  }
 0x28f   :  { %5431 = vmatprep.subr.bf16.mxu1 %v13601_v61  ;;  %v13661_v61 = vld [vmem:[#allocation14 + $0x17bc] ss:$48 sps:$4 sm:$0xff]  }
 0x291   :  { %5391 = vmatpush2.bf16.msra.mxu0 %v13596_v62  ;;  %v13656_v62 = vld [vmem:[#allocation14 + $0x11b8] ss:$48 sps:$4 sm:$0xff]  }
 0x292   :  { %5432 = vmatpush2.bf16.msra.mxu1 %v13599_v63  ;;  %5392 = vmatprep.subr.bf16.mxu0 %v13604_v1  ;;  %v13659_v63 = vld [vmem:[#allocation14 + $0x17b8] ss:$48 sps:$4 sm:$0xff]   ;;  %v13664_v1 = vld [vmem:[#allocation14 + $0x115c] ss:$48 sps:$4 sm:$0xff]  }
 0x293   :  { %5433 = vmatprep.subr.bf16.mxu1 %v13607_v2  ;;  %v13667_v2 = vld [vmem:[#allocation14 + $0x175c] ss:$48 sps:$4 sm:$0xff]  }
 0x295   :  { %5393 = vmatpush2.bf16.msra.mxu0 %v13602_v11  ;;  %v13662_v11 = vld [vmem:[#allocation14 + $0x1158] ss:$48 sps:$4 sm:$0xff]  }
 0x296   :  { %5434 = vmatpush2.bf16.msra.mxu1 %v13605_v12  ;;  %5444 = vmatprep.subr.bf16.mxu0 %v13610_v14  ;;  %v13665_v12 = vld [vmem:[#allocation14 + $0x1758] ss:$48 sps:$4 sm:$0xff]   ;;  %v13670_v14 = vld [vmem:[#allocation14 + $0x10fc] ss:$48 sps:$4 sm:$0xff]  }
 0x297   :  { %5485 = vmatprep.subr.bf16.mxu1 %v13613_v15  ;;  %v13673_v15 = vld [vmem:[#allocation14 + $0x16fc] ss:$48 sps:$4 sm:$0xff]  }
 0x298   :  { %v5150_v20 = vpop.f32.mrf.mxu0  ;;  %5395 = vmatmul.mubr.bf16.vlgmr.msra.gmra.mxu0 %v14486_v17 }
 0x299   :  { %v5151_v22 = vadd.f32 %v5150_v20, %v14539_v53  ;;  %v5191_v4 = vpop.f32.mrf.mxu1  ;;  %5436 = vmatmul.mubr.bf16.vlgmr.msra.gmra.mxu1 %v14488_v23  ;;  %5445 = vmatpush1.bf16.msra.mxu0 %v13608_v16  ;;  %v13625_v53 = vld [vmem:[#allocation14 + $0x13fc] ss:$48 sps:$4 sm:$0xff]   ;;  %v13668_v16 = vld [vmem:[#allocation14 + $0x10f8] ss:$48 sps:$4 sm:$0xff]  }
 0x29a   :  { %5476 = vmatprep.mubr.bf16.mxu0 %v14494_v28  ;;  %5486 = vmatpush1.bf16.msra.mxu1 %v13611_v18  ;;  %v5152_v6 = vpop.f32.mrf.mxu0  ;;  %v13671_v18 = vld [vmem:[#allocation14 + $0x16f8] ss:$48 sps:$4 sm:$0xff]   ;;  %v13679_v20 = vld [vmem:[#allocation14 + $0x169c] ss:$48 sps:$4 sm:$0xff]  }
 0x29b   :  { %v14549_v27 = vadd.f32 %v5191_v4, %v5151_v22  ;;  %5517 = vmatprep.mubr.bf16.mxu1 %v14496_v30  ;;  %v5153_v31 = vadd.f32 %v5152_v6, %v14543_v59  ;;  %v5193_v32 = vpop.f32.mrf.mxu1  ;;  %5446 = vmatprep.subr.bf16.mxu0 %v13616_v19  ;;  %v13626_v59 = vld [vmem:[#allocation14 + $0xd98] ss:$48 sps:$4 sm:$0xff]   ;;  %v13676_v19 = vld [vmem:[#allocation14 + $0x109c] ss:$48 sps:$4 sm:$0xff]  }
 0x29c   :  { %v5154_v33 = vpop.f32.mrf.mxu0  ;;  %5487 = vmatprep.subr.bf16.mxu1 %v13619_v21  ;;  %v13674_v21 = vld [vmem:[#allocation14 + $0x1098] ss:$48 sps:$4 sm:$0xff]   ;;  %v13682_v4 = vld [vmem:[#allocation14 + $0x103c] ss:$48 sps:$4 sm:$0xff]  }
 0x29d   :  { %v14553_v34 = vadd.f32 %v5193_v32, %v5153_v31  ;;  %v5195_v35 = vpop.f32.mrf.mxu1  ;;  %5447 = vmatpush1.bf16.msra.mxu0 %v13614_v24  ;;  %v13677_v22 = vld [vmem:[#allocation14 + $0x1698] ss:$48 sps:$4 sm:$0xff]   ;;  %v13685_v24 = vld [vmem:[#allocation14 + $0x163c] ss:$48 sps:$4 sm:$0xff]  }
 0x29e   :  { %5488 = vmatpush1.bf16.msra.mxu1 %v13617_v29  ;;  %v5155_v38 = vpop.f32.mrf.mxu0  ;;  %5448 = vmatprep.subr.bf16.mxu0 %v13622_v26  ;;  %v13680_v6 = vld [vmem:[#allocation14 + $0x1038] ss:$48 sps:$4 sm:$0xff]   ;;  %v13688_v26 = vld [vmem:[#allocation14 + $0xfdc] ss:$48 sps:$4 sm:$0xff]  }
 0x29f   :  { %v5196_v0 = vpop.f32.mrf.mxu1  ;;  %5489 = vmatprep.subr.bf16.mxu1 %v13625_v53  ;;  %v13683_v29 = vld [vmem:[#allocation14 + $0x1638] ss:$48 sps:$4 sm:$0xff]   ;;  %v13691_v31 = vld [vmem:[#allocation14 + $0x15dc] ss:$48 sps:$4 sm:$0xff]  }
 0x2a0   :  { %v13686_v32 = vld [vmem:[#allocation14 + $0xfd8] ss:$48 sps:$4 sm:$0xff]   ;;  %v13694_v33 = vld [vmem:[#allocation14 + $0xf7c] ss:$48 sps:$4 sm:$0xff]  }
 0x2a1   :  { %5449 = vmatpush1.bf16.msra.mxu0 %v13620_v36  ;;  %v13689_v53 = vld [vmem:[#allocation14 + $0x15d8] ss:$48 sps:$4 sm:$0xff]   ;;  %v13697_v35 = vld [vmem:[#allocation14 + $0x157c] ss:$48 sps:$4 sm:$0xff]  }
 0x2a2   :  { %5490 = vmatpush1.bf16.msra.mxu1 %v13623_v7  ;;  %5450 = vmatprep.subr.bf16.mxu0 %v13628_v8  ;;  %v13692_v36 = vld [vmem:[#allocation14 + $0xf78] ss:$48 sps:$4 sm:$0xff]   ;;  %v13700_v7 = vld [vmem:[#allocation14 + $0xf1c] ss:$48 sps:$4 sm:$0xff]  }
 0x2a3   :  { %5491 = vmatprep.subr.bf16.mxu1 %v13631_v42  ;;  %v13695_v38 = vld [vmem:[#allocation14 + $0x1578] ss:$48 sps:$4 sm:$0xff]   ;;  %v13703_v8 = vld [vmem:[#allocation14 + $0x151c] ss:$48 sps:$4 sm:$0xff]  }
 0x2a4   :  { %v13698_v0 = vld [vmem:[#allocation14 + $0xf18] ss:$48 sps:$4 sm:$0xff]  }
 0x2a5   :  { %5451 = vmatpush1.bf16.msra.mxu0 %v13626_v59  ;;  %v13701_v42 = vld [vmem:[#allocation14 + $0x1518] ss:$48 sps:$4 sm:$0xff]   ;;  %v13706_v59 = vld [vmem:[#allocation14 + $0x2c4] ss:$48 sps:$4 sm:$0xff]  }
 0x2a6   :  { %5492 = vmatpush1.bf16.msra.mxu1 %v13629_v43  ;;  %5452 = vmatprep.subr.bf16.mxu0 %v13634_v44  ;;  %v13709_v43 = vld [vmem:[#allocation14 + $0x8c4] ss:$48 sps:$4 sm:$0xff]   ;;  %v13704_v44 = vld [vmem:[#allocation14 + $0x2c0] ss:$48 sps:$4 sm:$0xff]  }
 0x2a7   :  { %5493 = vmatprep.subr.bf16.mxu1 %v13637_v25  ;;  %v13707_v25 = vld [vmem:[#allocation14 + $0x8c0] ss:$48 sps:$4 sm:$0xff]  }
 0x2a9   :  { %5453 = vmatpush1.bf16.msra.mxu0 %v13632_v3  ;;  %v13712_v3 = vld [vmem:[#allocation14 + $0x264] ss:$48 sps:$4 sm:$0xff]  }
 0x2aa   :  { %5494 = vmatpush1.bf16.msra.mxu1 %v13635_v45  ;;  %5454 = vmatprep.subr.bf16.mxu0 %v13640_v46  ;;  %v13715_v46 = vld [vmem:[#allocation14 + $0x864] ss:$48 sps:$4 sm:$0xff]  }
 0x2ab   :  { %5495 = vmatprep.subr.bf16.mxu1 %v13643_v47 }
 0x2ad   :  { %5455 = vmatpush1.bf16.msra.mxu0 %v13638_v48  ;;  %v13710_v48 = vld [vmem:[#allocation14 + $0x260] ss:$48 sps:$4 sm:$0xff]  }
 0x2ae   :  { %5496 = vmatpush1.bf16.msra.mxu1 %v13641_v49  ;;  %5456 = vmatprep.subr.bf16.mxu0 %v13646_v50  ;;  %v13713_v50 = vld [vmem:[#allocation14 + $0x860] ss:$48 sps:$4 sm:$0xff]  }
 0x2af   :  { %5497 = vmatprep.subr.bf16.mxu1 %v13649_v51  ;;  %v13718_v51 = vld [vmem:[#allocation14 + $0x204] ss:$48 sps:$4 sm:$0xff]  }
 0x2b1   :  { %5457 = vmatpush1.bf16.msra.mxu0 %v13644_v52 }
 0x2b2   :  { %5498 = vmatpush1.bf16.msra.mxu1 %v13647_v54  ;;  %5458 = vmatprep.subr.bf16.mxu0 %v13652_v55  ;;  %v13721_v54 = vld [vmem:[#allocation14 + $0x804] ss:$48 sps:$4 sm:$0xff]  }
 0x2b3   :  { %5499 = vmatprep.subr.bf16.mxu1 %v13655_v56 }
 0x2b5   :  { %5459 = vmatpush1.bf16.msra.mxu0 %v13650_v57 }
 0x2b6   :  { %5500 = vmatpush1.bf16.msra.mxu1 %v13653_v58  ;;  %5460 = vmatprep.subr.bf16.mxu0 %v13658_v60  ;;  %v13716_v58 = vld [vmem:[#allocation14 + $0x200] ss:$48 sps:$4 sm:$0xff]  }
 0x2b7   :  { %5501 = vmatprep.subr.bf16.mxu1 %v13661_v61  ;;  %v13719_v61 = vld [vmem:[#allocation14 + $0x800] ss:$48 sps:$4 sm:$0xff]  }
 0x2b9   :  { %5461 = vmatpush2.bf16.msra.mxu0 %v13656_v62  ;;  %v13724_v62 = vld [vmem:[#allocation14 + $0x1a4] ss:$48 sps:$4 sm:$0xff]  }
 0x2ba   :  { %5502 = vmatpush2.bf16.msra.mxu1 %v13659_v63  ;;  %5462 = vmatprep.subr.bf16.mxu0 %v13664_v1  ;;  %v13727_v1 = vld [vmem:[#allocation14 + $0x7a4] ss:$48 sps:$4 sm:$0xff]  }
 0x2bb   :  { %5503 = vmatprep.subr.bf16.mxu1 %v13667_v2  ;;  %v13722_v2 = vld [vmem:[#allocation14 + $0x1a0] ss:$48 sps:$4 sm:$0xff]  }
 0x2bd   :  { %5463 = vmatpush2.bf16.msra.mxu0 %v13662_v11  ;;  %v13725_v11 = vld [vmem:[#allocation14 + $0x7a0] ss:$48 sps:$4 sm:$0xff]  }
 0x2be   :  { %5504 = vmatpush2.bf16.msra.mxu1 %v13665_v12  ;;  %5464 = vmatprep.subr.bf16.mxu0 %v13670_v14  ;;  %v13730_v12 = vld [vmem:[#allocation14 + $0x144] ss:$48 sps:$4 sm:$0xff]  }
 0x2bf   :  { %5505 = vmatprep.subr.bf16.mxu1 %v13673_v15  ;;  %v13733_v14 = vld [vmem:[#allocation14 + $0x744] ss:$48 sps:$4 sm:$0xff]   ;;  %v13728_v15 = vld [vmem:[#allocation14 + $0x140] ss:$48 sps:$4 sm:$0xff]  }
 0x2c1   :  { %5465 = vmatpush2.bf16.msra.mxu0 %v13668_v16  ;;  %v13731_v16 = vld [vmem:[#allocation14 + $0x740] ss:$48 sps:$4 sm:$0xff]  }
 0x2c2   :  { %5506 = vmatpush2.bf16.msra.mxu1 %v13671_v18  ;;  %5466 = vmatprep.subr.bf16.mxu0 %v13676_v19  ;;  %v13736_v18 = vld [vmem:[#allocation14 + $0xe4] ss:$48 sps:$4 sm:$0xff]  }
 0x2c3   :  { %5507 = vmatprep.subr.bf16.mxu1 %v13679_v20  ;;  %v13739_v19 = vld [vmem:[#allocation14 + $0x6e4] ss:$48 sps:$4 sm:$0xff]   ;;  %v13734_v20 = vld [vmem:[#allocation14 + $0xe0] ss:$48 sps:$4 sm:$0xff]  }
 0x2c5   :  { %5467 = vmatpush2.bf16.msra.mxu0 %v13674_v21  ;;  %v13737_v21 = vld [vmem:[#allocation14 + $0x6e0] ss:$48 sps:$4 sm:$0xff]  }
 0x2c6   :  { %5508 = vmatpush2.bf16.msra.mxu1 %v13677_v22  ;;  %5468 = vmatprep.subr.bf16.mxu0 %v13682_v4  ;;  %v13742_v22 = vld [vmem:[#allocation14 + $0x84] ss:$48 sps:$4 sm:$0xff]  }
 0x2c7   :  { %5509 = vmatprep.subr.bf16.mxu1 %v13685_v24  ;;  %v13745_v4 = vld [vmem:[#allocation14 + $0x684] ss:$48 sps:$4 sm:$0xff]   ;;  %v13740_v24 = vld [vmem:[#allocation14 + $0x80] ss:$48 sps:$4 sm:$0xff]  }
 0x2c9   :  { %5469 = vmatpush2.bf16.msra.mxu0 %v13680_v6  ;;  %v13743_v6 = vld [vmem:[#allocation14 + $0x680] ss:$48 sps:$4 sm:$0xff]  }
 0x2ca   :  { %5510 = vmatpush2.bf16.msra.mxu1 %v13683_v29  ;;  %5470 = vmatprep.subr.bf16.mxu0 %v13688_v26  ;;  %v13748_v29 = vld [vmem:[#allocation14 + $0x24] ss:$48 sps:$4 sm:$0xff]  }
 0x2cb   :  { %5511 = vmatprep.subr.bf16.mxu1 %v13691_v31  ;;  %v13751_v26 = vld [vmem:[#allocation14 + $0x624] ss:$48 sps:$4 sm:$0xff]   ;;  %v13746_v31 = vld [vmem:[#allocation14 + $0x20] ss:$48 sps:$4 sm:$0xff]  }
 0x2cd   :  { %5471 = vmatpush2.bf16.msra.mxu0 %v13686_v32  ;;  %v13749_v32 = vld [vmem:[#allocation14 + $0x620] ss:$48 sps:$4 sm:$0xff]  }
 0x2ce   :  { %5512 = vmatpush2.bf16.msra.mxu1 %v13689_v53  ;;  %5472 = vmatprep.subr.bf16.mxu0 %v13694_v33  ;;  %v13754_v53 = vld [vmem:[#allocation14 + $0x5c4] ss:$48 sps:$4 sm:$0xff]  }
 0x2cf   :  { %5513 = vmatprep.subr.bf16.mxu1 %v13697_v35  ;;  %v13757_v33 = vld [vmem:[#allocation14 + $0xbc4] ss:$48 sps:$4 sm:$0xff]   ;;  %v13752_v35 = vld [vmem:[#allocation14 + $0x5c0] ss:$48 sps:$4 sm:$0xff]  }
 0x2d1   :  { %5473 = vmatpush2.bf16.msra.mxu0 %v13692_v36  ;;  %v13755_v36 = vld [vmem:[#allocation14 + $0xbc0] ss:$48 sps:$4 sm:$0xff]  }
 0x2d2   :  { %5514 = vmatpush2.bf16.msra.mxu1 %v13695_v38  ;;  %5474 = vmatprep.subr.bf16.mxu0 %v13700_v7  ;;  %v13760_v38 = vld [vmem:[#allocation14 + $0x564] ss:$48 sps:$4 sm:$0xff]  }
 0x2d3   :  { %5515 = vmatprep.subr.bf16.mxu1 %v13703_v8  ;;  %v13763_v7 = vld [vmem:[#allocation14 + $0xb64] ss:$48 sps:$4 sm:$0xff]   ;;  %v13758_v8 = vld [vmem:[#allocation14 + $0x560] ss:$48 sps:$4 sm:$0xff]  }
 0x2d5   :  { %5475 = vmatpush2.bf16.msra.mxu0 %v13698_v0  ;;  %v13761_v0 = vld [vmem:[#allocation14 + $0xb60] ss:$48 sps:$4 sm:$0xff]  }
 0x2d6   :  { %5516 = vmatpush2.bf16.msra.mxu1 %v13701_v42  ;;  %5526 = vmatprep.subr.bf16.mxu0 %v13706_v59  ;;  %v13766_v42 = vld [vmem:[#allocation14 + $0x504] ss:$48 sps:$4 sm:$0xff]  }
 0x2d7   :  { %5567 = vmatprep.subr.bf16.mxu1 %v13709_v43  ;;  %v13769_v59 = vld [vmem:[#allocation14 + $0xb04] ss:$48 sps:$4 sm:$0xff]   ;;  %v13764_v43 = vld [vmem:[#allocation14 + $0x500] ss:$48 sps:$4 sm:$0xff]  }
 0x2d8   :  { %v14555_v45 = vpop.f32.mrf.mxu0  ;;  %5477 = vmatmul.mubr.bf16.vlgmr.msra.gmra.mxu0 %v14502_v40 }
 0x2d9   :  { %v14558_v47 = vpop.f32.mrf.mxu1  ;;  %5518 = vmatmul.mubr.bf16.vlgmr.msra.gmra.mxu1 %v14506_v41  ;;  %5527 = vmatpush1.bf16.msra.mxu0 %v13704_v44  ;;  %v13767_v44 = vld [vmem:[#allocation14 + $0xb00] ss:$48 sps:$4 sm:$0xff]  }
 0x2da   :  { %5558 = vmatprep.mubr.bf16.mxu0 %v14482_v5  ;;  %5568 = vmatpush1.bf16.msra.mxu1 %v13707_v25  ;;  %v5234_v49 = vpop.f32.mrf.mxu0  ;;  %v13772_v25 = vld [vmem:[#allocation14 + $0x4a4] ss:$48 sps:$4 sm:$0xff]  }
 0x2db   :  { %5599 = vmatprep.mubr.bf16.mxu1 %v14484_v9  ;;  %v5275_v52 = vpop.f32.mrf.mxu1  ;;  %5528 = vmatprep.subr.bf16.mxu0 %v13712_v3  ;;  %v13775_v3 = vld [vmem:[#allocation14 + $0xaa4] ss:$48 sps:$4 sm:$0xff]  }
 0x2dc   :  { %v14563_v55 = vadd.f32 %v5275_v52, %v5234_v49  ;;  %v5236_v56 = vpop.f32.mrf.mxu0  ;;  %5569 = vmatprep.subr.bf16.mxu1 %v13715_v46  ;;  %v13770_v46 = vld [vmem:[#allocation14 + $0x4a0] ss:$48 sps:$4 sm:$0xff]   ;;  %v13778_v49 = vld [vmem:[#allocation14 + $0x444] ss:$48 sps:$4 sm:$0xff]  }
 0x2dd   :  { %v5277_v57 = vpop.f32.mrf.mxu1  ;;  %5529 = vmatpush1.bf16.msra.mxu0 %v13710_v48  ;;  %v13773_v48 = vld [vmem:[#allocation14 + $0xaa0] ss:$48 sps:$4 sm:$0xff]   ;;  %v13787_v56 = vld [vmem:[#allocation14 + $0x9e4] ss:$48 sps:$4 sm:$0xff]  }
 0x2de   :  { %5570 = vmatpush1.bf16.msra.mxu1 %v13713_v50  ;;  %v5237_v60 = vpop.f32.mrf.mxu0  ;;  %5530 = vmatprep.subr.bf16.mxu0 %v13718_v51  ;;  %v13781_v50 = vld [vmem:[#allocation14 + $0xa44] ss:$48 sps:$4 sm:$0xff]   ;;  %v13776_v51 = vld [vmem:[#allocation14 + $0x440] ss:$48 sps:$4 sm:$0xff]  }
 0x2df   :  { %v5278_v63 = vpop.f32.mrf.mxu1  ;;  %5571 = vmatprep.subr.bf16.mxu1 %v13721_v54  ;;  %v13779_v52 = vld [vmem:[#allocation14 + $0xa40] ss:$48 sps:$4 sm:$0xff]   ;;  %v13784_v54 = vld [vmem:[#allocation14 + $0x3e4] ss:$48 sps:$4 sm:$0xff]  }
 0x2e0   :  { %v13782_v57 = vld [vmem:[#allocation14 + $0x3e0] ss:$48 sps:$4 sm:$0xff]   ;;  %v13790_v60 = vld [vmem:[#allocation14 + $0x384] ss:$48 sps:$4 sm:$0xff]  }
 0x2e1   :  { %5531 = vmatpush1.bf16.msra.mxu0 %v13716_v58  ;;  %v13785_v58 = vld [vmem:[#allocation14 + $0x9e0] ss:$48 sps:$4 sm:$0xff]  }
 0x2e2   :  { %5572 = vmatpush1.bf16.msra.mxu1 %v13719_v61  ;;  %5532 = vmatprep.subr.bf16.mxu0 %v13724_v62  ;;  %v13793_v61 = vld [vmem:[#allocation14 + $0x984] ss:$48 sps:$4 sm:$0xff]   ;;  %v13788_v62 = vld [vmem:[#allocation14 + $0x380] ss:$48 sps:$4 sm:$0xff]  }
 0x2e3   :  { %5573 = vmatprep.subr.bf16.mxu1 %v13727_v1  ;;  %v13791_v63 = vld [vmem:[#allocation14 + $0x980] ss:$48 sps:$4 sm:$0xff]   ;;  %v13796_v1 = vld [vmem:[#allocation14 + $0x324] ss:$48 sps:$4 sm:$0xff]  }
 0x2e5   :  { %5533 = vmatpush1.bf16.msra.mxu0 %v13722_v2  ;;  %v13799_v2 = vld [vmem:[#allocation14 + $0x924] ss:$48 sps:$4 sm:$0xff]  }
 0x2e6   :  { %5574 = vmatpush1.bf16.msra.mxu1 %v13725_v11  ;;  %5534 = vmatprep.subr.bf16.mxu0 %v13730_v12  ;;  %v13794_v11 = vld [vmem:[#allocation14 + $0x320] ss:$48 sps:$4 sm:$0xff]  }
 0x2e7   :  { %5575 = vmatprep.subr.bf16.mxu1 %v13733_v14  ;;  %v13797_v12 = vld [vmem:[#allocation14 + $0x920] ss:$48 sps:$4 sm:$0xff]   ;;  %v13802_v14 = vld [vmem:[#allocation14 + $0xec4] ss:$48 sps:$4 sm:$0xff]  }
 0x2e9   :  { %5535 = vmatpush1.bf16.msra.mxu0 %v13728_v15  ;;  %v13805_v15 = vld [vmem:[#allocation14 + $0x14c4] ss:$48 sps:$4 sm:$0xff]  }
 0x2ea   :  { %5576 = vmatpush1.bf16.msra.mxu1 %v13731_v16  ;;  %5536 = vmatprep.subr.bf16.mxu0 %v13736_v18  ;;  %v13800_v16 = vld [vmem:[#allocation14 + $0xec0] ss:$48 sps:$4 sm:$0xff]  }
 0x2eb   :  { %5577 = vmatprep.subr.bf16.mxu1 %v13739_v19  ;;  %v13803_v18 = vld [vmem:[#allocation14 + $0x14c0] ss:$48 sps:$4 sm:$0xff]   ;;  %v5274_v19 = vadd.f32 %v14558_v47, %v14555_v45 }
 0x2ec   :  { %v13809_v47 = vld [vmem:[#allocation14 + $0x1460] ss:$48 sps:$4 sm:$0xff]  }
 0x2ed   :  { %5537 = vmatpush1.bf16.msra.mxu0 %v13734_v20  ;;  %v13808_v20 = vld [vmem:[#allocation14 + $0xe64] ss:$48 sps:$4 sm:$0xff]  }
 0x2ee   :  { %5578 = vmatpush1.bf16.msra.mxu1 %v13737_v21  ;;  %5538 = vmatprep.subr.bf16.mxu0 %v13742_v22  ;;  %v5854_v21 = vpack.c.bf16 %v14532_v37, %v14532_v37 }
 0x2ef   :  { %5579 = vmatprep.subr.bf16.mxu1 %v13745_v4  ;;  %v13811_v4 = vld [vmem:[#allocation14 + $0x1464] ss:$48 sps:$4 sm:$0xff]  }
 0x2f1   :  { %5539 = vmatpush1.bf16.msra.mxu0 %v13740_v24 }
 0x2f2   :  { %5580 = vmatpush1.bf16.msra.mxu1 %v13743_v6  ;;  %5540 = vmatprep.subr.bf16.mxu0 %v13748_v29  ;;  %v13806_v29 = vld [vmem:[#allocation14 + $0xe60] ss:$48 sps:$4 sm:$0xff]  }
 0x2f3   :  { %5581 = vmatprep.subr.bf16.mxu1 %v13751_v26  ;;  %v5855_v26 = vpack.c.bf16 %v14535_v39, %v14535_v39 }
 0x2f5   :  { %5541 = vmatpush1.bf16.msra.mxu0 %v13746_v31  ;;  %v13814_v31 = vld [vmem:[#allocation14 + $0xe04] ss:$48 sps:$4 sm:$0xff]  }
 0x2f6   :  { %5582 = vmatpush1.bf16.msra.mxu1 %v13749_v32  ;;  %5542 = vmatprep.subr.bf16.mxu0 %v13754_v53 }
 0x2f7   :  { %5583 = vmatprep.subr.bf16.mxu1 %v13757_v33  ;;  %v13817_v33 = vld [vmem:[#allocation14 + $0x1404] ss:$48 sps:$4 sm:$0xff]  }
 0x2f9   :  { %5543 = vmatpush2.bf16.msra.mxu0 %v13752_v35  ;;  %v5862_v35 = vunpack.c.l.bf16 %v5854_v21  ;;  %v13835_v21 = vld [vmem:[#allocation14 + $0x12e4] ss:$48 sps:$4 sm:$0xff]  }
 0x2fa   :  { %5584 = vmatpush2.bf16.msra.mxu1 %v13755_v36  ;;  %5544 = vmatprep.subr.bf16.mxu0 %v13760_v38  ;;  %v5880_v38 = vld [vmem:[#allocation9] sm:$0xff] }
 0x2fb   :  { %5585 = vmatprep.subr.bf16.mxu1 %v13763_v7 }
 0x2fd   :  { %5545 = vmatpush2.bf16.msra.mxu0 %v13758_v8 }
 0x2fe   :  { %5586 = vmatpush2.bf16.msra.mxu1 %v13761_v0  ;;  %5546 = vmatprep.subr.bf16.mxu0 %v13766_v42  ;;  %v13812_v0 = vld [vmem:[#allocation14 + $0xe00] ss:$48 sps:$4 sm:$0xff]   ;;  %v5863_v42 = vunpack.c.l.bf16 %v5855_v26 }
 0x2ff   :  { %5587 = vmatprep.subr.bf16.mxu1 %v13769_v59  ;;  %v5876_v59 = vld [vmem:[#allocation8] sm:$0xff] }
 0x300   :  { %v13839_v26 = vld [vmem:[#allocation14 + $0x1280] ss:$48 sps:$4 sm:$0xff]  }
 0x301   :  { %5547 = vmatpush2.bf16.msra.mxu0 %v13764_v43 }
 0x302   :  { %5588 = vmatpush2.bf16.msra.mxu1 %v13767_v44  ;;  %5548 = vmatprep.subr.bf16.mxu0 %v13772_v25  ;;  %v13815_v44 = vld [vmem:[#allocation14 + $0x1400] ss:$48 sps:$4 sm:$0xff]   ;;  %v13820_v25 = vld [vmem:[#allocation14 + $0xda4] ss:$48 sps:$4 sm:$0xff]  }
 0x303   :  { %5589 = vmatprep.subr.bf16.mxu1 %v13775_v3  ;;  %v5881_v3 = vld [vmem:[#allocation9 + $0x8] sm:$0xff] }
 0x305   :  { %5549 = vmatpush2.bf16.msra.mxu0 %v13770_v46 }
 0x306   :  { %5590 = vmatpush2.bf16.msra.mxu1 %v13773_v48  ;;  %5550 = vmatprep.subr.bf16.mxu0 %v13778_v49 }
 0x307   :  { %5591 = vmatprep.subr.bf16.mxu1 %v13781_v50  ;;  %v13823_v50 = vld [vmem:[#allocation14 + $0x13a4] ss:$48 sps:$4 sm:$0xff]  }
 0x309   :  { %5551 = vmatpush2.bf16.msra.mxu0 %v13776_v51  ;;  %v5902_v51 = vmul.f32 %v5880_v38, %v5862_v35 }
 0x30a   :  { %5592 = vmatpush2.bf16.msra.mxu1 %v13779_v52  ;;  %5552 = vmatprep.subr.bf16.mxu0 %v13784_v54 }
 0x30b   :  { %5593 = vmatprep.subr.bf16.mxu1 %v13787_v56  ;;  %v13818_v56 = vld [vmem:[#allocation14 + $0xda0] ss:$48 sps:$4 sm:$0xff]  }
 0x30d   :  { %5553 = vmatpush2.bf16.msra.mxu0 %v13782_v57  ;;  %v5886_v57 = vmul.f32 %v5876_v59, %v5862_v35  ;;  %v13851_v35 = vld [vmem:[#allocation14 + $0x17c0] ss:$48 sps:$4 sm:$0xff]  }
 0x30e   :  { %5594 = vmatpush2.bf16.msra.mxu1 %v13785_v58  ;;  %5554 = vmatprep.subr.bf16.mxu0 %v13790_v60 }
 0x30f   :  { %5595 = vmatprep.subr.bf16.mxu1 %v13793_v61  ;;  %v5903_v61 = vmul.f32 %v5881_v3, %v5863_v42 }
 0x311   :  { %5555 = vmatpush2.bf16.msra.mxu0 %v13788_v62  ;;  %v13821_v62 = vld [vmem:[#allocation14 + $0x13a0] ss:$48 sps:$4 sm:$0xff]  }
 0x312   :  { %5596 = vmatpush2.bf16.msra.mxu1 %v13791_v63  ;;  %5556 = vmatprep.subr.bf16.mxu0 %v13796_v1 }
 0x313   :  { %5597 = vmatprep.subr.bf16.mxu1 %v13799_v2 }
 0x315   :  { %5557 = vmatpush2.bf16.msra.mxu0 %v13794_v11 }
 0x316   :  { %5598 = vmatpush2.bf16.msra.mxu1 %v13797_v12  ;;  %5608 = vmatprep.subr.bf16.mxu0 %v13802_v14  ;;  %v13826_v12 = vld [vmem:[#allocation14 + $0xd44] ss:$48 sps:$4 sm:$0xff]  }
 0x317   :  { %5649 = vmatprep.subr.bf16.mxu1 %v13805_v15  ;;  %v13829_v14 = vld [vmem:[#allocation14 + $0x1344] ss:$48 sps:$4 sm:$0xff]   ;;  %v13824_v15 = vld [vmem:[#allocation14 + $0xd40] ss:$48 sps:$4 sm:$0xff]  }
 0x318   :  { %v5314_v22 = vpop.f32.mrf.mxu0  ;;  %5559 = vmatmul.mubr.bf16.vlgmr.msra.gmra.mxu0 %v14486_v17 }
 0x319   :  { %v5315_v24 = vadd.f32 %v5314_v22, %v5274_v19  ;;  %v5355_v6 = vpop.f32.mrf.mxu1  ;;  %5600 = vmatmul.mubr.bf16.vlgmr.msra.gmra.mxu1 %v14488_v23  ;;  %5609 = vmatpush1.bf16.msra.mxu0 %v13800_v16  ;;  %v13827_v19 = vld [vmem:[#allocation14 + $0x1340] ss:$48 sps:$4 sm:$0xff]  }
 0x31a   :  { %5640 = vmatprep.mubr.bf16.mxu0 %v14494_v28  ;;  %5650 = vmatpush1.bf16.msra.mxu1 %v13803_v18  ;;  %v5316_v45 = vpop.f32.mrf.mxu0  ;;  %v13830_v22 = vld [vmem:[#allocation14 + $0xce0] ss:$48 sps:$4 sm:$0xff]  }
 0x31b   :  { %v5356_v37 = vadd.f32 %v5355_v6, %v5315_v24  ;;  %5681 = vmatprep.mubr.bf16.mxu1 %v14496_v30  ;;  %v5317_v32 = vadd.f32 %v5316_v45, %v14563_v55  ;;  %v5357_v53 = vpop.f32.mrf.mxu1  ;;  %5610 = vmatprep.subr.bf16.mxu0 %v13808_v20  ;;  %v5877_v55 = vld [vmem:[#allocation8 + $0x8] sm:$0xff]  ;;  %v13832_v20 = vld [vmem:[#allocation14 + $0xce4] ss:$48 sps:$4 sm:$0xff]  }
 0x31c   :  { %v5318_v36 = vpop.f32.mrf.mxu0  ;;  %5651 = vmatprep.subr.bf16.mxu1 %v13811_v4  ;;  %v5887_v60 = vmul.f32 %v5877_v55, %v5863_v42  ;;  %v13833_v4 = vld [vmem:[#allocation14 + $0x12e0] ss:$48 sps:$4 sm:$0xff]   ;;  %v13838_v24 = vld [vmem:[#allocation14 + $0xc84] ss:$48 sps:$4 sm:$0xff]  }
 0x31d   :  { %v5858_v7 = vpack.c.bf16 %v5356_v37, %v5356_v37  ;;  %v5358_v39 = vadd.f32 %v5357_v53, %v5317_v32  ;;  %v5359_v8 = vpop.f32.mrf.mxu1  ;;  %5611 = vmatpush1.bf16.msra.mxu0 %v13806_v29  ;;  %v13841_v6 = vld [vmem:[#allocation14 + $0x1284] ss:$48 sps:$4 sm:$0xff]   ;;  %v13836_v29 = vld [vmem:[#allocation14 + $0xc80] ss:$48 sps:$4 sm:$0xff]  }
 0x31e   :  { %5652 = vmatpush1.bf16.msra.mxu1 %v13809_v47  ;;  %v5319_v43 = vpop.f32.mrf.mxu0  ;;  %5612 = vmatprep.subr.bf16.mxu0 %v13814_v31  ;;  %v13844_v45 = vld [vmem:[#allocation14 + $0xc24] ss:$48 sps:$4 sm:$0xff]   ;;  %v13842_v31 = vld [vmem:[#allocation14 + $0xc20] ss:$48 sps:$4 sm:$0xff]  }
 0x31f   :  { %v5866_v46 = vunpack.c.l.bf16 %v5858_v7  ;;  %v5859_v48 = vpack.c.bf16 %v5358_v39, %v5358_v39  ;;  %v5360_v49 = vpop.f32.mrf.mxu1  ;;  %5653 = vmatprep.subr.bf16.mxu1 %v13817_v33  ;;  %v13847_v47 = vld [vmem:[#allocation14 + $0x1224] ss:$48 sps:$4 sm:$0xff]   ;;  %v13845_v37 = vld [vmem:[#allocation14 + $0x1220] ss:$48 sps:$4 sm:$0xff]  }
 0x320   :  { %v13850_v32 = vld [vmem:[#allocation14 + $0x11c4] ss:$48 sps:$4 sm:$0xff]   ;;  %v13848_v33 = vld [vmem:[#allocation14 + $0x11c0] ss:$48 sps:$4 sm:$0xff]  }
 0x321   :  { %v5898_v52 = vmul.f32 %v5876_v59, %v5866_v46  ;;  %v5867_v54 = vunpack.c.l.bf16 %v5859_v48  ;;  %5613 = vmatpush1.bf16.msra.mxu0 %v13812_v0  ;;  %v5890_v58 = vmul.f32 %v5880_v38, %v5866_v46  ;;  %v13853_v53 = vld [vmem:[#allocation14 + $0x17c4] ss:$48 sps:$4 sm:$0xff]   ;;  %v13854_v7 = vld [vmem:[#allocation14 + $0x1160] ss:$48 sps:$4 sm:$0xff]  }
 0x322   :  { %5654 = vmatpush1.bf16.msra.mxu1 %v13815_v44  ;;  %5614 = vmatprep.subr.bf16.mxu0 %v13820_v25  ;;  %v13856_v36 = vld [vmem:[#allocation14 + $0x1164] ss:$48 sps:$4 sm:$0xff]   ;;  %v13857_v39 = vld [vmem:[#allocation14 + $0x1760] ss:$48 sps:$4 sm:$0xff]  }
 0x323   :  { %v5891_v63 = vmul.f32 %v5881_v3, %v5867_v54  ;;  %v5899_v1 = vmul.f32 %v5877_v55, %v5867_v54  ;;  %5655 = vmatprep.subr.bf16.mxu1 %v13823_v50  ;;  %v14576_v2 = vadd.f32 %v5902_v51, %v5898_v52  ;;  %v14578_v11 = vsub.f32 %v5886_v57, %v5890_v58  ;;  %v13859_v38 = vld [vmem:[#allocation14 + $0x1764] ss:$48 sps:$4 sm:$0xff]   ;;  %v13860_v42 = vld [vmem:[#allocation14 + $0x1100] ss:$48 sps:$4 sm:$0xff]  }
 0x324   :  { %v13862_v8 = vld [vmem:[#allocation14 + $0x1104] ss:$48 sps:$4 sm:$0xff]   ;;  %v13863_v59 = vld [vmem:[#allocation14 + $0x1700] ss:$48 sps:$4 sm:$0xff]  }
 0x325   :  { %5615 = vmatpush1.bf16.msra.mxu0 %v13818_v56  ;;  %6139 = vrot.lane.b32.xlu0 %v14576_v2, %s14334_s6  ;;  %v14582_v16 = vadd.f32 %v5903_v61, %v5899_v1  ;;  %v14584_v18 = vsub.f32 %v5887_v60, %v5891_v63  ;;  %v13865_v0 = vld [vmem:[#allocation14 + $0x1704] ss:$48 sps:$4 sm:$0xff]   ;;  %v13866_v25 = vld [vmem:[#allocation14 + $0x10a0] ss:$48 sps:$4 sm:$0xff]  }
 0x326   :  { %5656 = vmatpush1.bf16.msra.mxu1 %v13821_v62  ;;  %6213 = vrot.lane.b32.xlu1 %v14578_v11, %s14334_s6  ;;  %v13868_v43 = vld [vmem:[#allocation14 + $0x10a4] ss:$48 sps:$4 sm:$0xff]   ;;  %v13869_v55 = vld [vmem:[#allocation14 + $0x16a0] ss:$48 sps:$4 sm:$0xff]  }
 0x327   :  { %5616 = vmatprep.subr.bf16.mxu0 %v13826_v12  ;;  %5657 = vmatprep.subr.bf16.mxu1 %v13829_v14  ;;  %v13871_v44 = vld [vmem:[#allocation14 + $0x16a4] ss:$48 sps:$4 sm:$0xff]   ;;  %v13872_v48 = vld [vmem:[#allocation14 + $0x1040] ss:$48 sps:$4 sm:$0xff]   ;;  %v13898_v12 = vld [vmem:[#allocation14 + $0x2cc] ss:$48 sps:$4 sm:$0xff]  }
 0x328   :  { %v13874_v3 = vld [vmem:[#allocation14 + $0x1044] ss:$48 sps:$4 sm:$0xff]   ;;  %v13875_v49 = vld [vmem:[#allocation14 + $0x1640] ss:$48 sps:$4 sm:$0xff]   ;;  %v13901_v14 = vld [vmem:[#allocation14 + $0x8cc] ss:$48 sps:$4 sm:$0xff]  }
 0x329   :  { %5617 = vmatpush1.bf16.msra.mxu0 %v13824_v15  ;;  %v13877_v46 = vld [vmem:[#allocation14 + $0x1644] ss:$48 sps:$4 sm:$0xff]   ;;  %v13878_v52 = vld [vmem:[#allocation14 + $0xfe0] ss:$48 sps:$4 sm:$0xff]   ;;  %v13896_v15 = vld [vmem:[#allocation14 + $0x2c8] ss:$48 sps:$4 sm:$0xff]  }
 0x32a   :  { %5658 = vmatpush1.bf16.msra.mxu1 %v13827_v19  ;;  %6551 = vrot.lane.b32.xlu1 %v14582_v16, %s14334_s6  ;;  %v13880_v50 = vld [vmem:[#allocation14 + $0xfe4] ss:$48 sps:$4 sm:$0xff]   ;;  %v13881_v54 = vld [vmem:[#allocation14 + $0x15e0] ss:$48 sps:$4 sm:$0xff]   ;;  %v13899_v19 = vld [vmem:[#allocation14 + $0x8c8] ss:$48 sps:$4 sm:$0xff]  }
 0x32b   :  { %5618 = vmatprep.subr.bf16.mxu0 %v13832_v20  ;;  %5659 = vmatprep.subr.bf16.mxu1 %v13835_v21  ;;  %v13883_v51 = vld [vmem:[#allocation14 + $0x15e4] ss:$48 sps:$4 sm:$0xff]   ;;  %v13884_v58 = vld [vmem:[#allocation14 + $0xf80] ss:$48 sps:$4 sm:$0xff]   ;;  %v13904_v20 = vld [vmem:[#allocation14 + $0x26c] ss:$48 sps:$4 sm:$0xff]  }
 0x32c   :  { %v13886_v56 = vld [vmem:[#allocation14 + $0xf84] ss:$48 sps:$4 sm:$0xff]   ;;  %v13887_v60 = vld [vmem:[#allocation14 + $0x1580] ss:$48 sps:$4 sm:$0xff]  }
 0x32d   :  { %5619 = vmatpush1.bf16.msra.mxu0 %v13830_v22  ;;  %v13889_v57 = vld [vmem:[#allocation14 + $0x1584] ss:$48 sps:$4 sm:$0xff]   ;;  %v13890_v63 = vld [vmem:[#allocation14 + $0xf20] ss:$48 sps:$4 sm:$0xff]   ;;  %v13907_v22 = vld [vmem:[#allocation14 + $0x86c] ss:$48 sps:$4 sm:$0xff]  }
 0x32e   :  { %5660 = vmatpush1.bf16.msra.mxu1 %v13833_v4  ;;  %6625 = vrot.lane.b32.xlu1 %v14584_v18, %s14334_s6  ;;  %v13892_v61 = vld [vmem:[#allocation14 + $0xf24] ss:$48 sps:$4 sm:$0xff]   ;;  %v13893_v1 = vld [vmem:[#allocation14 + $0x1520] ss:$48 sps:$4 sm:$0xff]  }
 0x32f   :  { %5620 = vmatprep.subr.bf16.mxu0 %v13838_v24  ;;  %5661 = vmatprep.subr.bf16.mxu1 %v13841_v6  ;;  %v13895_v62 = vld [vmem:[#allocation14 + $0x1524] ss:$48 sps:$4 sm:$0xff]   ;;  %v13902_v24 = vld [vmem:[#allocation14 + $0x268] ss:$48 sps:$4 sm:$0xff]  }
 0x331   :  { %5621 = vmatpush1.bf16.msra.mxu0 %v13836_v29 }
 0x332   :  { %5662 = vmatpush1.bf16.msra.mxu1 %v13839_v26  ;;  %5622 = vmatprep.subr.bf16.mxu0 %v13844_v45  ;;  %v13905_v26 = vld [vmem:[#allocation14 + $0x868] ss:$48 sps:$4 sm:$0xff]   ;;  %v13910_v45 = vld [vmem:[#allocation14 + $0x20c] ss:$48 sps:$4 sm:$0xff]  }
 0x333   :  { %5663 = vmatprep.subr.bf16.mxu1 %v13847_v47 }
 0x335   :  { %5623 = vmatpush1.bf16.msra.mxu0 %v13842_v31  ;;  %v13913_v31 = vld [vmem:[#allocation14 + $0x80c] ss:$48 sps:$4 sm:$0xff]  }
 0x336   :  { %5664 = vmatpush1.bf16.msra.mxu1 %v13845_v37  ;;  %5624 = vmatprep.subr.bf16.mxu0 %v13850_v32 }
 0x337   :  { %5665 = vmatprep.subr.bf16.mxu1 %v13853_v53  ;;  %v13908_v53 = vld [vmem:[#allocation14 + $0x208] ss:$48 sps:$4 sm:$0xff]  }
 0x339   :  { %5625 = vmatpush2.bf16.msra.mxu0 %v13848_v33 }
 0x33a   :  { %5666 = vmatpush2.bf16.msra.mxu1 %v13851_v35  ;;  %5626 = vmatprep.subr.bf16.mxu0 %v13856_v36  ;;  %v13916_v35 = vld [vmem:[#allocation14 + $0x1ac] ss:$48 sps:$4 sm:$0xff]  }
 0x33b   :  { %5667 = vmatprep.subr.bf16.mxu1 %v13859_v38  ;;  %v13919_v38 = vld [vmem:[#allocation14 + $0x7ac] ss:$48 sps:$4 sm:$0xff]  }
 0x33d   :  { %5627 = vmatpush2.bf16.msra.mxu0 %v13854_v7  ;;  %v13914_v7 = vld [vmem:[#allocation14 + $0x1a8] ss:$48 sps:$4 sm:$0xff]  }
 0x33e   :  { %5668 = vmatpush2.bf16.msra.mxu1 %v13857_v39  ;;  %5628 = vmatprep.subr.bf16.mxu0 %v13862_v8  ;;  %v13922_v39 = vld [vmem:[#allocation14 + $0x14c] ss:$48 sps:$4 sm:$0xff]  }
 0x33f   :  { %5669 = vmatprep.subr.bf16.mxu1 %v13865_v0  ;;  %v13925_v8 = vld [vmem:[#allocation14 + $0x74c] ss:$48 sps:$4 sm:$0xff]   ;;  %v13920_v0 = vld [vmem:[#allocation14 + $0x148] ss:$48 sps:$4 sm:$0xff]  }
 0x341   :  { %5629 = vmatpush2.bf16.msra.mxu0 %v13860_v42  ;;  %v13923_v42 = vld [vmem:[#allocation14 + $0x748] ss:$48 sps:$4 sm:$0xff]  }
 0x342   :  { %5670 = vmatpush2.bf16.msra.mxu1 %v13863_v59  ;;  %5630 = vmatprep.subr.bf16.mxu0 %v13868_v43  ;;  %v13928_v59 = vld [vmem:[#allocation14 + $0xec] ss:$48 sps:$4 sm:$0xff]  }
 0x343   :  { %5671 = vmatprep.subr.bf16.mxu1 %v13871_v44  ;;  %v13931_v43 = vld [vmem:[#allocation14 + $0x6ec] ss:$48 sps:$4 sm:$0xff]   ;;  %v13926_v44 = vld [vmem:[#allocation14 + $0xe8] ss:$48 sps:$4 sm:$0xff]  }
 0x345   :  { %5631 = vmatpush2.bf16.msra.mxu0 %v13866_v25  ;;  %v13929_v25 = vld [vmem:[#allocation14 + $0x6e8] ss:$48 sps:$4 sm:$0xff]  }
 0x346   :  { %5672 = vmatpush2.bf16.msra.mxu1 %v13869_v55  ;;  %5632 = vmatprep.subr.bf16.mxu0 %v13874_v3  ;;  %v13934_v55 = vld [vmem:[#allocation14 + $0x8c] ss:$48 sps:$4 sm:$0xff]  }
 0x347   :  { %5673 = vmatprep.subr.bf16.mxu1 %v13877_v46  ;;  %v13937_v3 = vld [vmem:[#allocation14 + $0x68c] ss:$48 sps:$4 sm:$0xff]   ;;  %v13932_v46 = vld [vmem:[#allocation14 + $0x88] ss:$48 sps:$4 sm:$0xff]  }
 0x349   :  { %5633 = vmatpush2.bf16.msra.mxu0 %v13872_v48  ;;  %v13935_v48 = vld [vmem:[#allocation14 + $0x688] ss:$48 sps:$4 sm:$0xff]  }
 0x34a   :  { %5674 = vmatpush2.bf16.msra.mxu1 %v13875_v49  ;;  %5634 = vmatprep.subr.bf16.mxu0 %v13880_v50  ;;  %v13940_v49 = vld [vmem:[#allocation14 + $0x2c] ss:$48 sps:$4 sm:$0xff]  }
 0x34b   :  { %5675 = vmatprep.subr.bf16.mxu1 %v13883_v51  ;;  %v13943_v50 = vld [vmem:[#allocation14 + $0x62c] ss:$48 sps:$4 sm:$0xff]   ;;  %v13938_v51 = vld [vmem:[#allocation14 + $0x28] ss:$48 sps:$4 sm:$0xff]  }
 0x34d   :  { %5635 = vmatpush2.bf16.msra.mxu0 %v13878_v52  ;;  %v13941_v52 = vld [vmem:[#allocation14 + $0x628] ss:$48 sps:$4 sm:$0xff]  }
 0x34e   :  { %5676 = vmatpush2.bf16.msra.mxu1 %v13881_v54  ;;  %5636 = vmatprep.subr.bf16.mxu0 %v13886_v56  ;;  %v13946_v54 = vld [vmem:[#allocation14 + $0x5cc] ss:$48 sps:$4 sm:$0xff]  }
 0x34f   :  { %5677 = vmatprep.subr.bf16.mxu1 %v13889_v57  ;;  %v13949_v56 = vld [vmem:[#allocation14 + $0xbcc] ss:$48 sps:$4 sm:$0xff]   ;;  %v13944_v57 = vld [vmem:[#allocation14 + $0x5c8] ss:$48 sps:$4 sm:$0xff]  }
 0x351   :  { %5637 = vmatpush2.bf16.msra.mxu0 %v13884_v58  ;;  %v13947_v58 = vld [vmem:[#allocation14 + $0xbc8] ss:$48 sps:$4 sm:$0xff]  }
 0x352   :  { %5678 = vmatpush2.bf16.msra.mxu1 %v13887_v60  ;;  %5638 = vmatprep.subr.bf16.mxu0 %v13892_v61  ;;  %v13952_v60 = vld [vmem:[#allocation14 + $0x56c] ss:$48 sps:$4 sm:$0xff]  }
 0x353   :  { %5679 = vmatprep.subr.bf16.mxu1 %v13895_v62  ;;  %v13955_v61 = vld [vmem:[#allocation14 + $0xb6c] ss:$48 sps:$4 sm:$0xff]   ;;  %v13950_v62 = vld [vmem:[#allocation14 + $0x568] ss:$48 sps:$4 sm:$0xff]  }
 0x355   :  { %5639 = vmatpush2.bf16.msra.mxu0 %v13890_v63  ;;  %v13953_v63 = vld [vmem:[#allocation14 + $0xb68] ss:$48 sps:$4 sm:$0xff]  }
 0x356   :  { %5680 = vmatpush2.bf16.msra.mxu1 %v13893_v1  ;;  %5690 = vmatprep.subr.bf16.mxu0 %v13898_v12  ;;  %v13958_v1 = vld [vmem:[#allocation14 + $0x50c] ss:$48 sps:$4 sm:$0xff]  }
 0x357   :  { %5731 = vmatprep.subr.bf16.mxu1 %v13901_v14  ;;  %v13961_v12 = vld [vmem:[#allocation14 + $0xb0c] ss:$48 sps:$4 sm:$0xff]   ;;  %v13956_v14 = vld [vmem:[#allocation14 + $0x508] ss:$48 sps:$4 sm:$0xff]  }
 0x358   :  { %v5396_v21 = vpop.f32.mrf.mxu0  ;;  %5641 = vmatmul.mubr.bf16.vlgmr.msra.gmra.mxu0 %v14502_v40 }
 0x359   :  { %v5437_v4 = vpop.f32.mrf.mxu1  ;;  %5682 = vmatmul.mubr.bf16.vlgmr.msra.gmra.mxu1 %v14506_v41  ;;  %5691 = vmatpush1.bf16.msra.mxu0 %v13896_v15  ;;  %v13959_v15 = vld [vmem:[#allocation14 + $0xb08] ss:$48 sps:$4 sm:$0xff]  }
 0x35a   :  { %v14594_v6 = vadd.f32 %v5437_v4, %v5396_v21  ;;  %5722 = vmatprep.mubr.bf16.mxu0 %v14482_v5  ;;  %5732 = vmatpush1.bf16.msra.mxu1 %v13899_v19  ;;  %v14597_v29 = vpop.f32.mrf.mxu0  ;;  %v13911_v5 = vld [vmem:[#allocation14 + $0x808] ss:$48 sps:$4 sm:$0xff]   ;;  %v13964_v19 = vld [vmem:[#allocation14 + $0x4ac] ss:$48 sps:$4 sm:$0xff]  }
 0x35b   :  { %5763 = vmatprep.mubr.bf16.mxu1 %v14484_v9  ;;  %v14600_v47 = vpop.f32.mrf.mxu1  ;;  %5692 = vmatprep.subr.bf16.mxu0 %v13904_v20  ;;  %v13917_v9 = vld [vmem:[#allocation14 + $0x7a8] ss:$48 sps:$4 sm:$0xff]   ;;  %v13967_v20 = vld [vmem:[#allocation14 + $0xaac] ss:$48 sps:$4 sm:$0xff]  }
 0x35c   :  { %v5400_v37 = vpop.f32.mrf.mxu0  ;;  %5733 = vmatprep.subr.bf16.mxu1 %v13907_v22  ;;  %v13962_v21 = vld [vmem:[#allocation14 + $0x4a8] ss:$48 sps:$4 sm:$0xff]   ;;  %v13970_v4 = vld [vmem:[#allocation14 + $0x44c] ss:$48 sps:$4 sm:$0xff]  }
 0x35d   :  { %v5441_v32 = vpop.f32.mrf.mxu1  ;;  %5693 = vmatpush1.bf16.msra.mxu0 %v13902_v24  ;;  %v13965_v22 = vld [vmem:[#allocation14 + $0xaa8] ss:$48 sps:$4 sm:$0xff]   ;;  %v13973_v24 = vld [vmem:[#allocation14 + $0xa4c] ss:$48 sps:$4 sm:$0xff]  }
 0x35e   :  { %5734 = vmatpush1.bf16.msra.mxu1 %v13905_v26  ;;  %v5401_v33 = vpop.f32.mrf.mxu0  ;;  %5694 = vmatprep.subr.bf16.mxu0 %v13910_v45  ;;  %v13968_v26 = vld [vmem:[#allocation14 + $0x448] ss:$48 sps:$4 sm:$0xff]   ;;  %v13979_v37 = vld [vmem:[#allocation14 + $0x9ec] ss:$48 sps:$4 sm:$0xff]  }
 0x35f   :  { %v5442_v36 = vpop.f32.mrf.mxu1  ;;  %5735 = vmatprep.subr.bf16.mxu1 %v13913_v31  ;;  %v13971_v45 = vld [vmem:[#allocation14 + $0xa48] ss:$48 sps:$4 sm:$0xff]   ;;  %v13976_v31 = vld [vmem:[#allocation14 + $0x3ec] ss:$48 sps:$4 sm:$0xff]  }
 0x360   :  { %v13974_v32 = vld [vmem:[#allocation14 + $0x3e8] ss:$48 sps:$4 sm:$0xff]   ;;  %v13982_v33 = vld [vmem:[#allocation14 + $0x38c] ss:$48 sps:$4 sm:$0xff]  }
 0x361   :  { %5695 = vmatpush1.bf16.msra.mxu0 %v13908_v53  ;;  %v13977_v53 = vld [vmem:[#allocation14 + $0x9e8] ss:$48 sps:$4 sm:$0xff]  }
 0x362   :  { %5736 = vmatpush1.bf16.msra.mxu1 %v13911_v5  ;;  %5696 = vmatprep.subr.bf16.mxu0 %v13916_v35  ;;  %v13985_v5 = vld [vmem:[#allocation14 + $0x98c] ss:$48 sps:$4 sm:$0xff]   ;;  %v13980_v35 = vld [vmem:[#allocation14 + $0x388] ss:$48 sps:$4 sm:$0xff]  }
 0x363   :  { %5737 = vmatprep.subr.bf16.mxu1 %v13919_v38  ;;  %v13983_v36 = vld [vmem:[#allocation14 + $0x988] ss:$48 sps:$4 sm:$0xff]   ;;  %v13988_v38 = vld [vmem:[#allocation14 + $0x32c] ss:$48 sps:$4 sm:$0xff]  }
 0x365   :  { %5697 = vmatpush1.bf16.msra.mxu0 %v13914_v7  ;;  %v13991_v7 = vld [vmem:[#allocation14 + $0x92c] ss:$48 sps:$4 sm:$0xff]  }
 0x366   :  { %5738 = vmatpush1.bf16.msra.mxu1 %v13917_v9  ;;  %5698 = vmatprep.subr.bf16.mxu0 %v13922_v39  ;;  %v13986_v9 = vld [vmem:[#allocation14 + $0x328] ss:$48 sps:$4 sm:$0xff]  }
 0x367   :  { %5739 = vmatprep.subr.bf16.mxu1 %v13925_v8  ;;  %v13989_v39 = vld [vmem:[#allocation14 + $0x928] ss:$48 sps:$4 sm:$0xff]   ;;  %v13994_v8 = vld [vmem:[#allocation14 + $0xecc] ss:$48 sps:$4 sm:$0xff]  }
 0x369   :  { %5699 = vmatpush1.bf16.msra.mxu0 %v13920_v0  ;;  %v13997_v0 = vld [vmem:[#allocation14 + $0x14cc] ss:$48 sps:$4 sm:$0xff]  }
 0x36a   :  { %5740 = vmatpush1.bf16.msra.mxu1 %v13923_v42  ;;  %5700 = vmatprep.subr.bf16.mxu0 %v13928_v59  ;;  %v13992_v42 = vld [vmem:[#allocation14 + $0xec8] ss:$48 sps:$4 sm:$0xff]  }
 0x36b   :  { %5741 = vmatprep.subr.bf16.mxu1 %v13931_v43  ;;  %v13995_v59 = vld [vmem:[#allocation14 + $0x14c8] ss:$48 sps:$4 sm:$0xff]   ;;  %v14000_v43 = vld [vmem:[#allocation14 + $0xe6c] ss:$48 sps:$4 sm:$0xff]  }
 0x36d   :  { %5701 = vmatpush1.bf16.msra.mxu0 %v13926_v44  ;;  %v5856_v44 = vpack.c.bf16 %v14549_v27, %v14549_v27 }
 0x36e   :  { %5742 = vmatpush1.bf16.msra.mxu1 %v13929_v25  ;;  %5702 = vmatprep.subr.bf16.mxu0 %v13934_v55  ;;  %v14003_v55 = vld [vmem:[#allocation14 + $0x146c] ss:$48 sps:$4 sm:$0xff]  }
 0x36f   :  { %5743 = vmatprep.subr.bf16.mxu1 %v13937_v3  ;;  %v5440_v3 = vadd.f32 %v14600_v47, %v14597_v29 }
 0x371   :  { %5703 = vmatpush1.bf16.msra.mxu0 %v13932_v46 }
 0x372   :  { %5744 = vmatpush1.bf16.msra.mxu1 %v13935_v48  ;;  %5704 = vmatprep.subr.bf16.mxu0 %v13940_v49  ;;  %v13998_v49 = vld [vmem:[#allocation14 + $0xe68] ss:$48 sps:$4 sm:$0xff]  }
 0x373   :  { %5745 = vmatprep.subr.bf16.mxu1 %v13943_v50  ;;  %v5857_v50 = vpack.c.bf16 %v14553_v34, %v14553_v34 }
 0x375   :  { %5705 = vmatpush1.bf16.msra.mxu0 %v13938_v51  ;;  %v14001_v51 = vld [vmem:[#allocation14 + $0x1468] ss:$48 sps:$4 sm:$0xff]  }
 0x376   :  { %5746 = vmatpush1.bf16.msra.mxu1 %v13941_v52  ;;  %5706 = vmatprep.subr.bf16.mxu0 %v13946_v54  ;;  %v5864_v54 = vunpack.c.l.bf16 %v5856_v44  ;;  %v14030_v44 = vld [vmem:[#allocation14 + $0xc8c] ss:$48 sps:$4 sm:$0xff]  }
 0x377   :  { %5747 = vmatprep.subr.bf16.mxu1 %v13949_v56  ;;  %v5878_v56 = vld [vmem:[#allocation8 + $0x10] sm:$0xff] }
 0x379   :  { %5707 = vmatpush2.bf16.msra.mxu0 %v13944_v57 }
 0x37a   :  { %5748 = vmatpush2.bf16.msra.mxu1 %v13947_v58  ;;  %5708 = vmatprep.subr.bf16.mxu0 %v13952_v60  ;;  %v5882_v60 = vld [vmem:[#allocation9 + $0x10] sm:$0xff] }
 0x37b   :  { %5749 = vmatprep.subr.bf16.mxu1 %v13955_v61  ;;  %v5865_v61 = vunpack.c.l.bf16 %v5857_v50  ;;  %v14037_v50 = vld [vmem:[#allocation14 + $0x1228] ss:$48 sps:$4 sm:$0xff]  }
 0x37d   :  { %5709 = vmatpush2.bf16.msra.mxu0 %v13950_v62 }
 0x37e   :  { %5750 = vmatpush2.bf16.msra.mxu1 %v13953_v63  ;;  %5710 = vmatprep.subr.bf16.mxu0 %v13958_v1  ;;  %v14007_v63 = vld [vmem:[#allocation14 + $0x1408] ss:$48 sps:$4 sm:$0xff]  }
 0x37f   :  { %5751 = vmatprep.subr.bf16.mxu1 %v13961_v12  ;;  %v5879_v1 = vld [vmem:[#allocation8 + $0x18] sm:$0xff] }
 0x380   :  { %v5883_v12 = vld [vmem:[#allocation9 + $0x18] sm:$0xff] }
 0x381   :  { %5711 = vmatpush2.bf16.msra.mxu0 %v13956_v14 }
 0x382   :  { %5752 = vmatpush2.bf16.msra.mxu1 %v13959_v15  ;;  %5712 = vmatprep.subr.bf16.mxu0 %v13964_v19 }
 0x383   :  { %5753 = vmatprep.subr.bf16.mxu1 %v13967_v20  ;;  %v14015_v20 = vld [vmem:[#allocation14 + $0x13ac] ss:$48 sps:$4 sm:$0xff]  }
 0x385   :  { %5713 = vmatpush2.bf16.msra.mxu0 %v13962_v21  ;;  %v5888_v21 = vmul.f32 %v5878_v56, %v5864_v54 }
 0x386   :  { %5754 = vmatpush2.bf16.msra.mxu1 %v13965_v22  ;;  %5714 = vmatprep.subr.bf16.mxu0 %v13970_v4  ;;  %v5904_v22 = vmul.f32 %v5882_v60, %v5864_v54  ;;  %v14049_v54 = vld [vmem:[#allocation14 + $0x1768] ss:$48 sps:$4 sm:$0xff]  }
 0x387   :  { %5755 = vmatprep.subr.bf16.mxu1 %v13973_v24 }
 0x389   :  { %5715 = vmatpush2.bf16.msra.mxu0 %v13968_v26 }
 0x38a   :  { %5756 = vmatpush2.bf16.msra.mxu1 %v13971_v45  ;;  %5716 = vmatprep.subr.bf16.mxu0 %v13976_v31  ;;  %v14010_v45 = vld [vmem:[#allocation14 + $0xda8] ss:$48 sps:$4 sm:$0xff]   ;;  %v5889_v31 = vmul.f32 %v5879_v1, %v5865_v61 }
 0x38b   :  { %5757 = vmatprep.subr.bf16.mxu1 %v13979_v37  ;;  %v5905_v37 = vmul.f32 %v5883_v12, %v5865_v61  ;;  %v14061_v61 = vld [vmem:[#allocation14 + $0x16a8] ss:$48 sps:$4 sm:$0xff]  }
 0x38d   :  { %5717 = vmatpush2.bf16.msra.mxu0 %v13974_v32  ;;  %v14013_v32 = vld [vmem:[#allocation14 + $0x13a8] ss:$48 sps:$4 sm:$0xff]  }
 0x38e   :  { %5758 = vmatpush2.bf16.msra.mxu1 %v13977_v53  ;;  %5718 = vmatprep.subr.bf16.mxu0 %v13982_v33  ;;  %v14018_v53 = vld [vmem:[#allocation14 + $0xd4c] ss:$48 sps:$4 sm:$0xff]  }
 0x38f   :  { %5759 = vmatprep.subr.bf16.mxu1 %v13985_v5 }
 0x391   :  { %5719 = vmatpush2.bf16.msra.mxu0 %v13980_v35  ;;  %v14021_v35 = vld [vmem:[#allocation14 + $0x134c] ss:$48 sps:$4 sm:$0xff]  }
 0x392   :  { %5760 = vmatpush2.bf16.msra.mxu1 %v13983_v36  ;;  %5720 = vmatprep.subr.bf16.mxu0 %v13988_v38 }
 0x393   :  { %5761 = vmatprep.subr.bf16.mxu1 %v13991_v7 }
 0x395   :  { %5721 = vmatpush2.bf16.msra.mxu0 %v13986_v9  ;;  %v14016_v9 = vld [vmem:[#allocation14 + $0xd48] ss:$48 sps:$4 sm:$0xff]  }
 0x396   :  { %5762 = vmatpush2.bf16.msra.mxu1 %v13989_v39  ;;  %5772 = vmatprep.subr.bf16.mxu0 %v13994_v8  ;;  %v14019_v8 = vld [vmem:[#allocation14 + $0x1348] ss:$48 sps:$4 sm:$0xff]  }
 0x397   :  { %5813 = vmatprep.subr.bf16.mxu1 %v13997_v0  ;;  %v14024_v0 = vld [vmem:[#allocation14 + $0xcec] ss:$48 sps:$4 sm:$0xff]  }
 0x398   :  { %v5478_v25 = vpop.f32.mrf.mxu0  ;;  %5723 = vmatmul.mubr.bf16.vlgmr.msra.gmra.mxu0 %v14486_v17  ;;  %v14006_v17 = vld [vmem:[#allocation14 + $0xe0c] ss:$48 sps:$4 sm:$0xff]  }
 0x399   :  { %v5479_v46 = vadd.f32 %v5478_v25, %v14594_v6  ;;  %v5519_v48 = vpop.f32.mrf.mxu1  ;;  %5764 = vmatmul.mubr.bf16.vlgmr.msra.gmra.mxu1 %v14488_v23  ;;  %5773 = vmatpush1.bf16.msra.mxu0 %v13992_v42  ;;  %v14009_v6 = vld [vmem:[#allocation14 + $0x140c] ss:$48 sps:$4 sm:$0xff]  }
 0x39a   :  { %5804 = vmatprep.mubr.bf16.mxu0 %v14494_v28  ;;  %5814 = vmatpush1.bf16.msra.mxu1 %v13995_v59  ;;  %v5480_v27 = vpop.f32.mrf.mxu0  ;;  %v14004_v28 = vld [vmem:[#allocation14 + $0xe08] ss:$48 sps:$4 sm:$0xff]   ;;  %v14027_v42 = vld [vmem:[#allocation14 + $0x12ec] ss:$48 sps:$4 sm:$0xff]  }
 0x39b   :  { %v5520_v52 = vadd.f32 %v5519_v48, %v5479_v46  ;;  %5845 = vmatprep.mubr.bf16.mxu1 %v14496_v30  ;;  %v5481_v29 = vadd.f32 %v5480_v27, %v5440_v3  ;;  %v5521_v47 = vpop.f32.mrf.mxu1  ;;  %5774 = vmatprep.subr.bf16.mxu0 %v14000_v43  ;;  %v14012_v30 = vld [vmem:[#allocation14 + $0xdac] ss:$48 sps:$4 sm:$0xff]   ;;  %v14022_v59 = vld [vmem:[#allocation14 + $0xce8] ss:$48 sps:$4 sm:$0xff]  }
 0x39c   :  { %v5482_v23 = vpop.f32.mrf.mxu0  ;;  %5815 = vmatprep.subr.bf16.mxu1 %v14003_v55  ;;  %v14025_v43 = vld [vmem:[#allocation14 + $0x12e8] ss:$48 sps:$4 sm:$0xff]   ;;  %v14033_v25 = vld [vmem:[#allocation14 + $0x128c] ss:$48 sps:$4 sm:$0xff]  }
 0x39d   :  { %v5860_v57 = vpack.c.bf16 %v5520_v52, %v5520_v52  ;;  %v5522_v58 = vadd.f32 %v5521_v47, %v5481_v29  ;;  %v5523_v34 = vpop.f32.mrf.mxu1  ;;  %5775 = vmatpush1.bf16.msra.mxu0 %v13998_v49  ;;  %v14028_v55 = vld [vmem:[#allocation14 + $0xc88] ss:$48 sps:$4 sm:$0xff]   ;;  %v14036_v46 = vld [vmem:[#allocation14 + $0xc2c] ss:$48 sps:$4 sm:$0xff]  }
 0x39e   :  { %5816 = vmatpush1.bf16.msra.mxu1 %v14001_v51  ;;  %v5483_v62 = vpop.f32.mrf.mxu0  ;;  %5776 = vmatprep.subr.bf16.mxu0 %v14006_v17  ;;  %v14031_v3 = vld [vmem:[#allocation14 + $0x1288] ss:$48 sps:$4 sm:$0xff]   ;;  %v14039_v48 = vld [vmem:[#allocation14 + $0x122c] ss:$48 sps:$4 sm:$0xff]  }
 0x39f   :  { %v5868_v14 = vunpack.c.l.bf16 %v5860_v57  ;;  %v5861_v15 = vpack.c.bf16 %v5522_v58, %v5522_v58  ;;  %v5524_v19 = vpop.f32.mrf.mxu1  ;;  %5817 = vmatprep.subr.bf16.mxu1 %v14009_v6  ;;  %v14034_v49 = vld [vmem:[#allocation14 + $0xc28] ss:$48 sps:$4 sm:$0xff]   ;;  %v14042_v27 = vld [vmem:[#allocation14 + $0x11cc] ss:$48 sps:$4 sm:$0xff]  }
 0x3a0   :  { %v14045_v51 = vld [vmem:[#allocation14 + $0x17cc] ss:$48 sps:$4 sm:$0xff]   ;;  %v14040_v17 = vld [vmem:[#allocation14 + $0x11c8] ss:$48 sps:$4 sm:$0xff]  }
 0x3a1   :  { %v5892_v4 = vmul.f32 %v5882_v60, %v5868_v14  ;;  %v5900_v24 = vmul.f32 %v5878_v56, %v5868_v14  ;;  %v5869_v26 = vunpack.c.l.bf16 %v5861_v15  ;;  %5777 = vmatpush1.bf16.msra.mxu0 %v14004_v28  ;;  %v14043_v52 = vld [vmem:[#allocation14 + $0x17c8] ss:$48 sps:$4 sm:$0xff]   ;;  %v14048_v29 = vld [vmem:[#allocation14 + $0x116c] ss:$48 sps:$4 sm:$0xff]  }
 0x3a2   :  { %5818 = vmatpush1.bf16.msra.mxu1 %v14007_v63  ;;  %5778 = vmatprep.subr.bf16.mxu0 %v14012_v30  ;;  %v14051_v47 = vld [vmem:[#allocation14 + $0x176c] ss:$48 sps:$4 sm:$0xff]   ;;  %v14046_v6 = vld [vmem:[#allocation14 + $0x1168] ss:$48 sps:$4 sm:$0xff]  }
 0x3a3   :  { %v5893_v33 = vmul.f32 %v5883_v12, %v5869_v26  ;;  %v5901_v5 = vmul.f32 %v5879_v1, %v5869_v26  ;;  %5819 = vmatprep.subr.bf16.mxu1 %v14015_v20  ;;  %v14613_v36 = vadd.f32 %v5904_v22, %v5900_v24  ;;  %v14615_v38 = vsub.f32 %v5888_v21, %v5892_v4  ;;  %v14054_v23 = vld [vmem:[#allocation14 + $0x110c] ss:$48 sps:$4 sm:$0xff]   ;;  %v14052_v57 = vld [vmem:[#allocation14 + $0x1108] ss:$48 sps:$4 sm:$0xff]  }
 0x3a4   :  { %v14057_v56 = vld [vmem:[#allocation14 + $0x170c] ss:$48 sps:$4 sm:$0xff]   ;;  %v14055_v58 = vld [vmem:[#allocation14 + $0x1708] ss:$48 sps:$4 sm:$0xff]  }
 0x3a5   :  { %5779 = vmatpush1.bf16.msra.mxu0 %v14010_v45  ;;  %v14617_v7 = vadd.f32 %v5905_v37, %v5901_v5  ;;  %v14619_v39 = vsub.f32 %v5889_v31, %v5893_v33  ;;  %v14060_v34 = vld [vmem:[#allocation14 + $0x10ac] ss:$48 sps:$4 sm:$0xff]   ;;  %v14058_v60 = vld [vmem:[#allocation14 + $0x10a8] ss:$48 sps:$4 sm:$0xff]   ;;  %v14335_v37 = vmov 0.0  }
 0x3a6   :  { %5820 = vmatpush1.bf16.msra.mxu1 %v14013_v32  ;;  %5780 = vmatprep.subr.bf16.mxu0 %v14018_v53  ;;  %v14063_v28 = vld [vmem:[#allocation14 + $0x16ac] ss:$48 sps:$4 sm:$0xff]   ;;  %v14064_v30 = vld [vmem:[#allocation14 + $0x1048] ss:$48 sps:$4 sm:$0xff]  }
 0x3a7   :  { %7386 = vrot.lane.b32.xlu0 %v14617_v7, %s14334_s6  ;;  %5821 = vmatprep.subr.bf16.mxu1 %v14021_v35  ;;  %v14066_v62 = vld [vmem:[#allocation14 + $0x104c] ss:$48 sps:$4 sm:$0xff]   ;;  %v14067_v1 = vld [vmem:[#allocation14 + $0x1648] ss:$48 sps:$4 sm:$0xff]  }
 0x3a8   :  { %v14069_v63 = vld [vmem:[#allocation14 + $0x164c] ss:$48 sps:$4 sm:$0xff]   ;;  %v14070_v15 = vld [vmem:[#allocation14 + $0xfe8] ss:$48 sps:$4 sm:$0xff]  }
 0x3a9   :  { %5781 = vmatpush1.bf16.msra.mxu0 %v14016_v9  ;;  %v14072_v12 = vld [vmem:[#allocation14 + $0xfec] ss:$48 sps:$4 sm:$0xff]   ;;  %v14073_v19 = vld [vmem:[#allocation14 + $0x15e8] ss:$48 sps:$4 sm:$0xff]  }
 0x3aa   :  { %5822 = vmatpush1.bf16.msra.mxu1 %v14019_v8  ;;  %5782 = vmatprep.subr.bf16.mxu0 %v14024_v0  ;;  %v14075_v14 = vld [vmem:[#allocation14 + $0x15ec] ss:$48 sps:$4 sm:$0xff]   ;;  %v14076_v22 = vld [vmem:[#allocation14 + $0xf88] ss:$48 sps:$4 sm:$0xff]  }
 0x3ab   :  { %5823 = vmatprep.subr.bf16.mxu1 %v14027_v42  ;;  %v14078_v20 = vld [vmem:[#allocation14 + $0xf8c] ss:$48 sps:$4 sm:$0xff]   ;;  %v14079_v4 = vld [vmem:[#allocation14 + $0x1588] ss:$48 sps:$4 sm:$0xff]  }
 0x3ac   :  { %v14081_v21 = vld [vmem:[#allocation14 + $0x158c] ss:$48 sps:$4 sm:$0xff]   ;;  %v14082_v45 = vld [vmem:[#allocation14 + $0xf28] ss:$48 sps:$4 sm:$0xff]  }
 0x3ad   :  { %5783 = vmatpush1.bf16.msra.mxu0 %v14022_v59  ;;  %v14084_v24 = vld [vmem:[#allocation14 + $0xf2c] ss:$48 sps:$4 sm:$0xff]   ;;  %v14085_v31 = vld [vmem:[#allocation14 + $0x1528] ss:$48 sps:$4 sm:$0xff]  }
 0x3ae   :  { %5824 = vmatpush1.bf16.msra.mxu1 %v14025_v43  ;;  %5784 = vmatprep.subr.bf16.mxu0 %v14030_v44  ;;  %v14087_v26 = vld [vmem:[#allocation14 + $0x152c] ss:$48 sps:$4 sm:$0xff]  }
 0x3af   :  { %5825 = vmatprep.subr.bf16.mxu1 %v14033_v25 }
 0x3b1   :  { %5785 = vmatpush1.bf16.msra.mxu0 %v14028_v55 }
 0x3b2   :  { %5826 = vmatpush1.bf16.msra.mxu1 %v14031_v3  ;;  %5786 = vmatprep.subr.bf16.mxu0 %v14036_v46 }
 0x3b3   :  { %5827 = vmatprep.subr.bf16.mxu1 %v14039_v48 }
 0x3b5   :  { %5787 = vmatpush1.bf16.msra.mxu0 %v14034_v49 }
 0x3b6   :  { %5828 = vmatpush1.bf16.msra.mxu1 %v14037_v50  ;;  %5788 = vmatprep.subr.bf16.mxu0 %v14042_v27 }
 0x3b7   :  { %5829 = vmatprep.subr.bf16.mxu1 %v14045_v51 }
 0x3b9   :  { %5789 = vmatpush2.bf16.msra.mxu0 %v14040_v17 }
 0x3ba   :  { %5830 = vmatpush2.bf16.msra.mxu1 %v14043_v52  ;;  %5790 = vmatprep.subr.bf16.mxu0 %v14048_v29  ;;  %v5884_v29 = vld [vmem:[#allocation11] sm:$0xff] }
 0x3bb   :  { %5831 = vmatprep.subr.bf16.mxu1 %v14051_v47  ;;  %v5885_v47 = vld [vmem:[#allocation12] sm:$0xff] }
 0x3bd   :  { %5791 = vmatpush2.bf16.msra.mxu0 %v14046_v6 }
 0x3be   :  { %5832 = vmatpush2.bf16.msra.mxu1 %v14049_v54  ;;  %5792 = vmatprep.subr.bf16.mxu0 %v14054_v23 }
 0x3bf   :  { %5833 = vmatprep.subr.bf16.mxu1 %v14057_v56 }
 0x3c1   :  { %5793 = vmatpush2.bf16.msra.mxu0 %v14052_v57 }
 0x3c2   :  { %5834 = vmatpush2.bf16.msra.mxu1 %v14055_v58  ;;  %5794 = vmatprep.subr.bf16.mxu0 %v14060_v34 }
 0x3c3   :  { %5835 = vmatprep.subr.bf16.mxu1 %v14063_v28  ;;  %v6140_v28 = vpop.permute.xlu0 %6139 }
 0x3c5   :  { %5795 = vmatpush2.bf16.msra.mxu0 %v14058_v60 }
 0x3c6   :  { %5836 = vmatpush2.bf16.msra.mxu1 %v14061_v61  ;;  %5796 = vmatprep.subr.bf16.mxu0 %v14066_v62 }
 0x3c7   :  { %5837 = vmatprep.subr.bf16.mxu1 %v14069_v63 }
 0x3c9   :  { %5797 = vmatpush2.bf16.msra.mxu0 %v14064_v30 }
 0x3ca   :  { %5838 = vmatpush2.bf16.msra.mxu1 %v14067_v1  ;;  %5798 = vmatprep.subr.bf16.mxu0 %v14072_v12 }
 0x3cb   :  { %5839 = vmatprep.subr.bf16.mxu1 %v14075_v14 }
 0x3cd   :  { %5799 = vmatpush2.bf16.msra.mxu0 %v14070_v15 }
 0x3ce   :  { %5840 = vmatpush2.bf16.msra.mxu1 %v14073_v19  ;;  %5800 = vmatprep.subr.bf16.mxu0 %v14078_v20 }
 0x3cf   :  { %5841 = vmatprep.subr.bf16.mxu1 %v14081_v21 }
 0x3d1   :  { %5801 = vmatpush2.bf16.msra.mxu0 %v14076_v22 }
 0x3d2   :  { %5842 = vmatpush2.bf16.msra.mxu1 %v14079_v4  ;;  %5802 = vmatprep.subr.bf16.mxu0 %v14084_v24 }
 0x3d3   :  { %5843 = vmatprep.subr.bf16.mxu1 %v14087_v26 }
 0x3d5   :  { %5803 = vmatpush2.bf16.msra.mxu0 %v14082_v45 }
 0x3d6   :  { %5844 = vmatpush2.bf16.msra.mxu1 %v14085_v31  ;;  %12792 = vmatprep.subr.mxu0 %v14335_v37 }
 0x3d7   :  { %12797 = vmatprep.subr.mxu1 %v14335_v37 }
 0x3d8   :  { %v5560_v32 = vpop.f32.mrf.mxu0  ;;  %5805 = vmatmul.mubr.bf16.vlgmr.msra.gmra.mxu0 %v14502_v40 }
 0x3d9   :  { %v5601_v53 = vpop.f32.mrf.mxu1  ;;  %5846 = vmatmul.mubr.bf16.vlgmr.msra.gmra.mxu1 %v14506_v41  ;;  %12794 = vmatprep.mubr.msk.f32.mxu0 %vm14336_vm0, %v14335_v37 }
 0x3da   :  { %v5562_v33 = vpop.f32.mrf.mxu0  ;;  %12799 = vmatprep.mubr.msk.f32.mxu1 %vm14336_vm0, %v14335_v37  ;;  %v5602_v42 = vadd.f32 %v5601_v53, %v5560_v32 }
 0x3db   :  { %v5603_v5 = vpop.f32.mrf.mxu1 }
 0x3dc   :  { %v5564_v35 = vpop.f32.mrf.mxu0  ;;  %v5604_v43 = vadd.f32 %v5603_v5, %v5562_v33 }
 0x3dd   :  { %v5605_v9 = vpop.f32.mrf.mxu1 }
 0x3de   :  { %v5565_v8 = vpop.f32.mrf.mxu0 }
 0x3df   :  { %v5606_v0 = vpop.f32.mrf.mxu1 }
 0x418   :  { %v5642_v59 = vpop.f32.mrf.mxu0 }
 0x419   :  { %v5643_v40 = vadd.f32 %v5642_v59, %v5602_v42  ;;  %v5683_v44 = vpop.f32.mrf.mxu1 }
 0x41a   :  { %v5644_v25 = vpop.f32.mrf.mxu0 }
 0x41b   :  { %v5684_v41 = vadd.f32 %v5683_v44, %v5643_v40  ;;  %v5645_v55 = vadd.f32 %v5644_v25, %v5604_v43  ;;  %v5685_v3 = vpop.f32.mrf.mxu1 }
 0x41c   :  { %v5646_v46 = vpop.f32.mrf.mxu0 }
 0x41d   :  { %v5870_v48 = vpack.c.bf16 %v5684_v41, %v5684_v41  ;;  %v5686_v49 = vadd.f32 %v5685_v3, %v5645_v55  ;;  %v5687_v50 = vpop.f32.mrf.mxu1 }
 0x41e   :  { %v5647_v27 = vpop.f32.mrf.mxu0 }
 0x41f   :  { %v5872_v51 = vunpack.c.l.bf16 %v5870_v48  ;;  %v5871_v17 = vpack.c.bf16 %v5686_v49, %v5686_v49  ;;  %v5688_v52 = vpop.f32.mrf.mxu1 }
 0x421   :  { %v5873_v6 = vunpack.c.l.bf16 %v5871_v17  ;;  %v5910_v54 = vmul.f32 %v5884_v29, %v5872_v51  ;;  %v5914_v23 = vmul.f32 %v5885_v47, %v5872_v51 }
 0x423   :  { %v5911_v56 = vmul.f32 %v5885_v47, %v5873_v6  ;;  %v5913_v57 = vmul.f32 %v5884_v29, %v5873_v6 }
 0x425   :  { %v5912_v58 = vsub.f32 %v5910_v54, %v5911_v56  ;;  %v5915_v34 = vadd.f32 %v5914_v23, %v5913_v57 }
 0x427   :  { %12793 = vmatpush3.xpose.msk.msra.mxu0 %vm5922_vm1, %v5915_v34  ;;  %12798 = vmatpush3.xpose.msk.msra.mxu1 %vm5922_vm1, %v5912_v58 }
 0x428   :  { %6758 = vrot.lane.b32.xlu1 %v5915_v34, %s14334_s6  ;;  %12808 = vmatprep.subr.mxu1 %v14335_v37 }
 0x429   :  { %12802 = vmatprep.subr.bf16.mxu0 %v14335_v37 }
 0x42a   :  { %12795 = vmatmul.mubr.msk.f32.vlgmr.msra.gmra.mxu0 %vm5922_vm1, %v14576_v2  ;;  %12800 = vmatmul.mubr.msk.f32.vlgmr.msra.gmra.mxu1 %vm5922_vm1, %v14578_v11  ;;  %v6214_v2 = vpop.permute.xlu1 %6213 }
 0x42b   :  { %12809 = vmatpush3.xpose.msk.msra.mxu1 %vm5922_vm1, %v5915_v34  ;;  %12810 = vmatprep.mubr.msk.f32.mxu1 %vm14336_vm0, %v14335_v37 }
 0x42c   :  { %6835 = vrot.lane.b32.xlu1 %v5912_v58, %s14334_s6  ;;  %12813 = vmatprep.subr.mxu1 %v14335_v37 }
 0x42d   :  { %12804 = vmatprep.mubr.msk.bf16.mxu0 %vm14336_vm0, %v14335_v37 }
 0x42e   :  { %12811 = vmatmul.mubr.msk.f32.vlgmr.msra.gmra.mxu1 %vm5922_vm1, %v6140_v28  ;;  %v6552_v11 = vpop.permute.xlu1 %6551 }
 0x42f   :  { %12814 = vmatpush3.xpose.msk.msra.mxu1 %vm5922_vm1, %v5912_v58  ;;  %12815 = vmatprep.mubr.msk.f32.mxu1 %vm14336_vm0, %v14335_v37 }
 0x430   :  { %6974 = vrot.lane.b32.xlu1 %v14613_v36, %s14334_s6  ;;  %12824 = vmatprep.subr.mxu1 %v14335_v37 }
 0x432   :  { %12816 = vmatmul.mubr.msk.f32.vlgmr.msra.gmra.mxu1 %vm5922_vm1, %v6214_v2 }
 0x433   :  { %12825 = vmatpush3.xpose.msk.msra.mxu1 %vm5922_vm1, %v5915_v34  ;;  %12826 = vmatprep.mubr.msk.f32.mxu1 %vm14336_vm0, %v14335_v37 }
 0x434   :  { %7048 = vrot.lane.b32.xlu1 %v14615_v38, %s14334_s6  ;;  %12829 = vmatprep.subr.mxu1 %v14335_v37 }
 0x436   :  { %12827 = vmatmul.mubr.msk.f32.vlgmr.msra.gmra.mxu1 %vm5922_vm1, %v14582_v16  ;;  %v6626_v16 = vpop.permute.xlu1 %6625 }
 0x437   :  { %12830 = vmatpush3.xpose.msk.msra.mxu1 %vm5922_vm1, %v5912_v58  ;;  %12831 = vmatprep.mubr.msk.f32.mxu1 %vm14336_vm0, %v14335_v37 }
 0x438   :  { %7460 = vrot.lane.b32.xlu1 %v14619_v39, %s14334_s6  ;;  %12840 = vmatprep.subr.mxu1 %v14335_v37 }
 0x43a   :  { %12832 = vmatmul.mubr.msk.f32.vlgmr.msra.gmra.mxu1 %vm5922_vm1, %v14584_v18 }
 0x43b   :  { %12841 = vmatpush3.xpose.msk.msra.mxu1 %vm5922_vm1, %v5915_v34  ;;  %12842 = vmatprep.mubr.msk.f32.mxu1 %vm14336_vm0, %v14335_v37 }
 0x43c   :  { %12845 = vmatprep.subr.mxu1 %v14335_v37 }
 0x43e   :  { %12843 = vmatmul.mubr.msk.f32.vlgmr.msra.gmra.mxu1 %vm5922_vm1, %v6552_v11 }
 0x43f   :  { %12846 = vmatpush3.xpose.msk.msra.mxu1 %vm5922_vm1, %v5912_v58  ;;  %12847 = vmatprep.mubr.msk.f32.mxu1 %vm14336_vm0, %v14335_v37 }
 0x440   :  { %12856 = vmatprep.subr.mxu1 %v14335_v37 }
 0x442   :  { %12848 = vmatmul.mubr.msk.f32.vlgmr.msra.gmra.mxu1 %vm5922_vm1, %v6626_v16 }
 0x443   :  { %12858 = vmatprep.mubr.msk.f32.mxu1 %vm14336_vm0, %v14335_v37 }
 0x458   :  { %v5724_v18 = vpop.f32.mrf.mxu0 }
 0x459   :  { %v5765_v60 = vpop.f32.mrf.mxu1 }
 0x45a   :  { %v5726_v61 = vpop.f32.mrf.mxu0  ;;  %v5766_v15 = vadd.f32 %v5765_v60, %v5724_v18 }
 0x45b   :  { %v5767_v62 = vpop.f32.mrf.mxu1 }
 0x45c   :  { %v5768_v63 = vadd.f32 %v5767_v62, %v5726_v61  ;;  %v5728_v30 = vpop.f32.mrf.mxu0 }
 0x45d   :  { %v5769_v1 = vpop.f32.mrf.mxu1 }
 0x45e   :  { %v5729_v12 = vpop.f32.mrf.mxu0 }
 0x45f   :  { %v5770_v14 = vpop.f32.mrf.mxu1 }
 0x498   :  { %v5806_v19 = vpop.f32.mrf.mxu0 }
 0x499   :  { %v5807_v20 = vadd.f32 %v5806_v19, %v5766_v15  ;;  %v5847_v21 = vpop.f32.mrf.mxu1 }
 0x49a   :  { %v6759_v22 = vpop.permute.xlu1 %6758  ;;  %v5808_v4 = vpop.f32.mrf.mxu0 }
 0x49b   :  { %v5848_v24 = vadd.f32 %v5847_v21, %v5807_v20  ;;  %v5809_v26 = vadd.f32 %v5808_v4, %v5768_v63  ;;  %v5849_v45 = vpop.f32.mrf.mxu1  ;;  %12857 = vmatpush3.xpose.msk.msra.mxu1 %vm5922_vm1, %v6759_v22 }
 0x49c   :  { %v5810_v31 = vpop.f32.mrf.mxu0  ;;  %12861 = vmatprep.subr.mxu1 %v14335_v37 }
 0x49d   :  { %v5874_v32 = vpack.c.bf16 %v5848_v24, %v5848_v24  ;;  %v5850_v53 = vadd.f32 %v5849_v45, %v5809_v26  ;;  %v5851_v33 = vpop.f32.mrf.mxu1 }
 0x49e   :  { %v6836_v5 = vpop.permute.xlu1 %6835  ;;  %12859 = vmatmul.mubr.msk.f32.vlgmr.msra.gmra.mxu1 %vm5922_vm1, %v14613_v36  ;;  %v5811_v35 = vpop.f32.mrf.mxu0 }
 0x49f   :  { %v14688_v9 = vsel %vm6093_vm2, %v5874_v32, 0  ;;  %v5875_v8 = vpack.c.bf16 %v5850_v53, %v5850_v53  ;;  %v5852_v0 = vpop.f32.mrf.mxu1  ;;  %12862 = vmatpush3.xpose.msk.msra.mxu1 %vm5922_vm1, %v6836_v5  ;;  %12863 = vmatprep.mubr.msk.f32.mxu1 %vm14336_vm0, %v14335_v37 }
 0x4a0   :  { %12803 = vmatpush3.bf16.msra.mxu0 %v14688_v9  ;;  %12872 = vmatprep.subr.mxu1 %v14335_v37 }
 0x4a1   :  { %v14696_v42 = vsel %vm6093_vm2, %v5875_v8, 0  ;;  %12818 = vmatprep.subr.bf16.mxu0 %v14335_v37 }
 0x4a2   :  { %12864 = vmatmul.mubr.msk.f32.vlgmr.msra.gmra.mxu1 %vm5922_vm1, %v14615_v38  ;;  %v6975_v36 = vpop.permute.xlu1 %6974  ;;  %v7387_v38 = vpop.permute.xlu0 %7386 }
 0x4a3   :  { %12873 = vmatpush3.xpose.msk.msra.mxu1 %vm5922_vm1, %v6759_v22  ;;  %12874 = vmatprep.mubr.msk.f32.mxu1 %vm14336_vm0, %v14335_v37 }
 0x4a4   :  { %12877 = vmatprep.subr.mxu1 %v14335_v37 }
 0x4a6   :  { %12875 = vmatmul.mubr.msk.f32.vlgmr.msra.gmra.mxu1 %vm5922_vm1, %v6975_v36  ;;  %v7049_v59 = vpop.permute.xlu1 %7048 }
 0x4a7   :  { %12878 = vmatpush3.xpose.msk.msra.mxu1 %vm5922_vm1, %v6836_v5  ;;  %12879 = vmatprep.mubr.msk.f32.mxu1 %vm14336_vm0, %v14335_v37 }
 0x4a8   :  { %12888 = vmatprep.subr.mxu1 %v14335_v37 }
 0x4aa   :  { %12880 = vmatmul.mubr.msk.f32.vlgmr.msra.gmra.mxu1 %vm5922_vm1, %v7049_v59 }
 0x4ab   :  { %12889 = vmatpush3.xpose.msk.msra.mxu1 %vm5922_vm1, %v6759_v22  ;;  %12890 = vmatprep.mubr.msk.f32.mxu1 %vm14336_vm0, %v14335_v37 }
 0x4ac   :  { %12893 = vmatprep.subr.mxu1 %v14335_v37 }
 0x4ae   :  { %12891 = vmatmul.mubr.msk.f32.vlgmr.msra.gmra.mxu1 %vm5922_vm1, %v14617_v7  ;;  %v7461_v7 = vpop.permute.xlu1 %7460 }
 0x4af   :  { %12894 = vmatpush3.xpose.msk.msra.mxu1 %vm5922_vm1, %v6836_v5  ;;  %12895 = vmatprep.mubr.msk.f32.mxu1 %vm14336_vm0, %v14335_v37 }
 0x4b0   :  { %12904 = vmatprep.subr.mxu1 %v14335_v37 }
 0x4b2   :  { %12896 = vmatmul.mubr.msk.f32.vlgmr.msra.gmra.mxu1 %vm5922_vm1, %v14619_v39  ;;  %v5919_v39 = vand.u32 127, %v174_v10 }
 0x4b3   :  { %12905 = vmatpush3.xpose.msk.msra.mxu1 %vm5922_vm1, %v6759_v22  ;;  %12906 = vmatprep.mubr.msk.f32.mxu1 %vm14336_vm0, %v14335_v37 }
 0x4b4   :  { %12909 = vmatprep.subr.mxu1 %v14335_v37  ;;  %vm5920_vm3 = vcmp.gt.s32.totalorder %v5919_v39, %v14440_v13 }
 0x4b5   :  { %v14735_v55 = vsel %vm5920_vm3, -3.4028235e+38, %v14335_v37 }
 0x4b6   :  { %12907 = vmatmul.mubr.msk.f32.vlgmr.msra.gmra.mxu1 %vm5922_vm1, %v7387_v38 }
 0x4b7   :  { %12910 = vmatpush3.xpose.msk.msra.mxu1 %vm5922_vm1, %v6836_v5  ;;  %12911 = vmatprep.mubr.msk.f32.mxu1 %vm14336_vm0, %v14335_v37 }
 0x4ba   :  { %12912 = vmatmul.mubr.msk.f32.vlgmr.msra.gmra.mxu1 %vm5922_vm1, %v7461_v7 }
 0x4ea   :  { %v5995_v43 = vpop.f32.mrf.mxu0  ;;  %v6071_v40 = vpop.f32.mrf.mxu1 }
 0x4eb   :  { %v6072_v44 = vadd.f32 %v6071_v40, %v5995_v43 }
 0x4ec   :  { %v12796_v25 = vpop.f32.mrf.mxu0  ;;  %v12801_v41 = vpop.f32.mrf.mxu1 }
 0x4ed   :  { %v6075_v3 = vmul.f32 0.088388346, %v6072_v44 }
 0x4ee   :  { %v6209_v46 = vpop.f32.mrf.mxu1 }
 0x4ef   :  { %v14738_v48 = vadd.f32 %v6075_v3, %v14735_v55 }
 0x4f0   :  { %v12812_v49 = vpop.f32.mrf.mxu1 }
 0x4f1   :  { %v6078_v10 = vsel %vm6077_vm4, %v14738_v48, -inf }
 0x4f2   :  { %6079 = vmax.xlane.f32.xlu0 %v6078_v10  ;;  %v6283_v13 = vpop.f32.mrf.mxu1 }
 0x4f3   :  { %v6284_v50 = vadd.f32 %v6283_v13, %v6209_v46 }
 0x4f4   :  { %v12817_v27 = vpop.f32.mrf.mxu1 }
 0x4f5   :  { %v6287_v51 = vmul.f32 0.088388346, %v6284_v50 }
 0x4f6   :  { %v6415_v17 = vpop.f32.mrf.mxu1 }
 0x4f7   :  { %v6288_v52 = vadd.f32 %v6287_v51, %v14735_v55 }
 0x4f8   :  { %v12828_v29 = vpop.f32.mrf.mxu1 }
 0x4f9   :  { %v6289_v47 = vsel %vm6077_vm4, %v6288_v52, -inf }
 0x4fa   :  { %6290 = vmax.xlane.f32.xlu1 %v6289_v47  ;;  %v6488_v6 = vpop.f32.mrf.mxu1 }
 0x4fb   :  { %v6489_v54 = vadd.f32 %v6488_v6, %v6415_v17 }
 0x4fc   :  { %v12833_v23 = vpop.f32.mrf.mxu1 }
 0x4fd   :  { %v6492_v56 = vmul.f32 0.088388346, %v6489_v54 }
 0x4fe   :  { %v6621_v57 = vpop.f32.mrf.mxu1 }
 0x4ff   :  { %v6493_v58 = vadd.f32 %v6492_v56, %v14735_v55 }
 0x500   :  { %v12844_v34 = vpop.f32.mrf.mxu1 }
 0x501   :  { %v6494_v28 = vsel %vm6077_vm4, %v6493_v58, -inf }
 0x502   :  { %6495 = vmax.xlane.f32.xlu0 %v6494_v28  ;;  %v6695_v2 = vpop.f32.mrf.mxu1 }
 0x503   :  { %v6696_v11 = vadd.f32 %v6695_v2, %v6621_v57 }
 0x504   :  { %v12849_v16 = vpop.f32.mrf.mxu1 }
 0x505   :  { %v6699_v18 = vmul.f32 0.088388346, %v6696_v11 }
 0x507   :  { %v6700_v60 = vadd.f32 %v6699_v18, %v14735_v55 }
 0x509   :  { %v6701_v61 = vsel %vm6077_vm4, %v6700_v60, -inf }
 0x50a   :  { %6702 = vmax.xlane.f32.xlu0 %v6701_v61 }
 0x55e   :  { %v6831_v62 = vpop.f32.mrf.mxu1 }
 0x560   :  { %v12860_v63 = vpop.f32.mrf.mxu1 }
 0x562   :  { %v6908_v30 = vpop.f32.mrf.mxu1 }
 0x563   :  { %v6909_v1 = vadd.f32 %v6908_v30, %v6831_v62 }
 0x564   :  { %v12865_v12 = vpop.f32.mrf.mxu1 }
 0x565   :  { %v6912_v14 = vmul.f32 0.088388346, %v6909_v1 }
 0x566   :  { %v7044_v15 = vpop.f32.mrf.mxu1 }
 0x567   :  { %v6913_v19 = vadd.f32 %v6912_v14, %v14735_v55 }
 0x568   :  { %v12876_v20 = vpop.f32.mrf.mxu1 }
 0x569   :  { %v6914_v21 = vsel %vm6077_vm4, %v6913_v19, -inf }
 0x56a   :  { %6915 = vmax.xlane.f32.xlu1 %v6914_v21  ;;  %v7118_v22 = vpop.f32.mrf.mxu1 }
 0x56b   :  { %v7119_v4 = vadd.f32 %v7118_v22, %v7044_v15 }
 0x56c   :  { %v12881_v24 = vpop.f32.mrf.mxu1 }
 0x56d   :  { %v7122_v26 = vmul.f32 0.088388346, %v7119_v4 }
 0x56e   :  { %v7250_v45 = vpop.f32.mrf.mxu1 }
 0x56f   :  { %v7123_v31 = vadd.f32 %v7122_v26, %v14735_v55 }
 0x570   :  { %v12892_v32 = vpop.f32.mrf.mxu1 }
 0x571   :  { %v7124_v53 = vsel %vm6077_vm4, %v7123_v31, -inf }
 0x572   :  { %7125 = vmax.xlane.f32.xlu0 %v7124_v53  ;;  %v7323_v33 = vpop.f32.mrf.mxu1 }
 0x573   :  { %v7324_v5 = vadd.f32 %v7323_v33, %v7250_v45 }
 0x574   :  { %v12897_v35 = vpop.f32.mrf.mxu1 }
 0x575   :  { %v7327_v8 = vmul.f32 0.088388346, %v7324_v5 }
 0x576   :  { %v7456_v0 = vpop.f32.mrf.mxu1 }
 0x577   :  { %v7328_v36 = vadd.f32 %v7327_v8, %v14735_v55 }
 0x578   :  { %v12908_v59 = vpop.f32.mrf.mxu1 }
 0x579   :  { %v7329_v38 = vsel %vm6077_vm4, %v7328_v36, -inf  ;;  %v7653_v59 = vld [vmem:[#allocation15 + $0x1c0] sm:$0xff] }
 0x57a   :  { %7330 = vmax.xlane.f32.xlu1 %v7329_v38  ;;  %v7530_v7 = vpop.f32.mrf.mxu1  ;;  %v7657_v38 = vld [vmem:[#allocation15 + $0x1e0] sm:$0xff] }
 0x57b   :  { %v7531_v39 = vadd.f32 %v7530_v7, %v7456_v0  ;;  %v6080_v43 = vpop.xlane.xlu0 %6079  ;;  %v7645_v7 = vld [vmem:[#allocation15 + $0x180] sm:$0xff] }
 0x57c   :  { %v6081_v40 = vsub.f32 %v14738_v48, %v6080_v43  ;;  %v12913_v44 = vpop.f32.mrf.mxu1  ;;  %v12281_v43 = vcombine.high %v7653_v59, %v7657_v38 }
 0x57d   :  { %v7534_v25 = vmul.f32 0.088388346, %v7531_v39  ;;  %v12280_v39 = vcombine.low %v7653_v59, %v7657_v38  ;;  %v7669_v38 = vld [vmem:[#allocation15 + $0x240] sm:$0xff] }
 0x57e   :  { %v6082_v41 = vmul.f32 1.442695, %v6081_v40  ;;  %v7649_v40 = vld [vmem:[#allocation15 + $0x1a0] sm:$0xff]  ;;  %10697 = vmatprep.subr.bf16.mxu1 %v12281_v43 }
 0x57f   :  { %v7535_v3 = vadd.f32 %v7534_v25, %v14735_v55  ;;  %v12273_v44 = vcombine.high %v7645_v7, %v7649_v40  ;;  %10698 = vmatpush1.bf16.msra.mxu1 %v12280_v39 }
 0x580   :  { %14098 = vpow2.f32 %v6082_v41  ;;  %v7637_v41 = vld [vmem:[#allocation15 + $0x140] sm:$0xff] }
 0x581   :  { %v7536_v46 = vsel %vm6077_vm4, %v7535_v3, -inf  ;;  %10699 = vmatprep.subr.bf16.mxu1 %v12273_v44  ;;  %v7665_v44 = vld [vmem:[#allocation15 + $0x220] sm:$0xff] }
 0x582   :  { %7537 = vmax.xlane.f32.xlu0 %v7536_v46 }
 0x583   :  { %v6291_v49 = vpop.xlane.xlu1 %6290 }
 0x584   :  { %v6292_v10 = vsub.f32 %v6288_v52, %v6291_v49  ;;  %v12272_v49 = vcombine.low %v7645_v7, %v7649_v40  ;;  %v7673_v7 = vld [vmem:[#allocation15 + $0x260] sm:$0xff] }
 0x585   :  { %v12296_v39 = vcombine.low %v7669_v38, %v7673_v7  ;;  %v12297_v43 = vcombine.high %v7669_v38, %v7673_v7  ;;  %v7661_v40 = vld [vmem:[#allocation15 + $0x200] sm:$0xff] }
 0x586   :  { %v6293_v13 = vmul.f32 1.442695, %v6292_v10  ;;  %10700 = vmatpush1.bf16.msra.mxu1 %v12272_v49  ;;  %v14803_v49 = vld [vmem:[#allocation15 + $0x9e0] sm:$0xff] }
 0x587   :  { %v7841_v38 = vld [vmem:[#allocation15 + $0x7a0] sm:$0xff] }
 0x588   :  { %14100 = vpow2.f32 %v6293_v13  ;;  %v7629_v13 = vld [vmem:[#allocation15 + $0x100] sm:$0xff] }
 0x58b   :  { %v6496_v50 = vpop.xlane.xlu0 %6495 }
 0x58c   :  { %v6497_v27 = vsub.f32 %v6493_v58, %v6496_v50  ;;  %v7633_v50 = vld [vmem:[#allocation15 + $0x120] sm:$0xff] }
 0x58d   :  { %v14099_v51 = vpop.eup %14098 }
 0x58e   :  { %v6498_v17 = vmul.f32 1.442695, %v6497_v27  ;;  %v6084_v29 = vsel %vm6077_vm4, %v14099_v51, 0.0 }
 0x58f   :  { %6085 = vadd.xlane.f32.xlu1 %v6084_v29  ;;  %v7625_v29 = vld [vmem:[#allocation15 + $0xe0] sm:$0xff] }
 0x590   :  { %14102 = vpow2.f32 %v6498_v17  ;;  %v7621_v17 = vld [vmem:[#allocation15 + $0xc0] sm:$0xff] }
 0x593   :  { %v6703_v48 = vpop.xlane.xlu0 %6702 }
 0x594   :  { %v6704_v47 = vsub.f32 %v6700_v60, %v6703_v48  ;;  %v12256_v48 = vcombine.low %v7629_v13, %v7633_v50 }
 0x595   :  { %v14101_v6 = vpop.eup %14100 }
 0x596   :  { %v6705_v55 = vmul.f32 1.442695, %v6704_v47  ;;  %v6295_v54 = vsel %vm6077_vm4, %v14101_v6, 0.0  ;;  %v12249_v47 = vcombine.high %v7621_v17, %v7625_v29 }
 0x597   :  { %6296 = vadd.xlane.f32.xlu0 %v6295_v54  ;;  %v12248_v54 = vcombine.low %v7621_v17, %v7625_v29 }
 0x598   :  { %14104 = vpow2.f32 %v6705_v55  ;;  %v7617_v55 = vld [vmem:[#allocation15 + $0xa0] sm:$0xff] }
 0x59d   :  { %v14103_v23 = vpop.eup %14102 }
 0x59e   :  { %v6500_v52 = vsel %vm6077_vm4, %v14103_v23, 0.0 }
 0x59f   :  { %6501 = vadd.xlane.f32.xlu1 %v6500_v52  ;;  %v7605_v52 = vld [vmem:[#allocation15 + $0x40] sm:$0xff] }
 0x5a5   :  { %v14760_v56 = vpop.eup %14104 }
 0x5a6   :  { %v6707_v57 = vsel %vm6077_vm4, %v14760_v56, 0.0 }
 0x5a7   :  { %6708 = vadd.xlane.f32.xlu0 %v6707_v57 }
 0x5f3   :  { %v6916_v58 = vpop.xlane.xlu1 %6915 }
 0x5f4   :  { %v6917_v34 = vsub.f32 %v6913_v19, %v6916_v58 }
 0x5f6   :  { %v6918_v28 = vmul.f32 1.442695, %v6917_v34  ;;  %v7597_v34 = vld [vmem:[#allocation15] sm:$0xff] }
 0x5f8   :  { %14106 = vpow2.f32 %v6918_v28  ;;  %v7601_v28 = vld [vmem:[#allocation15 + $0x20] sm:$0xff] }
 0x5fb   :  { %v7126_v2 = vpop.xlane.xlu0 %7125 }
 0x5fc   :  { %v7127_v11 = vsub.f32 %v7123_v31, %v7126_v2 }
 0x5fe   :  { %v7128_v16 = vmul.f32 1.442695, %v7127_v11  ;;  %v12225_v11 = vcombine.high %v7597_v34, %v7601_v28 }
 0x600   :  { %14108 = vpow2.f32 %v7128_v16  ;;  %v7717_v16 = vld [vmem:[#allocation15 + $0x3c0] sm:$0xff] }
 0x603   :  { %v7331_v18 = vpop.xlane.xlu1 %7330 }
 0x604   :  { %v7332_v60 = vsub.f32 %v7328_v36, %v7331_v18  ;;  %v7721_v18 = vld [vmem:[#allocation15 + $0x3e0] sm:$0xff] }
 0x605   :  { %v14764_v61 = vpop.eup %14106 }
 0x606   :  { %v7333_v62 = vmul.f32 1.442695, %v7332_v60  ;;  %v6920_v63 = vsel %vm6077_vm4, %v14764_v61, 0.0  ;;  %v12224_v60 = vcombine.low %v7597_v34, %v7601_v28 }
 0x607   :  { %6921 = vadd.xlane.f32.xlu1 %v6920_v63  ;;  %v7709_v63 = vld [vmem:[#allocation15 + $0x380] sm:$0xff] }
 0x608   :  { %14110 = vpow2.f32 %v7333_v62  ;;  %v12345_v62 = vcombine.high %v7717_v16, %v7721_v18 }
 0x60b   :  { %v7538_v30 = vpop.xlane.xlu0 %7537 }
 0x60c   :  { %v7539_v1 = vsub.f32 %v7535_v3, %v7538_v30  ;;  %v7641_v3 = vld [vmem:[#allocation15 + $0x160] sm:$0xff] }
 0x60d   :  { %v14768_v12 = vpop.eup %14108  ;;  %v12264_v27 = vcombine.low %v7637_v41, %v7641_v3  ;;  %v7713_v30 = vld [vmem:[#allocation15 + $0x3a0] sm:$0xff] }
 0x60e   :  { %v7540_v14 = vmul.f32 1.442695, %v7539_v1  ;;  %v7130_v15 = vsel %vm6077_vm4, %v14768_v12, 0.0  ;;  %v12344_v1 = vcombine.low %v7717_v16, %v7721_v18  ;;  %v7765_v16 = vld [vmem:[#allocation15 + $0x540] sm:$0xff] }
 0x60f   :  { %7131 = vadd.xlane.f32.xlu0 %v7130_v15  ;;  %v7701_v15 = vld [vmem:[#allocation15 + $0x340] sm:$0xff] }
 0x610   :  { %14112 = vpow2.f32 %v7540_v14  ;;  %v12337_v14 = vcombine.high %v7709_v63, %v7713_v30 }
 0x615   :  { %v14772_v19 = vpop.eup %14110 }
 0x616   :  { %v7335_v20 = vsel %vm6077_vm4, %v14772_v19, 0.0 }
 0x617   :  { %7336 = vadd.xlane.f32.xlu1 %v7335_v20  ;;  %v7705_v20 = vld [vmem:[#allocation15 + $0x360] sm:$0xff] }
 0x618   :  { %v6086_v21 = vpop.xlane.xlu1 %6085 }
 0x619   :  { %14114 = vrcp.f32 %v6086_v21  ;;  %v12336_v21 = vcombine.low %v7709_v63, %v7713_v30  ;;  %v7749_v30 = vld [vmem:[#allocation15 + $0x4c0] sm:$0xff] }
 0x61d   :  { %v14776_v22 = vpop.eup %14112 }
 0x61e   :  { %v7542_v4 = vsel %vm6077_vm4, %v14776_v22, 0.0 }
 0x61f   :  { %7543 = vadd.xlane.f32.xlu0 %v7542_v4  ;;  %v12329_v4 = vcombine.high %v7701_v15, %v7705_v20 }
 0x620   :  { %v6297_v24 = vpop.xlane.xlu0 %6296 }
 0x621   :  { %14116 = vrcp.f32 %v6297_v24  ;;  %v12328_v24 = vcombine.low %v7701_v15, %v7705_v20  ;;  %v7741_v15 = vld [vmem:[#allocation15 + $0x480] sm:$0xff] }
 0x622   :  { %v7745_v20 = vld [vmem:[#allocation15 + $0x4a0] sm:$0xff] }
 0x626   :  { %v14115_v26 = vpop.eup %14114 }
 0x627   :  { %v6088_v45 = vmul.f32 %v14115_v26, %v14099_v51  ;;  %v12257_v51 = vcombine.high %v7629_v13, %v7633_v50  ;;  %v7693_v26 = vld [vmem:[#allocation15 + $0x300] sm:$0xff] }
 0x628   :  { %v6502_v31 = vpop.xlane.xlu1 %6501 }
 0x629   :  { %14118 = vrcp.f32 %v6502_v31  ;;  %v6089_v32 = vpack.c.bf16 %v6088_v45, %v6088_v45  ;;  %v7697_v45 = vld [vmem:[#allocation15 + $0x320] sm:$0xff] }
 0x62a   :  { %v12321_v31 = vcombine.high %v7693_v26, %v7697_v45 }
 0x62b   :  { %12805 = vmatmul.mubr.msk.bf16.vlgmr.msra.gmra.mxu0 %vm6077_vm4, %v6089_v32  ;;  %v12320_v32 = vcombine.low %v7693_v26, %v7697_v45  ;;  %v7737_v26 = vld [vmem:[#allocation15 + $0x460] sm:$0xff]  ;;  %v12368_v45 = vcombine.low %v7741_v15, %v7745_v20 }
 0x62c   :  { %12819 = vmatpush3.bf16.msra.mxu0 %v14688_v9  ;;  %12820 = vmatprep.mubr.msk.bf16.mxu0 %vm14336_vm0, %v14335_v37 }
 0x62d   :  { %12834 = vmatprep.subr.bf16.mxu0 %v14335_v37 }
 0x62e   :  { %v14117_v53 = vpop.eup %14116 }
 0x62f   :  { %v6299_v33 = vmul.f32 %v14117_v53, %v14101_v6  ;;  %v7613_v6 = vld [vmem:[#allocation15 + $0x80] sm:$0xff] }
 0x630   :  { %v6709_v5 = vpop.xlane.xlu0 %6708  ;;  %v12240_v57 = vcombine.low %v7613_v6, %v7617_v55  ;;  %v7685_v53 = vld [vmem:[#allocation15 + $0x2c0] sm:$0xff] }
 0x631   :  { %14120 = vrcp.f32 %v6709_v5  ;;  %v6300_v35 = vpack.c.bf16 %v6299_v33, %v6299_v33  ;;  %v7689_v33 = vld [vmem:[#allocation15 + $0x2e0] sm:$0xff] }
 0x632   :  { %v12312_v5 = vcombine.low %v7685_v53, %v7689_v33 }
 0x633   :  { %12821 = vmatmul.mubr.msk.bf16.vlgmr.msra.gmra.mxu0 %vm6077_vm4, %v6300_v35  ;;  %v12313_v35 = vcombine.high %v7685_v53, %v7689_v33  ;;  %v7729_v53 = vld [vmem:[#allocation15 + $0x420] sm:$0xff] }
 0x634   :  { %12835 = vmatpush3.bf16.msra.mxu0 %v14688_v9  ;;  %12836 = vmatprep.mubr.msk.bf16.mxu0 %vm14336_vm0, %v14335_v37 }
 0x635   :  { %12850 = vmatprep.subr.bf16.mxu0 %v14335_v37 }
 0x636   :  { %v14119_v8 = vpop.eup %14118 }
 0x637   :  { %v6504_v0 = vmul.f32 %v14119_v8, %v14103_v23  ;;  %v12241_v23 = vcombine.high %v7613_v6, %v7617_v55  ;;  %v7677_v8 = vld [vmem:[#allocation15 + $0x280] sm:$0xff] }
 0x638   :  { %v7781_v55 = vld [vmem:[#allocation15 + $0x5c0] sm:$0xff] }
 0x639   :  { %v6505_v36 = vpack.c.bf16 %v6504_v0, %v6504_v0  ;;  %v7681_v0 = vld [vmem:[#allocation15 + $0x2a0] sm:$0xff] }
 0x63a   :  { %v12304_v59 = vcombine.low %v7677_v8, %v7681_v0 }
 0x63b   :  { %12837 = vmatmul.mubr.msk.bf16.vlgmr.msra.gmra.mxu0 %vm6077_vm4, %v6505_v36  ;;  %v12305_v36 = vcombine.high %v7677_v8, %v7681_v0  ;;  %v7849_v8 = vld [vmem:[#allocation15 + $0x7e0] sm:$0xff] }
 0x63c   :  { %12851 = vmatpush3.bf16.msra.mxu0 %v14688_v9  ;;  %12852 = vmatprep.mubr.msk.bf16.mxu0 %vm14336_vm0, %v14335_v37  ;;  %v12265_v9 = vcombine.high %v7637_v41, %v7641_v3  ;;  %v12288_v41 = vcombine.low %v7661_v40, %v7665_v44 }
 0x63d   :  { %12866 = vmatprep.subr.bf16.mxu0 %v14335_v37 }
 0x63e   :  { %v14121_v25 = vpop.eup %14120  ;;  %10701 = vmatprep.subr.bf16.mxu1 %v12265_v9 }
 0x63f   :  { %v6711_v46 = vmul.f32 %v14121_v25, %v14760_v56  ;;  %10702 = vmatpush1.bf16.msra.mxu1 %v12264_v27  ;;  %v7609_v56 = vld [vmem:[#allocation15 + $0x60] sm:$0xff]  ;;  %v12289_v25 = vcombine.high %v7661_v40, %v7665_v44 }
 0x640   :  { %10703 = vmatprep.subr.bf16.mxu1 %v12257_v51  ;;  %v12233_v58 = vcombine.high %v7605_v52, %v7609_v56  ;;  %v12232_v2 = vcombine.low %v7605_v52, %v7609_v56  ;;  %v7833_v40 = vld [vmem:[#allocation15 + $0x760] sm:$0xff] }
 0x641   :  { %v6712_v10 = vpack.c.bf16 %v6711_v46, %v6711_v46  ;;  %v14801_v46 = vld [vmem:[#allocation15 + $0x9c0] sm:$0xff] }
 0x642   :  { %v12537_v9 = vcombine.high %v14801_v46, %v14803_v49 }
 0x643   :  { %12853 = vmatmul.mubr.msk.bf16.vlgmr.msra.gmra.mxu0 %vm6077_vm4, %v6712_v10  ;;  %10704 = vmatpush1.bf16.msra.mxu1 %v12256_v48  ;;  %v12536_v10 = vcombine.low %v14801_v46, %v14803_v49 }
 0x644   :  { %12867 = vmatpush3.bf16.msra.mxu0 %v14696_v42  ;;  %12868 = vmatprep.mubr.msk.bf16.mxu0 %vm14336_vm0, %v14335_v37 }
 0x645   :  { %12882 = vmatprep.subr.bf16.mxu0 %v14335_v37  ;;  %10705 = vmatprep.subr.bf16.mxu1 %v12249_v47 }
 0x647   :  { %10706 = vmatpush1.bf16.msra.mxu1 %v12248_v54  ;;  %v7785_v54 = vld [vmem:[#allocation15 + $0x5e0] sm:$0xff] }
 0x648   :  { %10707 = vmatprep.subr.bf16.mxu1 %v12241_v23  ;;  %v12409_v56 = vcombine.high %v7781_v55, %v7785_v54  ;;  %v12408_v28 = vcombine.low %v7781_v55, %v7785_v54  ;;  %v7801_v55 = vld [vmem:[#allocation15 + $0x660] sm:$0xff] }
 0x64b   :  { %10708 = vmatpush1.bf16.msra.mxu1 %v12240_v57  ;;  %v7773_v57 = vld [vmem:[#allocation15 + $0x580] sm:$0xff] }
 0x64c   :  { %10709 = vmatprep.subr.bf16.mxu1 %v12233_v58  ;;  %v7777_v58 = vld [vmem:[#allocation15 + $0x5a0] sm:$0xff] }
 0x64d   :  { %v12400_v18 = vcombine.low %v7773_v57, %v7777_v58 }
 0x64f   :  { %10710 = vmatpush1.bf16.msra.mxu1 %v12232_v2 }
 0x650   :  { %10711 = vmatprep.subr.bf16.mxu1 %v12225_v11  ;;  %v12401_v11 = vcombine.high %v7773_v57, %v7777_v58  ;;  %v7789_v57 = vld [vmem:[#allocation15 + $0x600] sm:$0xff] }
 0x651   :  { %v7793_v58 = vld [vmem:[#allocation15 + $0x620] sm:$0xff] }
 0x653   :  { %10712 = vmatpush1.bf16.msra.mxu1 %v12224_v60  ;;  %v7757_v60 = vld [vmem:[#allocation15 + $0x500] sm:$0xff] }
 0x654   :  { %10713 = vmatprep.subr.bf16.mxu1 %v12345_v62  ;;  %v7761_v62 = vld [vmem:[#allocation15 + $0x520] sm:$0xff] }
 0x655   :  { %v12385_v63 = vcombine.high %v7757_v60, %v7761_v62 }
 0x657   :  { %10714 = vmatpush2.bf16.msra.mxu1 %v12344_v1  ;;  %v7753_v1 = vld [vmem:[#allocation15 + $0x4e0] sm:$0xff] }
 0x658   :  { %10715 = vmatprep.subr.bf16.mxu1 %v12337_v14  ;;  %v12377_v14 = vcombine.high %v7749_v30, %v7753_v1 }
 0x65b   :  { %10716 = vmatpush2.bf16.msra.mxu1 %v12336_v21  ;;  %v12376_v21 = vcombine.low %v7749_v30, %v7753_v1 }
 0x65c   :  { %10717 = vmatprep.subr.bf16.mxu1 %v12329_v4  ;;  %v12369_v4 = vcombine.high %v7741_v15, %v7745_v20  ;;  %v7905_v15 = vld [vmem:[#allocation15 + $0x9a0] sm:$0xff] }
 0x65f   :  { %10718 = vmatpush2.bf16.msra.mxu1 %v12328_v24  ;;  %v7733_v24 = vld [vmem:[#allocation15 + $0x440] sm:$0xff] }
 0x660   :  { %10719 = vmatprep.subr.bf16.mxu1 %v12321_v31  ;;  %v12361_v31 = vcombine.high %v7733_v24, %v7737_v26  ;;  %v12360_v33 = vcombine.low %v7733_v24, %v7737_v26 }
 0x663   :  { %10720 = vmatpush2.bf16.msra.mxu1 %v12320_v32  ;;  %v7725_v32 = vld [vmem:[#allocation15 + $0x400] sm:$0xff] }
 0x664   :  { %10721 = vmatprep.subr.bf16.mxu1 %v12313_v35  ;;  %v7845_v35 = vld [vmem:[#allocation15 + $0x7c0] sm:$0xff]  ;;  %v12352_v0 = vcombine.low %v7725_v32, %v7729_v53 }
 0x665   :  { %v12472_v7 = vcombine.low %v7845_v35, %v7849_v8 }
 0x667   :  { %10722 = vmatpush2.bf16.msra.mxu1 %v12312_v5  ;;  %v12353_v5 = vcombine.high %v7725_v32, %v7729_v53  ;;  %v7897_v32 = vld [vmem:[#allocation15 + $0x960] sm:$0xff] }
 0x668   :  { %10723 = vmatprep.subr.bf16.mxu1 %v12305_v36  ;;  %v12473_v36 = vcombine.high %v7845_v35, %v7849_v8 }
 0x66b   :  { %10724 = vmatpush2.bf16.msra.mxu1 %v12304_v59  ;;  %v7837_v59 = vld [vmem:[#allocation15 + $0x780] sm:$0xff] }
 0x66c   :  { %10725 = vmatprep.subr.bf16.mxu1 %v12297_v43  ;;  %v7829_v43 = vld [vmem:[#allocation15 + $0x740] sm:$0xff]  ;;  %v12464_v44 = vcombine.low %v7837_v59, %v7841_v38 }
 0x66f   :  { %10726 = vmatpush2.bf16.msra.mxu1 %v12296_v39  ;;  %v12465_v39 = vcombine.high %v7837_v59, %v7841_v38 }
 0x670   :  { %10727 = vmatprep.subr.bf16.mxu1 %v12289_v25  ;;  %v12457_v25 = vcombine.high %v7829_v43, %v7833_v40 }
 0x673   :  { %10728 = vmatpush2.bf16.msra.mxu1 %v12288_v41  ;;  %v7821_v41 = vld [vmem:[#allocation15 + $0x700] sm:$0xff] }
 0x674   :  { %10779 = vmatprep.subr.bf16.mxu1 %v12537_v9  ;;  %v12456_v9 = vcombine.low %v7829_v43, %v7833_v40  ;;  %v7877_v43 = vld [vmem:[#allocation15 + $0x8c0] sm:$0xff] }
 0x675   :  { %v7881_v40 = vld [vmem:[#allocation15 + $0x8e0] sm:$0xff] }
 0x676   :  { %v12505_v49 = vcombine.high %v7877_v43, %v7881_v40 }
 0x690   :  { %v6922_v3 = vpop.xlane.xlu1 %6921 }
 0x691   :  { %14122 = vrcp.f32 %v6922_v3  ;;  %v7825_v3 = vld [vmem:[#allocation15 + $0x720] sm:$0xff] }
 0x698   :  { %v7132_v13 = vpop.xlane.xlu0 %7131 }
 0x699   :  { %14124 = vrcp.f32 %v7132_v13  ;;  %v12449_v13 = vcombine.high %v7821_v41, %v7825_v3 }
 0x69e   :  { %v14123_v50 = vpop.eup %14122 }
 0x69f   :  { %v6924_v27 = vmul.f32 %v14123_v50, %v14764_v61  ;;  %v7813_v50 = vld [vmem:[#allocation15 + $0x6c0] sm:$0xff] }
 0x6a0   :  { %v7337_v51 = vpop.xlane.xlu1 %7336 }
 0x6a1   :  { %14126 = vrcp.f32 %v7337_v51  ;;  %v6925_v17 = vpack.c.bf16 %v6924_v27, %v6924_v27  ;;  %v7817_v27 = vld [vmem:[#allocation15 + $0x6e0] sm:$0xff]  ;;  %v12448_v51 = vcombine.low %v7821_v41, %v7825_v3 }
 0x6a2   :  { %v8029_v41 = vld [vmem:[#allocation15 + $0xd80] sm:$0xff] }
 0x6a3   :  { %12869 = vmatmul.mubr.msk.bf16.vlgmr.msra.gmra.mxu0 %vm6077_vm4, %v6925_v17  ;;  %v12441_v17 = vcombine.high %v7813_v50, %v7817_v27  ;;  %v8033_v3 = vld [vmem:[#allocation15 + $0xda0] sm:$0xff] }
 0x6a4   :  { %12883 = vmatpush3.bf16.msra.mxu0 %v14696_v42  ;;  %12884 = vmatprep.mubr.msk.bf16.mxu0 %vm14336_vm0, %v14335_v37 }
 0x6a5   :  { %12898 = vmatprep.subr.bf16.mxu0 %v14335_v37 }
 0x6a6   :  { %v14125_v29 = vpop.eup %14124 }
 0x6a7   :  { %v7134_v48 = vmul.f32 %v14125_v29, %v14768_v12  ;;  %v7805_v29 = vld [vmem:[#allocation15 + $0x680] sm:$0xff] }
 0x6a8   :  { %v7544_v47 = vpop.xlane.xlu0 %7543 }
 0x6a9   :  { %14128 = vrcp.f32 %v7544_v47  ;;  %v7135_v6 = vpack.c.bf16 %v7134_v48, %v7134_v48  ;;  %v7809_v48 = vld [vmem:[#allocation15 + $0x6a0] sm:$0xff]  ;;  %v12440_v47 = vcombine.low %v7813_v50, %v7817_v27  ;;  %v12504_v27 = vcombine.low %v7877_v43, %v7881_v40 }
 0x6ab   :  { %12885 = vmatmul.mubr.msk.bf16.vlgmr.msra.gmra.mxu0 %vm6077_vm4, %v7135_v6  ;;  %v12433_v6 = vcombine.high %v7805_v29, %v7809_v48 }
 0x6ac   :  { %12899 = vmatpush3.bf16.msra.mxu0 %v14696_v42  ;;  %12900 = vmatprep.mubr.msk.bf16.mxu0 %vm14336_vm0, %v14335_v37 }
 0x6ad   :  { %12914 = vmatprep.subr.bf16.mxu0 %v14335_v37 }
 0x6ae   :  { %v14127_v61 = vpop.eup %14126 }
 0x6af   :  { %v7339_v23 = vmul.f32 %v14127_v61, %v14772_v19  ;;  %v7769_v19 = vld [vmem:[#allocation15 + $0x560] sm:$0xff] }
 0x6b0   :  { %v7797_v61 = vld [vmem:[#allocation15 + $0x640] sm:$0xff] }
 0x6b1   :  { %v7340_v52 = vpack.c.bf16 %v7339_v23, %v7339_v23 }
 0x6b3   :  { %12901 = vmatmul.mubr.msk.bf16.vlgmr.msra.gmra.mxu0 %vm6077_vm4, %v7340_v52  ;;  %v12432_v52 = vcombine.low %v7805_v29, %v7809_v48  ;;  %v12657_v29 = vcombine.high %v8029_v41, %v8033_v3  ;;  %v7861_v48 = vld [vmem:[#allocation15 + $0x840] sm:$0xff] }
 0x6b4   :  { %12915 = vmatpush3.bf16.msra.mxu0 %v14696_v42  ;;  %12916 = vmatprep.mubr.msk.bf16.mxu0 %vm14336_vm0, %v14335_v37  ;;  %v12393_v42 = vcombine.high %v7765_v16, %v7769_v19  ;;  %v12392_v37 = vcombine.low %v7765_v16, %v7769_v19  ;;  %v14828_v16 = vld [vmem:[#allocation15 + $0xdc0] sm:$0xff] }
 0x6b5   :  { %10738 = vmatprep.subr.bf16.mxu0 %v12409_v56  ;;  %v14830_v19 = vld [vmem:[#allocation15 + $0xde0] sm:$0xff] }
 0x6b6   :  { %v14129_v12 = vpop.eup %14128 }
 0x6b7   :  { %v7546_v34 = vmul.f32 %v14129_v12, %v14776_v22  ;;  %v12384_v22 = vcombine.low %v7757_v60, %v7761_v62  ;;  %v12425_v12 = vcombine.high %v7797_v61, %v7801_v55  ;;  %v12416_v60 = vcombine.low %v7789_v57, %v7793_v58 }
 0x6b9   :  { %v7547_v2 = vpack.c.bf16 %v7546_v34, %v7546_v34 }
 0x6bb   :  { %12917 = vmatmul.mubr.msk.bf16.vlgmr.msra.gmra.mxu0 %vm6077_vm4, %v7547_v2 }
 0x6bc   :  { %10739 = vmatpush1.bf16.msra.mxu0 %v12408_v28  ;;  %v12424_v28 = vcombine.low %v7797_v61, %v7801_v55  ;;  %v8025_v61 = vld [vmem:[#allocation15 + $0xd60] sm:$0xff] }
 0x6bd   :  { %10740 = vmatprep.subr.bf16.mxu0 %v12401_v11  ;;  %v12417_v11 = vcombine.high %v7789_v57, %v7793_v58  ;;  %v8013_v57 = vld [vmem:[#allocation15 + $0xd00] sm:$0xff] }
 0x6be   :  { %v8017_v58 = vld [vmem:[#allocation15 + $0xd20] sm:$0xff] }
 0x6c0   :  { %10741 = vmatpush1.bf16.msra.mxu0 %v12400_v18 }
 0x6c1   :  { %10742 = vmatprep.subr.bf16.mxu0 %v12393_v42 }
 0x6c4   :  { %10743 = vmatpush1.bf16.msra.mxu0 %v12392_v37  ;;  %v12665_v37 = vcombine.high %v14828_v16, %v14830_v19 }
 0x6c5   :  { %10744 = vmatprep.subr.bf16.mxu0 %v12385_v63 }
 0x6c8   :  { %10745 = vmatpush1.bf16.msra.mxu0 %v12384_v22 }
 0x6c9   :  { %10746 = vmatprep.subr.bf16.mxu0 %v12377_v14  ;;  %v7901_v14 = vld [vmem:[#allocation15 + $0x980] sm:$0xff] }
 0x6cc   :  { %10747 = vmatpush1.bf16.msra.mxu0 %v12376_v21 }
 0x6cd   :  { %10748 = vmatprep.subr.bf16.mxu0 %v12369_v4 }
 0x6d0   :  { %10749 = vmatpush1.bf16.msra.mxu0 %v12368_v45  ;;  %v12529_v45 = vcombine.high %v7901_v14, %v7905_v15 }
 0x6d1   :  { %10750 = vmatprep.subr.bf16.mxu0 %v12361_v31  ;;  %v7893_v31 = vld [vmem:[#allocation15 + $0x940] sm:$0xff] }
 0x6d2   :  { %v12521_v35 = vcombine.high %v7893_v31, %v7897_v32  ;;  %v12520_v38 = vcombine.low %v7893_v31, %v7897_v32  ;;  %v7961_v31 = vld [vmem:[#allocation15 + $0xb60] sm:$0xff] }
 0x6d3   :  { %v7989_v32 = vld [vmem:[#allocation15 + $0xc40] sm:$0xff] }
 0x6d4   :  { %10751 = vmatpush1.bf16.msra.mxu0 %v12360_v33  ;;  %v12528_v33 = vcombine.low %v7901_v14, %v7905_v15  ;;  %v8001_v14 = vld [vmem:[#allocation15 + $0xca0] sm:$0xff] }
 0x6d5   :  { %10752 = vmatprep.subr.bf16.mxu0 %v12353_v5 }
 0x6d8   :  { %10753 = vmatpush1.bf16.msra.mxu0 %v12352_v0  ;;  %v7885_v0 = vld [vmem:[#allocation15 + $0x900] sm:$0xff] }
 0x6d9   :  { %10754 = vmatprep.subr.bf16.mxu0 %v12473_v36  ;;  %v7889_v36 = vld [vmem:[#allocation15 + $0x920] sm:$0xff] }
 0x6da   :  { %v12512_v46 = vcombine.low %v7885_v0, %v7889_v36 }
 0x6dc   :  { %10755 = vmatpush2.bf16.msra.mxu0 %v12472_v7 }
 0x6dd   :  { %10756 = vmatprep.subr.bf16.mxu0 %v12465_v39  ;;  %v12513_v39 = vcombine.high %v7885_v0, %v7889_v36  ;;  %v7949_v0 = vld [vmem:[#allocation15 + $0xb00] sm:$0xff] }
 0x6de   :  { %v7953_v36 = vld [vmem:[#allocation15 + $0xb20] sm:$0xff] }
 0x6df   :  { %v12577_v43 = vcombine.high %v7949_v0, %v7953_v36 }
 0x6e0   :  { %10757 = vmatpush2.bf16.msra.mxu0 %v12464_v44 }
 0x6e1   :  { %10758 = vmatprep.subr.bf16.mxu0 %v12457_v25  ;;  %v7873_v25 = vld [vmem:[#allocation15 + $0x8a0] sm:$0xff] }
 0x6e4   :  { %10759 = vmatpush2.bf16.msra.mxu0 %v12456_v9 }
 0x6e5   :  { %10760 = vmatprep.subr.bf16.mxu0 %v12449_v13 }
 0x6e8   :  { %10761 = vmatpush2.bf16.msra.mxu0 %v12448_v51  ;;  %v12664_v51 = vcombine.low %v14828_v16, %v14830_v19  ;;  %v7973_v16 = vld [vmem:[#allocation15 + $0xbc0] sm:$0xff] }
 0x6e9   :  { %10762 = vmatprep.subr.bf16.mxu0 %v12441_v17  ;;  %v7977_v19 = vld [vmem:[#allocation15 + $0xbe0] sm:$0xff] }
 0x6ea   :  { %v12600_v15 = vcombine.low %v7973_v16, %v7977_v19 }
 0x6eb   :  { %v6131_v54 = vpop.f32.mrf.mxu0 }
 0x6ec   :  { %v6137_v23 = vpack.c.bf16 %v6131_v54, %v6131_v54  ;;  %10763 = vmatpush2.bf16.msra.mxu0 %v12440_v47  ;;  %v7865_v47 = vld [vmem:[#allocation15 + $0x860] sm:$0xff]  ;;  %v12656_v54 = vcombine.low %v8029_v41, %v8033_v3 }
 0x6ed   :  { %v12806_v56 = vpop.f32.mrf.mxu0  ;;  %10764 = vmatprep.subr.bf16.mxu0 %v12433_v6  ;;  %v8021_v6 = vld [vmem:[#allocation15 + $0xd40] sm:$0xff] }
 0x6ee   :  { %6138 = vst [vmem:[#allocation2] sm:$0xf] %v6137_v23  ;;  %v12489_v23 = vcombine.high %v7861_v48, %v7865_v47  ;;  %v7853_v56 = vld [vmem:[#allocation15 + $0x800] sm:$0xff] }
 0x6ef   :  { %v6134_v34 = vpop.f32.mrf.mxu0 }
 0x6f0   :  { %10765 = vmatpush2.bf16.msra.mxu0 %v12432_v52  ;;  %v12649_v52 = vcombine.high %v8021_v6, %v8025_v61  ;;  %v12488_v34 = vcombine.low %v7861_v48, %v7865_v47 }
 0x6f1   :  { %v12807_v2 = vpop.f32.mrf.mxu0  ;;  %10766 = vmatprep.subr.bf16.mxu0 %v12425_v12  ;;  %v7857_v12 = vld [vmem:[#allocation15 + $0x820] sm:$0xff] }
 0x6f2   :  { %v12481_v2 = vcombine.high %v7853_v56, %v7857_v12 }
 0x6f3   :  { %v6338_v18 = vpop.f32.mrf.mxu0 }
 0x6f4   :  { %v6344_v42 = vpack.c.bf16 %v6338_v18, %v6338_v18  ;;  %10767 = vmatpush2.bf16.msra.mxu0 %v12424_v28  ;;  %v12648_v28 = vcombine.low %v8021_v6, %v8025_v61  ;;  %v8005_v18 = vld [vmem:[#allocation15 + $0xcc0] sm:$0xff] }
 0x6f5   :  { %v12822_v62 = vpop.f32.mrf.mxu0  ;;  %10768 = vmatprep.subr.bf16.mxu0 %v12417_v11  ;;  %v12641_v11 = vcombine.high %v8013_v57, %v8017_v58 }
 0x6f6   :  { %6345 = vst [vmem:[#allocation2 + $0x4] sm:$0xf] %v6344_v42  ;;  %v8009_v42 = vld [vmem:[#allocation15 + $0xce0] sm:$0xff]  ;;  %v12640_v62 = vcombine.low %v8013_v57, %v8017_v58 }
 0x6f7   :  { %v6341_v63 = vpop.f32.mrf.mxu0 }
 0x6f8   :  { %10769 = vmatpush2.bf16.msra.mxu0 %v12416_v60  ;;  %v12480_v60 = vcombine.low %v7853_v56, %v7857_v12  ;;  %v12633_v63 = vcombine.high %v8005_v18, %v8009_v42 }
 0x6f9   :  { %v12823_v30 = vpop.f32.mrf.mxu0  ;;  %10820 = vmatprep.subr.bf16.mxu0 %v12665_v37  ;;  %v12601_v37 = vcombine.high %v7973_v16, %v7977_v19 }
 0x6fa   :  { %v7965_v30 = vld [vmem:[#allocation15 + $0xb80] sm:$0xff] }
 0x6fb   :  { %v6543_v1 = vpop.f32.mrf.mxu0 }
 0x6fc   :  { %v6549_v22 = vpack.c.bf16 %v6543_v1, %v6543_v1  ;;  %v7969_v1 = vld [vmem:[#allocation15 + $0xba0] sm:$0xff] }
 0x6fd   :  { %v12838_v20 = vpop.f32.mrf.mxu0  ;;  %v7593_v21 = vld [vmem:[#allocation2] sm:$0xff] }
 0x6fe   :  { %6550 = vst [vmem:[#allocation2 + $0x8] sm:$0xf] %v6549_v22  ;;  %v14834_v4 = vcombine.high %v7593_v21, %v7593_v21  ;;  %v14836_v24 = vcombine.low %v7593_v21, %v7593_v21  ;;  %v7997_v22 = vld [vmem:[#allocation15 + $0xc80] sm:$0xff]  ;;  %v12632_v20 = vcombine.low %v8005_v18, %v8009_v42  ;;  %v12593_v21 = vcombine.high %v7965_v30, %v7969_v1 }
 0x6ff   :  { %v6546_v26 = vpop.f32.mrf.mxu0 }
 0x700   :  { %10729 = vmatprep.mubr.bf16.mxu1 %v14834_v4  ;;  %v12625_v26 = vcombine.high %v7997_v22, %v8001_v14 }
 0x701   :  { %v12839_v53 = vpop.f32.mrf.mxu0  ;;  %10730 = vmatmul.mubr.bf16.vlgmr.msra.gmra.mxu1 %v14836_v24 }
 0x702   :  { %10780 = vmatpush1.bf16.msra.mxu1 %v12536_v10  ;;  %v7869_v10 = vld [vmem:[#allocation15 + $0x880] sm:$0xff] }
 0x703   :  { %v6750_v5 = vpop.f32.mrf.mxu0  ;;  %10781 = vmatprep.subr.bf16.mxu1 %v12529_v45  ;;  %v12497_v17 = vcombine.high %v7869_v10, %v7873_v25  ;;  %v12496_v55 = vcombine.low %v7869_v10, %v7873_v25  ;;  %v7957_v45 = vld [vmem:[#allocation15 + $0xb40] sm:$0xff]  ;;  %v12576_v25 = vcombine.low %v7949_v0, %v7953_v36  ;;  %v14857_v0 = vld [vmem:[#allocation15 + $0x5c8] sm:$0xff] }
 0x704   :  { %v6756_v8 = vpack.c.bf16 %v6750_v5, %v6750_v5  ;;  %v7993_v53 = vld [vmem:[#allocation15 + $0xc60] sm:$0xff]  ;;  %v12624_v5 = vcombine.low %v7997_v22, %v8001_v14  ;;  %v14859_v36 = vld [vmem:[#allocation15 + $0x5e8] sm:$0xff] }
 0x705   :  { %v12854_v59 = vpop.f32.mrf.mxu0  ;;  %v8105_v10 = vld [vmem:[#allocation15 + $0xfe0] sm:$0xff] }
 0x706   :  { %6757 = vst [vmem:[#allocation2 + $0xc] sm:$0xf] %v6756_v8  ;;  %10782 = vmatpush1.bf16.msra.mxu1 %v12528_v33  ;;  %v12592_v33 = vcombine.low %v7965_v30, %v7969_v1  ;;  %v12617_v8 = vcombine.high %v7989_v32, %v7993_v53  ;;  %v7981_v59 = vld [vmem:[#allocation15 + $0xc00] sm:$0xff] }
 0x707   :  { %v6753_v7 = vpop.f32.mrf.mxu0  ;;  %10783 = vmatprep.subr.bf16.mxu1 %v12521_v35  ;;  %v12585_v35 = vcombine.high %v7957_v45, %v7961_v31 }
 0x708   :  { %v12584_v7 = vcombine.low %v7957_v45, %v7961_v31  ;;  %v8053_v45 = vld [vmem:[#allocation15 + $0xe40] sm:$0xff] }
 0x709   :  { %v12855_v44 = vpop.f32.mrf.mxu0  ;;  %v8057_v31 = vld [vmem:[#allocation15 + $0xe60] sm:$0xff] }
 0x70a   :  { %10784 = vmatpush1.bf16.msra.mxu1 %v12520_v38  ;;  %v7985_v38 = vld [vmem:[#allocation15 + $0xc20] sm:$0xff] }
 0x70b   :  { %10785 = vmatprep.subr.bf16.mxu1 %v12513_v39  ;;  %v12616_v39 = vcombine.low %v7989_v32, %v7993_v53  ;;  %v12609_v40 = vcombine.high %v7981_v59, %v7985_v38  ;;  %v7941_v44 = vld [vmem:[#allocation15 + $0xac0] sm:$0xff]  ;;  %v12608_v41 = vcombine.low %v7981_v59, %v7985_v38  ;;  %v12681_v53 = vcombine.high %v8053_v45, %v8057_v31 }
 0x70c   :  { %v12411_v38 = vcombine.high %v14857_v0, %v14859_v36 }
 0x70d   :  { %v7594_v9 = vld [vmem:[#allocation2 + $0x8] sm:$0xff] }
 0x70e   :  { %v14843_v13 = vcombine.high %v7594_v9, %v7594_v9  ;;  %v14845_v50 = vcombine.low %v7594_v9, %v7594_v9  ;;  %10786 = vmatpush1.bf16.msra.mxu1 %v12512_v46  ;;  %v7945_v46 = vld [vmem:[#allocation15 + $0xae0] sm:$0xff] }
 0x70f   :  { %10787 = vmatprep.subr.bf16.mxu1 %v12505_v49  ;;  %v8101_v49 = vld [vmem:[#allocation15 + $0xfc0] sm:$0xff]  ;;  %v12569_v3 = vcombine.high %v7941_v44, %v7945_v46  ;;  %v12568_v48 = vcombine.low %v7941_v44, %v7945_v46 }
 0x710   :  { %10770 = vmatprep.mubr.bf16.mxu0 %v14843_v13  ;;  %v12729_v9 = vcombine.high %v8101_v49, %v8105_v10  ;;  %v12728_v47 = vcombine.low %v8101_v49, %v8105_v10 }
 0x711   :  { %10771 = vmatmul.mubr.bf16.vlgmr.msra.gmra.mxu0 %v14845_v50 }
 0x712   :  { %10788 = vmatpush1.bf16.msra.mxu1 %v12504_v27  ;;  %10821 = vmatpush1.bf16.msra.mxu0 %v12664_v51  ;;  %v7933_v27 = vld [vmem:[#allocation15 + $0xa80] sm:$0xff] }
 0x713   :  { %10789 = vmatprep.subr.bf16.mxu1 %v12497_v17  ;;  %10822 = vmatprep.subr.bf16.mxu0 %v12657_v29  ;;  %v7937_v51 = vld [vmem:[#allocation15 + $0xaa0] sm:$0xff] }
 0x714   :  { %v8093_v17 = vld [vmem:[#allocation15 + $0xf80] sm:$0xff]  ;;  %v12561_v6 = vcombine.high %v7933_v27, %v7937_v51  ;;  %v12560_v56 = vcombine.low %v7933_v27, %v7937_v51  ;;  %v7646_v27 = vld [vmem:[#allocation15 + $0x188] sm:$0xff] }
 0x715   :  { %v8097_v29 = vld [vmem:[#allocation15 + $0xfa0] sm:$0xff]  ;;  %v7650_v51 = vld [vmem:[#allocation15 + $0x1a8] sm:$0xff] }
 0x716   :  { %10790 = vmatpush1.bf16.msra.mxu1 %v12496_v55  ;;  %10823 = vmatpush1.bf16.msra.mxu0 %v12656_v54  ;;  %v12721_v61 = vcombine.high %v8093_v17, %v8097_v29  ;;  %v7925_v55 = vld [vmem:[#allocation15 + $0xa40] sm:$0xff]  ;;  %v12720_v12 = vcombine.low %v8093_v17, %v8097_v29 }
 0x717   :  { %10791 = vmatprep.subr.bf16.mxu1 %v12489_v23  ;;  %10824 = vmatprep.subr.bf16.mxu0 %v12649_v52  ;;  %v7929_v54 = vld [vmem:[#allocation15 + $0xa60] sm:$0xff] }
 0x718   :  { %v8085_v23 = vld [vmem:[#allocation15 + $0xf40] sm:$0xff]  ;;  %v12553_v57 = vcombine.high %v7925_v55, %v7929_v54  ;;  %v12552_v16 = vcombine.low %v7925_v55, %v7929_v54  ;;  %v12275_v55 = vcombine.high %v7646_v27, %v7650_v51  ;;  %v7638_v54 = vld [vmem:[#allocation15 + $0x148] sm:$0xff] }
 0x719   :  { %v8089_v52 = vld [vmem:[#allocation15 + $0xf60] sm:$0xff] }
 0x71a   :  { %10792 = vmatpush1.bf16.msra.mxu1 %v12488_v34  ;;  %10825 = vmatpush1.bf16.msra.mxu0 %v12648_v28  ;;  %v12713_v58 = vcombine.high %v8085_v23, %v8089_v52  ;;  %v7917_v34 = vld [vmem:[#allocation15 + $0xa00] sm:$0xff]  ;;  %v12712_v19 = vcombine.low %v8085_v23, %v8089_v52  ;;  %v7642_v23 = vld [vmem:[#allocation15 + $0x168] sm:$0xff] }
 0x71b   :  { %10793 = vmatprep.subr.bf16.mxu1 %v12481_v2  ;;  %10826 = vmatprep.subr.bf16.mxu0 %v12641_v11  ;;  %v7921_v28 = vld [vmem:[#allocation15 + $0xa20] sm:$0xff] }
 0x71c   :  { %v8077_v2 = vld [vmem:[#allocation15 + $0xf00] sm:$0xff]  ;;  %v12545_v18 = vcombine.high %v7917_v34, %v7921_v28  ;;  %v12544_v30 = vcombine.low %v7917_v34, %v7921_v28  ;;  %v7630_v34 = vld [vmem:[#allocation15 + $0x108] sm:$0xff] }
 0x71d   :  { %v8081_v11 = vld [vmem:[#allocation15 + $0xf20] sm:$0xff]  ;;  %v7634_v28 = vld [vmem:[#allocation15 + $0x128] sm:$0xff] }
 0x71e   :  { %10794 = vmatpush1.bf16.msra.mxu1 %v12480_v60  ;;  %10827 = vmatpush1.bf16.msra.mxu0 %v12640_v62  ;;  %v12705_v42 = vcombine.high %v8077_v2, %v8081_v11  ;;  %v8069_v60 = vld [vmem:[#allocation15 + $0xec0] sm:$0xff]  ;;  %v12704_v1 = vcombine.low %v8077_v2, %v8081_v11  ;;  %v12266_v11 = vcombine.low %v7638_v54, %v7642_v23 }
 0x71f   :  { %10795 = vmatprep.subr.bf16.mxu1 %v12601_v37  ;;  %10828 = vmatprep.subr.bf16.mxu0 %v12633_v63  ;;  %v8073_v62 = vld [vmem:[#allocation15 + $0xee0] sm:$0xff]  ;;  %v14851_v37 = vld [vmem:[#allocation15 + $0x1c8] sm:$0xff] }
 0x720   :  { %v14853_v63 = vld [vmem:[#allocation15 + $0x1e8] sm:$0xff]  ;;  %v12697_v22 = vcombine.high %v8069_v60, %v8073_v62 }
 0x721   :  { %v12283_v14 = vcombine.high %v14851_v37, %v14853_v63 }
 0x722   :  { %10796 = vmatpush2.bf16.msra.mxu1 %v12600_v15  ;;  %10829 = vmatpush1.bf16.msra.mxu0 %v12632_v20  ;;  %v8061_v15 = vld [vmem:[#allocation15 + $0xe80] sm:$0xff] }
 0x723   :  { %10797 = vmatprep.subr.bf16.mxu1 %v12593_v21  ;;  %10830 = vmatprep.subr.bf16.mxu0 %v12625_v26  ;;  %v8065_v20 = vld [vmem:[#allocation15 + $0xea0] sm:$0xff]  ;;  %v12696_v21 = vcombine.low %v8069_v60, %v8073_v62  ;;  %v12258_v62 = vcombine.low %v7630_v34, %v7634_v28 }
 0x724   :  { %v12689_v26 = vcombine.high %v8061_v15, %v8065_v20  ;;  %v12688_v32 = vcombine.low %v8061_v15, %v8065_v20 }
 0x726   :  { %10798 = vmatpush2.bf16.msra.mxu1 %v12592_v33  ;;  %10831 = vmatpush1.bf16.msra.mxu0 %v12624_v5  ;;  %v8045_v33 = vld [vmem:[#allocation15 + $0xe00] sm:$0xff] }
 0x727   :  { %10799 = vmatprep.subr.bf16.mxu1 %v12585_v35  ;;  %10832 = vmatprep.subr.bf16.mxu0 %v12617_v8  ;;  %v8049_v5 = vld [vmem:[#allocation15 + $0xe20] sm:$0xff]  ;;  %v12680_v35 = vcombine.low %v8053_v45, %v8057_v31  ;;  %v7606_v31 = vld [vmem:[#allocation15 + $0x48] sm:$0xff] }
 0x728   :  { %v12673_v8 = vcombine.high %v8045_v33, %v8049_v5  ;;  %v12672_v59 = vcombine.low %v8045_v33, %v8049_v5  ;;  %v7766_v33 = vld [vmem:[#allocation15 + $0x548] sm:$0xff] }
 0x729   :  { %v7770_v5 = vld [vmem:[#allocation15 + $0x568] sm:$0xff] }
 0x72a   :  { %10800 = vmatpush2.bf16.msra.mxu1 %v12584_v7  ;;  %10833 = vmatpush1.bf16.msra.mxu0 %v12616_v39 }
 0x72b   :  { %10801 = vmatprep.subr.bf16.mxu1 %v12577_v43  ;;  %10834 = vmatprep.subr.bf16.mxu0 %v12609_v40 }
 0x72e   :  { %10802 = vmatpush2.bf16.msra.mxu1 %v12576_v25  ;;  %10835 = vmatpush1.bf16.msra.mxu0 %v12608_v41 }
 0x72f   :  { %10803 = vmatprep.subr.bf16.mxu1 %v12569_v3  ;;  %10836 = vmatprep.subr.bf16.mxu0 %v12729_v9 }
 0x732   :  { %10804 = vmatpush2.bf16.msra.mxu1 %v12568_v48  ;;  %10837 = vmatpush2.bf16.msra.mxu0 %v12728_v47  ;;  %v12282_v47 = vcombine.low %v14851_v37, %v14853_v63  ;;  %v7614_v63 = vld [vmem:[#allocation15 + $0x88] sm:$0xff] }
 0x733   :  { %10805 = vmatprep.subr.bf16.mxu1 %v12561_v6  ;;  %10838 = vmatprep.subr.bf16.mxu0 %v12721_v61 }
 0x736   :  { %10806 = vmatpush2.bf16.msra.mxu1 %v12560_v56  ;;  %10839 = vmatpush2.bf16.msra.mxu0 %v12720_v12  ;;  %v12274_v56 = vcombine.low %v7646_v27, %v7650_v51 }
 0x737   :  { %10807 = vmatprep.subr.bf16.mxu1 %v12553_v57  ;;  %10840 = vmatprep.subr.bf16.mxu0 %v12713_v58  ;;  %v12267_v57 = vcombine.high %v7638_v54, %v7642_v23 }
 0x73a   :  { %10808 = vmatpush2.bf16.msra.mxu1 %v12552_v16  ;;  %10841 = vmatpush2.bf16.msra.mxu0 %v12712_v19  ;;  %v12259_v19 = vcombine.high %v7630_v34, %v7634_v28 }
 0x73b   :  { %10809 = vmatprep.subr.bf16.mxu1 %v12545_v18  ;;  %10842 = vmatprep.subr.bf16.mxu0 %v12705_v42  ;;  %v7622_v18 = vld [vmem:[#allocation15 + $0xc8] sm:$0xff] }
 0x73c   :  { %v7626_v42 = vld [vmem:[#allocation15 + $0xe8] sm:$0xff] }
 0x73d   :  { %v12251_v37 = vcombine.high %v7622_v18, %v7626_v42  ;;  %v12250_v20 = vcombine.low %v7622_v18, %v7626_v42  ;;  %v7726_v18 = vld [vmem:[#allocation15 + $0x408] sm:$0xff] }
 0x73e   :  { %10810 = vmatpush2.bf16.msra.mxu1 %v12544_v30  ;;  %10843 = vmatpush2.bf16.msra.mxu0 %v12704_v1  ;;  %v7618_v30 = vld [vmem:[#allocation15 + $0xa8] sm:$0xff] }
 0x73f   :  { %10844 = vmatprep.subr.bf16.mxu0 %v12697_v22  ;;  %10861 = vmatprep.subr.bf16.mxu1 %v12283_v14  ;;  %v7774_v22 = vld [vmem:[#allocation15 + $0x588] sm:$0xff]  ;;  %v12243_v45 = vcombine.high %v7614_v63, %v7618_v30 }
 0x740   :  { %v7778_v14 = vld [vmem:[#allocation15 + $0x5a8] sm:$0xff] }
 0x741   :  { %v7730_v42 = vld [vmem:[#allocation15 + $0x428] sm:$0xff] }
 0x742   :  { %10845 = vmatpush2.bf16.msra.mxu0 %v12696_v21  ;;  %v12410_v21 = vcombine.low %v14857_v0, %v14859_v36  ;;  %v12395_v36 = vcombine.high %v7766_v33, %v7770_v5 }
 0x743   :  { %10846 = vmatprep.subr.bf16.mxu0 %v12689_v26 }
 0x746   :  { %10847 = vmatpush2.bf16.msra.mxu0 %v12688_v32  ;;  %v12403_v32 = vcombine.high %v7774_v22, %v7778_v14 }
 0x747   :  { %10848 = vmatprep.subr.bf16.mxu0 %v12681_v53  ;;  %v7610_v53 = vld [vmem:[#allocation15 + $0x68] sm:$0xff] }
 0x748   :  { %v12235_v0 = vcombine.high %v7606_v31, %v7610_v53 }
 0x74a   :  { %10849 = vmatpush2.bf16.msra.mxu0 %v12680_v35  ;;  %v12242_v35 = vcombine.low %v7614_v63, %v7618_v30  ;;  %v12355_v63 = vcombine.high %v7726_v18, %v7730_v42  ;;  %v7686_v30 = vld [vmem:[#allocation15 + $0x2c8] sm:$0xff] }
 0x74b   :  { %10850 = vmatprep.subr.bf16.mxu0 %v12673_v8  ;;  %v12402_v8 = vcombine.low %v7774_v22, %v7778_v14  ;;  %v7846_v22 = vld [vmem:[#allocation15 + $0x7c8] sm:$0xff] }
 0x74c   :  { %v7850_v14 = vld [vmem:[#allocation15 + $0x7e8] sm:$0xff] }
 0x74e   :  { %10851 = vmatpush2.bf16.msra.mxu0 %v12672_v59  ;;  %v7598_v59 = vld [vmem:[#allocation15 + $0x8] sm:$0xff] }
 0x74f   :  { %10902 = vmatprep.subr.bf16.mxu0 %v12411_v38  ;;  %v7602_v38 = vld [vmem:[#allocation15 + $0x28] sm:$0xff] }
 0x763   :  { %v6966_v7 = vpop.f32.mrf.mxu0 }
 0x764   :  { %v6972_v39 = vpack.c.bf16 %v6966_v7, %v6966_v7  ;;  %v7758_v7 = vld [vmem:[#allocation15 + $0x508] sm:$0xff] }
 0x765   :  { %v12870_v43 = vpop.f32.mrf.mxu0 }
 0x766   :  { %6973 = vst [vmem:[#allocation2 + $0x10] sm:$0xf] %v6972_v39  ;;  %v7762_v39 = vld [vmem:[#allocation15 + $0x528] sm:$0xff]  ;;  %v12234_v43 = vcombine.low %v7606_v31, %v7610_v53  ;;  %v12475_v31 = vcombine.high %v7846_v22, %v7850_v14 }
 0x767   :  { %v6969_v40 = vpop.f32.mrf.mxu0  ;;  %v7682_v53 = vld [vmem:[#allocation15 + $0x2a8] sm:$0xff] }
 0x768   :  { %v12394_v40 = vcombine.low %v7766_v33, %v7770_v5  ;;  %v7838_v33 = vld [vmem:[#allocation15 + $0x788] sm:$0xff] }
 0x769   :  { %v12871_v44 = vpop.f32.mrf.mxu0  ;;  %v7842_v5 = vld [vmem:[#allocation15 + $0x7a8] sm:$0xff] }
 0x76a   :  { %v12227_v44 = vcombine.high %v7598_v59, %v7602_v38 }
 0x76b   :  { %v7173_v46 = vpop.f32.mrf.mxu0 }
 0x76c   :  { %v7179_v49 = vpack.c.bf16 %v7173_v46, %v7173_v46  ;;  %v12387_v46 = vcombine.high %v7758_v7, %v7762_v39 }
 0x76d   :  { %v12886_v10 = vpop.f32.mrf.mxu0 }
 0x76e   :  { %7180 = vst [vmem:[#allocation2 + $0x14] sm:$0xf] %v7179_v49  ;;  %v7718_v49 = vld [vmem:[#allocation15 + $0x3c8] sm:$0xff] }
 0x76f   :  { %v7176_v25 = vpop.f32.mrf.mxu0  ;;  %v7722_v10 = vld [vmem:[#allocation15 + $0x3e8] sm:$0xff] }
 0x770   :  { %v7750_v25 = vld [vmem:[#allocation15 + $0x4c8] sm:$0xff]  ;;  %v12347_v27 = vcombine.high %v7718_v49, %v7722_v10 }
 0x771   :  { %v12887_v41 = vpop.f32.mrf.mxu0 }
 0x772   :  { %v7754_v41 = vld [vmem:[#allocation15 + $0x4e8] sm:$0xff] }
 0x773   :  { %v7378_v3 = vpop.f32.mrf.mxu0  ;;  %v12379_v51 = vcombine.high %v7750_v25, %v7754_v41  ;;  %v12378_v54 = vcombine.low %v7750_v25, %v7754_v41  ;;  %v7822_v25 = vld [vmem:[#allocation15 + $0x708] sm:$0xff] }
 0x774   :  { %v7384_v9 = vpack.c.bf16 %v7378_v3, %v7378_v3  ;;  %v12226_v3 = vcombine.low %v7598_v59, %v7602_v38  ;;  %v7670_v59 = vld [vmem:[#allocation15 + $0x248] sm:$0xff] }
 0x775   :  { %v12902_v17 = vpop.f32.mrf.mxu0  ;;  %v7595_v29 = vld [vmem:[#allocation2 + $0x10] sm:$0xff]  ;;  %v7674_v38 = vld [vmem:[#allocation15 + $0x268] sm:$0xff] }
 0x776   :  { %7385 = vst [vmem:[#allocation2 + $0x18] sm:$0xf] %v7384_v9  ;;  %v14863_v48 = vcombine.high %v7595_v29, %v7595_v29  ;;  %v14867_v6 = vcombine.low %v7595_v29, %v7595_v29  ;;  %v12386_v9 = vcombine.low %v7758_v7, %v7762_v39  ;;  %v7710_v17 = vld [vmem:[#allocation15 + $0x388] sm:$0xff] }
 0x777   :  { %v7381_v61 = vpop.f32.mrf.mxu0  ;;  %v7714_v29 = vld [vmem:[#allocation15 + $0x3a8] sm:$0xff] }
 0x778   :  { %10811 = vmatprep.mubr.bf16.mxu1 %v14863_v48  ;;  %v7746_v61 = vld [vmem:[#allocation15 + $0x4a8] sm:$0xff]  ;;  %v12339_v23 = vcombine.high %v7710_v17, %v7714_v29  ;;  %v12338_v34 = vcombine.low %v7710_v17, %v7714_v29 }
 0x779   :  { %v12903_v52 = vpop.f32.mrf.mxu0  ;;  %10812 = vmatmul.mubr.bf16.vlgmr.msra.gmra.mxu1 %v14867_v6  ;;  %v7830_v7 = vld [vmem:[#allocation15 + $0x748] sm:$0xff] }
 0x77a   :  { %10862 = vmatpush1.bf16.msra.mxu1 %v12282_v47  ;;  %10893 = vmatprep.mubr.bf16.mxu1 %v14834_v4  ;;  %v7742_v47 = vld [vmem:[#allocation15 + $0x488] sm:$0xff] }
 0x77b   :  { %v7585_v12 = vpop.f32.mrf.mxu0  ;;  %10863 = vmatprep.subr.bf16.mxu1 %v12275_v55  ;;  %v12346_v55 = vcombine.low %v7718_v49, %v7722_v10  ;;  %v12371_v52 = vcombine.high %v7742_v47, %v7746_v61  ;;  %v12370_v28 = vcombine.low %v7742_v47, %v7746_v61  ;;  %v7834_v39 = vld [vmem:[#allocation15 + $0x768] sm:$0xff] }
 0x77c   :  { %v7591_v58 = vpack.c.bf16 %v7585_v12, %v7585_v12  ;;  %v7706_v12 = vld [vmem:[#allocation15 + $0x368] sm:$0xff] }
 0x77d   :  { %v12918_v2 = vpop.f32.mrf.mxu0  ;;  %v7662_v49 = vld [vmem:[#allocation15 + $0x208] sm:$0xff] }
 0x77e   :  { %7592 = vst [vmem:[#allocation2 + $0x1c] sm:$0xf] %v7591_v58  ;;  %10864 = vmatpush1.bf16.msra.mxu1 %v12274_v56  ;;  %v7702_v56 = vld [vmem:[#allocation15 + $0x348] sm:$0xff] }
 0x77f   :  { %v7588_v16 = vpop.f32.mrf.mxu0  ;;  %10865 = vmatprep.subr.bf16.mxu1 %v12267_v57  ;;  %v7734_v57 = vld [vmem:[#allocation15 + $0x448] sm:$0xff]  ;;  %v12331_v2 = vcombine.high %v7702_v56, %v7706_v12 }
 0x780   :  { %v7738_v58 = vld [vmem:[#allocation15 + $0x468] sm:$0xff] }
 0x781   :  { %v12919_v60 = vpop.f32.mrf.mxu0  ;;  %v7694_v16 = vld [vmem:[#allocation15 + $0x308] sm:$0xff] }
 0x782   :  { %10866 = vmatpush1.bf16.msra.mxu1 %v12266_v11  ;;  %v12363_v11 = vcombine.high %v7734_v57, %v7738_v58  ;;  %v12330_v60 = vcombine.low %v7702_v56, %v7706_v12  ;;  %v7666_v10 = vld [vmem:[#allocation15 + $0x228] sm:$0xff] }
 0x783   :  { %10867 = vmatprep.subr.bf16.mxu1 %v12259_v19  ;;  %v7698_v19 = vld [vmem:[#allocation15 + $0x328] sm:$0xff] }
 0x784   :  { %v7826_v41 = vld [vmem:[#allocation15 + $0x728] sm:$0xff] }
 0x785   :  { %v7596_v1 = vld [vmem:[#allocation2 + $0x18] sm:$0xff]  ;;  %v7814_v17 = vld [vmem:[#allocation15 + $0x6c8] sm:$0xff] }
 0x786   :  { %10868 = vmatpush1.bf16.msra.mxu1 %v12258_v62  ;;  %v14872_v15 = vcombine.high %v7596_v1, %v7596_v1  ;;  %v14876_v26 = vcombine.low %v7596_v1, %v7596_v1  ;;  %v12362_v62 = vcombine.low %v7734_v57, %v7738_v58  ;;  %v7690_v1 = vld [vmem:[#allocation15 + $0x2e8] sm:$0xff] }
 0x787   :  { %10869 = vmatprep.subr.bf16.mxu1 %v12251_v37  ;;  %v12323_v37 = vcombine.high %v7694_v16, %v7698_v19  ;;  %v7818_v29 = vld [vmem:[#allocation15 + $0x6e8] sm:$0xff] }
 0x788   :  { %10852 = vmatprep.mubr.bf16.mxu0 %v14872_v15  ;;  %v7910_v47 = vld [vmem:[#allocation15 + $0x9c8] sm:$0xff] }
 0x789   :  { %10853 = vmatmul.mubr.bf16.vlgmr.msra.gmra.mxu0 %v14876_v26  ;;  %v7914_v61 = vld [vmem:[#allocation15 + $0x9e8] sm:$0xff] }
 0x78a   :  { %10870 = vmatpush1.bf16.msra.mxu1 %v12250_v20  ;;  %10903 = vmatpush1.bf16.msra.mxu0 %v12410_v21  ;;  %v12322_v20 = vcombine.low %v7694_v16, %v7698_v19  ;;  %v12354_v21 = vcombine.low %v7726_v18, %v7730_v42  ;;  %v7806_v56 = vld [vmem:[#allocation15 + $0x688] sm:$0xff] }
 0x78b   :  { %10934 = vmatprep.mubr.bf16.mxu0 %v14843_v13  ;;  %10871 = vmatprep.subr.bf16.mxu1 %v12243_v45  ;;  %v12315_v45 = vcombine.high %v7686_v30, %v7690_v1  ;;  %v7810_v12 = vld [vmem:[#allocation15 + $0x6a8] sm:$0xff] }
 0x78c   :  { %10904 = vmatprep.subr.bf16.mxu0 %v12403_v32  ;;  %v7678_v32 = vld [vmem:[#allocation15 + $0x288] sm:$0xff] }
 0x78d   :  { %v7902_v57 = vld [vmem:[#allocation15 + $0x988] sm:$0xff] }
 0x78e   :  { %10872 = vmatpush1.bf16.msra.mxu1 %v12242_v35  ;;  %10905 = vmatpush1.bf16.msra.mxu0 %v12402_v8  ;;  %v12314_v35 = vcombine.low %v7686_v30, %v7690_v1  ;;  %v12474_v8 = vcombine.low %v7846_v22, %v7850_v14  ;;  %v7906_v58 = vld [vmem:[#allocation15 + $0x9a8] sm:$0xff] }
 0x78f   :  { %10873 = vmatprep.subr.bf16.mxu1 %v12235_v0  ;;  %10906 = vmatprep.subr.bf16.mxu0 %v12395_v36  ;;  %v12307_v0 = vcombine.high %v7678_v32, %v7682_v53  ;;  %v12467_v36 = vcombine.high %v7838_v33, %v7842_v5  ;;  %v12531_v16 = vcombine.high %v7902_v57, %v7906_v58  ;;  %v7802_v19 = vld [vmem:[#allocation15 + $0x668] sm:$0xff] }
 0x790   :  { %v7894_v18 = vld [vmem:[#allocation15 + $0x948] sm:$0xff] }
 0x791   :  { %v7898_v42 = vld [vmem:[#allocation15 + $0x968] sm:$0xff] }
 0x792   :  { %10874 = vmatpush1.bf16.msra.mxu1 %v12234_v43  ;;  %10907 = vmatpush1.bf16.msra.mxu0 %v12394_v40  ;;  %v12306_v43 = vcombine.low %v7678_v32, %v7682_v53  ;;  %v12466_v40 = vcombine.low %v7838_v33, %v7842_v5  ;;  %v7790_v30 = vld [vmem:[#allocation15 + $0x608] sm:$0xff] }
 0x793   :  { %10875 = vmatprep.subr.bf16.mxu1 %v12227_v44  ;;  %10908 = vmatprep.subr.bf16.mxu0 %v12387_v46  ;;  %v12299_v44 = vcombine.high %v7670_v59, %v7674_v38  ;;  %v12459_v46 = vcombine.high %v7830_v7, %v7834_v39  ;;  %v7794_v1 = vld [vmem:[#allocation15 + $0x628] sm:$0xff] }
 0x794   :  { %v7886_v22 = vld [vmem:[#allocation15 + $0x908] sm:$0xff] }
 0x795   :  { %v7890_v14 = vld [vmem:[#allocation15 + $0x928] sm:$0xff] }
 0x796   :  { %10876 = vmatpush1.bf16.msra.mxu1 %v12226_v3  ;;  %10909 = vmatpush1.bf16.msra.mxu0 %v12386_v9  ;;  %v12298_v3 = vcombine.low %v7670_v59, %v7674_v38  ;;  %v12458_v9 = vcombine.low %v7830_v7, %v7834_v39  ;;  %v7878_v32 = vld [vmem:[#allocation15 + $0x8c8] sm:$0xff] }
 0x797   :  { %10877 = vmatprep.subr.bf16.mxu1 %v12347_v27  ;;  %10910 = vmatprep.subr.bf16.mxu0 %v12379_v51  ;;  %v12291_v27 = vcombine.high %v7662_v49, %v7666_v10  ;;  %v12451_v51 = vcombine.high %v7822_v25, %v7826_v41  ;;  %v7882_v53 = vld [vmem:[#allocation15 + $0x8e8] sm:$0xff] }
 0x798   :  { %v8038_v33 = vld [vmem:[#allocation15 + $0xdc8] sm:$0xff]  ;;  %v12507_v59 = vcombine.high %v7878_v32, %v7882_v53 }
 0x799   :  { %v8042_v5 = vld [vmem:[#allocation15 + $0xde8] sm:$0xff] }
 0x79a   :  { %10878 = vmatpush2.bf16.msra.mxu1 %v12346_v55  ;;  %10911 = vmatpush1.bf16.msra.mxu0 %v12378_v54  ;;  %v12290_v55 = vcombine.low %v7662_v49, %v7666_v10  ;;  %v12450_v54 = vcombine.low %v7822_v25, %v7826_v41  ;;  %v12667_v38 = vcombine.high %v8038_v33, %v8042_v5  ;;  %v7870_v7 = vld [vmem:[#allocation15 + $0x888] sm:$0xff] }
 0x79b   :  { %10879 = vmatprep.subr.bf16.mxu1 %v12339_v23  ;;  %10912 = vmatprep.subr.bf16.mxu0 %v12371_v52  ;;  %v12443_v23 = vcombine.high %v7814_v17, %v7818_v29  ;;  %v12539_v52 = vcombine.high %v7910_v47, %v7914_v61  ;;  %v7874_v39 = vld [vmem:[#allocation15 + $0x8a8] sm:$0xff]  ;;  %v12666_v49 = vcombine.low %v8038_v33, %v8042_v5 }
 0x79c   :  { %v12499_v25 = vcombine.high %v7870_v7, %v7874_v39  ;;  %v7862_v41 = vld [vmem:[#allocation15 + $0x848] sm:$0xff] }
 0x79d   :  { %v7958_v33 = vld [vmem:[#allocation15 + $0xb48] sm:$0xff] }
 0x79e   :  { %10880 = vmatpush2.bf16.msra.mxu1 %v12338_v34  ;;  %10913 = vmatpush1.bf16.msra.mxu0 %v12370_v28  ;;  %v12442_v34 = vcombine.low %v7814_v17, %v7818_v29  ;;  %v12538_v28 = vcombine.low %v7910_v47, %v7914_v61  ;;  %v12498_v17 = vcombine.low %v7870_v7, %v7874_v39  ;;  %v7962_v5 = vld [vmem:[#allocation15 + $0xb68] sm:$0xff] }
 0x79f   :  { %10881 = vmatprep.subr.bf16.mxu1 %v12331_v2  ;;  %10914 = vmatprep.subr.bf16.mxu0 %v12363_v11  ;;  %v12435_v2 = vcombine.high %v7806_v56, %v7810_v12  ;;  %v7798_v11 = vld [vmem:[#allocation15 + $0x648] sm:$0xff] }
 0x7a0   :  { %v7950_v7 = vld [vmem:[#allocation15 + $0xb08] sm:$0xff] }
 0x7a1   :  { %v7954_v39 = vld [vmem:[#allocation15 + $0xb28] sm:$0xff] }
 0x7a2   :  { %10882 = vmatpush2.bf16.msra.mxu1 %v12330_v60  ;;  %10915 = vmatpush1.bf16.msra.mxu0 %v12362_v62  ;;  %v12434_v60 = vcombine.low %v7806_v56, %v7810_v12  ;;  %v12530_v62 = vcombine.low %v7902_v57, %v7906_v58 }
 0x7a3   :  { %10883 = vmatprep.subr.bf16.mxu1 %v12323_v37  ;;  %10916 = vmatprep.subr.bf16.mxu0 %v12355_v63  ;;  %v12427_v37 = vcombine.high %v7798_v11, %v7802_v19  ;;  %v12523_v63 = vcombine.high %v7894_v18, %v7898_v42 }
 0x7a6   :  { %10884 = vmatpush2.bf16.msra.mxu1 %v12322_v20  ;;  %10917 = vmatpush1.bf16.msra.mxu0 %v12354_v21  ;;  %v12426_v20 = vcombine.low %v7798_v11, %v7802_v19  ;;  %v12522_v21 = vcombine.low %v7894_v18, %v7898_v42  ;;  %v8010_v11 = vld [vmem:[#allocation15 + $0xce8] sm:$0xff] }
 0x7a7   :  { %10885 = vmatprep.subr.bf16.mxu1 %v12315_v45  ;;  %10918 = vmatprep.subr.bf16.mxu0 %v12475_v31  ;;  %v12419_v45 = vcombine.high %v7790_v30, %v7794_v1  ;;  %v12515_v31 = vcombine.high %v7886_v22, %v7890_v14 }
 0x7aa   :  { %10886 = vmatpush2.bf16.msra.mxu1 %v12314_v35  ;;  %10919 = vmatpush2.bf16.msra.mxu0 %v12474_v8  ;;  %v12418_v8 = vcombine.low %v7790_v30, %v7794_v1  ;;  %v7970_v1 = vld [vmem:[#allocation15 + $0xba8] sm:$0xff] }
 0x7ab   :  { %10887 = vmatprep.subr.bf16.mxu1 %v12307_v0  ;;  %10920 = vmatprep.subr.bf16.mxu0 %v12467_v36  ;;  %v12514_v0 = vcombine.low %v7886_v22, %v7890_v14  ;;  %v7998_v22 = vld [vmem:[#allocation15 + $0xc88] sm:$0xff] }
 0x7ac   :  { %v8002_v14 = vld [vmem:[#allocation15 + $0xca8] sm:$0xff] }
 0x7ae   :  { %10888 = vmatpush2.bf16.msra.mxu1 %v12306_v43  ;;  %10921 = vmatpush2.bf16.msra.mxu0 %v12466_v40  ;;  %v8030_v40 = vld [vmem:[#allocation15 + $0xd88] sm:$0xff] }
 0x7af   :  { %10889 = vmatprep.subr.bf16.mxu1 %v12299_v44  ;;  %10922 = vmatprep.subr.bf16.mxu0 %v12459_v46  ;;  %v8034_v44 = vld [vmem:[#allocation15 + $0xda8] sm:$0xff]  ;;  %v12506_v46 = vcombine.low %v7878_v32, %v7882_v53  ;;  %v12627_v53 = vcombine.high %v7998_v22, %v8002_v14 }
 0x7b0   :  { %v12658_v29 = vcombine.low %v8030_v40, %v8034_v44 }
 0x7b2   :  { %10890 = vmatpush2.bf16.msra.mxu1 %v12298_v3  ;;  %10923 = vmatpush2.bf16.msra.mxu0 %v12458_v9  ;;  %v12659_v3 = vcombine.high %v8030_v40, %v8034_v44  ;;  %v7866_v9 = vld [vmem:[#allocation15 + $0x868] sm:$0xff]  ;;  %v12586_v44 = vcombine.low %v7958_v33, %v7962_v5 }
 0x7b3   :  { %10891 = vmatprep.subr.bf16.mxu1 %v12291_v27  ;;  %10924 = vmatprep.subr.bf16.mxu0 %v12451_v51  ;;  %v8022_v27 = vld [vmem:[#allocation15 + $0xd48] sm:$0xff]  ;;  %v12491_v47 = vcombine.high %v7862_v41, %v7866_v9  ;;  %v12490_v56 = vcombine.low %v7862_v41, %v7866_v9 }
 0x7b4   :  { %v8026_v51 = vld [vmem:[#allocation15 + $0xd68] sm:$0xff] }
 0x7b5   :  { %v12651_v61 = vcombine.high %v8022_v27, %v8026_v51  ;;  %v12650_v12 = vcombine.low %v8022_v27, %v8026_v51  ;;  %v7986_v40 = vld [vmem:[#allocation15 + $0xc28] sm:$0xff]  ;;  %v12578_v27 = vcombine.low %v7950_v7, %v7954_v39 }
 0x7b6   :  { %10892 = vmatpush2.bf16.msra.mxu1 %v12290_v55  ;;  %10925 = vmatpush2.bf16.msra.mxu0 %v12450_v54  ;;  %v7854_v55 = vld [vmem:[#allocation15 + $0x808] sm:$0xff] }
 0x7b7   :  { %10926 = vmatprep.subr.bf16.mxu0 %v12443_v23  ;;  %10943 = vmatprep.subr.bf16.mxu1 %v12539_v52  ;;  %v7858_v54 = vld [vmem:[#allocation15 + $0x828] sm:$0xff] }
 0x7b8   :  { %v8014_v23 = vld [vmem:[#allocation15 + $0xd08] sm:$0xff]  ;;  %v12483_v57 = vcombine.high %v7854_v55, %v7858_v54  ;;  %v12482_v18 = vcombine.low %v7854_v55, %v7858_v54 }
 0x7b9   :  { %10894 = vmatmul.mubr.bf16.vlgmr.msra.gmra.mxu1 %v14836_v24  ;;  %v8018_v52 = vld [vmem:[#allocation15 + $0xd28] sm:$0xff] }
 0x7ba   :  { %10927 = vmatpush2.bf16.msra.mxu0 %v12442_v34  ;;  %10944 = vmatpush1.bf16.msra.mxu1 %v12538_v28  ;;  %v12643_v58 = vcombine.high %v8014_v23, %v8018_v52  ;;  %v7974_v34 = vld [vmem:[#allocation15 + $0xbc8] sm:$0xff]  ;;  %v12642_v42 = vcombine.low %v8014_v23, %v8018_v52 }
 0x7bb   :  { %10975 = vmatprep.mubr.bf16.mxu1 %v14863_v48  ;;  %10928 = vmatprep.subr.bf16.mxu0 %v12435_v2  ;;  %v7978_v28 = vld [vmem:[#allocation15 + $0xbe8] sm:$0xff] }
 0x7bc   :  { %10945 = vmatprep.subr.bf16.mxu1 %v12531_v16  ;;  %v8006_v2 = vld [vmem:[#allocation15 + $0xcc8] sm:$0xff] }
 0x7bd   :  { %v7946_v41 = vld [vmem:[#allocation15 + $0xae8] sm:$0xff] }
 0x7be   :  { %10929 = vmatpush2.bf16.msra.mxu0 %v12434_v60  ;;  %10946 = vmatpush1.bf16.msra.mxu1 %v12530_v62  ;;  %v12603_v62 = vcombine.high %v7974_v34, %v7978_v28  ;;  %v8106_v9 = vld [vmem:[#allocation15 + $0xfe8] sm:$0xff] }
 0x7bf   :  { %10930 = vmatprep.subr.bf16.mxu0 %v12427_v37  ;;  %10947 = vmatprep.subr.bf16.mxu1 %v12523_v63  ;;  %v12635_v37 = vcombine.high %v8006_v2, %v8010_v11  ;;  %v7966_v63 = vld [vmem:[#allocation15 + $0xb88] sm:$0xff] }
 0x7c0   :  { %v12595_v32 = vcombine.high %v7966_v63, %v7970_v1  ;;  %v8094_v55 = vld [vmem:[#allocation15 + $0xf88] sm:$0xff] }
 0x7c1   :  { %v10731_v35 = vpop.f32.mrf.mxu1  ;;  %v8098_v54 = vld [vmem:[#allocation15 + $0xfa8] sm:$0xff] }
 0x7c2   :  { %10931 = vmatpush2.bf16.msra.mxu0 %v12426_v20  ;;  %10948 = vmatpush1.bf16.msra.mxu1 %v12522_v21  ;;  %v12602_v21 = vcombine.low %v7974_v34, %v7978_v28  ;;  %v8086_v34 = vld [vmem:[#allocation15 + $0xf48] sm:$0xff] }
 0x7c3   :  { %v10733_v36 = vpop.f32.mrf.mxu1  ;;  %10932 = vmatprep.subr.bf16.mxu0 %v12419_v45  ;;  %10949 = vmatprep.subr.bf16.mxu1 %v12515_v31  ;;  %v12634_v45 = vcombine.low %v8006_v2, %v8010_v11  ;;  %v8090_v28 = vld [vmem:[#allocation15 + $0xf68] sm:$0xff]  ;;  %v12722_v11 = vcombine.low %v8094_v55, %v8098_v54 }
 0x7c5   :  { %v10735_v43 = vpop.f32.mrf.mxu1 }
 0x7c6   :  { %10933 = vmatpush2.bf16.msra.mxu0 %v12418_v8  ;;  %10950 = vmatpush1.bf16.msra.mxu1 %v12514_v0  ;;  %v7994_v8 = vld [vmem:[#allocation15 + $0xc68] sm:$0xff]  ;;  %v12594_v0 = vcombine.low %v7966_v63, %v7970_v1  ;;  %v12714_v1 = vcombine.low %v8086_v34, %v8090_v28 }
 0x7c7   :  { %v10736_v10 = vpop.f32.mrf.mxu1  ;;  %10951 = vmatprep.subr.bf16.mxu1 %v12507_v59  ;;  %10984 = vmatprep.subr.bf16.mxu0 %v12667_v38  ;;  %v12587_v59 = vcombine.high %v7958_v33, %v7962_v5  ;;  %v7982_v43 = vld [vmem:[#allocation15 + $0xc08] sm:$0xff] }
 0x7c8   :  { %v12611_v10 = vcombine.high %v7982_v43, %v7986_v40  ;;  %v12610_v51 = vcombine.low %v7982_v43, %v7986_v40  ;;  %v8058_v40 = vld [vmem:[#allocation15 + $0xe68] sm:$0xff] }
 0x7c9   :  { %10935 = vmatmul.mubr.bf16.vlgmr.msra.gmra.mxu0 %v14845_v50 }
 0x7ca   :  { %10952 = vmatpush1.bf16.msra.mxu1 %v12506_v46  ;;  %10985 = vmatpush1.bf16.msra.mxu0 %v12666_v49  ;;  %v12579_v49 = vcombine.high %v7950_v7, %v7954_v39  ;;  %v8054_v39 = vld [vmem:[#allocation15 + $0xe48] sm:$0xff] }
 0x7cb   :  { %11016 = vmatprep.mubr.bf16.mxu0 %v14872_v15  ;;  %10953 = vmatprep.subr.bf16.mxu1 %v12499_v25  ;;  %v7942_v25 = vld [vmem:[#allocation15 + $0xac8] sm:$0xff] }
 0x7cc   :  { %10986 = vmatprep.subr.bf16.mxu0 %v12659_v3  ;;  %v8102_v3 = vld [vmem:[#allocation15 + $0xfc8] sm:$0xff]  ;;  %v12570_v23 = vcombine.low %v7942_v25, %v7946_v41 }
 0x7cd   :  { %v12730_v52 = vcombine.low %v8102_v3, %v8106_v9 }
 0x7ce   :  { %10954 = vmatpush1.bf16.msra.mxu1 %v12498_v17  ;;  %10987 = vmatpush1.bf16.msra.mxu0 %v12658_v29  ;;  %v12571_v17 = vcombine.high %v7942_v25, %v7946_v41  ;;  %v12731_v29 = vcombine.high %v8102_v3, %v8106_v9  ;;  %v12683_v25 = vcombine.high %v8054_v39, %v8058_v40  ;;  %v8046_v3 = vld [vmem:[#allocation15 + $0xe08] sm:$0xff] }
 0x7cf   :  { %10955 = vmatprep.subr.bf16.mxu1 %v12491_v47  ;;  %10988 = vmatprep.subr.bf16.mxu0 %v12651_v61  ;;  %v7934_v47 = vld [vmem:[#allocation15 + $0xa88] sm:$0xff] }
 0x7d0   :  { %v7938_v61 = vld [vmem:[#allocation15 + $0xaa8] sm:$0xff] }
 0x7d1   :  { %v10772_v16 = vpop.f32.mrf.mxu0  ;;  %v12562_v2 = vcombine.low %v7934_v47, %v7938_v61  ;;  %v8050_v9 = vld [vmem:[#allocation15 + $0xe28] sm:$0xff] }
 0x7d2   :  { %10956 = vmatpush1.bf16.msra.mxu1 %v12490_v56  ;;  %10989 = vmatpush1.bf16.msra.mxu0 %v12650_v12  ;;  %v14885_v19 = vadd.f32 %v10772_v16, %v10731_v35  ;;  %v7990_v35 = vld [vmem:[#allocation15 + $0xc48] sm:$0xff]  ;;  %v12563_v56 = vcombine.high %v7934_v47, %v7938_v61  ;;  %v12723_v12 = vcombine.high %v8094_v55, %v8098_v54  ;;  %v7623_v55 = vld [vmem:[#allocation15 + $0xd0] sm:$0xff] }
 0x7d3   :  { %v10774_v60 = vpop.f32.mrf.mxu0  ;;  %10957 = vmatprep.subr.bf16.mxu1 %v12483_v57  ;;  %10990 = vmatprep.subr.bf16.mxu0 %v12643_v58  ;;  %v12619_v38 = vcombine.high %v7990_v35, %v7994_v8  ;;  %v12618_v46 = vcombine.low %v7990_v35, %v7994_v8  ;;  %v7926_v57 = vld [vmem:[#allocation15 + $0xa48] sm:$0xff]  ;;  %v12675_v47 = vcombine.high %v8046_v3, %v8050_v9  ;;  %v7627_v54 = vld [vmem:[#allocation15 + $0xf0] sm:$0xff] }
 0x7d4   :  { %v14887_v30 = vadd.f32 %v10774_v60, %v10733_v36  ;;  %v12626_v36 = vcombine.low %v7998_v22, %v8002_v14  ;;  %v7930_v58 = vld [vmem:[#allocation15 + $0xa68] sm:$0xff] }
 0x7d5   :  { %v10776_v20 = vpop.f32.mrf.mxu0  ;;  %v12555_v16 = vcombine.high %v7926_v57, %v7930_v58  ;;  %v7922_v60 = vld [vmem:[#allocation15 + $0xa28] sm:$0xff]  ;;  %v12554_v63 = vcombine.low %v7926_v57, %v7930_v58  ;;  %v12253_v57 = vcombine.high %v7623_v55, %v7627_v54 }
 0x7d6   :  { %10958 = vmatpush1.bf16.msra.mxu1 %v12482_v18  ;;  %10991 = vmatpush1.bf16.msra.mxu0 %v12642_v42  ;;  %v12715_v18 = vcombine.high %v8086_v34, %v8090_v28  ;;  %v7918_v42 = vld [vmem:[#allocation15 + $0xa08] sm:$0xff]  ;;  %v7615_v34 = vld [vmem:[#allocation15 + $0x90] sm:$0xff] }
 0x7d7   :  { %v10777_v31 = vpop.f32.mrf.mxu0  ;;  %10959 = vmatprep.subr.bf16.mxu1 %v12603_v62  ;;  %10992 = vmatprep.subr.bf16.mxu0 %v12635_v37  ;;  %v8078_v62 = vld [vmem:[#allocation15 + $0xf08] sm:$0xff]  ;;  %v12547_v22 = vcombine.high %v7918_v42, %v7922_v60  ;;  %v7619_v28 = vld [vmem:[#allocation15 + $0xb0] sm:$0xff] }
 0x7d8   :  { %v8082_v37 = vld [vmem:[#allocation15 + $0xf28] sm:$0xff]  ;;  %v7659_v31 = vld [vmem:[#allocation15 + $0x1f0] sm:$0xff] }
 0x7d9   :  { %v12707_v14 = vcombine.high %v8078_v62, %v8082_v37  ;;  %v8070_v20 = vld [vmem:[#allocation15 + $0xec8] sm:$0xff] }
 0x7da   :  { %10960 = vmatpush2.bf16.msra.mxu1 %v12602_v21  ;;  %10993 = vmatpush1.bf16.msra.mxu0 %v12634_v45  ;;  %v8074_v21 = vld [vmem:[#allocation15 + $0xee8] sm:$0xff]  ;;  %v7655_v45 = vld [vmem:[#allocation15 + $0x1d0] sm:$0xff] }
 0x7db   :  { %10961 = vmatprep.subr.bf16.mxu1 %v12595_v32  ;;  %10994 = vmatprep.subr.bf16.mxu0 %v12627_v53  ;;  %v12546_v32 = vcombine.low %v7918_v42, %v7922_v60  ;;  %v12706_v53 = vcombine.low %v8078_v62, %v8082_v37  ;;  %v12699_v33 = vcombine.high %v8070_v20, %v8074_v21  ;;  %v8062_v35 = vld [vmem:[#allocation15 + $0xe88] sm:$0xff]  ;;  %v7607_v60 = vld [vmem:[#allocation15 + $0x50] sm:$0xff] }
 0x7dc   :  { %v12285_v5 = vcombine.high %v7655_v45, %v7659_v31  ;;  %v8066_v8 = vld [vmem:[#allocation15 + $0xea8] sm:$0xff]  ;;  %v12245_v42 = vcombine.high %v7615_v34, %v7619_v28  ;;  %v7611_v37 = vld [vmem:[#allocation15 + $0x70] sm:$0xff] }
 0x7dd   :  { %v12691_v7 = vcombine.high %v8062_v35, %v8066_v8 }
 0x7de   :  { %10962 = vmatpush2.bf16.msra.mxu1 %v12594_v0  ;;  %10995 = vmatpush1.bf16.msra.mxu0 %v12626_v36  ;;  %v7647_v0 = vld [vmem:[#allocation15 + $0x190] sm:$0xff] }
 0x7df   :  { %10963 = vmatprep.subr.bf16.mxu1 %v12587_v59  ;;  %10996 = vmatprep.subr.bf16.mxu0 %v12619_v38  ;;  %v7651_v36 = vld [vmem:[#allocation15 + $0x1b0] sm:$0xff]  ;;  %v12698_v59 = vcombine.low %v8070_v20, %v8074_v21  ;;  %v12284_v38 = vcombine.low %v7655_v45, %v7659_v31  ;;  %v12237_v20 = vcombine.high %v7607_v60, %v7611_v37 }
 0x7e0   :  { %v12277_v43 = vcombine.high %v7647_v0, %v7651_v36  ;;  %v7599_v45 = vld [vmem:[#allocation15 + $0x10] sm:$0xff] }
 0x7e1   :  { %v7603_v31 = vld [vmem:[#allocation15 + $0x30] sm:$0xff] }
 0x7e2   :  { %10964 = vmatpush2.bf16.msra.mxu1 %v12586_v44  ;;  %10997 = vmatpush1.bf16.msra.mxu0 %v12618_v46  ;;  %v7639_v44 = vld [vmem:[#allocation15 + $0x150] sm:$0xff] }
 0x7e3   :  { %10965 = vmatprep.subr.bf16.mxu1 %v12579_v49  ;;  %10998 = vmatprep.subr.bf16.mxu0 %v12611_v10  ;;  %v7643_v46 = vld [vmem:[#allocation15 + $0x170] sm:$0xff]  ;;  %v12690_v49 = vcombine.low %v8062_v35, %v8066_v8  ;;  %v12276_v10 = vcombine.low %v7647_v0, %v7651_v36  ;;  %v12229_v35 = vcombine.high %v7599_v45, %v7603_v31 }
 0x7e4   :  { %v12269_v41 = vcombine.high %v7639_v44, %v7643_v46  ;;  %v7719_v0 = vld [vmem:[#allocation15 + $0x3d0] sm:$0xff] }
 0x7e5   :  { %v7723_v36 = vld [vmem:[#allocation15 + $0x3f0] sm:$0xff] }
 0x7e6   :  { %10966 = vmatpush2.bf16.msra.mxu1 %v12578_v27  ;;  %10999 = vmatpush1.bf16.msra.mxu0 %v12610_v51  ;;  %v7631_v27 = vld [vmem:[#allocation15 + $0x110] sm:$0xff] }
 0x7e7   :  { %10967 = vmatprep.subr.bf16.mxu1 %v12571_v17  ;;  %11000 = vmatprep.subr.bf16.mxu0 %v12731_v29  ;;  %v7635_v51 = vld [vmem:[#allocation15 + $0x130] sm:$0xff]  ;;  %v12682_v17 = vcombine.low %v8054_v39, %v8058_v40  ;;  %v12268_v29 = vcombine.low %v7639_v44, %v7643_v46 }
 0x7e8   :  { %v12261_v61 = vcombine.high %v7631_v27, %v7635_v51  ;;  %v7711_v44 = vld [vmem:[#allocation15 + $0x390] sm:$0xff] }
 0x7e9   :  { %v7715_v46 = vld [vmem:[#allocation15 + $0x3b0] sm:$0xff] }
 0x7ea   :  { %10968 = vmatpush2.bf16.msra.mxu1 %v12570_v23  ;;  %11001 = vmatpush2.bf16.msra.mxu0 %v12730_v52  ;;  %v7783_v23 = vld [vmem:[#allocation15 + $0x5d0] sm:$0xff] }
 0x7eb   :  { %10969 = vmatprep.subr.bf16.mxu1 %v12563_v56  ;;  %11002 = vmatprep.subr.bf16.mxu0 %v12723_v12  ;;  %v7787_v52 = vld [vmem:[#allocation15 + $0x5f0] sm:$0xff]  ;;  %v12674_v56 = vcombine.low %v8046_v3, %v8050_v9  ;;  %v12260_v12 = vcombine.low %v7631_v27, %v7635_v51  ;;  %v12341_v3 = vcombine.high %v7711_v44, %v7715_v46 }
 0x7ec   :  { %v12413_v58 = vcombine.high %v7783_v23, %v7787_v52  ;;  %v7703_v27 = vld [vmem:[#allocation15 + $0x350] sm:$0xff] }
 0x7ed   :  { %v7707_v51 = vld [vmem:[#allocation15 + $0x370] sm:$0xff] }
 0x7ee   :  { %10970 = vmatpush2.bf16.msra.mxu1 %v12562_v2  ;;  %11003 = vmatpush2.bf16.msra.mxu0 %v12722_v11  ;;  %v7775_v2 = vld [vmem:[#allocation15 + $0x590] sm:$0xff] }
 0x7ef   :  { %10971 = vmatprep.subr.bf16.mxu1 %v12555_v16  ;;  %11004 = vmatprep.subr.bf16.mxu0 %v12715_v18  ;;  %v7779_v11 = vld [vmem:[#allocation15 + $0x5b0] sm:$0xff]  ;;  %v12252_v16 = vcombine.low %v7623_v55, %v7627_v54  ;;  %v12412_v18 = vcombine.low %v7783_v23, %v7787_v52  ;;  %v12333_v55 = vcombine.high %v7703_v27, %v7707_v51 }
 0x7f0   :  { %v12405_v62 = vcombine.high %v7775_v2, %v7779_v11  ;;  %v7695_v23 = vld [vmem:[#allocation15 + $0x310] sm:$0xff] }
 0x7f1   :  { %v7699_v52 = vld [vmem:[#allocation15 + $0x330] sm:$0xff] }
 0x7f2   :  { %10972 = vmatpush2.bf16.msra.mxu1 %v12554_v63  ;;  %11005 = vmatpush2.bf16.msra.mxu0 %v12714_v1  ;;  %v7767_v63 = vld [vmem:[#allocation15 + $0x550] sm:$0xff] }
 0x7f3   :  { %10973 = vmatprep.subr.bf16.mxu1 %v12547_v22  ;;  %11006 = vmatprep.subr.bf16.mxu0 %v12707_v14  ;;  %v7771_v1 = vld [vmem:[#allocation15 + $0x570] sm:$0xff]  ;;  %v12244_v22 = vcombine.low %v7615_v34, %v7619_v28  ;;  %v12404_v14 = vcombine.low %v7775_v2, %v7779_v11  ;;  %v12325_v34 = vcombine.high %v7695_v23, %v7699_v52 }
 0x7f4   :  { %v12397_v21 = vcombine.high %v7767_v63, %v7771_v1  ;;  %v7687_v2 = vld [vmem:[#allocation15 + $0x2d0] sm:$0xff] }
 0x7f5   :  { %v7691_v11 = vld [vmem:[#allocation15 + $0x2f0] sm:$0xff] }
 0x7f6   :  { %10974 = vmatpush2.bf16.msra.mxu1 %v12546_v32  ;;  %11007 = vmatpush2.bf16.msra.mxu0 %v12706_v53  ;;  %v7759_v32 = vld [vmem:[#allocation15 + $0x510] sm:$0xff] }
 0x7f7   :  { %11008 = vmatprep.subr.bf16.mxu0 %v12699_v33  ;;  %11025 = vmatprep.subr.bf16.mxu1 %v12285_v5  ;;  %v7763_v53 = vld [vmem:[#allocation15 + $0x530] sm:$0xff]  ;;  %v12236_v33 = vcombine.low %v7607_v60, %v7611_v37  ;;  %v12396_v5 = vcombine.low %v7767_v63, %v7771_v1 }
 0x7f8   :  { %v12389_v8 = vcombine.high %v7759_v32, %v7763_v53  ;;  %v12388_v39 = vcombine.low %v7759_v32, %v7763_v53  ;;  %v7679_v63 = vld [vmem:[#allocation15 + $0x290] sm:$0xff] }
 0x7f9   :  { %10976 = vmatmul.mubr.bf16.vlgmr.msra.gmra.mxu1 %v14867_v6  ;;  %v7683_v1 = vld [vmem:[#allocation15 + $0x2b0] sm:$0xff] }
 0x7fa   :  { %11009 = vmatpush2.bf16.msra.mxu0 %v12698_v59  ;;  %11026 = vmatpush1.bf16.msra.mxu1 %v12284_v38  ;;  %v7751_v59 = vld [vmem:[#allocation15 + $0x4d0] sm:$0xff] }
 0x7fb   :  { %11057 = vmatprep.mubr.bf16.mxu1 %v14834_v4  ;;  %11010 = vmatprep.subr.bf16.mxu0 %v12691_v7  ;;  %v7755_v38 = vld [vmem:[#allocation15 + $0x4f0] sm:$0xff]  ;;  %v12228_v7 = vcombine.low %v7599_v45, %v7603_v31  ;;  %v12309_v45 = vcombine.high %v7679_v63, %v7683_v1 }
 0x7fc   :  { %11027 = vmatprep.subr.bf16.mxu1 %v12277_v43  ;;  %v12349_v43 = vcombine.high %v7719_v0, %v7723_v36  ;;  %v12381_v40 = vcombine.high %v7751_v59, %v7755_v38  ;;  %v7671_v32 = vld [vmem:[#allocation15 + $0x250] sm:$0xff] }
 0x7fd   :  { %v7675_v53 = vld [vmem:[#allocation15 + $0x270] sm:$0xff] }
 0x7fe   :  { %11011 = vmatpush2.bf16.msra.mxu0 %v12690_v49  ;;  %11028 = vmatpush1.bf16.msra.mxu1 %v12276_v10  ;;  %v7743_v49 = vld [vmem:[#allocation15 + $0x490] sm:$0xff] }
 0x7ff   :  { %11012 = vmatprep.subr.bf16.mxu0 %v12683_v25  ;;  %11029 = vmatprep.subr.bf16.mxu1 %v12269_v41  ;;  %v7747_v10 = vld [vmem:[#allocation15 + $0x4b0] sm:$0xff]  ;;  %v12348_v25 = vcombine.low %v7719_v0, %v7723_v36  ;;  %v12380_v41 = vcombine.low %v7751_v59, %v7755_v38  ;;  %v12301_v0 = vcombine.high %v7671_v32, %v7675_v53 }
 0x800   :  { %v12373_v9 = vcombine.high %v7743_v49, %v7747_v10  ;;  %v7663_v59 = vld [vmem:[#allocation15 + $0x210] sm:$0xff] }
 0x801   :  { %v7667_v38 = vld [vmem:[#allocation15 + $0x230] sm:$0xff] }
 0x802   :  { %11013 = vmatpush2.bf16.msra.mxu0 %v12682_v17  ;;  %11030 = vmatpush1.bf16.msra.mxu1 %v12268_v29  ;;  %v7735_v17 = vld [vmem:[#allocation15 + $0x450] sm:$0xff] }
 0x803   :  { %11014 = vmatprep.subr.bf16.mxu0 %v12675_v47  ;;  %11031 = vmatprep.subr.bf16.mxu1 %v12261_v61  ;;  %v7739_v29 = vld [vmem:[#allocation15 + $0x470] sm:$0xff]  ;;  %v12340_v47 = vcombine.low %v7711_v44, %v7715_v46  ;;  %v12372_v61 = vcombine.low %v7743_v49, %v7747_v10  ;;  %v12293_v44 = vcombine.high %v7663_v59, %v7667_v38 }
 0x804   :  { %v12365_v54 = vcombine.high %v7735_v17, %v7739_v29  ;;  %v7815_v49 = vld [vmem:[#allocation15 + $0x6d0] sm:$0xff] }
 0x805   :  { %v7819_v10 = vld [vmem:[#allocation15 + $0x6f0] sm:$0xff] }
 0x806   :  { %11015 = vmatpush2.bf16.msra.mxu0 %v12674_v56  ;;  %11032 = vmatpush1.bf16.msra.mxu1 %v12260_v12  ;;  %v7727_v56 = vld [vmem:[#allocation15 + $0x410] sm:$0xff] }
 0x807   :  { %11033 = vmatprep.subr.bf16.mxu1 %v12253_v57  ;;  %11066 = vmatprep.subr.bf16.mxu0 %v12413_v58  ;;  %v7731_v12 = vld [vmem:[#allocation15 + $0x430] sm:$0xff]  ;;  %v12332_v57 = vcombine.low %v7703_v27, %v7707_v51  ;;  %v12364_v58 = vcombine.low %v7735_v17, %v7739_v29  ;;  %v12445_v27 = vcombine.high %v7815_v49, %v7819_v10 }
 0x808   :  { %v12357_v28 = vcombine.high %v7727_v56, %v7731_v12  ;;  %v12356_v60 = vcombine.low %v7727_v56, %v7731_v12  ;;  %v7807_v17 = vld [vmem:[#allocation15 + $0x690] sm:$0xff] }
 0x809   :  { %11017 = vmatmul.mubr.bf16.vlgmr.msra.gmra.mxu0 %v14876_v26  ;;  %v7811_v29 = vld [vmem:[#allocation15 + $0x6b0] sm:$0xff] }
 0x80a   :  { %11034 = vmatpush1.bf16.msra.mxu1 %v12252_v16  ;;  %11067 = vmatpush1.bf16.msra.mxu0 %v12412_v18  ;;  %v7847_v16 = vld [vmem:[#allocation15 + $0x7d0] sm:$0xff] }
 0x80b   :  { %11098 = vmatprep.mubr.bf16.mxu0 %v14843_v13  ;;  %11035 = vmatprep.subr.bf16.mxu1 %v12245_v42  ;;  %v7851_v18 = vld [vmem:[#allocation15 + $0x7f0] sm:$0xff]  ;;  %v12324_v42 = vcombine.low %v7695_v23, %v7699_v52  ;;  %v12437_v23 = vcombine.high %v7807_v17, %v7811_v29 }
 0x80c   :  { %11068 = vmatprep.subr.bf16.mxu0 %v12405_v62  ;;  %v12317_v62 = vcombine.high %v7687_v2, %v7691_v11  ;;  %v12477_v37 = vcombine.high %v7847_v16, %v7851_v18  ;;  %v7799_v52 = vld [vmem:[#allocation15 + $0x650] sm:$0xff] }
 0x80d   :  { %v7803_v12 = vld [vmem:[#allocation15 + $0x670] sm:$0xff] }
 0x80e   :  { %11036 = vmatpush1.bf16.msra.mxu1 %v12244_v22  ;;  %11069 = vmatpush1.bf16.msra.mxu0 %v12404_v14  ;;  %v7839_v22 = vld [vmem:[#allocation15 + $0x790] sm:$0xff] }
 0x80f   :  { %11037 = vmatprep.subr.bf16.mxu1 %v12237_v20  ;;  %11070 = vmatprep.subr.bf16.mxu0 %v12397_v21  ;;  %v7843_v14 = vld [vmem:[#allocation15 + $0x7b0] sm:$0xff]  ;;  %v12316_v20 = vcombine.low %v7687_v2, %v7691_v11  ;;  %v12476_v21 = vcombine.low %v7847_v16, %v7851_v18  ;;  %v12429_v16 = vcombine.high %v7799_v52, %v7803_v12 }
 0x810   :  { %v12469_v31 = vcombine.high %v7839_v22, %v7843_v14 }
 0x812   :  { %11038 = vmatpush1.bf16.msra.mxu1 %v12236_v33  ;;  %11071 = vmatpush1.bf16.msra.mxu0 %v12396_v5  ;;  %v7831_v33 = vld [vmem:[#allocation15 + $0x750] sm:$0xff] }
 0x813   :  { %11039 = vmatprep.subr.bf16.mxu1 %v12229_v35  ;;  %11072 = vmatprep.subr.bf16.mxu0 %v12389_v8  ;;  %v7835_v5 = vld [vmem:[#allocation15 + $0x770] sm:$0xff]  ;;  %v12308_v35 = vcombine.low %v7679_v63, %v7683_v1  ;;  %v12468_v8 = vcombine.low %v7839_v22, %v7843_v14  ;;  %v12428_v1 = vcombine.low %v7799_v52, %v7803_v12 }
 0x814   :  { %v12461_v36 = vcombine.high %v7831_v33, %v7835_v5  ;;  %v8019_v52 = vld [vmem:[#allocation15 + $0xd30] sm:$0xff] }
 0x816   :  { %11040 = vmatpush1.bf16.msra.mxu1 %v12228_v7  ;;  %11073 = vmatpush1.bf16.msra.mxu0 %v12388_v39  ;;  %v7823_v7 = vld [vmem:[#allocation15 + $0x710] sm:$0xff] }
 0x817   :  { %11041 = vmatprep.subr.bf16.mxu1 %v12349_v43  ;;  %11074 = vmatprep.subr.bf16.mxu0 %v12381_v40  ;;  %v7827_v39 = vld [vmem:[#allocation15 + $0x730] sm:$0xff]  ;;  %v12300_v43 = vcombine.low %v7671_v32, %v7675_v53  ;;  %v12460_v40 = vcombine.low %v7831_v33, %v7835_v5 }
 0x818   :  { %v12453_v46 = vcombine.high %v7823_v7, %v7827_v39  ;;  %v8039_v32 = vld [vmem:[#allocation15 + $0xdd0] sm:$0xff] }
 0x819   :  { %v8043_v53 = vld [vmem:[#allocation15 + $0xdf0] sm:$0xff] }
 0x81a   :  { %11042 = vmatpush2.bf16.msra.mxu1 %v12348_v25  ;;  %11075 = vmatpush1.bf16.msra.mxu0 %v12380_v41  ;;  %v7911_v25 = vld [vmem:[#allocation15 + $0x9d0] sm:$0xff] }
 0x81b   :  { %11043 = vmatprep.subr.bf16.mxu1 %v12341_v3  ;;  %11076 = vmatprep.subr.bf16.mxu0 %v12373_v9  ;;  %v7915_v41 = vld [vmem:[#allocation15 + $0x9f0] sm:$0xff]  ;;  %v12292_v3 = vcombine.low %v7663_v59, %v7667_v38  ;;  %v12452_v9 = vcombine.low %v7823_v7, %v7827_v39  ;;  %v12668_v39 = vcombine.low %v8039_v32, %v8043_v53 }
 0x81c   :  { %v12541_v51 = vcombine.high %v7911_v25, %v7915_v41  ;;  %v8031_v59 = vld [vmem:[#allocation15 + $0xd90] sm:$0xff] }
 0x81d   :  { %v8035_v38 = vld [vmem:[#allocation15 + $0xdb0] sm:$0xff] }
 0x81e   :  { %11044 = vmatpush2.bf16.msra.mxu1 %v12340_v47  ;;  %11077 = vmatpush1.bf16.msra.mxu0 %v12372_v61  ;;  %v7903_v47 = vld [vmem:[#allocation15 + $0x990] sm:$0xff] }
 0x81f   :  { %11045 = vmatprep.subr.bf16.mxu1 %v12333_v55  ;;  %11078 = vmatprep.subr.bf16.mxu0 %v12365_v54  ;;  %v7907_v61 = vld [vmem:[#allocation15 + $0x9b0] sm:$0xff]  ;;  %v12444_v55 = vcombine.low %v7815_v49, %v7819_v10  ;;  %v12540_v54 = vcombine.low %v7911_v25, %v7915_v41 }
 0x820   :  { %v12533_v56 = vcombine.high %v7903_v47, %v7907_v61  ;;  %v12532_v2 = vcombine.low %v7903_v47, %v7907_v61  ;;  %v8023_v49 = vld [vmem:[#allocation15 + $0xd50] sm:$0xff] }
 0x821   :  { %v8027_v10 = vld [vmem:[#allocation15 + $0xd70] sm:$0xff] }
 0x822   :  { %11046 = vmatpush2.bf16.msra.mxu1 %v12332_v57  ;;  %11079 = vmatpush1.bf16.msra.mxu0 %v12364_v58  ;;  %v7895_v57 = vld [vmem:[#allocation15 + $0x950] sm:$0xff]  ;;  %v12652_v12 = vcombine.low %v8023_v49, %v8027_v10 }
 0x823   :  { %11047 = vmatprep.subr.bf16.mxu1 %v12325_v34  ;;  %11080 = vmatprep.subr.bf16.mxu0 %v12357_v28  ;;  %v7899_v58 = vld [vmem:[#allocation15 + $0x970] sm:$0xff]  ;;  %v12436_v28 = vcombine.low %v7807_v17, %v7811_v29  ;;  %v12653_v29 = vcombine.high %v8023_v49, %v8027_v10 }
 0x824   :  { %v12525_v18 = vcombine.high %v7895_v57, %v7899_v58  ;;  %v12524_v22 = vcombine.low %v7895_v57, %v7899_v58  ;;  %v7855_v47 = vld [vmem:[#allocation15 + $0x810] sm:$0xff] }
 0x825   :  { %v7947_v49 = vld [vmem:[#allocation15 + $0xaf0] sm:$0xff] }
 0x826   :  { %11048 = vmatpush2.bf16.msra.mxu1 %v12324_v42  ;;  %11081 = vmatpush1.bf16.msra.mxu0 %v12356_v60  ;;  %v7791_v42 = vld [vmem:[#allocation15 + $0x610] sm:$0xff] }
 0x827   :  { %11049 = vmatprep.subr.bf16.mxu1 %v12317_v62  ;;  %11082 = vmatprep.subr.bf16.mxu0 %v12477_v37  ;;  %v7795_v60 = vld [vmem:[#allocation15 + $0x630] sm:$0xff] }
 0x828   :  { %v7887_v62 = vld [vmem:[#allocation15 + $0x910] sm:$0xff]  ;;  %v12420_v33 = vcombine.low %v7791_v42, %v7795_v60 }
 0x829   :  { %v7891_v37 = vld [vmem:[#allocation15 + $0x930] sm:$0xff] }
 0x82a   :  { %11050 = vmatpush2.bf16.msra.mxu1 %v12316_v20  ;;  %11083 = vmatpush2.bf16.msra.mxu0 %v12476_v21  ;;  %v12421_v20 = vcombine.high %v7791_v42, %v7795_v60  ;;  %v12517_v21 = vcombine.high %v7887_v62, %v7891_v37  ;;  %v12516_v5 = vcombine.low %v7887_v62, %v7891_v37  ;;  %v7967_v37 = vld [vmem:[#allocation15 + $0xb90] sm:$0xff] }
 0x82b   :  { %11051 = vmatprep.subr.bf16.mxu1 %v12309_v45  ;;  %11084 = vmatprep.subr.bf16.mxu0 %v12469_v31  ;;  %v7879_v45 = vld [vmem:[#allocation15 + $0x8d0] sm:$0xff] }
 0x82c   :  { %v7883_v31 = vld [vmem:[#allocation15 + $0x8f0] sm:$0xff] }
 0x82d   :  { %v12508_v7 = vcombine.low %v7879_v45, %v7883_v31  ;;  %v8103_v10 = vld [vmem:[#allocation15 + $0xfd0] sm:$0xff] }
 0x82e   :  { %11052 = vmatpush2.bf16.msra.mxu1 %v12308_v35  ;;  %11085 = vmatpush2.bf16.msra.mxu0 %v12468_v8  ;;  %v12509_v35 = vcombine.high %v7879_v45, %v7883_v31  ;;  %v12669_v8 = vcombine.high %v8039_v32, %v8043_v53  ;;  %v7959_v31 = vld [vmem:[#allocation15 + $0xb50] sm:$0xff] }
 0x82f   :  { %11053 = vmatprep.subr.bf16.mxu1 %v12301_v0  ;;  %11086 = vmatprep.subr.bf16.mxu0 %v12461_v36  ;;  %v7871_v0 = vld [vmem:[#allocation15 + $0x890] sm:$0xff] }
 0x830   :  { %v7875_v36 = vld [vmem:[#allocation15 + $0x8b0] sm:$0xff] }
 0x831   :  { %v12500_v41 = vcombine.low %v7871_v0, %v7875_v36  ;;  %v7963_v32 = vld [vmem:[#allocation15 + $0xb70] sm:$0xff] }
 0x832   :  { %11054 = vmatpush2.bf16.msra.mxu1 %v12300_v43  ;;  %11087 = vmatpush2.bf16.msra.mxu0 %v12460_v40  ;;  %v12501_v43 = vcombine.high %v7871_v0, %v7875_v36  ;;  %v7863_v40 = vld [vmem:[#allocation15 + $0x850] sm:$0xff] }
 0x833   :  { %11055 = vmatprep.subr.bf16.mxu1 %v12293_v44  ;;  %11088 = vmatprep.subr.bf16.mxu0 %v12453_v46  ;;  %v12661_v44 = vcombine.high %v8031_v59, %v8035_v38  ;;  %v7867_v46 = vld [vmem:[#allocation15 + $0x870] sm:$0xff] }
 0x834   :  { %v12493_v17 = vcombine.high %v7863_v40, %v7867_v46  ;;  %v7991_v53 = vld [vmem:[#allocation15 + $0xc50] sm:$0xff] }
 0x835   :  { %v7951_v36 = vld [vmem:[#allocation15 + $0xb10] sm:$0xff] }
 0x836   :  { %11056 = vmatpush2.bf16.msra.mxu1 %v12292_v3  ;;  %11089 = vmatpush2.bf16.msra.mxu0 %v12452_v9 }
 0x837   :  { %11090 = vmatprep.subr.bf16.mxu0 %v12445_v27  ;;  %11107 = vmatprep.subr.bf16.mxu1 %v12541_v51  ;;  %v12660_v27 = vcombine.low %v8031_v59, %v8035_v38  ;;  %v7955_v59 = vld [vmem:[#allocation15 + $0xb30] sm:$0xff] }
 0x838   :  { %v7983_v38 = vld [vmem:[#allocation15 + $0xc10] sm:$0xff] }
 0x839   :  { %11058 = vmatmul.mubr.bf16.vlgmr.msra.gmra.mxu1 %v14836_v24  ;;  %v10813_v34 = vpop.f32.mrf.mxu1 }
 0x83a   :  { %11091 = vmatpush2.bf16.msra.mxu0 %v12444_v55  ;;  %11108 = vmatpush1.bf16.msra.mxu1 %v12540_v54  ;;  %v10814_v3 = vadd.f32 %v10813_v34, %v14885_v19  ;;  %v7859_v54 = vld [vmem:[#allocation15 + $0x830] sm:$0xff] }
 0x83b   :  { %11139 = vmatprep.mubr.bf16.mxu1 %v14863_v48  ;;  %v10815_v11 = vpop.f32.mrf.mxu1  ;;  %11092 = vmatprep.subr.bf16.mxu0 %v12437_v23  ;;  %v8015_v23 = vld [vmem:[#allocation15 + $0xd10] sm:$0xff]  ;;  %v12485_v58 = vcombine.high %v7855_v47, %v7859_v54 }
 0x83c   :  { %11109 = vmatprep.subr.bf16.mxu1 %v12533_v56  ;;  %v10816_v9 = vadd.f32 %v10815_v11, %v14887_v30  ;;  %v12492_v30 = vcombine.low %v7863_v40, %v7867_v46  ;;  %v12645_v34 = vcombine.high %v8015_v23, %v8019_v52  ;;  %v8007_v11 = vld [vmem:[#allocation15 + $0xcd0] sm:$0xff]  ;;  %v12644_v42 = vcombine.low %v8015_v23, %v8019_v52 }
 0x83d   :  { %v10817_v63 = vpop.f32.mrf.mxu1  ;;  %v12581_v40 = vcombine.high %v7951_v36, %v7955_v59  ;;  %v7943_v46 = vld [vmem:[#allocation15 + $0xad0] sm:$0xff] }
 0x83e   :  { %11093 = vmatpush2.bf16.msra.mxu0 %v12436_v28  ;;  %11110 = vmatpush1.bf16.msra.mxu1 %v12532_v2  ;;  %v7975_v28 = vld [vmem:[#allocation15 + $0xbd0] sm:$0xff] }
 0x83f   :  { %v10818_v14 = vpop.f32.mrf.mxu1  ;;  %11094 = vmatprep.subr.bf16.mxu0 %v12429_v16  ;;  %11111 = vmatprep.subr.bf16.mxu1 %v12525_v18  ;;  %v7979_v2 = vld [vmem:[#allocation15 + $0xbf0] sm:$0xff]  ;;  %v12484_v18 = vcombine.low %v7855_v47, %v7859_v54 }
 0x840   :  { %v8011_v16 = vld [vmem:[#allocation15 + $0xcf0] sm:$0xff]  ;;  %v12605_v60 = vcombine.high %v7975_v28, %v7979_v2  ;;  %v12604_v14 = vcombine.low %v7975_v28, %v7979_v2 }
 0x841   :  { %v12637_v62 = vcombine.high %v8007_v11, %v8011_v16  ;;  %v7971_v63 = vld [vmem:[#allocation15 + $0xbb0] sm:$0xff] }
 0x842   :  { %11095 = vmatpush2.bf16.msra.mxu0 %v12428_v1  ;;  %11112 = vmatpush1.bf16.msra.mxu1 %v12524_v22  ;;  %v7999_v1 = vld [vmem:[#allocation15 + $0xc90] sm:$0xff] }
 0x843   :  { %11096 = vmatprep.subr.bf16.mxu0 %v12421_v20  ;;  %11113 = vmatprep.subr.bf16.mxu1 %v12517_v21  ;;  %v8003_v22 = vld [vmem:[#allocation15 + $0xcb0] sm:$0xff]  ;;  %v12636_v20 = vcombine.low %v8007_v11, %v8011_v16  ;;  %v12597_v21 = vcombine.high %v7967_v37, %v7971_v63 }
 0x844   :  { %v12629_v45 = vcombine.high %v7999_v1, %v8003_v22  ;;  %v8099_v47 = vld [vmem:[#allocation15 + $0xfb0] sm:$0xff] }
 0x845   :  { %v7927_v52 = vld [vmem:[#allocation15 + $0xa50] sm:$0xff] }
 0x846   :  { %11097 = vmatpush2.bf16.msra.mxu0 %v12420_v33  ;;  %11114 = vmatpush1.bf16.msra.mxu1 %v12516_v5  ;;  %v7995_v33 = vld [vmem:[#allocation15 + $0xc70] sm:$0xff]  ;;  %v12596_v5 = vcombine.low %v7967_v37, %v7971_v63 }
 0x847   :  { %11115 = vmatprep.subr.bf16.mxu1 %v12509_v35  ;;  %11148 = vmatprep.subr.bf16.mxu0 %v12669_v8  ;;  %v12628_v35 = vcombine.low %v7999_v1, %v8003_v22  ;;  %v12589_v8 = vcombine.high %v7959_v31, %v7963_v32  ;;  %v12621_v0 = vcombine.high %v7991_v53, %v7995_v33  ;;  %v7919_v28 = vld [vmem:[#allocation15 + $0xa10] sm:$0xff]  ;;  %v7656_v1 = vld [vmem:[#allocation15 + $0x1d8] sm:$0xff] }
 0x848   :  { %v7923_v2 = vld [vmem:[#allocation15 + $0xa30] sm:$0xff]  ;;  %v7660_v22 = vld [vmem:[#allocation15 + $0x1f8] sm:$0xff] }
 0x849   :  { %11099 = vmatmul.mubr.bf16.vlgmr.msra.gmra.mxu0 %v14845_v50  ;;  %v10854_v25 = vpop.f32.mrf.mxu0  ;;  %v8079_v11 = vld [vmem:[#allocation15 + $0xf10] sm:$0xff] }
 0x84a   :  { %11116 = vmatpush1.bf16.msra.mxu1 %v12508_v7  ;;  %11149 = vmatpush1.bf16.msra.mxu0 %v12668_v39  ;;  %v10855_v61 = vadd.f32 %v10854_v25, %v10814_v3  ;;  %v7987_v7 = vld [vmem:[#allocation15 + $0xc30] sm:$0xff]  ;;  %v12588_v39 = vcombine.low %v7959_v31, %v7963_v32 }
 0x84b   :  { %11180 = vmatprep.mubr.bf16.mxu0 %v14872_v15  ;;  %v10856_v51 = vpop.f32.mrf.mxu0  ;;  %11117 = vmatprep.subr.bf16.mxu1 %v12501_v43  ;;  %v12620_v43 = vcombine.low %v7991_v53, %v7995_v33  ;;  %v8107_v25 = vld [vmem:[#allocation15 + $0xff0] sm:$0xff]  ;;  %v12612_v3 = vcombine.low %v7983_v38, %v7987_v7  ;;  %v7648_v53 = vld [vmem:[#allocation15 + $0x198] sm:$0xff] }
 0x84c   :  { %v10857_v55 = vadd.f32 %v10856_v51, %v10816_v9  ;;  %11150 = vmatprep.subr.bf16.mxu0 %v12661_v44  ;;  %v12613_v44 = vcombine.high %v7983_v38, %v7987_v7  ;;  %v12573_v9 = vcombine.high %v7943_v46, %v7947_v49  ;;  %v7935_v51 = vld [vmem:[#allocation15 + $0xa90] sm:$0xff]  ;;  %v7652_v33 = vld [vmem:[#allocation15 + $0x1b8] sm:$0xff] }
 0x84d   :  { %v10858_v56 = vpop.f32.mrf.mxu0  ;;  %v8083_v16 = vld [vmem:[#allocation15 + $0xf30] sm:$0xff]  ;;  %v7640_v38 = vld [vmem:[#allocation15 + $0x158] sm:$0xff] }
 0x84e   :  { %v12740_v19 = vpack.c.bf16 %v10857_v55, %v10855_v61  ;;  %11118 = vmatpush1.bf16.msra.mxu1 %v12500_v41  ;;  %11151 = vmatpush1.bf16.msra.mxu0 %v12660_v27  ;;  %v12580_v41 = vcombine.low %v7951_v36, %v7955_v59  ;;  %v12733_v27 = vcombine.high %v8103_v10, %v8107_v25  ;;  %v7931_v56 = vld [vmem:[#allocation15 + $0xa70] sm:$0xff]  ;;  %v7644_v7 = vld [vmem:[#allocation15 + $0x178] sm:$0xff] }
 0x84f   :  { %v10859_v57 = vpop.f32.mrf.mxu0  ;;  %11119 = vmatprep.subr.bf16.mxu1 %v12493_v17  ;;  %11152 = vmatprep.subr.bf16.mxu0 %v12653_v29  ;;  %v7939_v17 = vld [vmem:[#allocation15 + $0xab0] sm:$0xff]  ;;  %v12572_v61 = vcombine.low %v7943_v46, %v7947_v49  ;;  %v12732_v55 = vcombine.low %v8103_v10, %v8107_v25  ;;  %v12279_v36 = vcombine.high %v7648_v53, %v7652_v33 }
 0x850   :  { %11385 = vst [vmem:[#allocation17] sm:$0xff] %v12740_v19  ;;  %v8095_v29 = vld [vmem:[#allocation15 + $0xf90] sm:$0xff]  ;;  %v12565_v54 = vcombine.high %v7935_v51, %v7939_v17  ;;  %v12271_v49 = vcombine.high %v7640_v38, %v7644_v7 }
 0x851   :  { %v12725_v23 = vcombine.high %v8095_v29, %v8099_v47  ;;  %v8087_v19 = vld [vmem:[#allocation15 + $0xf50] sm:$0xff]  ;;  %v12724_v57 = vcombine.low %v8095_v29, %v8099_v47  ;;  %v7624_v47 = vld [vmem:[#allocation15 + $0xd8] sm:$0xff] }
 0x852   :  { %11120 = vmatpush1.bf16.msra.mxu1 %v12492_v30  ;;  %11153 = vmatpush1.bf16.msra.mxu0 %v12652_v12  ;;  %v8091_v30 = vld [vmem:[#allocation15 + $0xf70] sm:$0xff]  ;;  %v12564_v12 = vcombine.low %v7935_v51, %v7939_v17  ;;  %v12270_v51 = vcombine.low %v7640_v38, %v7644_v7 }
 0x853   :  { %11121 = vmatprep.subr.bf16.mxu1 %v12485_v58  ;;  %11154 = vmatprep.subr.bf16.mxu0 %v12645_v34  ;;  %v12557_v58 = vcombine.high %v7927_v52, %v7931_v56  ;;  %v12717_v34 = vcombine.high %v8087_v19, %v8091_v30  ;;  %v8071_v37 = vld [vmem:[#allocation15 + $0xed0] sm:$0xff] }
 0x854   :  { %v8075_v63 = vld [vmem:[#allocation15 + $0xef0] sm:$0xff] }
 0x855   :  { %v8063_v31 = vld [vmem:[#allocation15 + $0xe90] sm:$0xff] }
 0x856   :  { %11122 = vmatpush1.bf16.msra.mxu1 %v12484_v18  ;;  %11155 = vmatpush1.bf16.msra.mxu0 %v12644_v42  ;;  %v12556_v18 = vcombine.low %v7927_v52, %v7931_v56  ;;  %v12716_v42 = vcombine.low %v8087_v19, %v8091_v30  ;;  %v8067_v32 = vld [vmem:[#allocation15 + $0xeb0] sm:$0xff]  ;;  %v7616_v30 = vld [vmem:[#allocation15 + $0x98] sm:$0xff] }
 0x857   :  { %11123 = vmatprep.subr.bf16.mxu1 %v12605_v60  ;;  %11156 = vmatprep.subr.bf16.mxu0 %v12637_v62  ;;  %v12549_v60 = vcombine.high %v7919_v28, %v7923_v2  ;;  %v12709_v62 = vcombine.high %v8079_v11, %v8083_v16  ;;  %v8059_v59 = vld [vmem:[#allocation15 + $0xe70] sm:$0xff] }
 0x858   :  { %v8047_v10 = vld [vmem:[#allocation15 + $0xe10] sm:$0xff] }
 0x859   :  { %v8051_v25 = vld [vmem:[#allocation15 + $0xe30] sm:$0xff] }
 0x85a   :  { %11124 = vmatpush2.bf16.msra.mxu1 %v12604_v14  ;;  %11157 = vmatpush1.bf16.msra.mxu0 %v12636_v20  ;;  %v12548_v14 = vcombine.low %v7919_v28, %v7923_v2  ;;  %v12708_v20 = vcombine.low %v8079_v11, %v8083_v16  ;;  %v12677_v29 = vcombine.high %v8047_v10, %v8051_v25  ;;  %v7608_v11 = vld [vmem:[#allocation15 + $0x58] sm:$0xff] }
 0x85b   :  { %11125 = vmatprep.subr.bf16.mxu1 %v12597_v21  ;;  %11158 = vmatprep.subr.bf16.mxu0 %v12629_v45  ;;  %v12701_v21 = vcombine.high %v8071_v37, %v8075_v63  ;;  %v12287_v45 = vcombine.high %v7656_v1, %v7660_v22 }
 0x85e   :  { %11126 = vmatpush2.bf16.msra.mxu1 %v12596_v5  ;;  %11159 = vmatpush1.bf16.msra.mxu0 %v12628_v35  ;;  %v12700_v5 = vcombine.low %v8071_v37, %v8075_v63  ;;  %v12286_v35 = vcombine.low %v7656_v1, %v7660_v22 }
 0x85f   :  { %11127 = vmatprep.subr.bf16.mxu1 %v12589_v8  ;;  %11160 = vmatprep.subr.bf16.mxu0 %v12621_v0  ;;  %v12693_v8 = vcombine.high %v8063_v31, %v8067_v32  ;;  %v8055_v0 = vld [vmem:[#allocation15 + $0xe50] sm:$0xff] }
 0x860   :  { %v12685_v46 = vcombine.high %v8055_v0, %v8059_v59 }
 0x862   :  { %11128 = vmatpush2.bf16.msra.mxu1 %v12588_v39  ;;  %11161 = vmatpush1.bf16.msra.mxu0 %v12620_v43  ;;  %v12692_v43 = vcombine.low %v8063_v31, %v8067_v32  ;;  %v7764_v31 = vld [vmem:[#allocation15 + $0x538] sm:$0xff] }
 0x863   :  { %11129 = vmatprep.subr.bf16.mxu1 %v12581_v40  ;;  %11162 = vmatprep.subr.bf16.mxu0 %v12613_v44  ;;  %v12278_v40 = vcombine.low %v7648_v53, %v7652_v33 }
 0x866   :  { %11130 = vmatpush2.bf16.msra.mxu1 %v12580_v41  ;;  %11163 = vmatpush1.bf16.msra.mxu0 %v12612_v3  ;;  %v7632_v41 = vld [vmem:[#allocation15 + $0x118] sm:$0xff] }
 0x867   :  { %11131 = vmatprep.subr.bf16.mxu1 %v12573_v9  ;;  %11164 = vmatprep.subr.bf16.mxu0 %v12733_v27  ;;  %v7636_v3 = vld [vmem:[#allocation15 + $0x138] sm:$0xff]  ;;  %v12684_v27 = vcombine.low %v8055_v0, %v8059_v59 }
 0x868   :  { %v12262_v52 = vcombine.low %v7632_v41, %v7636_v3  ;;  %v7724_v0 = vld [vmem:[#allocation15 + $0x3f8] sm:$0xff] }
 0x869   :  { %v7756_v59 = vld [vmem:[#allocation15 + $0x4f8] sm:$0xff] }
 0x86a   :  { %11132 = vmatpush2.bf16.msra.mxu1 %v12572_v61  ;;  %11165 = vmatpush2.bf16.msra.mxu0 %v12732_v55  ;;  %v7628_v61 = vld [vmem:[#allocation15 + $0xf8] sm:$0xff] }
 0x86b   :  { %11133 = vmatprep.subr.bf16.mxu1 %v12565_v54  ;;  %11166 = vmatprep.subr.bf16.mxu0 %v12725_v23  ;;  %v7784_v55 = vld [vmem:[#allocation15 + $0x5d8] sm:$0xff]  ;;  %v12676_v23 = vcombine.low %v8047_v10, %v8051_v25  ;;  %v12255_v56 = vcombine.high %v7624_v47, %v7628_v61 }
 0x86c   :  { %v7788_v54 = vld [vmem:[#allocation15 + $0x5f8] sm:$0xff] }
 0x86d   :  { %v12415_v19 = vcombine.high %v7784_v55, %v7788_v54  ;;  %v12414_v28 = vcombine.low %v7784_v55, %v7788_v54  ;;  %v7744_v10 = vld [vmem:[#allocation15 + $0x498] sm:$0xff] }
 0x86e   :  { %11134 = vmatpush2.bf16.msra.mxu1 %v12564_v12  ;;  %11167 = vmatpush2.bf16.msra.mxu0 %v12724_v57  ;;  %v7620_v12 = vld [vmem:[#allocation15 + $0xb8] sm:$0xff] }
 0x86f   :  { %11135 = vmatprep.subr.bf16.mxu1 %v12557_v58  ;;  %11168 = vmatprep.subr.bf16.mxu0 %v12717_v34  ;;  %v7776_v57 = vld [vmem:[#allocation15 + $0x598] sm:$0xff]  ;;  %v12254_v34 = vcombine.low %v7624_v47, %v7628_v61  ;;  %v12247_v2 = vcombine.high %v7616_v30, %v7620_v12  ;;  %v12246_v37 = vcombine.low %v7616_v30, %v7620_v12 }
 0x870   :  { %v7780_v58 = vld [vmem:[#allocation15 + $0x5b8] sm:$0xff] }
 0x871   :  { %v12407_v16 = vcombine.high %v7776_v57, %v7780_v58  ;;  %v12406_v63 = vcombine.low %v7776_v57, %v7780_v58  ;;  %v7748_v25 = vld [vmem:[#allocation15 + $0x4b8] sm:$0xff] }
 0x872   :  { %11136 = vmatpush2.bf16.msra.mxu1 %v12556_v18  ;;  %11169 = vmatpush2.bf16.msra.mxu0 %v12716_v42  ;;  %v7612_v18 = vld [vmem:[#allocation15 + $0x78] sm:$0xff]  ;;  %v12374_v61 = vcombine.low %v7744_v10, %v7748_v25 }
 0x873   :  { %11137 = vmatprep.subr.bf16.mxu1 %v12549_v60  ;;  %11170 = vmatprep.subr.bf16.mxu0 %v12709_v62  ;;  %v7768_v42 = vld [vmem:[#allocation15 + $0x558] sm:$0xff]  ;;  %v12239_v22 = vcombine.high %v7608_v11, %v7612_v18  ;;  %v12238_v53 = vcombine.low %v7608_v11, %v7612_v18 }
 0x874   :  { %v7772_v60 = vld [vmem:[#allocation15 + $0x578] sm:$0xff] }
 0x875   :  { %v12398_v33 = vcombine.low %v7768_v42, %v7772_v60  ;;  %v7852_v11 = vld [vmem:[#allocation15 + $0x7f8] sm:$0xff] }
 0x876   :  { %11138 = vmatpush2.bf16.msra.mxu1 %v12548_v14  ;;  %11171 = vmatpush2.bf16.msra.mxu0 %v12708_v20  ;;  %v12399_v14 = vcombine.high %v7768_v42, %v7772_v60  ;;  %v7600_v20 = vld [vmem:[#allocation15 + $0x18] sm:$0xff] }
 0x877   :  { %11172 = vmatprep.subr.bf16.mxu0 %v12701_v21  ;;  %11189 = vmatprep.subr.bf16.mxu1 %v12287_v45  ;;  %v7604_v21 = vld [vmem:[#allocation15 + $0x38] sm:$0xff] }
 0x878   :  { %v7760_v45 = vld [vmem:[#allocation15 + $0x518] sm:$0xff]  ;;  %v12230_v38 = vcombine.low %v7600_v20, %v7604_v21 }
 0x879   :  { %v14899_v39 = vpop.f32.mrf.mxu1  ;;  %11140 = vmatmul.mubr.bf16.vlgmr.msra.gmra.mxu1 %v14867_v6  ;;  %v12390_v7 = vcombine.low %v7760_v45, %v7764_v31 }
 0x87a   :  { %11173 = vmatpush2.bf16.msra.mxu0 %v12700_v5  ;;  %11190 = vmatpush1.bf16.msra.mxu1 %v12286_v35  ;;  %v12231_v35 = vcombine.high %v7600_v20, %v7604_v21 }
 0x87b   :  { %11221 = vmatprep.mubr.bf16.mxu1 %v14834_v4  ;;  %v14903_v44 = vpop.f32.mrf.mxu1  ;;  %11174 = vmatprep.subr.bf16.mxu0 %v12693_v8  ;;  %v12263_v4 = vcombine.high %v7632_v41, %v7636_v3  ;;  %v7720_v8 = vld [vmem:[#allocation15 + $0x3d8] sm:$0xff] }
 0x87c   :  { %11191 = vmatprep.subr.bf16.mxu1 %v12279_v36  ;;  %v7752_v36 = vld [vmem:[#allocation15 + $0x4d8] sm:$0xff]  ;;  %v12350_v41 = vcombine.low %v7720_v8, %v7724_v0 }
 0x87d   :  { %v10899_v9 = vpop.f32.mrf.mxu1  ;;  %v12382_v3 = vcombine.low %v7752_v36, %v7756_v59 }
 0x87e   :  { %11175 = vmatpush2.bf16.msra.mxu0 %v12692_v43  ;;  %11192 = vmatpush1.bf16.msra.mxu1 %v12278_v40  ;;  %v12351_v43 = vcombine.high %v7720_v8, %v7724_v0  ;;  %v12383_v40 = vcombine.high %v7752_v36, %v7756_v59  ;;  %v7664_v36 = vld [vmem:[#allocation15 + $0x218] sm:$0xff] }
 0x87f   :  { %v10900_v17 = vpop.f32.mrf.mxu1  ;;  %11176 = vmatprep.subr.bf16.mxu0 %v12685_v46  ;;  %11193 = vmatprep.subr.bf16.mxu1 %v12271_v49  ;;  %v7712_v46 = vld [vmem:[#allocation15 + $0x398] sm:$0xff] }
 0x880   :  { %v7716_v49 = vld [vmem:[#allocation15 + $0x3b8] sm:$0xff] }
 0x881   :  { %v12343_v9 = vcombine.high %v7712_v46, %v7716_v49  ;;  %v7708_v17 = vld [vmem:[#allocation15 + $0x378] sm:$0xff]  ;;  %v12342_v47 = vcombine.low %v7712_v46, %v7716_v49 }
 0x882   :  { %11177 = vmatpush2.bf16.msra.mxu0 %v12684_v27  ;;  %11194 = vmatpush1.bf16.msra.mxu1 %v12270_v51  ;;  %v12375_v27 = vcombine.high %v7744_v10, %v7748_v25  ;;  %v7704_v51 = vld [vmem:[#allocation15 + $0x358] sm:$0xff] }
 0x883   :  { %11178 = vmatprep.subr.bf16.mxu0 %v12677_v29  ;;  %11195 = vmatprep.subr.bf16.mxu1 %v12263_v4  ;;  %v7736_v29 = vld [vmem:[#allocation15 + $0x458] sm:$0xff]  ;;  %v12335_v55 = vcombine.high %v7704_v51, %v7708_v17  ;;  %v12334_v30 = vcombine.low %v7704_v51, %v7708_v17 }
 0x884   :  { %v7740_v4 = vld [vmem:[#allocation15 + $0x478] sm:$0xff] }
 0x885   :  { %v12367_v54 = vcombine.high %v7736_v29, %v7740_v4  ;;  %v12366_v12 = vcombine.low %v7736_v29, %v7740_v4  ;;  %v7668_v59 = vld [vmem:[#allocation15 + $0x238] sm:$0xff] }
 0x886   :  { %11179 = vmatpush2.bf16.msra.mxu0 %v12676_v23  ;;  %11196 = vmatpush1.bf16.msra.mxu1 %v12262_v52  ;;  %v7696_v23 = vld [vmem:[#allocation15 + $0x318] sm:$0xff]  ;;  %v12295_v46 = vcombine.high %v7664_v36, %v7668_v59 }
 0x887   :  { %11197 = vmatprep.subr.bf16.mxu1 %v12255_v56  ;;  %11230 = vmatprep.subr.bf16.mxu0 %v12415_v19  ;;  %v7700_v52 = vld [vmem:[#allocation15 + $0x338] sm:$0xff] }
 0x888   :  { %v7728_v56 = vld [vmem:[#allocation15 + $0x418] sm:$0xff]  ;;  %v12327_v57 = vcombine.high %v7696_v23, %v7700_v52 }
 0x889   :  { %v14905_v62 = vpop.f32.mrf.mxu0  ;;  %11181 = vmatmul.mubr.bf16.vlgmr.msra.gmra.mxu0 %v14876_v26  ;;  %v7732_v19 = vld [vmem:[#allocation15 + $0x438] sm:$0xff] }
 0x88a   :  { %11198 = vmatpush1.bf16.msra.mxu1 %v12254_v34  ;;  %11231 = vmatpush1.bf16.msra.mxu0 %v12414_v28  ;;  %v12359_v58 = vcombine.high %v7728_v56, %v7732_v19  ;;  %v7688_v34 = vld [vmem:[#allocation15 + $0x2d8] sm:$0xff]  ;;  %v12358_v18 = vcombine.low %v7728_v56, %v7732_v19 }
 0x88b   :  { %11262 = vmatprep.mubr.bf16.mxu0 %v14843_v13  ;;  %v14909_v1 = vpop.f32.mrf.mxu0  ;;  %11199 = vmatprep.subr.bf16.mxu1 %v12247_v2  ;;  %v12391_v13 = vcombine.high %v7760_v45, %v7764_v31  ;;  %v7692_v28 = vld [vmem:[#allocation15 + $0x2f8] sm:$0xff] }
 0x88c   :  { %11232 = vmatprep.subr.bf16.mxu0 %v12407_v16  ;;  %v7848_v2 = vld [vmem:[#allocation15 + $0x7d8] sm:$0xff]  ;;  %v12326_v16 = vcombine.low %v7696_v23, %v7700_v52  ;;  %v12319_v42 = vcombine.high %v7688_v34, %v7692_v28  ;;  %v12318_v20 = vcombine.low %v7688_v34, %v7692_v28 }
 0x88d   :  { %v10940_v32 = vpop.f32.mrf.mxu0  ;;  %v12479_v60 = vcombine.high %v7848_v2, %v7852_v11  ;;  %v12478_v21 = vcombine.low %v7848_v2, %v7852_v11  ;;  %v7816_v10 = vld [vmem:[#allocation15 + $0x6d8] sm:$0xff] }
 0x88e   :  { %11200 = vmatpush1.bf16.msra.mxu1 %v12246_v37  ;;  %11233 = vmatpush1.bf16.msra.mxu0 %v12406_v63  ;;  %v7680_v37 = vld [vmem:[#allocation15 + $0x298] sm:$0xff] }
 0x88f   :  { %v10941_v5 = vpop.f32.mrf.mxu0  ;;  %11201 = vmatprep.subr.bf16.mxu1 %v12239_v22  ;;  %11234 = vmatprep.subr.bf16.mxu0 %v12399_v14  ;;  %v7684_v63 = vld [vmem:[#allocation15 + $0x2b8] sm:$0xff] }
 0x890   :  { %v7840_v22 = vld [vmem:[#allocation15 + $0x798] sm:$0xff]  ;;  %v12311_v45 = vcombine.high %v7680_v37, %v7684_v63 }
 0x891   :  { %v7844_v14 = vld [vmem:[#allocation15 + $0x7b8] sm:$0xff] }
 0x892   :  { %11202 = vmatpush1.bf16.msra.mxu1 %v12238_v53  ;;  %11235 = vmatpush1.bf16.msra.mxu0 %v12398_v33  ;;  %v12471_v31 = vcombine.high %v7840_v22, %v7844_v14  ;;  %v7672_v32 = vld [vmem:[#allocation15 + $0x258] sm:$0xff] }
 0x893   :  { %11203 = vmatprep.subr.bf16.mxu1 %v12231_v35  ;;  %11236 = vmatprep.subr.bf16.mxu0 %v12391_v13  ;;  %v7676_v53 = vld [vmem:[#allocation15 + $0x278] sm:$0xff]  ;;  %v12310_v35 = vcombine.low %v7680_v37, %v7684_v63  ;;  %v12470_v13 = vcombine.low %v7840_v22, %v7844_v14 }
 0x894   :  { %v7832_v33 = vld [vmem:[#allocation15 + $0x758] sm:$0xff]  ;;  %v12303_v8 = vcombine.high %v7672_v32, %v7676_v53 }
 0x895   :  { %v7836_v5 = vld [vmem:[#allocation15 + $0x778] sm:$0xff] }
 0x896   :  { %11204 = vmatpush1.bf16.msra.mxu1 %v12230_v38  ;;  %11237 = vmatpush1.bf16.msra.mxu0 %v12390_v7  ;;  %v12463_v0 = vcombine.high %v7832_v33, %v7836_v5  ;;  %v7824_v38 = vld [vmem:[#allocation15 + $0x718] sm:$0xff] }
 0x897   :  { %11205 = vmatprep.subr.bf16.mxu1 %v12351_v43  ;;  %11238 = vmatprep.subr.bf16.mxu0 %v12383_v40  ;;  %v7828_v7 = vld [vmem:[#allocation15 + $0x738] sm:$0xff]  ;;  %v12302_v43 = vcombine.low %v7672_v32, %v7676_v53  ;;  %v12462_v40 = vcombine.low %v7832_v33, %v7836_v5 }
 0x898   :  { %v12455_v49 = vcombine.high %v7824_v38, %v7828_v7  ;;  %v7820_v25 = vld [vmem:[#allocation15 + $0x6f8] sm:$0xff] }
 0x899   :  { %v12447_v51 = vcombine.high %v7816_v10, %v7820_v25  ;;  %v7808_v29 = vld [vmem:[#allocation15 + $0x698] sm:$0xff] }
 0x89a   :  { %11206 = vmatpush2.bf16.msra.mxu1 %v12350_v41  ;;  %11239 = vmatpush1.bf16.msra.mxu0 %v12382_v3  ;;  %v7912_v41 = vld [vmem:[#allocation15 + $0x9d8] sm:$0xff] }
 0x89b   :  { %11207 = vmatprep.subr.bf16.mxu1 %v12343_v9  ;;  %11240 = vmatprep.subr.bf16.mxu0 %v12375_v27  ;;  %v7916_v3 = vld [vmem:[#allocation15 + $0x9f8] sm:$0xff]  ;;  %v12294_v9 = vcombine.low %v7664_v36, %v7668_v59  ;;  %v12454_v27 = vcombine.low %v7824_v38, %v7828_v7 }
 0x89c   :  { %v12543_v17 = vcombine.high %v7912_v41, %v7916_v3  ;;  %v7812_v4 = vld [vmem:[#allocation15 + $0x6b8] sm:$0xff] }
 0x89d   :  { %v12439_v23 = vcombine.high %v7808_v29, %v7812_v4  ;;  %v7800_v52 = vld [vmem:[#allocation15 + $0x658] sm:$0xff] }
 0x89e   :  { %11208 = vmatpush2.bf16.msra.mxu1 %v12342_v47  ;;  %11241 = vmatpush1.bf16.msra.mxu0 %v12374_v61  ;;  %v7904_v47 = vld [vmem:[#allocation15 + $0x998] sm:$0xff] }
 0x89f   :  { %11209 = vmatprep.subr.bf16.mxu1 %v12335_v55  ;;  %11242 = vmatprep.subr.bf16.mxu0 %v12367_v54  ;;  %v7908_v61 = vld [vmem:[#allocation15 + $0x9b8] sm:$0xff]  ;;  %v12446_v55 = vcombine.low %v7816_v10, %v7820_v25  ;;  %v12542_v54 = vcombine.low %v7912_v41, %v7916_v3 }
 0x8a0   :  { %v12535_v56 = vcombine.high %v7904_v47, %v7908_v61  ;;  %v7804_v19 = vld [vmem:[#allocation15 + $0x678] sm:$0xff]  ;;  %v12534_v34 = vcombine.low %v7904_v47, %v7908_v61 }
 0x8a1   :  { %v12431_v2 = vcombine.high %v7800_v52, %v7804_v19  ;;  %v12430_v63 = vcombine.low %v7800_v52, %v7804_v19  ;;  %v7864_v7 = vld [vmem:[#allocation15 + $0x858] sm:$0xff] }
 0x8a2   :  { %11210 = vmatpush2.bf16.msra.mxu1 %v12334_v30  ;;  %11243 = vmatpush1.bf16.msra.mxu0 %v12366_v12  ;;  %v7896_v30 = vld [vmem:[#allocation15 + $0x958] sm:$0xff] }
 0x8a3   :  { %11211 = vmatprep.subr.bf16.mxu1 %v12327_v57  ;;  %11244 = vmatprep.subr.bf16.mxu0 %v12359_v58  ;;  %v7900_v12 = vld [vmem:[#allocation15 + $0x978] sm:$0xff]  ;;  %v12438_v58 = vcombine.low %v7808_v29, %v7812_v4 }
 0x8a4   :  { %v12527_v11 = vcombine.high %v7896_v30, %v7900_v12  ;;  %v8024_v10 = vld [vmem:[#allocation15 + $0xd58] sm:$0xff] }
 0x8a5   :  { %v8028_v25 = vld [vmem:[#allocation15 + $0xd78] sm:$0xff] }
 0x8a6   :  { %11212 = vmatpush2.bf16.msra.mxu1 %v12326_v16  ;;  %11245 = vmatpush1.bf16.msra.mxu0 %v12358_v18  ;;  %v7792_v16 = vld [vmem:[#allocation15 + $0x618] sm:$0xff] }
 0x8a7   :  { %11213 = vmatprep.subr.bf16.mxu1 %v12319_v42  ;;  %11246 = vmatprep.subr.bf16.mxu0 %v12479_v60  ;;  %v7796_v18 = vld [vmem:[#allocation15 + $0x638] sm:$0xff] }
 0x8a8   :  { %v7888_v42 = vld [vmem:[#allocation15 + $0x918] sm:$0xff]  ;;  %v12423_v14 = vcombine.high %v7792_v16, %v7796_v18  ;;  %v12422_v32 = vcombine.low %v7792_v16, %v7796_v18 }
 0x8a9   :  { %v7892_v60 = vld [vmem:[#allocation15 + $0x938] sm:$0xff] }
 0x8aa   :  { %11214 = vmatpush2.bf16.msra.mxu1 %v12318_v20  ;;  %11247 = vmatpush2.bf16.msra.mxu0 %v12478_v21  ;;  %v12519_v20 = vcombine.high %v7888_v42, %v7892_v60  ;;  %v7884_v21 = vld [vmem:[#allocation15 + $0x8f8] sm:$0xff]  ;;  %v12518_v53 = vcombine.low %v7888_v42, %v7892_v60 }
 0x8ab   :  { %11215 = vmatprep.subr.bf16.mxu1 %v12311_v45  ;;  %11248 = vmatprep.subr.bf16.mxu0 %v12471_v31  ;;  %v8040_v45 = vld [vmem:[#allocation15 + $0xdd8] sm:$0xff] }
 0x8ac   :  { %v8044_v31 = vld [vmem:[#allocation15 + $0xdf8] sm:$0xff] }
 0x8ad   :  { %v12671_v5 = vcombine.high %v8040_v45, %v8044_v31  ;;  %v12670_v59 = vcombine.low %v8040_v45, %v8044_v31  ;;  %v7860_v4 = vld [vmem:[#allocation15 + $0x838] sm:$0xff] }
 0x8ae   :  { %11216 = vmatpush2.bf16.msra.mxu1 %v12310_v35  ;;  %11249 = vmatpush2.bf16.msra.mxu0 %v12470_v13  ;;  %v7872_v35 = vld [vmem:[#allocation15 + $0x898] sm:$0xff] }
 0x8af   :  { %11217 = vmatprep.subr.bf16.mxu1 %v12303_v8  ;;  %11250 = vmatprep.subr.bf16.mxu0 %v12463_v0  ;;  %v7876_v13 = vld [vmem:[#allocation15 + $0x8b8] sm:$0xff] }
 0x8b0   :  { %v8032_v8 = vld [vmem:[#allocation15 + $0xd98] sm:$0xff]  ;;  %v12503_v38 = vcombine.high %v7872_v35, %v7876_v13  ;;  %v12502_v3 = vcombine.low %v7872_v35, %v7876_v13 }
 0x8b1   :  { %v8036_v0 = vld [vmem:[#allocation15 + $0xdb8] sm:$0xff] }
 0x8b2   :  { %11218 = vmatpush2.bf16.msra.mxu1 %v12302_v43  ;;  %11251 = vmatpush2.bf16.msra.mxu0 %v12462_v40  ;;  %v10937_v43 = vadd.f32 %v14905_v62, %v14899_v39  ;;  %v10939_v40 = vadd.f32 %v14909_v1, %v14903_v44  ;;  %v12655_v62 = vcombine.high %v8024_v10, %v8028_v25  ;;  %v7856_v44 = vld [vmem:[#allocation15 + $0x818] sm:$0xff] }
 0x8b3   :  { %11219 = vmatprep.subr.bf16.mxu1 %v12295_v46  ;;  %11252 = vmatprep.subr.bf16.mxu0 %v12455_v49  ;;  %v12663_v46 = vcombine.high %v8032_v8, %v8036_v0  ;;  %v7868_v49 = vld [vmem:[#allocation15 + $0x878] sm:$0xff] }
 0x8b4   :  { %v12495_v39 = vcombine.high %v7864_v7, %v7868_v49  ;;  %v8016_v47 = vld [vmem:[#allocation15 + $0xd18] sm:$0xff] }
 0x8b5   :  { %v8020_v61 = vld [vmem:[#allocation15 + $0xd38] sm:$0xff] }
 0x8b6   :  { %11220 = vmatpush2.bf16.msra.mxu1 %v12294_v9  ;;  %11253 = vmatpush2.bf16.msra.mxu0 %v12454_v27  ;;  %v7976_v19 = vld [vmem:[#allocation15 + $0xbd8] sm:$0xff] }
 0x8b7   :  { %11254 = vmatprep.subr.bf16.mxu0 %v12447_v51  ;;  %11271 = vmatprep.subr.bf16.mxu1 %v12543_v17  ;;  %v12662_v51 = vcombine.low %v8032_v8, %v8036_v0  ;;  %v7972_v16 = vld [vmem:[#allocation15 + $0xbb8] sm:$0xff] }
 0x8b8   :  { %v8000_v18 = vld [vmem:[#allocation15 + $0xc98] sm:$0xff] }
 0x8b9   :  { %v10977_v57 = vpop.f32.mrf.mxu1  ;;  %11222 = vmatmul.mubr.bf16.vlgmr.msra.gmra.mxu1 %v14836_v24  ;;  %v12526_v24 = vcombine.low %v7896_v30, %v7900_v12  ;;  %v7980_v30 = vld [vmem:[#allocation15 + $0xbf8] sm:$0xff] }
 0x8ba   :  { %11255 = vmatpush2.bf16.msra.mxu0 %v12446_v55  ;;  %11272 = vmatpush1.bf16.msra.mxu1 %v12542_v54  ;;  %v10978_v9 = vadd.f32 %v10977_v57, %v10937_v43  ;;  %v12494_v54 = vcombine.low %v7864_v7, %v7868_v49  ;;  %v8008_v12 = vld [vmem:[#allocation15 + $0xcd8] sm:$0xff]  ;;  %v12606_v60 = vcombine.low %v7976_v19, %v7980_v30 }
 0x8bb   :  { %11303 = vmatprep.mubr.bf16.mxu1 %v14863_v48  ;;  %v10979_v28 = vpop.f32.mrf.mxu1  ;;  %11256 = vmatprep.subr.bf16.mxu0 %v12439_v23  ;;  %v7880_v48 = vld [vmem:[#allocation15 + $0x8d8] sm:$0xff]  ;;  %v12654_v23 = vcombine.low %v8024_v10, %v8028_v25 }
 0x8bc   :  { %11273 = vmatprep.subr.bf16.mxu1 %v12535_v56  ;;  %v12511_v33 = vcombine.high %v7880_v48, %v7884_v21  ;;  %v12510_v36 = vcombine.low %v7880_v48, %v7884_v21  ;;  %v10980_v27 = vadd.f32 %v10979_v28, %v10939_v40  ;;  %v12647_v56 = vcombine.high %v8016_v47, %v8020_v61  ;;  %v8012_v57 = vld [vmem:[#allocation15 + $0xcf8] sm:$0xff] }
 0x8bd   :  { %v10981_v37 = vpop.f32.mrf.mxu1  ;;  %v12607_v28 = vcombine.high %v7976_v19, %v7980_v30  ;;  %v8004_v42 = vld [vmem:[#allocation15 + $0xcb8] sm:$0xff] }
 0x8be   :  { %11257 = vmatpush2.bf16.msra.mxu0 %v12438_v58  ;;  %11274 = vmatpush1.bf16.msra.mxu1 %v12534_v34  ;;  %v12486_v58 = vcombine.low %v7856_v44, %v7860_v4  ;;  %v12646_v34 = vcombine.low %v8016_v47, %v8020_v61  ;;  %v12638_v37 = vcombine.low %v8008_v12, %v8012_v57  ;;  %v7996_v48 = vld [vmem:[#allocation15 + $0xc78] sm:$0xff] }
 0x8bf   :  { %v10982_v22 = vpop.f32.mrf.mxu1  ;;  %11258 = vmatprep.subr.bf16.mxu0 %v12431_v2  ;;  %11275 = vmatprep.subr.bf16.mxu1 %v12527_v11  ;;  %v12639_v2 = vcombine.high %v8008_v12, %v8012_v57  ;;  %v7968_v11 = vld [vmem:[#allocation15 + $0xb98] sm:$0xff]  ;;  %v12630_v45 = vcombine.low %v8000_v18, %v8004_v42 }
 0x8c0   :  { %v7960_v22 = vld [vmem:[#allocation15 + $0xb58] sm:$0xff]  ;;  %v12598_v21 = vcombine.low %v7968_v11, %v7972_v16 }
 0x8c1   :  { %v7988_v35 = vld [vmem:[#allocation15 + $0xc38] sm:$0xff] }
 0x8c2   :  { %11259 = vmatpush2.bf16.msra.mxu0 %v12430_v63  ;;  %11276 = vmatpush1.bf16.msra.mxu1 %v12526_v24  ;;  %v12599_v63 = vcombine.high %v7968_v11, %v7972_v16  ;;  %v12631_v24 = vcombine.high %v8000_v18, %v8004_v42  ;;  %v8104_v7 = vld [vmem:[#allocation15 + $0xfd8] sm:$0xff] }
 0x8c3   :  { %11260 = vmatprep.subr.bf16.mxu0 %v12423_v14  ;;  %11277 = vmatprep.subr.bf16.mxu1 %v12519_v20  ;;  %v7964_v14 = vld [vmem:[#allocation15 + $0xb78] sm:$0xff] }
 0x8c4   :  { %v7992_v20 = vld [vmem:[#allocation15 + $0xc58] sm:$0xff]  ;;  %v12591_v31 = vcombine.high %v7960_v22, %v7964_v14  ;;  %v12590_v13 = vcombine.low %v7960_v22, %v7964_v14 }
 0x8c5   :  { %v12622_v8 = vcombine.low %v7992_v20, %v7996_v48  ;;  %v8108_v43 = vld [vmem:[#allocation15 + $0xff8] sm:$0xff] }
 0x8c6   :  { %11261 = vmatpush2.bf16.msra.mxu0 %v12422_v32  ;;  %11278 = vmatpush1.bf16.msra.mxu1 %v12518_v53  ;;  %v12623_v32 = vcombine.high %v7992_v20, %v7996_v48  ;;  %v7952_v53 = vld [vmem:[#allocation15 + $0xb18] sm:$0xff]  ;;  %v12735_v10 = vcombine.high %v8104_v7, %v8108_v43 }
 0x8c7   :  { %11279 = vmatprep.subr.bf16.mxu1 %v12511_v33  ;;  %11312 = vmatprep.subr.bf16.mxu0 %v12671_v5  ;;  %v7956_v33 = vld [vmem:[#allocation15 + $0xb38] sm:$0xff] }
 0x8c8   :  { %v7984_v5 = vld [vmem:[#allocation15 + $0xc18] sm:$0xff]  ;;  %v12583_v0 = vcombine.high %v7952_v53, %v7956_v33  ;;  %v12582_v40 = vcombine.low %v7952_v53, %v7956_v33 }
 0x8c9   :  { %v11018_v41 = vpop.f32.mrf.mxu0  ;;  %11263 = vmatmul.mubr.bf16.vlgmr.msra.gmra.mxu0 %v14845_v50  ;;  %v7936_v25 = vld [vmem:[#allocation15 + $0xa98] sm:$0xff] }
 0x8ca   :  { %11280 = vmatpush1.bf16.msra.mxu1 %v12510_v36  ;;  %11313 = vmatpush1.bf16.msra.mxu0 %v12670_v59  ;;  %v11019_v1 = vadd.f32 %v11018_v41, %v10978_v9  ;;  %v12615_v36 = vcombine.high %v7984_v5, %v7988_v35  ;;  %v7944_v59 = vld [vmem:[#allocation15 + $0xad8] sm:$0xff] }
 0x8cb   :  { %11344 = vmatprep.mubr.bf16.mxu0 %v14872_v15  ;;  %v11020_v17 = vpop.f32.mrf.mxu0  ;;  %11281 = vmatprep.subr.bf16.mxu1 %v12503_v38  ;;  %v12487_v15 = vcombine.high %v7856_v44, %v7860_v4  ;;  %v7948_v38 = vld [vmem:[#allocation15 + $0xaf8] sm:$0xff] }
 0x8cc   :  { %v11021_v29 = vadd.f32 %v11020_v17, %v10980_v27  ;;  %11314 = vmatprep.subr.bf16.mxu0 %v12663_v46  ;;  %v12614_v46 = vcombine.low %v7984_v5, %v7988_v35  ;;  %v12575_v49 = vcombine.high %v7944_v59, %v7948_v38  ;;  %v7940_v41 = vld [vmem:[#allocation15 + $0xab8] sm:$0xff]  ;;  %v12574_v27 = vcombine.low %v7944_v59, %v7948_v38 }
 0x8cd   :  { %v11022_v50 = vpop.f32.mrf.mxu0  ;;  %v8100_v9 = vld [vmem:[#allocation15 + $0xfb8] sm:$0xff]  ;;  %v12567_v17 = vcombine.high %v7936_v25, %v7940_v41  ;;  %v12566_v4 = vcombine.low %v7936_v25, %v7940_v41 }
 0x8ce   :  { %v12741_v55 = vpack.c.bf16 %v11021_v29, %v11019_v1  ;;  %11282 = vmatpush1.bf16.msra.mxu1 %v12502_v3  ;;  %11315 = vmatpush1.bf16.msra.mxu0 %v12662_v51  ;;  %v8096_v3 = vld [vmem:[#allocation15 + $0xf98] sm:$0xff]  ;;  %v12734_v51 = vcombine.low %v8104_v7, %v8108_v43 }
 0x8cf   :  { %v11023_v52 = vpop.f32.mrf.mxu0  ;;  %11283 = vmatprep.subr.bf16.mxu1 %v12495_v39  ;;  %11316 = vmatprep.subr.bf16.mxu0 %v12655_v62  ;;  %v12727_v39 = vcombine.high %v8096_v3, %v8100_v9  ;;  %v7928_v62 = vld [vmem:[#allocation15 + $0xa58] sm:$0xff]  ;;  %v12726_v47 = vcombine.low %v8096_v3, %v8100_v9 }
 0x8d0   :  { %11386 = vst [vmem:[#allocation17 + $0x8] sm:$0xff] %v12741_v55  ;;  %v7932_v44 = vld [vmem:[#allocation15 + $0xa78] sm:$0xff] }
 0x8d1   :  { %v8088_v1 = vld [vmem:[#allocation15 + $0xf58] sm:$0xff]  ;;  %v12559_v61 = vcombine.high %v7928_v62, %v7932_v44 }
 0x8d2   :  { %11284 = vmatpush1.bf16.msra.mxu1 %v12494_v54  ;;  %11317 = vmatpush1.bf16.msra.mxu0 %v12654_v23  ;;  %v8092_v29 = vld [vmem:[#allocation15 + $0xf78] sm:$0xff] }
 0x8d3   :  { %11285 = vmatprep.subr.bf16.mxu1 %v12487_v15  ;;  %11318 = vmatprep.subr.bf16.mxu0 %v12647_v56  ;;  %v12719_v50 = vcombine.high %v8088_v1, %v8092_v29  ;;  %v7920_v55 = vld [vmem:[#allocation15 + $0xa18] sm:$0xff]  ;;  %v12558_v15 = vcombine.low %v7928_v62, %v7932_v44  ;;  %v12718_v56 = vcombine.low %v8088_v1, %v8092_v29 }
 0x8d4   :  { %v7924_v54 = vld [vmem:[#allocation15 + $0xa38] sm:$0xff] }
 0x8d5   :  { %v8080_v23 = vld [vmem:[#allocation15 + $0xf18] sm:$0xff]  ;;  %v12551_v19 = vcombine.high %v7920_v55, %v7924_v54 }
 0x8d6   :  { %11286 = vmatpush1.bf16.msra.mxu1 %v12486_v58  ;;  %11319 = vmatpush1.bf16.msra.mxu0 %v12646_v34  ;;  %v8084_v52 = vld [vmem:[#allocation15 + $0xf38] sm:$0xff]  ;;  %v12550_v58 = vcombine.low %v7920_v55, %v7924_v54 }
 0x8d7   :  { %11287 = vmatprep.subr.bf16.mxu1 %v12607_v28  ;;  %11320 = vmatprep.subr.bf16.mxu0 %v12639_v2  ;;  %v12711_v30 = vcombine.high %v8080_v23, %v8084_v52  ;;  %v8072_v12 = vld [vmem:[#allocation15 + $0xed8] sm:$0xff]  ;;  %v12710_v34 = vcombine.low %v8080_v23, %v8084_v52 }
 0x8d8   :  { %v8076_v57 = vld [vmem:[#allocation15 + $0xef8] sm:$0xff] }
 0x8d9   :  { %v12703_v28 = vcombine.high %v8072_v12, %v8076_v57  ;;  %v8064_v2 = vld [vmem:[#allocation15 + $0xe98] sm:$0xff]  ;;  %v12702_v16 = vcombine.low %v8072_v12, %v8076_v57 }
 0x8da   :  { %11288 = vmatpush2.bf16.msra.mxu1 %v12606_v60  ;;  %11321 = vmatpush1.bf16.msra.mxu0 %v12638_v37  ;;  %v8068_v11 = vld [vmem:[#allocation15 + $0xeb8] sm:$0xff] }
 0x8db   :  { %11289 = vmatprep.subr.bf16.mxu1 %v12599_v63  ;;  %11322 = vmatprep.subr.bf16.mxu0 %v12631_v24  ;;  %v12695_v18 = vcombine.high %v8064_v2, %v8068_v11  ;;  %v8056_v42 = vld [vmem:[#allocation15 + $0xe58] sm:$0xff]  ;;  %v12694_v63 = vcombine.low %v8064_v2, %v8068_v11 }
 0x8dc   :  { %v8060_v60 = vld [vmem:[#allocation15 + $0xe78] sm:$0xff] }
 0x8dd   :  { %v12687_v22 = vcombine.high %v8056_v42, %v8060_v60  ;;  %v8048_v14 = vld [vmem:[#allocation15 + $0xe18] sm:$0xff] }
 0x8de   :  { %11290 = vmatpush2.bf16.msra.mxu1 %v12598_v21  ;;  %11323 = vmatpush1.bf16.msra.mxu0 %v12630_v45  ;;  %v8052_v20 = vld [vmem:[#allocation15 + $0xe38] sm:$0xff]  ;;  %v12686_v21 = vcombine.low %v8056_v42, %v8060_v60 }
 0x8df   :  { %11291 = vmatprep.subr.bf16.mxu1 %v12591_v31  ;;  %11324 = vmatprep.subr.bf16.mxu0 %v12623_v32  ;;  %v12679_v31 = vcombine.high %v8048_v14, %v8052_v20  ;;  %v12678_v32 = vcombine.low %v8048_v14, %v8052_v20 }
 0x8e2   :  { %11292 = vmatpush2.bf16.msra.mxu1 %v12590_v13  ;;  %11325 = vmatpush1.bf16.msra.mxu0 %v12622_v8 }
 0x8e3   :  { %11293 = vmatprep.subr.bf16.mxu1 %v12583_v0  ;;  %11326 = vmatprep.subr.bf16.mxu0 %v12615_v36 }
 0x8e6   :  { %11294 = vmatpush2.bf16.msra.mxu1 %v12582_v40  ;;  %11327 = vmatpush1.bf16.msra.mxu0 %v12614_v46 }
 0x8e7   :  { %11295 = vmatprep.subr.bf16.mxu1 %v12575_v49  ;;  %11328 = vmatprep.subr.bf16.mxu0 %v12735_v10 }
 0x8ea   :  { %11296 = vmatpush2.bf16.msra.mxu1 %v12574_v27  ;;  %11329 = vmatpush2.bf16.msra.mxu0 %v12734_v51 }
 0x8eb   :  { %11297 = vmatprep.subr.bf16.mxu1 %v12567_v17  ;;  %11330 = vmatprep.subr.bf16.mxu0 %v12727_v39 }
 0x8ee   :  { %11298 = vmatpush2.bf16.msra.mxu1 %v12566_v4  ;;  %11331 = vmatpush2.bf16.msra.mxu0 %v12726_v47 }
 0x8ef   :  { %11299 = vmatprep.subr.bf16.mxu1 %v12559_v61  ;;  %11332 = vmatprep.subr.bf16.mxu0 %v12719_v50 }
 0x8f2   :  { %11300 = vmatpush2.bf16.msra.mxu1 %v12558_v15  ;;  %11333 = vmatpush2.bf16.msra.mxu0 %v12718_v56 }
 0x8f3   :  { %11301 = vmatprep.subr.bf16.mxu1 %v12551_v19  ;;  %11334 = vmatprep.subr.bf16.mxu0 %v12711_v30 }
 0x8f6   :  { %11302 = vmatpush2.bf16.msra.mxu1 %v12550_v58  ;;  %11335 = vmatpush2.bf16.msra.mxu0 %v12710_v34 }
 0x8f7   :  { %11336 = vmatprep.subr.bf16.mxu0 %v12703_v28 }
 0x8f9   :  { %v11059_v37 = vpop.f32.mrf.mxu1  ;;  %11304 = vmatmul.mubr.bf16.vlgmr.msra.gmra.mxu1 %v14867_v6 }
 0x8fa   :  { %11337 = vmatpush2.bf16.msra.mxu0 %v12702_v16 }
 0x8fb   :  { %v11061_v24 = vpop.f32.mrf.mxu1  ;;  %11338 = vmatprep.subr.bf16.mxu0 %v12695_v18 }
 0x8fd   :  { %v11063_v48 = vpop.f32.mrf.mxu1 }
 0x8fe   :  { %11339 = vmatpush2.bf16.msra.mxu0 %v12694_v63 }
 0x8ff   :  { %v11064_v45 = vpop.f32.mrf.mxu1  ;;  %11340 = vmatprep.subr.bf16.mxu0 %v12687_v22 }
 0x902   :  { %11341 = vmatpush2.bf16.msra.mxu0 %v12686_v21 }
 0x903   :  { %11342 = vmatprep.subr.bf16.mxu0 %v12679_v31 }
 0x906   :  { %11343 = vmatpush2.bf16.msra.mxu0 %v12678_v32 }
 0x909   :  { %v11100_v53 = vpop.f32.mrf.mxu0  ;;  %11345 = vmatmul.mubr.bf16.vlgmr.msra.gmra.mxu0 %v14876_v26 }
 0x90a   :  { %v11101_v36 = vadd.f32 %v11100_v53, %v11059_v37 }
 0x90b   :  { %v11102_v6 = vpop.f32.mrf.mxu0 }
 0x90c   :  { %v11103_v59 = vadd.f32 %v11102_v6, %v11061_v24 }
 0x90d   :  { %v11104_v33 = vpop.f32.mrf.mxu0 }
 0x90f   :  { %v11105_v5 = vpop.f32.mrf.mxu0 }
 0x939   :  { %v11141_v35 = vpop.f32.mrf.mxu1 }
 0x93a   :  { %v11142_v7 = vadd.f32 %v11141_v35, %v11101_v36 }
 0x93b   :  { %v11143_v13 = vpop.f32.mrf.mxu1 }
 0x93c   :  { %v11144_v43 = vadd.f32 %v11143_v13, %v11103_v59 }
 0x93d   :  { %v11145_v8 = vpop.f32.mrf.mxu1 }
 0x93f   :  { %v11146_v0 = vpop.f32.mrf.mxu1 }
 0x949   :  { %v11182_v38 = vpop.f32.mrf.mxu0 }
 0x94a   :  { %v11183_v46 = vadd.f32 %v11182_v38, %v11142_v7 }
 0x94b   :  { %v11184_v40 = vpop.f32.mrf.mxu0 }
 0x94c   :  { %v11185_v49 = vadd.f32 %v11184_v40, %v11144_v43 }
 0x94d   :  { %v11186_v10 = vpop.f32.mrf.mxu0 }
 0x94e   :  { %v12742_v25 = vpack.c.bf16 %v11185_v49, %v11183_v46 }
 0x94f   :  { %v11187_v41 = vpop.f32.mrf.mxu0 }
 0x950   :  { %11387 = vst [vmem:[#allocation17 + $0x10] sm:$0xff] %v12742_v25 }
 0x979   :  { %v11223_v26 = vpop.f32.mrf.mxu1 }
 0x97b   :  { %v11225_v3 = vpop.f32.mrf.mxu1 }
 0x97d   :  { %v11227_v9 = vpop.f32.mrf.mxu1 }
 0x97f   :  { %v11228_v27 = vpop.f32.mrf.mxu1 }
 0x989   :  { %v11264_v51 = vpop.f32.mrf.mxu0 }
 0x98a   :  { %v11265_v47 = vadd.f32 %v11264_v51, %v11223_v26 }
 0x98b   :  { %v11266_v17 = vpop.f32.mrf.mxu0 }
 0x98c   :  { %v11267_v61 = vadd.f32 %v11266_v17, %v11225_v3 }
 0x98d   :  { %v11268_v39 = vpop.f32.mrf.mxu0 }
 0x98f   :  { %v11269_v62 = vpop.f32.mrf.mxu0 }
 0x9b9   :  { %v11305_v44 = vpop.f32.mrf.mxu1 }
 0x9ba   :  { %v11306_v55 = vadd.f32 %v11305_v44, %v11265_v47 }
 0x9bb   :  { %v11307_v1 = vpop.f32.mrf.mxu1 }
 0x9bc   :  { %v11308_v54 = vadd.f32 %v11307_v1, %v11267_v61 }
 0x9bd   :  { %v11309_v29 = vpop.f32.mrf.mxu1 }
 0x9bf   :  { %v11310_v4 = vpop.f32.mrf.mxu1 }
 0x9c9   :  { %v11346_v50 = vpop.f32.mrf.mxu0 }
 0x9ca   :  { %v11347_v52 = vadd.f32 %v11346_v50, %v11306_v55 }
 0x9cb   :  { %v11348_v23 = vpop.f32.mrf.mxu0 }
 0x9cc   :  { %v11349_v15 = vadd.f32 %v11348_v23, %v11308_v54 }
 0x9cd   :  { %v11350_v56 = vpop.f32.mrf.mxu0 }
 0x9ce   :  { %v12743_v19 = vpack.c.bf16 %v11349_v15, %v11347_v52 }
 0x9cf   :  { %v11351_v30 = vpop.f32.mrf.mxu0 }
 0x9d0   :  { %11388 = vst [vmem:[#allocation17 + $0x18] sm:$0xff] %v12743_v19 }
 0x9d1   :  { %14301 = shalt.err (!%p14298_p2)
}
 0x9d2   :  { %11398 = dma.vmem_to_hbm [thread:$0]  %s11396_s20, 512, %s14932_s8, [#allocation5]  }
 0x9d3   :  { %14320 = dma.done.wait [#allocation5], 512  }
 0x9d4   :  { %14321 = vsyncadd [#allocation5], 4294966784 }
 0x9d5   :  { %11402 = vsyncpa [#allocation4], 1 }
 0x9d6   :  { %11403 = vsyncpa [#allocation7], 1 }
 0x9d7   :  { %11404 = vsyncpa [#allocation10], 1 }
 0x9d8   :  { %11405 = vsyncpa [#allocation13], 1 }
 0x9d9   :  { %11406 = vsyncpa [#allocation16], 1 }
 0x9da   :  { %11407 = vsyncpa [#allocation5], 1 }

</bundles_post_ra>
